<compile_context>
chip_gen: v7x
topology: tpu7x:2x2x1
jax: 0.10.0
libtpu: 0.0.40
codegen_flags: <defaults>
</compile_context>

<pallas_src>
import jax
import jax.numpy as jnp
from jax.experimental import pallas as pl
from jax.experimental.pallas import tpu as pltpu

OCP = 128    # every channel dim is zero-padded to one full lane width
SIMG = 256   # per-image row stride inside the fused activation buffers


# ------------------------------- the kernel --------------------------------

def _lenet5_kernel(p_ref, w1_ref, b1_ref, w2_ref, b2_ref, w3_ref, b3_ref,
                   w4_ref, b4_ref, w5_ref, b5_ref, o_ref,
                   act1_ref, packed_ref, conv2_ref, pool2_ref, c3lhs_ref):
    f32 = jnp.float32
    bf16 = jnp.bfloat16
    B = o_ref.shape[0]              # images per grid step
    R1 = act1_ref.shape[0]          # B*256
    RPB = packed_ref.shape[0]       # R1 - 8
    R2 = conv2_ref.shape[0]         # R1 - 64
    RPOOL = pool2_ref.shape[0]      # R1 - 80

    # ---- C1: conv(1->6) + ReLU + 2x2/2 max-pool, all B images folded into M.
    # p_ref is (4, B*256, 25): leading axis = pool phase, rows = per-image
    # pooled grid (b*256 + i*14+j, plus zero pad rows), last axis = 25 taps.
    w1 = w1_ref[...]
    b1 = b1_ref[...]
    for ph in range(4):
        y = jnp.dot(p_ref[ph].astype(bf16), w1, preferred_element_type=f32)
        y = jnp.maximum(y + b1, 0.0)
        if ph == 0:
            act1_ref[...] = y                       # lanes 0:6 real, rest 0
        else:
            act1_ref[...] = jnp.maximum(act1_ref[...], y)

    # ---- Lane-pack the 5 kj tap shifts of the 6 real channels: lane 6*kj + c
    # holds act1[row + kj, c].  Rolled copies only move exact zeros into the
    # other lanes, so the adds are disjoint lane merges.
    pk = act1_ref[pl.ds(0, RPB), :]
    for kj in range(1, 5):
        pk = pk + pltpu.roll(act1_ref[pl.ds(kj, RPB), :], 6 * kj, 1)
    packed_ref[...] = pk.astype(bf16)               # lanes 0:30 real

    # ---- C2_1 & C2_2 merged (32 output lanes): 5 ki-shifted sub-matmuls on
    # the packed activation, accumulated in VMEM, bias+ReLU folded in.
    b2 = b2_ref[...]
    for ki in range(5):
        contrib = jnp.dot(packed_ref[pl.ds(ki * 14, R2), :], w2_ref[ki],
                          preferred_element_type=f32)
        if ki == 0:
            conv2_ref[...] = contrib + b2
        elif ki < 4:
            conv2_ref[...] = conv2_ref[...] + contrib
        else:
            conv2_ref[...] = jnp.maximum(conv2_ref[...] + contrib, 0.0)

    # ---- 2x2/2 max-pool of both branches via row-shifted views.
    # Valid pooled anchors live at rows b*256 + 28*i + 2*j (i, j in [0, 5)).
    pool2_ref[...] = jnp.maximum(
        jnp.maximum(conv2_ref[pl.ds(0, RPOOL), :],
                    conv2_ref[pl.ds(1, RPOOL), :]),
        jnp.maximum(conv2_ref[pl.ds(14, RPOOL), :],
                    conv2_ref[pl.ds(15, RPOOL), :]))

    # ---- C3 + ReLU.  The residual add (c2_1_pool + c2_2_pool) is folded into
    # w3 (duplicated input-channel rows).  4 taps x 32 merged channels are
    # packed along the 128 K lanes -> only 7 weight tiles instead of 25.
    h = None
    for g in range(7):
        for b in range(B):
            acc = None
            for m in range(4):
                t = 4 * g + m
                if t >= 25:
                    break
                i, j = divmod(t, 5)
                row = pool2_ref[pl.ds(b * SIMG + 28 * i + 2 * j, 1), :]
                if m:
                    row = pltpu.roll(row, 32 * m, 1)   # lanes >=32 are zero
                acc = row if acc is None else acc + row
            c3lhs_ref[pl.ds(b, 1), :] = acc
        contrib = jnp.dot(c3lhs_ref[...].astype(bf16), w3_ref[g],
                          preferred_element_type=f32)
        h = contrib if g == 0 else h + contrib
    h = jnp.maximum(h + b3_ref[...], 0.0)            # (B, 128), lanes 0:120

    # ---- F4 + ReLU, F5, log-softmax over the 10 real lanes.
    h = jnp.maximum(
        jnp.dot(h.astype(bf16), w4_ref[...], preferred_element_type=f32)
        + b4_ref[...], 0.0)
    logits = (jnp.dot(h.astype(bf16), w5_ref[...], preferred_element_type=f32)
              + b5_ref[...])
    lane = jax.lax.broadcasted_iota(jnp.int32, (B, OCP), 1)
    logits = jnp.where(lane < 10, logits, -1e30)
    mx = jnp.max(logits, axis=-1, keepdims=True)
    lse = jnp.log(jnp.sum(jnp.exp(logits - mx), axis=-1, keepdims=True))
    o_ref[...] = logits - mx - lse


# ------------------------- parameter / input prep ---------------------------

def prepare_kernel_params(p):
    """One-time conversion of PyTorch-layout params into lane-padded,
    tap-packed, bf16 kernel-ready tensors."""
    f32 = jnp.float32
    bf16 = jnp.bfloat16

    # C1: (6,1,5,5) -> (25 taps, 128 lanes)
    w1 = jnp.zeros((25, OCP), f32).at[:, :6].set(p["c1_w"].reshape(6, 25).T)
    b1 = jnp.zeros((1, OCP), f32).at[0, :6].set(p["c1_b"])

    # C2_1 / C2_2 merged: lanes 0:16 = c2_1 branch, lanes 16:32 = c2_2 branch.
    # kj is lane-packed: input lane 6*kj + c -> weight row 6*kj + c.
    w2m = jnp.concatenate([p["c2_1_w"], p["c2_2_w"]], axis=0)      # (32,6,5,5)
    w2m = jnp.transpose(w2m, (2, 3, 1, 0))                         # (ki,kj,ci,co)
    w2p = jnp.zeros((5, OCP, OCP), f32)
    for kj in range(5):
        w2p = w2p.at[:, 6 * kj:6 * kj + 6, :32].set(w2m[:, kj])
    b2 = jnp.zeros((1, OCP), f32).at[0, :32].set(
        jnp.concatenate([p["c2_1_b"], p["c2_2_b"]]))

    # C3: (120,16,5,5).  4 taps packed per 128 K lanes (4 x 32 merged chans);
    # the 16 input-channel rows are duplicated into both 16-lane halves so the
    # branch residual add happens inside the matmul.
    w3m = jnp.transpose(p["c3_w"], (2, 3, 1, 0)).reshape(25, 16, 120)
    w3p = jnp.zeros((7, OCP, OCP), f32)
    for t in range(25):
        g, m = divmod(t, 4)
        w3p = w3p.at[g, 32 * m:32 * m + 16, :120].set(w3m[t])
        w3p = w3p.at[g, 32 * m + 16:32 * m + 32, :120].set(w3m[t])
    b3 = jnp.zeros((1, OCP), f32).at[0, :120].set(p["c3_b"])

    # F4 / F5
    w4 = jnp.zeros((OCP, OCP), f32).at[:120, :84].set(p["f4_w"].T)
    b4 = jnp.zeros((1, OCP), f32).at[0, :84].set(p["f4_b"])
    w5 = jnp.zeros((OCP, OCP), f32).at[:84, :10].set(p["f5_w"].T)
    b5 = jnp.zeros((1, OCP), f32).at[0, :10].set(p["f5_b"])

    return dict(w1=w1.astype(bf16), b1=b1,
                w2p=w2p.astype(bf16), b2=b2,
                w3p=w3p.astype(bf16), b3=b3,
                w4=w4.astype(bf16), b4=b4,
                w5=w5.astype(bf16), b5=b5)


def lenet5_forward(kp, img):
    # img: (N, 1, 32, 32) float32
    N = img.shape[0]
    x = img[:, 0]                                            # (N, 32, 32)

    # Batch block size: fold up to 8 images per grid step.
    B = N if N <= 8 else 8
    NB = -(-N // B)
    N_pad = NB * B
    if N_pad != N:
        x = jnp.pad(x, ((0, N_pad - N), (0, 0), (0, 0)))

    # conv1 patches, grouped by 2x2 pool phase (transpose-free strided slices;
    # rows are already in pooled-grid order i*14+j).
    phases = []
    for p in range(2):
        for q in range(2):
            taps = [x[:, p + ki:p + ki + 27:2, q + kj:q + kj + 27:2]
                    for ki in range(5) for kj in range(5)]
            phases.append(jnp.stack(taps, axis=-1).reshape(N_pad, 196, 25))
    patches = jnp.stack(phases, axis=1)                      # (Np, 4, 196, 25)
    patches = jnp.pad(patches, ((0, 0), (0, 0), (0, 60), (0, 0)))  # rows->256
    patches = patches.reshape(NB, B, 4, SIMG, 25).transpose(0, 2, 1, 3, 4)
    patches = patches.reshape(NB, 4, B * SIMG, 25)           # per-step block

    R1 = B * SIMG

    out = pl.pallas_call(
        _lenet5_kernel,
        out_shape=jax.ShapeDtypeStruct((NB, B, OCP), jnp.float32),
        grid=(NB,),
        in_specs=[
            pl.BlockSpec((None, 4, R1, 25), lambda g: (g, 0, 0, 0)),  # patches
            pl.BlockSpec((25, OCP), lambda g: (0, 0)),                # w1
            pl.BlockSpec((1, OCP), lambda g: (0, 0)),                 # b1
            pl.BlockSpec((5, OCP, OCP), lambda g: (0, 0, 0)),         # w2 packed
            pl.BlockSpec((1, OCP), lambda g: (0, 0)),                 # b2
            pl.BlockSpec((7, OCP, OCP), lambda g: (0, 0, 0)),         # w3 packed
            pl.BlockSpec((1, OCP), lambda g: (0, 0)),                 # b3
            pl.BlockSpec((OCP, OCP), lambda g: (0, 0)),               # w4
            pl.BlockSpec((1, OCP), lambda g: (0, 0)),                 # b4
            pl.BlockSpec((OCP, OCP), lambda g: (0, 0)),               # w5
            pl.BlockSpec((1, OCP), lambda g: (0, 0)),                 # b5
        ],
        out_specs=pl.BlockSpec((None, B, OCP), lambda g: (g, 0, 0)),
        scratch_shapes=[
            pltpu.VMEM((R1, OCP), jnp.float32),        # pooled C1 activation
            pltpu.VMEM((R1 - 8, OCP), jnp.bfloat16),   # kj-lane-packed C1 act
            pltpu.VMEM((R1 - 64, OCP), jnp.float32),   # merged C2 conv output
            pltpu.VMEM((R1 - 80, OCP), jnp.float32),   # pooled C2 (both branches)
            pltpu.VMEM((B, OCP), jnp.float32),         # C3 tap-group LHS
        ],
        compiler_params=pltpu.CompilerParams(
            dimension_semantics=("parallel",)),
    )(patches, kp["w1"], kp["b1"], kp["w2p"], kp["b2"], kp["w3p"], kp["b3"],
      kp["w4"], kp["b4"], kp["w5"], kp["b5"])

    return out.reshape(N_pad, OCP)[:N, :10]                  # (N, 10)


# ----------------------------- reference model ------------------------------

def lenet5_reference(params, img):
    hp = jax.lax.Precision.HIGHEST

    def conv_relu(x, w, b):
        y = jax.lax.conv_general_dilated(
            x, w, (1, 1), "VALID",
            dimension_numbers=("NCHW", "OIHW", "NCHW"), precision=hp)
        return jax.nn.relu(y + b[None, :, None, None])

    def pool(x):
        n, c, h, w = x.shape
        return x.reshape(n, c, h // 2, 2, w // 2, 2).max(axis=(3, 5))

    y = pool(conv_relu(img, params["c1_w"], params["c1_b"]))
    br1 = pool(conv_relu(y, params["c2_1_w"], params["c2_1_b"]))
    br2 = pool(conv_relu(y, params["c2_2_w"], params["c2_2_b"]))
    y = conv_relu(br2 + br1, params["c3_w"], params["c3_b"])
    y = y.reshape(img.shape[0], -1)
    y = jax.nn.relu(jnp.dot(y, params["f4_w"].T, precision=hp) + params["f4_b"])
    y = jnp.dot(y, params["f5_w"].T, precision=hp) + params["f5_b"]
    return jax.nn.log_softmax(y, axis=-1)


def init_lenet_params(key):
    # PyTorch-style uniform(-1/sqrt(fan_in), 1/sqrt(fan_in)) init.
    def uniform(k, shape, fan_in):
        bound = 1.0 / float(fan_in) ** 0.5
        return jax.random.uniform(k, shape, jnp.float32, -bound, bound)

    ks = jax.random.split(key, 12)
    return {
        "c1_w": uniform(ks[0], (6, 1, 5, 5), 1 * 25),
        "c1_b": uniform(ks[1], (6,), 1 * 25),
        "c2_1_w": uniform(ks[2], (16, 6, 5, 5), 6 * 25),
        "c2_1_b": uniform(ks[3], (16,), 6 * 25),
        "c2_2_w": uniform(ks[4], (16, 6, 5, 5), 6 * 25),
        "c2_2_b": uniform(ks[5], (16,), 6 * 25),
        "c3_w": uniform(ks[6], (120, 16, 5, 5), 16 * 25),
        "c3_b": uniform(ks[7], (120,), 16 * 25),
        "f4_w": uniform(ks[8], (84, 120), 120),
        "f4_b": uniform(ks[9], (84,), 120),
        "f5_w": uniform(ks[10], (10, 84), 84),
        "f5_b": uniform(ks[11], (10,), 84),
    }


if __name__ == "__main__":
    key = jax.random.PRNGKey(0)
    pkey, xkey = jax.random.split(key)
    params = init_lenet_params(pkey)
    # LeNet-5 requires 1x32x32 spatial input; small batch of 2.
    img = jax.random.normal(xkey, (2, 1, 32, 32), jnp.float32)

    kparams = prepare_kernel_params(params)
    fwd = jax.jit(lenet5_forward)
    out = jax.block_until_ready(fwd(kparams, img))

    assert out.shape == (2, 10)
    assert bool(jnp.all(jnp.isfinite(out)))
    # log-softmax rows must sum to ~1 in prob space
    assert bool(jnp.allclose(jnp.sum(jnp.exp(out), axis=-1), 1.0, atol=1e-4))
    # match the pure-JAX reference forward pass (bf16 MXU operands)
    ref = lenet5_reference(params, img)
    assert bool(jnp.allclose(out, ref, atol=5e-2, rtol=5e-2))

    print("KERNEL_OK")
</pallas_src>

<mosaic_0001>
module attributes {stable_mosaic.version = 11 : i64} {
  func.func @_lenet5_kernel(%arg0: i32, %arg1: memref<1x4x512x25xf32, #tpu.memory_space<vmem>>, %arg2: memref<25x128xbf16, #tpu.memory_space<vmem>>, %arg3: memref<1x128xf32, #tpu.memory_space<vmem>>, %arg4: memref<5x128x128xbf16, #tpu.memory_space<vmem>>, %arg5: memref<1x128xf32, #tpu.memory_space<vmem>>, %arg6: memref<7x128x128xbf16, #tpu.memory_space<vmem>>, %arg7: memref<1x128xf32, #tpu.memory_space<vmem>>, %arg8: memref<128x128xbf16, #tpu.memory_space<vmem>>, %arg9: memref<1x128xf32, #tpu.memory_space<vmem>>, %arg10: memref<128x128xbf16, #tpu.memory_space<vmem>>, %arg11: memref<1x128xf32, #tpu.memory_space<vmem>>, %arg12: memref<1x2x128xf32, #tpu.memory_space<vmem>>, %arg13: memref<512x128xf32, #tpu.memory_space<vmem>>, %arg14: memref<504x128xbf16, #tpu.memory_space<vmem>>, %arg15: memref<448x128xf32, #tpu.memory_space<vmem>>, %arg16: memref<432x128xf32, #tpu.memory_space<vmem>>, %arg17: memref<2x128xf32, #tpu.memory_space<vmem>>) attributes {dimension_semantics = [#tpu.dimension_semantics<parallel>], iteration_bounds = array<i64: 1>, scalar_prefetch = 0 : i64, scratch_operands = 5 : i64, tpu.core_type = #tpu.core_type<tc>, window_params = [{transform_indices = @transform_0, window_bounds = array<i64: 1, 4, 512, 25>}, {pipeline_mode = #tpu.pipeline_mode<synchronous>, transform_indices = @transform_1, window_bounds = array<i64: 25, 128>}, {pipeline_mode = #tpu.pipeline_mode<synchronous>, transform_indices = @transform_2, window_bounds = array<i64: 1, 128>}, {pipeline_mode = #tpu.pipeline_mode<synchronous>, transform_indices = @transform_3, window_bounds = array<i64: 5, 128, 128>}, {pipeline_mode = #tpu.pipeline_mode<synchronous>, transform_indices = @transform_4, window_bounds = array<i64: 1, 128>}, {pipeline_mode = #tpu.pipeline_mode<synchronous>, transform_indices = @transform_5, window_bounds = array<i64: 7, 128, 128>}, {pipeline_mode = #tpu.pipeline_mode<synchronous>, transform_indices = @transform_6, window_bounds = array<i64: 1, 128>}, {pipeline_mode = #tpu.pipeline_mode<synchronous>, transform_indices = @transform_7, window_bounds = array<i64: 128, 128>}, {pipeline_mode = #tpu.pipeline_mode<synchronous>, transform_indices = @transform_8, window_bounds = array<i64: 1, 128>}, {pipeline_mode = #tpu.pipeline_mode<synchronous>, transform_indices = @transform_9, window_bounds = array<i64: 128, 128>}, {pipeline_mode = #tpu.pipeline_mode<synchronous>, transform_indices = @transform_10, window_bounds = array<i64: 1, 128>}, {transform_indices = @transform_11, window_bounds = array<i64: 1, 2, 128>}]} {
    %c0 = arith.constant 0 : index
    %c0_0 = arith.constant 0 : index
    %0 = vector.load %arg2[%c0, %c0_0] : memref<25x128xbf16, #tpu.memory_space<vmem>>, vector<25x128xbf16>
    %c0_1 = arith.constant 0 : index
    %c0_2 = arith.constant 0 : index
    %1 = vector.load %arg3[%c0_1, %c0_2] : memref<1x128xf32, #tpu.memory_space<vmem>>, vector<1x128xf32>
    %c0_3 = arith.constant 0 : index
    %c0_4 = arith.constant 0 : index
    %c0_5 = arith.constant 0 : index
    %c0_6 = arith.constant 0 : index
    %2 = vector.load %arg1[%c0_3, %c0_4, %c0_5, %c0_6] : memref<1x4x512x25xf32, #tpu.memory_space<vmem>>, vector<1x1x512x25xf32>
    %3 = vector.shape_cast %2 : vector<1x1x512x25xf32> to vector<512x25xf32>
    %4 = arith.truncf %3 : vector<512x25xf32> to vector<512x25xbf16>
    %cst = arith.constant dense<0.000000e+00> : vector<512x128xf32>
    %5 = tpu.matmul %4, %0, %cst {dimension_numbers = #tpu.dot_dimension_numbers<[1], [0], [0], [1], [0, 0, 1, 1], [], []>} : vector<512x25xbf16>, vector<25x128xbf16>, vector<512x128xf32> -> vector<512x128xf32>
    %6 = vector.broadcast %1 : vector<1x128xf32> to vector<512x128xf32>
    %7 = arith.addf %5, %6 : vector<512x128xf32>
    %cst_7 = arith.constant 0.000000e+00 : f32
    %8 = vector.broadcast %cst_7 : f32 to vector<512x128xf32>
    %9 = arith.maximumf %7, %8 : vector<512x128xf32>
    %c0_8 = arith.constant 0 : index
    %c0_9 = arith.constant 0 : index
    %10 = vector.load %arg13[%c0_8, %c0_9] : memref<512x128xf32, #tpu.memory_space<vmem>>, vector<512x128xf32>
    tpu.vector_store %arg13[%c0_8, %c0_9], %9 {strides = array<i32>} : memref<512x128xf32, #tpu.memory_space<vmem>>, vector<512x128xf32>,
    %c0_10 = arith.constant 0 : index
    %c1 = arith.constant 1 : index
    %c0_11 = arith.constant 0 : index
    %c0_12 = arith.constant 0 : index
    %11 = vector.load %arg1[%c0_10, %c1, %c0_11, %c0_12] : memref<1x4x512x25xf32, #tpu.memory_space<vmem>>, vector<1x1x512x25xf32>
    %12 = vector.shape_cast %11 : vector<1x1x512x25xf32> to vector<512x25xf32>
    %13 = arith.truncf %12 : vector<512x25xf32> to vector<512x25xbf16>
    %cst_13 = arith.constant dense<0.000000e+00> : vector<512x128xf32>
    %14 = tpu.matmul %13, %0, %cst_13 {dimension_numbers = #tpu.dot_dimension_numbers<[1], [0], [0], [1], [0, 0, 1, 1], [], []>} : vector<512x25xbf16>, vector<25x128xbf16>, vector<512x128xf32> -> vector<512x128xf32>
    %15 = vector.broadcast %1 : vector<1x128xf32> to vector<512x128xf32>
    %16 = arith.addf %14, %15 : vector<512x128xf32>
    %cst_14 = arith.constant 0.000000e+00 : f32
    %17 = vector.broadcast %cst_14 : f32 to vector<512x128xf32>
    %18 = arith.maximumf %16, %17 : vector<512x128xf32>
    %c0_15 = arith.constant 0 : index
    %c0_16 = arith.constant 0 : index
    %19 = vector.load %arg13[%c0_15, %c0_16] : memref<512x128xf32, #tpu.memory_space<vmem>>, vector<512x128xf32>
    %20 = arith.maximumf %19, %18 : vector<512x128xf32>
    %c0_17 = arith.constant 0 : index
    %c0_18 = arith.constant 0 : index
    %21 = vector.load %arg13[%c0_17, %c0_18] : memref<512x128xf32, #tpu.memory_space<vmem>>, vector<512x128xf32>
    tpu.vector_store %arg13[%c0_17, %c0_18], %20 {strides = array<i32>} : memref<512x128xf32, #tpu.memory_space<vmem>>, vector<512x128xf32>,
    %c0_19 = arith.constant 0 : index
    %c2 = arith.constant 2 : index
    %c0_20 = arith.constant 0 : index
    %c0_21 = arith.constant 0 : index
    %22 = vector.load %arg1[%c0_19, %c2, %c0_20, %c0_21] : memref<1x4x512x25xf32, #tpu.memory_space<vmem>>, vector<1x1x512x25xf32>
    %23 = vector.shape_cast %22 : vector<1x1x512x25xf32> to vector<512x25xf32>
    %24 = arith.truncf %23 : vector<512x25xf32> to vector<512x25xbf16>
    %cst_22 = arith.constant dense<0.000000e+00> : vector<512x128xf32>
    %25 = tpu.matmul %24, %0, %cst_22 {dimension_numbers = #tpu.dot_dimension_numbers<[1], [0], [0], [1], [0, 0, 1, 1], [], []>} : vector<512x25xbf16>, vector<25x128xbf16>, vector<512x128xf32> -> vector<512x128xf32>
    %26 = vector.broadcast %1 : vector<1x128xf32> to vector<512x128xf32>
    %27 = arith.addf %25, %26 : vector<512x128xf32>
    %cst_23 = arith.constant 0.000000e+00 : f32
    %28 = vector.broadcast %cst_23 : f32 to vector<512x128xf32>
    %29 = arith.maximumf %27, %28 : vector<512x128xf32>
    %c0_24 = arith.constant 0 : index
    %c0_25 = arith.constant 0 : index
    %30 = vector.load %arg13[%c0_24, %c0_25] : memref<512x128xf32, #tpu.memory_space<vmem>>, vector<512x128xf32>
    %31 = arith.maximumf %30, %29 : vector<512x128xf32>
    %c0_26 = arith.constant 0 : index
    %c0_27 = arith.constant 0 : index
    %32 = vector.load %arg13[%c0_26, %c0_27] : memref<512x128xf32, #tpu.memory_space<vmem>>, vector<512x128xf32>
    tpu.vector_store %arg13[%c0_26, %c0_27], %31 {strides = array<i32>} : memref<512x128xf32, #tpu.memory_space<vmem>>, vector<512x128xf32>,
    %c0_28 = arith.constant 0 : index
    %c3 = arith.constant 3 : index
    %c0_29 = arith.constant 0 : index
    %c0_30 = arith.constant 0 : index
    %33 = vector.load %arg1[%c0_28, %c3, %c0_29, %c0_30] : memref<1x4x512x25xf32, #tpu.memory_space<vmem>>, vector<1x1x512x25xf32>
    %34 = vector.shape_cast %33 : vector<1x1x512x25xf32> to vector<512x25xf32>
    %35 = arith.truncf %34 : vector<512x25xf32> to vector<512x25xbf16>
    %cst_31 = arith.constant dense<0.000000e+00> : vector<512x128xf32>
    %36 = tpu.matmul %35, %0, %cst_31 {dimension_numbers = #tpu.dot_dimension_numbers<[1], [0], [0], [1], [0, 0, 1, 1], [], []>} : vector<512x25xbf16>, vector<25x128xbf16>, vector<512x128xf32> -> vector<512x128xf32>
    %37 = vector.broadcast %1 : vector<1x128xf32> to vector<512x128xf32>
    %38 = arith.addf %36, %37 : vector<512x128xf32>
    %cst_32 = arith.constant 0.000000e+00 : f32
    %39 = vector.broadcast %cst_32 : f32 to vector<512x128xf32>
    %40 = arith.maximumf %38, %39 : vector<512x128xf32>
    %c0_33 = arith.constant 0 : index
    %c0_34 = arith.constant 0 : index
    %41 = vector.load %arg13[%c0_33, %c0_34] : memref<512x128xf32, #tpu.memory_space<vmem>>, vector<512x128xf32>
    %42 = arith.maximumf %41, %40 : vector<512x128xf32>
    %c0_35 = arith.constant 0 : index
    %c0_36 = arith.constant 0 : index
    %43 = vector.load %arg13[%c0_35, %c0_36] : memref<512x128xf32, #tpu.memory_space<vmem>>, vector<512x128xf32>
    tpu.vector_store %arg13[%c0_35, %c0_36], %42 {strides = array<i32>} : memref<512x128xf32, #tpu.memory_space<vmem>>, vector<512x128xf32>,
    %c0_37 = arith.constant 0 : index
    %c0_38 = arith.constant 0 : index
    %44 = vector.load %arg13[%c0_37, %c0_38] : memref<512x128xf32, #tpu.memory_space<vmem>>, vector<504x128xf32>
    %c1_39 = arith.constant 1 : index
    %c0_40 = arith.constant 0 : index
    %45 = vector.load %arg13[%c1_39, %c0_40] : memref<512x128xf32, #tpu.memory_space<vmem>>, vector<504x128xf32>
    %c6_i32 = arith.constant 6 : i32
    %46 = tpu.dynamic_rotate %45 by %c6_i32 dim 1 : vector<504x128xf32>, i32 -> vector<504x128xf32>
    %47 = arith.addf %44, %46 : vector<504x128xf32>
    %c2_41 = arith.constant 2 : index
    %c0_42 = arith.constant 0 : index
    %48 = vector.load %arg13[%c2_41, %c0_42] : memref<512x128xf32, #tpu.memory_space<vmem>>, vector<504x128xf32>
    %c12_i32 = arith.constant 12 : i32
    %49 = tpu.dynamic_rotate %48 by %c12_i32 dim 1 : vector<504x128xf32>, i32 -> vector<504x128xf32>
    %50 = arith.addf %47, %49 : vector<504x128xf32>
    %c3_43 = arith.constant 3 : index
    %c0_44 = arith.constant 0 : index
    %51 = vector.load %arg13[%c3_43, %c0_44] : memref<512x128xf32, #tpu.memory_space<vmem>>, vector<504x128xf32>
    %c18_i32 = arith.constant 18 : i32
    %52 = tpu.dynamic_rotate %51 by %c18_i32 dim 1 : vector<504x128xf32>, i32 -> vector<504x128xf32>
    %53 = arith.addf %50, %52 : vector<504x128xf32>
    %c4 = arith.constant 4 : index
    %c0_45 = arith.constant 0 : index
    %54 = vector.load %arg13[%c4, %c0_45] : memref<512x128xf32, #tpu.memory_space<vmem>>, vector<504x128xf32>
    %c24_i32 = arith.constant 24 : i32
    %55 = tpu.dynamic_rotate %54 by %c24_i32 dim 1 : vector<504x128xf32>, i32 -> vector<504x128xf32>
    %56 = arith.addf %53, %55 : vector<504x128xf32>
    %57 = arith.truncf %56 : vector<504x128xf32> to vector<504x128xbf16>
    %c0_46 = arith.constant 0 : index
    %c0_47 = arith.constant 0 : index
    %58 = vector.load %arg14[%c0_46, %c0_47] : memref<504x128xbf16, #tpu.memory_space<vmem>>, vector<504x128xbf16>
    tpu.vector_store %arg14[%c0_46, %c0_47], %57 {strides = array<i32>} : memref<504x128xbf16, #tpu.memory_space<vmem>>, vector<504x128xbf16>,
    %c0_48 = arith.constant 0 : index
    %c0_49 = arith.constant 0 : index
    %59 = vector.load %arg5[%c0_48, %c0_49] : memref<1x128xf32, #tpu.memory_space<vmem>>, vector<1x128xf32>
    %c0_50 = arith.constant 0 : index
    %c0_51 = arith.constant 0 : index
    %60 = vector.load %arg14[%c0_50, %c0_51] : memref<504x128xbf16, #tpu.memory_space<vmem>>, vector<448x128xbf16>
    %c0_52 = arith.constant 0 : index
    %c0_53 = arith.constant 0 : index
    %c0_54 = arith.constant 0 : index
    %61 = vector.load %arg4[%c0_52, %c0_53, %c0_54] : memref<5x128x128xbf16, #tpu.memory_space<vmem>>, vector<1x128x128xbf16>
    %62 = vector.shape_cast %61 : vector<1x128x128xbf16> to vector<128x128xbf16>
    %cst_55 = arith.constant dense<0.000000e+00> : vector<448x128xf32>
    %63 = tpu.matmul %60, %62, %cst_55 {dimension_numbers = #tpu.dot_dimension_numbers<[1], [0], [0], [1], [0, 0, 1, 1], [], []>} : vector<448x128xbf16>, vector<128x128xbf16>, vector<448x128xf32> -> vector<448x128xf32>
    %64 = vector.broadcast %59 : vector<1x128xf32> to vector<448x128xf32>
    %65 = arith.addf %63, %64 : vector<448x128xf32>
    %c0_56 = arith.constant 0 : index
    %c0_57 = arith.constant 0 : index
    %66 = vector.load %arg15[%c0_56, %c0_57] : memref<448x128xf32, #tpu.memory_space<vmem>>, vector<448x128xf32>
    tpu.vector_store %arg15[%c0_56, %c0_57], %65 {strides = array<i32>} : memref<448x128xf32, #tpu.memory_space<vmem>>, vector<448x128xf32>,
    %c14 = arith.constant 14 : index
    %c0_58 = arith.constant 0 : index
    %67 = vector.load %arg14[%c14, %c0_58] : memref<504x128xbf16, #tpu.memory_space<vmem>>, vector<448x128xbf16>
    %c1_59 = arith.constant 1 : index
    %c0_60 = arith.constant 0 : index
    %c0_61 = arith.constant 0 : index
    %68 = vector.load %arg4[%c1_59, %c0_60, %c0_61] : memref<5x128x128xbf16, #tpu.memory_space<vmem>>, vector<1x128x128xbf16>
    %69 = vector.shape_cast %68 : vector<1x128x128xbf16> to vector<128x128xbf16>
    %cst_62 = arith.constant dense<0.000000e+00> : vector<448x128xf32>
    %70 = tpu.matmul %67, %69, %cst_62 {dimension_numbers = #tpu.dot_dimension_numbers<[1], [0], [0], [1], [0, 0, 1, 1], [], []>} : vector<448x128xbf16>, vector<128x128xbf16>, vector<448x128xf32> -> vector<448x128xf32>
    %c0_63 = arith.constant 0 : index
    %c0_64 = arith.constant 0 : index
    %71 = vector.load %arg15[%c0_63, %c0_64] : memref<448x128xf32, #tpu.memory_space<vmem>>, vector<448x128xf32>
    %72 = arith.addf %71, %70 : vector<448x128xf32>
    %c0_65 = arith.constant 0 : index
    %c0_66 = arith.constant 0 : index
    %73 = vector.load %arg15[%c0_65, %c0_66] : memref<448x128xf32, #tpu.memory_space<vmem>>, vector<448x128xf32>
    tpu.vector_store %arg15[%c0_65, %c0_66], %72 {strides = array<i32>} : memref<448x128xf32, #tpu.memory_space<vmem>>, vector<448x128xf32>,
    %c28 = arith.constant 28 : index
    %c0_67 = arith.constant 0 : index
    %74 = vector.load %arg14[%c28, %c0_67] : memref<504x128xbf16, #tpu.memory_space<vmem>>, vector<448x128xbf16>
    %c2_68 = arith.constant 2 : index
    %c0_69 = arith.constant 0 : index
    %c0_70 = arith.constant 0 : index
    %75 = vector.load %arg4[%c2_68, %c0_69, %c0_70] : memref<5x128x128xbf16, #tpu.memory_space<vmem>>, vector<1x128x128xbf16>
    %76 = vector.shape_cast %75 : vector<1x128x128xbf16> to vector<128x128xbf16>
    %cst_71 = arith.constant dense<0.000000e+00> : vector<448x128xf32>
    %77 = tpu.matmul %74, %76, %cst_71 {dimension_numbers = #tpu.dot_dimension_numbers<[1], [0], [0], [1], [0, 0, 1, 1], [], []>} : vector<448x128xbf16>, vector<128x128xbf16>, vector<448x128xf32> -> vector<448x128xf32>
    %c0_72 = arith.constant 0 : index
    %c0_73 = arith.constant 0 : index
    %78 = vector.load %arg15[%c0_72, %c0_73] : memref<448x128xf32, #tpu.memory_space<vmem>>, vector<448x128xf32>
    %79 = arith.addf %78, %77 : vector<448x128xf32>
    %c0_74 = arith.constant 0 : index
    %c0_75 = arith.constant 0 : index
    %80 = vector.load %arg15[%c0_74, %c0_75] : memref<448x128xf32, #tpu.memory_space<vmem>>, vector<448x128xf32>
    tpu.vector_store %arg15[%c0_74, %c0_75], %79 {strides = array<i32>} : memref<448x128xf32, #tpu.memory_space<vmem>>, vector<448x128xf32>,
    %c42 = arith.constant 42 : index
    %c0_76 = arith.constant 0 : index
    %81 = vector.load %arg14[%c42, %c0_76] : memref<504x128xbf16, #tpu.memory_space<vmem>>, vector<448x128xbf16>
    %c3_77 = arith.constant 3 : index
    %c0_78 = arith.constant 0 : index
    %c0_79 = arith.constant 0 : index
    %82 = vector.load %arg4[%c3_77, %c0_78, %c0_79] : memref<5x128x128xbf16, #tpu.memory_space<vmem>>, vector<1x128x128xbf16>
    %83 = vector.shape_cast %82 : vector<1x128x128xbf16> to vector<128x128xbf16>
    %cst_80 = arith.constant dense<0.000000e+00> : vector<448x128xf32>
    %84 = tpu.matmul %81, %83, %cst_80 {dimension_numbers = #tpu.dot_dimension_numbers<[1], [0], [0], [1], [0, 0, 1, 1], [], []>} : vector<448x128xbf16>, vector<128x128xbf16>, vector<448x128xf32> -> vector<448x128xf32>
    %c0_81 = arith.constant 0 : index
    %c0_82 = arith.constant 0 : index
    %85 = vector.load %arg15[%c0_81, %c0_82] : memref<448x128xf32, #tpu.memory_space<vmem>>, vector<448x128xf32>
    %86 = arith.addf %85, %84 : vector<448x128xf32>
    %c0_83 = arith.constant 0 : index
    %c0_84 = arith.constant 0 : index
    %87 = vector.load %arg15[%c0_83, %c0_84] : memref<448x128xf32, #tpu.memory_space<vmem>>, vector<448x128xf32>
    tpu.vector_store %arg15[%c0_83, %c0_84], %86 {strides = array<i32>} : memref<448x128xf32, #tpu.memory_space<vmem>>, vector<448x128xf32>,
    %c56 = arith.constant 56 : index
    %c0_85 = arith.constant 0 : index
    %88 = vector.load %arg14[%c56, %c0_85] : memref<504x128xbf16, #tpu.memory_space<vmem>>, vector<448x128xbf16>
    %c4_86 = arith.constant 4 : index
    %c0_87 = arith.constant 0 : index
    %c0_88 = arith.constant 0 : index
    %89 = vector.load %arg4[%c4_86, %c0_87, %c0_88] : memref<5x128x128xbf16, #tpu.memory_space<vmem>>, vector<1x128x128xbf16>
    %90 = vector.shape_cast %89 : vector<1x128x128xbf16> to vector<128x128xbf16>
    %cst_89 = arith.constant dense<0.000000e+00> : vector<448x128xf32>
    %91 = tpu.matmul %88, %90, %cst_89 {dimension_numbers = #tpu.dot_dimension_numbers<[1], [0], [0], [1], [0, 0, 1, 1], [], []>} : vector<448x128xbf16>, vector<128x128xbf16>, vector<448x128xf32> -> vector<448x128xf32>
    %c0_90 = arith.constant 0 : index
    %c0_91 = arith.constant 0 : index
    %92 = vector.load %arg15[%c0_90, %c0_91] : memref<448x128xf32, #tpu.memory_space<vmem>>, vector<448x128xf32>
    %93 = arith.addf %92, %91 : vector<448x128xf32>
    %cst_92 = arith.constant 0.000000e+00 : f32
    %94 = vector.broadcast %cst_92 : f32 to vector<448x128xf32>
    %95 = arith.maximumf %93, %94 : vector<448x128xf32>
    %c0_93 = arith.constant 0 : index
    %c0_94 = arith.constant 0 : index
    %96 = vector.load %arg15[%c0_93, %c0_94] : memref<448x128xf32, #tpu.memory_space<vmem>>, vector<448x128xf32>
    tpu.vector_store %arg15[%c0_93, %c0_94], %95 {strides = array<i32>} : memref<448x128xf32, #tpu.memory_space<vmem>>, vector<448x128xf32>,
    %c0_95 = arith.constant 0 : index
    %c0_96 = arith.constant 0 : index
    %97 = vector.load %arg15[%c0_95, %c0_96] : memref<448x128xf32, #tpu.memory_space<vmem>>, vector<432x128xf32>
    %c1_97 = arith.constant 1 : index
    %c0_98 = arith.constant 0 : index
    %98 = vector.load %arg15[%c1_97, %c0_98] : memref<448x128xf32, #tpu.memory_space<vmem>>, vector<432x128xf32>
    %99 = arith.maximumf %97, %98 : vector<432x128xf32>
    %c14_99 = arith.constant 14 : index
    %c0_100 = arith.constant 0 : index
    %100 = vector.load %arg15[%c14_99, %c0_100] : memref<448x128xf32, #tpu.memory_space<vmem>>, vector<432x128xf32>
    %c15 = arith.constant 15 : index
    %c0_101 = arith.constant 0 : index
    %101 = vector.load %arg15[%c15, %c0_101] : memref<448x128xf32, #tpu.memory_space<vmem>>, vector<432x128xf32>
    %102 = arith.maximumf %100, %101 : vector<432x128xf32>
    %103 = arith.maximumf %99, %102 : vector<432x128xf32>
    %c0_102 = arith.constant 0 : index
    %c0_103 = arith.constant 0 : index
    %104 = vector.load %arg16[%c0_102, %c0_103] : memref<432x128xf32, #tpu.memory_space<vmem>>, vector<432x128xf32>
    tpu.vector_store %arg16[%c0_102, %c0_103], %103 {strides = array<i32>} : memref<432x128xf32, #tpu.memory_space<vmem>>, vector<432x128xf32>,
    %c0_104 = arith.constant 0 : index
    %c0_105 = arith.constant 0 : index
    %105 = vector.load %arg16[%c0_104, %c0_105] : memref<432x128xf32, #tpu.memory_space<vmem>>, vector<1x128xf32>
    %c2_106 = arith.constant 2 : index
    %c0_107 = arith.constant 0 : index
    %106 = vector.load %arg16[%c2_106, %c0_107] : memref<432x128xf32, #tpu.memory_space<vmem>>, vector<1x128xf32>
    %c32_i32 = arith.constant 32 : i32
    %107 = tpu.dynamic_rotate %106 by %c32_i32 dim 1 : vector<1x128xf32>, i32 -> vector<1x128xf32>
    %108 = arith.addf %105, %107 : vector<1x128xf32>
    %c4_108 = arith.constant 4 : index
    %c0_109 = arith.constant 0 : index
    %109 = vector.load %arg16[%c4_108, %c0_109] : memref<432x128xf32, #tpu.memory_space<vmem>>, vector<1x128xf32>
    %c64_i32 = arith.constant 64 : i32
    %110 = tpu.dynamic_rotate %109 by %c64_i32 dim 1 : vector<1x128xf32>, i32 -> vector<1x128xf32>
    %111 = arith.addf %108, %110 : vector<1x128xf32>
    %c6 = arith.constant 6 : index
    %c0_110 = arith.constant 0 : index
    %112 = vector.load %arg16[%c6, %c0_110] : memref<432x128xf32, #tpu.memory_space<vmem>>, vector<1x128xf32>
    %c96_i32 = arith.constant 96 : i32
    %113 = tpu.dynamic_rotate %112 by %c96_i32 dim 1 : vector<1x128xf32>, i32 -> vector<1x128xf32>
    %114 = arith.addf %111, %113 : vector<1x128xf32>
    %c0_111 = arith.constant 0 : index
    %c0_112 = arith.constant 0 : index
    %115 = vector.load %arg17[%c0_111, %c0_112] : memref<2x128xf32, #tpu.memory_space<vmem>>, vector<1x128xf32>
    tpu.vector_store %arg17[%c0_111, %c0_112], %114 {strides = array<i32>} : memref<2x128xf32, #tpu.memory_space<vmem>>, vector<1x128xf32>,
    %c256 = arith.constant 256 : index
    %c0_113 = arith.constant 0 : index
    %116 = vector.load %arg16[%c256, %c0_113] : memref<432x128xf32, #tpu.memory_space<vmem>>, vector<1x128xf32>
    %c258 = arith.constant 258 : index
    %c0_114 = arith.constant 0 : index
    %117 = vector.load %arg16[%c258, %c0_114] : memref<432x128xf32, #tpu.memory_space<vmem>>, vector<1x128xf32>
    %c32_i32_115 = arith.constant 32 : i32
    %118 = tpu.dynamic_rotate %117 by %c32_i32_115 dim 1 : vector<1x128xf32>, i32 -> vector<1x128xf32>
    %119 = arith.addf %116, %118 : vector<1x128xf32>
    %c260 = arith.constant 260 : index
    %c0_116 = arith.constant 0 : index
    %120 = vector.load %arg16[%c260, %c0_116] : memref<432x128xf32, #tpu.memory_space<vmem>>, vector<1x128xf32>
    %c64_i32_117 = arith.constant 64 : i32
    %121 = tpu.dynamic_rotate %120 by %c64_i32_117 dim 1 : vector<1x128xf32>, i32 -> vector<1x128xf32>
    %122 = arith.addf %119, %121 : vector<1x128xf32>
    %c262 = arith.constant 262 : index
    %c0_118 = arith.constant 0 : index
    %123 = vector.load %arg16[%c262, %c0_118] : memref<432x128xf32, #tpu.memory_space<vmem>>, vector<1x128xf32>
    %c96_i32_119 = arith.constant 96 : i32
    %124 = tpu.dynamic_rotate %123 by %c96_i32_119 dim 1 : vector<1x128xf32>, i32 -> vector<1x128xf32>
    %125 = arith.addf %122, %124 : vector<1x128xf32>
    %c1_120 = arith.constant 1 : index
    %c0_121 = arith.constant 0 : index
    %126 = vector.load %arg17[%c1_120, %c0_121] : memref<2x128xf32, #tpu.memory_space<vmem>>, vector<1x128xf32>
    tpu.vector_store %arg17[%c1_120, %c0_121], %125 {strides = array<i32>} : memref<2x128xf32, #tpu.memory_space<vmem>>, vector<1x128xf32>,
    %c0_122 = arith.constant 0 : index
    %c0_123 = arith.constant 0 : index
    %127 = vector.load %arg17[%c0_122, %c0_123] : memref<2x128xf32, #tpu.memory_space<vmem>>, vector<2x128xf32>
    %128 = arith.truncf %127 : vector<2x128xf32> to vector<2x128xbf16>
    %c0_124 = arith.constant 0 : index
    %c0_125 = arith.constant 0 : index
    %c0_126 = arith.constant 0 : index
    %129 = vector.load %arg6[%c0_124, %c0_125, %c0_126] : memref<7x128x128xbf16, #tpu.memory_space<vmem>>, vector<1x128x128xbf16>
    %130 = vector.shape_cast %129 : vector<1x128x128xbf16> to vector<128x128xbf16>
    %cst_127 = arith.constant dense<0.000000e+00> : vector<2x128xf32>
    %131 = tpu.matmul %128, %130, %cst_127 {dimension_numbers = #tpu.dot_dimension_numbers<[1], [0], [0], [1], [0, 0, 1, 1], [], []>} : vector<2x128xbf16>, vector<128x128xbf16>, vector<2x128xf32> -> vector<2x128xf32>
    %c8 = arith.constant 8 : index
    %c0_128 = arith.constant 0 : index
    %132 = vector.load %arg16[%c8, %c0_128] : memref<432x128xf32, #tpu.memory_space<vmem>>, vector<1x128xf32>
    %c28_129 = arith.constant 28 : index
    %c0_130 = arith.constant 0 : index
    %133 = vector.load %arg16[%c28_129, %c0_130] : memref<432x128xf32, #tpu.memory_space<vmem>>, vector<1x128xf32>
    %c32_i32_131 = arith.constant 32 : i32
    %134 = tpu.dynamic_rotate %133 by %c32_i32_131 dim 1 : vector<1x128xf32>, i32 -> vector<1x128xf32>
    %135 = arith.addf %132, %134 : vector<1x128xf32>
    %c30 = arith.constant 30 : index
    %c0_132 = arith.constant 0 : index
    %136 = vector.load %arg16[%c30, %c0_132] : memref<432x128xf32, #tpu.memory_space<vmem>>, vector<1x128xf32>
    %c64_i32_133 = arith.constant 64 : i32
    %137 = tpu.dynamic_rotate %136 by %c64_i32_133 dim 1 : vector<1x128xf32>, i32 -> vector<1x128xf32>
    %138 = arith.addf %135, %137 : vector<1x128xf32>
    %c32 = arith.constant 32 : index
    %c0_134 = arith.constant 0 : index
    %139 = vector.load %arg16[%c32, %c0_134] : memref<432x128xf32, #tpu.memory_space<vmem>>, vector<1x128xf32>
    %c96_i32_135 = arith.constant 96 : i32
    %140 = tpu.dynamic_rotate %139 by %c96_i32_135 dim 1 : vector<1x128xf32>, i32 -> vector<1x128xf32>
    %141 = arith.addf %138, %140 : vector<1x128xf32>
    %c0_136 = arith.constant 0 : index
    %c0_137 = arith.constant 0 : index
    %142 = vector.load %arg17[%c0_136, %c0_137] : memref<2x128xf32, #tpu.memory_space<vmem>>, vector<1x128xf32>
    tpu.vector_store %arg17[%c0_136, %c0_137], %141 {strides = array<i32>} : memref<2x128xf32, #tpu.memory_space<vmem>>, vector<1x128xf32>,
    %c264 = arith.constant 264 : index
    %c0_138 = arith.constant 0 : index
    %143 = vector.load %arg16[%c264, %c0_138] : memref<432x128xf32, #tpu.memory_space<vmem>>, vector<1x128xf32>
    %c284 = arith.constant 284 : index
    %c0_139 = arith.constant 0 : index
    %144 = vector.load %arg16[%c284, %c0_139] : memref<432x128xf32, #tpu.memory_space<vmem>>, vector<1x128xf32>
    %c32_i32_140 = arith.constant 32 : i32
    %145 = tpu.dynamic_rotate %144 by %c32_i32_140 dim 1 : vector<1x128xf32>, i32 -> vector<1x128xf32>
    %146 = arith.addf %143, %145 : vector<1x128xf32>
    %c286 = arith.constant 286 : index
    %c0_141 = arith.constant 0 : index
    %147 = vector.load %arg16[%c286, %c0_141] : memref<432x128xf32, #tpu.memory_space<vmem>>, vector<1x128xf32>
    %c64_i32_142 = arith.constant 64 : i32
    %148 = tpu.dynamic_rotate %147 by %c64_i32_142 dim 1 : vector<1x128xf32>, i32 -> vector<1x128xf32>
    %149 = arith.addf %146, %148 : vector<1x128xf32>
    %c288 = arith.constant 288 : index
    %c0_143 = arith.constant 0 : index
    %150 = vector.load %arg16[%c288, %c0_143] : memref<432x128xf32, #tpu.memory_space<vmem>>, vector<1x128xf32>
    %c96_i32_144 = arith.constant 96 : i32
    %151 = tpu.dynamic_rotate %150 by %c96_i32_144 dim 1 : vector<1x128xf32>, i32 -> vector<1x128xf32>
    %152 = arith.addf %149, %151 : vector<1x128xf32>
    %c1_145 = arith.constant 1 : index
    %c0_146 = arith.constant 0 : index
    %153 = vector.load %arg17[%c1_145, %c0_146] : memref<2x128xf32, #tpu.memory_space<vmem>>, vector<1x128xf32>
    tpu.vector_store %arg17[%c1_145, %c0_146], %152 {strides = array<i32>} : memref<2x128xf32, #tpu.memory_space<vmem>>, vector<1x128xf32>,
    %c0_147 = arith.constant 0 : index
    %c0_148 = arith.constant 0 : index
    %154 = vector.load %arg17[%c0_147, %c0_148] : memref<2x128xf32, #tpu.memory_space<vmem>>, vector<2x128xf32>
    %155 = arith.truncf %154 : vector<2x128xf32> to vector<2x128xbf16>
    %c1_149 = arith.constant 1 : index
    %c0_150 = arith.constant 0 : index
    %c0_151 = arith.constant 0 : index
    %156 = vector.load %arg6[%c1_149, %c0_150, %c0_151] : memref<7x128x128xbf16, #tpu.memory_space<vmem>>, vector<1x128x128xbf16>
    %157 = vector.shape_cast %156 : vector<1x128x128xbf16> to vector<128x128xbf16>
    %cst_152 = arith.constant dense<0.000000e+00> : vector<2x128xf32>
    %158 = tpu.matmul %155, %157, %cst_152 {dimension_numbers = #tpu.dot_dimension_numbers<[1], [0], [0], [1], [0, 0, 1, 1], [], []>} : vector<2x128xbf16>, vector<128x128xbf16>, vector<2x128xf32> -> vector<2x128xf32>
    %159 = arith.addf %131, %158 : vector<2x128xf32>
    %c34 = arith.constant 34 : index
    %c0_153 = arith.constant 0 : index
    %160 = vector.load %arg16[%c34, %c0_153] : memref<432x128xf32, #tpu.memory_space<vmem>>, vector<1x128xf32>
    %c36 = arith.constant 36 : index
    %c0_154 = arith.constant 0 : index
    %161 = vector.load %arg16[%c36, %c0_154] : memref<432x128xf32, #tpu.memory_space<vmem>>, vector<1x128xf32>
    %c32_i32_155 = arith.constant 32 : i32
    %162 = tpu.dynamic_rotate %161 by %c32_i32_155 dim 1 : vector<1x128xf32>, i32 -> vector<1x128xf32>
    %163 = arith.addf %160, %162 : vector<1x128xf32>
    %c56_156 = arith.constant 56 : index
    %c0_157 = arith.constant 0 : index
    %164 = vector.load %arg16[%c56_156, %c0_157] : memref<432x128xf32, #tpu.memory_space<vmem>>, vector<1x128xf32>
    %c64_i32_158 = arith.constant 64 : i32
    %165 = tpu.dynamic_rotate %164 by %c64_i32_158 dim 1 : vector<1x128xf32>, i32 -> vector<1x128xf32>
    %166 = arith.addf %163, %165 : vector<1x128xf32>
    %c58 = arith.constant 58 : index
    %c0_159 = arith.constant 0 : index
    %167 = vector.load %arg16[%c58, %c0_159] : memref<432x128xf32, #tpu.memory_space<vmem>>, vector<1x128xf32>
    %c96_i32_160 = arith.constant 96 : i32
    %168 = tpu.dynamic_rotate %167 by %c96_i32_160 dim 1 : vector<1x128xf32>, i32 -> vector<1x128xf32>
    %169 = arith.addf %166, %168 : vector<1x128xf32>
    %c0_161 = arith.constant 0 : index
    %c0_162 = arith.constant 0 : index
    %170 = vector.load %arg17[%c0_161, %c0_162] : memref<2x128xf32, #tpu.memory_space<vmem>>, vector<1x128xf32>
    tpu.vector_store %arg17[%c0_161, %c0_162], %169 {strides = array<i32>} : memref<2x128xf32, #tpu.memory_space<vmem>>, vector<1x128xf32>,
    %c290 = arith.constant 290 : index
    %c0_163 = arith.constant 0 : index
    %171 = vector.load %arg16[%c290, %c0_163] : memref<432x128xf32, #tpu.memory_space<vmem>>, vector<1x128xf32>
    %c292 = arith.constant 292 : index
    %c0_164 = arith.constant 0 : index
    %172 = vector.load %arg16[%c292, %c0_164] : memref<432x128xf32, #tpu.memory_space<vmem>>, vector<1x128xf32>
    %c32_i32_165 = arith.constant 32 : i32
    %173 = tpu.dynamic_rotate %172 by %c32_i32_165 dim 1 : vector<1x128xf32>, i32 -> vector<1x128xf32>
    %174 = arith.addf %171, %173 : vector<1x128xf32>
    %c312 = arith.constant 312 : index
    %c0_166 = arith.constant 0 : index
    %175 = vector.load %arg16[%c312, %c0_166] : memref<432x128xf32, #tpu.memory_space<vmem>>, vector<1x128xf32>
    %c64_i32_167 = arith.constant 64 : i32
    %176 = tpu.dynamic_rotate %175 by %c64_i32_167 dim 1 : vector<1x128xf32>, i32 -> vector<1x128xf32>
    %177 = arith.addf %174, %176 : vector<1x128xf32>
    %c314 = arith.constant 314 : index
    %c0_168 = arith.constant 0 : index
    %178 = vector.load %arg16[%c314, %c0_168] : memref<432x128xf32, #tpu.memory_space<vmem>>, vector<1x128xf32>
    %c96_i32_169 = arith.constant 96 : i32
    %179 = tpu.dynamic_rotate %178 by %c96_i32_169 dim 1 : vector<1x128xf32>, i32 -> vector<1x128xf32>
    %180 = arith.addf %177, %179 : vector<1x128xf32>
    %c1_170 = arith.constant 1 : index
    %c0_171 = arith.constant 0 : index
    %181 = vector.load %arg17[%c1_170, %c0_171] : memref<2x128xf32, #tpu.memory_space<vmem>>, vector<1x128xf32>
    tpu.vector_store %arg17[%c1_170, %c0_171], %180 {strides = array<i32>} : memref<2x128xf32, #tpu.memory_space<vmem>>, vector<1x128xf32>,
    %c0_172 = arith.constant 0 : index
    %c0_173 = arith.constant 0 : index
    %182 = vector.load %arg17[%c0_172, %c0_173] : memref<2x128xf32, #tpu.memory_space<vmem>>, vector<2x128xf32>
    %183 = arith.truncf %182 : vector<2x128xf32> to vector<2x128xbf16>
    %c2_174 = arith.constant 2 : index
    %c0_175 = arith.constant 0 : index
    %c0_176 = arith.constant 0 : index
    %184 = vector.load %arg6[%c2_174, %c0_175, %c0_176] : memref<7x128x128xbf16, #tpu.memory_space<vmem>>, vector<1x128x128xbf16>
    %185 = vector.shape_cast %184 : vector<1x128x128xbf16> to vector<128x128xbf16>
    %cst_177 = arith.constant dense<0.000000e+00> : vector<2x128xf32>
    %186 = tpu.matmul %183, %185, %cst_177 {dimension_numbers = #tpu.dot_dimension_numbers<[1], [0], [0], [1], [0, 0, 1, 1], [], []>} : vector<2x128xbf16>, vector<128x128xbf16>, vector<2x128xf32> -> vector<2x128xf32>
    %187 = arith.addf %159, %186 : vector<2x128xf32>
    %c60 = arith.constant 60 : index
    %c0_178 = arith.constant 0 : index
    %188 = vector.load %arg16[%c60, %c0_178] : memref<432x128xf32, #tpu.memory_space<vmem>>, vector<1x128xf32>
    %c62 = arith.constant 62 : index
    %c0_179 = arith.constant 0 : index
    %189 = vector.load %arg16[%c62, %c0_179] : memref<432x128xf32, #tpu.memory_space<vmem>>, vector<1x128xf32>
    %c32_i32_180 = arith.constant 32 : i32
    %190 = tpu.dynamic_rotate %189 by %c32_i32_180 dim 1 : vector<1x128xf32>, i32 -> vector<1x128xf32>
    %191 = arith.addf %188, %190 : vector<1x128xf32>
    %c64 = arith.constant 64 : index
    %c0_181 = arith.constant 0 : index
    %192 = vector.load %arg16[%c64, %c0_181] : memref<432x128xf32, #tpu.memory_space<vmem>>, vector<1x128xf32>
    %c64_i32_182 = arith.constant 64 : i32
    %193 = tpu.dynamic_rotate %192 by %c64_i32_182 dim 1 : vector<1x128xf32>, i32 -> vector<1x128xf32>
    %194 = arith.addf %191, %193 : vector<1x128xf32>
    %c84 = arith.constant 84 : index
    %c0_183 = arith.constant 0 : index
    %195 = vector.load %arg16[%c84, %c0_183] : memref<432x128xf32, #tpu.memory_space<vmem>>, vector<1x128xf32>
    %c96_i32_184 = arith.constant 96 : i32
    %196 = tpu.dynamic_rotate %195 by %c96_i32_184 dim 1 : vector<1x128xf32>, i32 -> vector<1x128xf32>
    %197 = arith.addf %194, %196 : vector<1x128xf32>
    %c0_185 = arith.constant 0 : index
    %c0_186 = arith.constant 0 : index
    %198 = vector.load %arg17[%c0_185, %c0_186] : memref<2x128xf32, #tpu.memory_space<vmem>>, vector<1x128xf32>
    tpu.vector_store %arg17[%c0_185, %c0_186], %197 {strides = array<i32>} : memref<2x128xf32, #tpu.memory_space<vmem>>, vector<1x128xf32>,
    %c316 = arith.constant 316 : index
    %c0_187 = arith.constant 0 : index
    %199 = vector.load %arg16[%c316, %c0_187] : memref<432x128xf32, #tpu.memory_space<vmem>>, vector<1x128xf32>
    %c318 = arith.constant 318 : index
    %c0_188 = arith.constant 0 : index
    %200 = vector.load %arg16[%c318, %c0_188] : memref<432x128xf32, #tpu.memory_space<vmem>>, vector<1x128xf32>
    %c32_i32_189 = arith.constant 32 : i32
    %201 = tpu.dynamic_rotate %200 by %c32_i32_189 dim 1 : vector<1x128xf32>, i32 -> vector<1x128xf32>
    %202 = arith.addf %199, %201 : vector<1x128xf32>
    %c320 = arith.constant 320 : index
    %c0_190 = arith.constant 0 : index
    %203 = vector.load %arg16[%c320, %c0_190] : memref<432x128xf32, #tpu.memory_space<vmem>>, vector<1x128xf32>
    %c64_i32_191 = arith.constant 64 : i32
    %204 = tpu.dynamic_rotate %203 by %c64_i32_191 dim 1 : vector<1x128xf32>, i32 -> vector<1x128xf32>
    %205 = arith.addf %202, %204 : vector<1x128xf32>
    %c340 = arith.constant 340 : index
    %c0_192 = arith.constant 0 : index
    %206 = vector.load %arg16[%c340, %c0_192] : memref<432x128xf32, #tpu.memory_space<vmem>>, vector<1x128xf32>
    %c96_i32_193 = arith.constant 96 : i32
    %207 = tpu.dynamic_rotate %206 by %c96_i32_193 dim 1 : vector<1x128xf32>, i32 -> vector<1x128xf32>
    %208 = arith.addf %205, %207 : vector<1x128xf32>
    %c1_194 = arith.constant 1 : index
    %c0_195 = arith.constant 0 : index
    %209 = vector.load %arg17[%c1_194, %c0_195] : memref<2x128xf32, #tpu.memory_space<vmem>>, vector<1x128xf32>
    tpu.vector_store %arg17[%c1_194, %c0_195], %208 {strides = array<i32>} : memref<2x128xf32, #tpu.memory_space<vmem>>, vector<1x128xf32>,
    %c0_196 = arith.constant 0 : index
    %c0_197 = arith.constant 0 : index
    %210 = vector.load %arg17[%c0_196, %c0_197] : memref<2x128xf32, #tpu.memory_space<vmem>>, vector<2x128xf32>
    %211 = arith.truncf %210 : vector<2x128xf32> to vector<2x128xbf16>
    %c3_198 = arith.constant 3 : index
    %c0_199 = arith.constant 0 : index
    %c0_200 = arith.constant 0 : index
    %212 = vector.load %arg6[%c3_198, %c0_199, %c0_200] : memref<7x128x128xbf16, #tpu.memory_space<vmem>>, vector<1x128x128xbf16>
    %213 = vector.shape_cast %212 : vector<1x128x128xbf16> to vector<128x128xbf16>
    %cst_201 = arith.constant dense<0.000000e+00> : vector<2x128xf32>
    %214 = tpu.matmul %211, %213, %cst_201 {dimension_numbers = #tpu.dot_dimension_numbers<[1], [0], [0], [1], [0, 0, 1, 1], [], []>} : vector<2x128xbf16>, vector<128x128xbf16>, vector<2x128xf32> -> vector<2x128xf32>
    %215 = arith.addf %187, %214 : vector<2x128xf32>
    %c86 = arith.constant 86 : index
    %c0_202 = arith.constant 0 : index
    %216 = vector.load %arg16[%c86, %c0_202] : memref<432x128xf32, #tpu.memory_space<vmem>>, vector<1x128xf32>
    %c88 = arith.constant 88 : index
    %c0_203 = arith.constant 0 : index
    %217 = vector.load %arg16[%c88, %c0_203] : memref<432x128xf32, #tpu.memory_space<vmem>>, vector<1x128xf32>
    %c32_i32_204 = arith.constant 32 : i32
    %218 = tpu.dynamic_rotate %217 by %c32_i32_204 dim 1 : vector<1x128xf32>, i32 -> vector<1x128xf32>
    %219 = arith.addf %216, %218 : vector<1x128xf32>
    %c90 = arith.constant 90 : index
    %c0_205 = arith.constant 0 : index
    %220 = vector.load %arg16[%c90, %c0_205] : memref<432x128xf32, #tpu.memory_space<vmem>>, vector<1x128xf32>
    %c64_i32_206 = arith.constant 64 : i32
    %221 = tpu.dynamic_rotate %220 by %c64_i32_206 dim 1 : vector<1x128xf32>, i32 -> vector<1x128xf32>
    %222 = arith.addf %219, %221 : vector<1x128xf32>
    %c92 = arith.constant 92 : index
    %c0_207 = arith.constant 0 : index
    %223 = vector.load %arg16[%c92, %c0_207] : memref<432x128xf32, #tpu.memory_space<vmem>>, vector<1x128xf32>
    %c96_i32_208 = arith.constant 96 : i32
    %224 = tpu.dynamic_rotate %223 by %c96_i32_208 dim 1 : vector<1x128xf32>, i32 -> vector<1x128xf32>
    %225 = arith.addf %222, %224 : vector<1x128xf32>
    %c0_209 = arith.constant 0 : index
    %c0_210 = arith.constant 0 : index
    %226 = vector.load %arg17[%c0_209, %c0_210] : memref<2x128xf32, #tpu.memory_space<vmem>>, vector<1x128xf32>
    tpu.vector_store %arg17[%c0_209, %c0_210], %225 {strides = array<i32>} : memref<2x128xf32, #tpu.memory_space<vmem>>, vector<1x128xf32>,
    %c342 = arith.constant 342 : index
    %c0_211 = arith.constant 0 : index
    %227 = vector.load %arg16[%c342, %c0_211] : memref<432x128xf32, #tpu.memory_space<vmem>>, vector<1x128xf32>
    %c344 = arith.constant 344 : index
    %c0_212 = arith.constant 0 : index
    %228 = vector.load %arg16[%c344, %c0_212] : memref<432x128xf32, #tpu.memory_space<vmem>>, vector<1x128xf32>
    %c32_i32_213 = arith.constant 32 : i32
    %229 = tpu.dynamic_rotate %228 by %c32_i32_213 dim 1 : vector<1x128xf32>, i32 -> vector<1x128xf32>
    %230 = arith.addf %227, %229 : vector<1x128xf32>
    %c346 = arith.constant 346 : index
    %c0_214 = arith.constant 0 : index
    %231 = vector.load %arg16[%c346, %c0_214] : memref<432x128xf32, #tpu.memory_space<vmem>>, vector<1x128xf32>
    %c64_i32_215 = arith.constant 64 : i32
    %232 = tpu.dynamic_rotate %231 by %c64_i32_215 dim 1 : vector<1x128xf32>, i32 -> vector<1x128xf32>
    %233 = arith.addf %230, %232 : vector<1x128xf32>
    %c348 = arith.constant 348 : index
    %c0_216 = arith.constant 0 : index
    %234 = vector.load %arg16[%c348, %c0_216] : memref<432x128xf32, #tpu.memory_space<vmem>>, vector<1x128xf32>
    %c96_i32_217 = arith.constant 96 : i32
    %235 = tpu.dynamic_rotate %234 by %c96_i32_217 dim 1 : vector<1x128xf32>, i32 -> vector<1x128xf32>
    %236 = arith.addf %233, %235 : vector<1x128xf32>
    %c1_218 = arith.constant 1 : index
    %c0_219 = arith.constant 0 : index
    %237 = vector.load %arg17[%c1_218, %c0_219] : memref<2x128xf32, #tpu.memory_space<vmem>>, vector<1x128xf32>
    tpu.vector_store %arg17[%c1_218, %c0_219], %236 {strides = array<i32>} : memref<2x128xf32, #tpu.memory_space<vmem>>, vector<1x128xf32>,
    %c0_220 = arith.constant 0 : index
    %c0_221 = arith.constant 0 : index
    %238 = vector.load %arg17[%c0_220, %c0_221] : memref<2x128xf32, #tpu.memory_space<vmem>>, vector<2x128xf32>
    %239 = arith.truncf %238 : vector<2x128xf32> to vector<2x128xbf16>
    %c4_222 = arith.constant 4 : index
    %c0_223 = arith.constant 0 : index
    %c0_224 = arith.constant 0 : index
    %240 = vector.load %arg6[%c4_222, %c0_223, %c0_224] : memref<7x128x128xbf16, #tpu.memory_space<vmem>>, vector<1x128x128xbf16>
    %241 = vector.shape_cast %240 : vector<1x128x128xbf16> to vector<128x128xbf16>
    %cst_225 = arith.constant dense<0.000000e+00> : vector<2x128xf32>
    %242 = tpu.matmul %239, %241, %cst_225 {dimension_numbers = #tpu.dot_dimension_numbers<[1], [0], [0], [1], [0, 0, 1, 1], [], []>} : vector<2x128xbf16>, vector<128x128xbf16>, vector<2x128xf32> -> vector<2x128xf32>
    %243 = arith.addf %215, %242 : vector<2x128xf32>
    %c112 = arith.constant 112 : index
    %c0_226 = arith.constant 0 : index
    %244 = vector.load %arg16[%c112, %c0_226] : memref<432x128xf32, #tpu.memory_space<vmem>>, vector<1x128xf32>
    %c114 = arith.constant 114 : index
    %c0_227 = arith.constant 0 : index
    %245 = vector.load %arg16[%c114, %c0_227] : memref<432x128xf32, #tpu.memory_space<vmem>>, vector<1x128xf32>
    %c32_i32_228 = arith.constant 32 : i32
    %246 = tpu.dynamic_rotate %245 by %c32_i32_228 dim 1 : vector<1x128xf32>, i32 -> vector<1x128xf32>
    %247 = arith.addf %244, %246 : vector<1x128xf32>
    %c116 = arith.constant 116 : index
    %c0_229 = arith.constant 0 : index
    %248 = vector.load %arg16[%c116, %c0_229] : memref<432x128xf32, #tpu.memory_space<vmem>>, vector<1x128xf32>
    %c64_i32_230 = arith.constant 64 : i32
    %249 = tpu.dynamic_rotate %248 by %c64_i32_230 dim 1 : vector<1x128xf32>, i32 -> vector<1x128xf32>
    %250 = arith.addf %247, %249 : vector<1x128xf32>
    %c118 = arith.constant 118 : index
    %c0_231 = arith.constant 0 : index
    %251 = vector.load %arg16[%c118, %c0_231] : memref<432x128xf32, #tpu.memory_space<vmem>>, vector<1x128xf32>
    %c96_i32_232 = arith.constant 96 : i32
    %252 = tpu.dynamic_rotate %251 by %c96_i32_232 dim 1 : vector<1x128xf32>, i32 -> vector<1x128xf32>
    %253 = arith.addf %250, %252 : vector<1x128xf32>
    %c0_233 = arith.constant 0 : index
    %c0_234 = arith.constant 0 : index
    %254 = vector.load %arg17[%c0_233, %c0_234] : memref<2x128xf32, #tpu.memory_space<vmem>>, vector<1x128xf32>
    tpu.vector_store %arg17[%c0_233, %c0_234], %253 {strides = array<i32>} : memref<2x128xf32, #tpu.memory_space<vmem>>, vector<1x128xf32>,
    %c368 = arith.constant 368 : index
    %c0_235 = arith.constant 0 : index
    %255 = vector.load %arg16[%c368, %c0_235] : memref<432x128xf32, #tpu.memory_space<vmem>>, vector<1x128xf32>
    %c370 = arith.constant 370 : index
    %c0_236 = arith.constant 0 : index
    %256 = vector.load %arg16[%c370, %c0_236] : memref<432x128xf32, #tpu.memory_space<vmem>>, vector<1x128xf32>
    %c32_i32_237 = arith.constant 32 : i32
    %257 = tpu.dynamic_rotate %256 by %c32_i32_237 dim 1 : vector<1x128xf32>, i32 -> vector<1x128xf32>
    %258 = arith.addf %255, %257 : vector<1x128xf32>
    %c372 = arith.constant 372 : index
    %c0_238 = arith.constant 0 : index
    %259 = vector.load %arg16[%c372, %c0_238] : memref<432x128xf32, #tpu.memory_space<vmem>>, vector<1x128xf32>
    %c64_i32_239 = arith.constant 64 : i32
    %260 = tpu.dynamic_rotate %259 by %c64_i32_239 dim 1 : vector<1x128xf32>, i32 -> vector<1x128xf32>
    %261 = arith.addf %258, %260 : vector<1x128xf32>
    %c374 = arith.constant 374 : index
    %c0_240 = arith.constant 0 : index
    %262 = vector.load %arg16[%c374, %c0_240] : memref<432x128xf32, #tpu.memory_space<vmem>>, vector<1x128xf32>
    %c96_i32_241 = arith.constant 96 : i32
    %263 = tpu.dynamic_rotate %262 by %c96_i32_241 dim 1 : vector<1x128xf32>, i32 -> vector<1x128xf32>
    %264 = arith.addf %261, %263 : vector<1x128xf32>
    %c1_242 = arith.constant 1 : index
    %c0_243 = arith.constant 0 : index
    %265 = vector.load %arg17[%c1_242, %c0_243] : memref<2x128xf32, #tpu.memory_space<vmem>>, vector<1x128xf32>
    tpu.vector_store %arg17[%c1_242, %c0_243], %264 {strides = array<i32>} : memref<2x128xf32, #tpu.memory_space<vmem>>, vector<1x128xf32>,
    %c0_244 = arith.constant 0 : index
    %c0_245 = arith.constant 0 : index
    %266 = vector.load %arg17[%c0_244, %c0_245] : memref<2x128xf32, #tpu.memory_space<vmem>>, vector<2x128xf32>
    %267 = arith.truncf %266 : vector<2x128xf32> to vector<2x128xbf16>
    %c5 = arith.constant 5 : index
    %c0_246 = arith.constant 0 : index
    %c0_247 = arith.constant 0 : index
    %268 = vector.load %arg6[%c5, %c0_246, %c0_247] : memref<7x128x128xbf16, #tpu.memory_space<vmem>>, vector<1x128x128xbf16>
    %269 = vector.shape_cast %268 : vector<1x128x128xbf16> to vector<128x128xbf16>
    %cst_248 = arith.constant dense<0.000000e+00> : vector<2x128xf32>
    %270 = tpu.matmul %267, %269, %cst_248 {dimension_numbers = #tpu.dot_dimension_numbers<[1], [0], [0], [1], [0, 0, 1, 1], [], []>} : vector<2x128xbf16>, vector<128x128xbf16>, vector<2x128xf32> -> vector<2x128xf32>
    %271 = arith.addf %243, %270 : vector<2x128xf32>
    %c120 = arith.constant 120 : index
    %c0_249 = arith.constant 0 : index
    %272 = vector.load %arg16[%c120, %c0_249] : memref<432x128xf32, #tpu.memory_space<vmem>>, vector<1x128xf32>
    %c0_250 = arith.constant 0 : index
    %c0_251 = arith.constant 0 : index
    %273 = vector.load %arg17[%c0_250, %c0_251] : memref<2x128xf32, #tpu.memory_space<vmem>>, vector<1x128xf32>
    tpu.vector_store %arg17[%c0_250, %c0_251], %272 {strides = array<i32>} : memref<2x128xf32, #tpu.memory_space<vmem>>, vector<1x128xf32>,
    %c376 = arith.constant 376 : index
    %c0_252 = arith.constant 0 : index
    %274 = vector.load %arg16[%c376, %c0_252] : memref<432x128xf32, #tpu.memory_space<vmem>>, vector<1x128xf32>
    %c1_253 = arith.constant 1 : index
    %c0_254 = arith.constant 0 : index
    %275 = vector.load %arg17[%c1_253, %c0_254] : memref<2x128xf32, #tpu.memory_space<vmem>>, vector<1x128xf32>
    tpu.vector_store %arg17[%c1_253, %c0_254], %274 {strides = array<i32>} : memref<2x128xf32, #tpu.memory_space<vmem>>, vector<1x128xf32>,
    %c0_255 = arith.constant 0 : index
    %c0_256 = arith.constant 0 : index
    %276 = vector.load %arg17[%c0_255, %c0_256] : memref<2x128xf32, #tpu.memory_space<vmem>>, vector<2x128xf32>
    %277 = arith.truncf %276 : vector<2x128xf32> to vector<2x128xbf16>
    %c6_257 = arith.constant 6 : index
    %c0_258 = arith.constant 0 : index
    %c0_259 = arith.constant 0 : index
    %278 = vector.load %arg6[%c6_257, %c0_258, %c0_259] : memref<7x128x128xbf16, #tpu.memory_space<vmem>>, vector<1x128x128xbf16>
    %279 = vector.shape_cast %278 : vector<1x128x128xbf16> to vector<128x128xbf16>
    %cst_260 = arith.constant dense<0.000000e+00> : vector<2x128xf32>
    %280 = tpu.matmul %277, %279, %cst_260 {dimension_numbers = #tpu.dot_dimension_numbers<[1], [0], [0], [1], [0, 0, 1, 1], [], []>} : vector<2x128xbf16>, vector<128x128xbf16>, vector<2x128xf32> -> vector<2x128xf32>
    %281 = arith.addf %271, %280 : vector<2x128xf32>
    %c0_261 = arith.constant 0 : index
    %c0_262 = arith.constant 0 : index
    %282 = vector.load %arg7[%c0_261, %c0_262] : memref<1x128xf32, #tpu.memory_space<vmem>>, vector<1x128xf32>
    %283 = vector.broadcast %282 : vector<1x128xf32> to vector<2x128xf32>
    %284 = arith.addf %281, %283 : vector<2x128xf32>
    %cst_263 = arith.constant 0.000000e+00 : f32
    %285 = vector.broadcast %cst_263 : f32 to vector<2x128xf32>
    %286 = arith.maximumf %284, %285 : vector<2x128xf32>
    %287 = arith.truncf %286 : vector<2x128xf32> to vector<2x128xbf16>
    %c0_264 = arith.constant 0 : index
    %c0_265 = arith.constant 0 : index
    %288 = vector.load %arg8[%c0_264, %c0_265] : memref<128x128xbf16, #tpu.memory_space<vmem>>, vector<128x128xbf16>
    %cst_266 = arith.constant dense<0.000000e+00> : vector<2x128xf32>
    %289 = tpu.matmul %287, %288, %cst_266 {dimension_numbers = #tpu.dot_dimension_numbers<[1], [0], [0], [1], [0, 0, 1, 1], [], []>} : vector<2x128xbf16>, vector<128x128xbf16>, vector<2x128xf32> -> vector<2x128xf32>
    %c0_267 = arith.constant 0 : index
    %c0_268 = arith.constant 0 : index
    %290 = vector.load %arg9[%c0_267, %c0_268] : memref<1x128xf32, #tpu.memory_space<vmem>>, vector<1x128xf32>
    %291 = vector.broadcast %290 : vector<1x128xf32> to vector<2x128xf32>
    %292 = arith.addf %289, %291 : vector<2x128xf32>
    %cst_269 = arith.constant 0.000000e+00 : f32
    %293 = vector.broadcast %cst_269 : f32 to vector<2x128xf32>
    %294 = arith.maximumf %292, %293 : vector<2x128xf32>
    %295 = arith.truncf %294 : vector<2x128xf32> to vector<2x128xbf16>
    %c0_270 = arith.constant 0 : index
    %c0_271 = arith.constant 0 : index
    %296 = vector.load %arg10[%c0_270, %c0_271] : memref<128x128xbf16, #tpu.memory_space<vmem>>, vector<128x128xbf16>
    %cst_272 = arith.constant dense<0.000000e+00> : vector<2x128xf32>
    %297 = tpu.matmul %295, %296, %cst_272 {dimension_numbers = #tpu.dot_dimension_numbers<[1], [0], [0], [1], [0, 0, 1, 1], [], []>} : vector<2x128xbf16>, vector<128x128xbf16>, vector<2x128xf32> -> vector<2x128xf32>
    %c0_273 = arith.constant 0 : index
    %c0_274 = arith.constant 0 : index
    %298 = vector.load %arg11[%c0_273, %c0_274] : memref<1x128xf32, #tpu.memory_space<vmem>>, vector<1x128xf32>
    %299 = vector.broadcast %298 : vector<1x128xf32> to vector<2x128xf32>
    %300 = arith.addf %297, %299 : vector<2x128xf32>
    %301 = tpu.iota {dimensions = array<i32: 1>} : vector<2x128xi32>
    %c10_i32 = arith.constant 10 : i32
    %302 = vector.broadcast %c10_i32 : i32 to vector<2x128xi32>
    %303 = arith.cmpi slt, %301, %302 : vector<2x128xi32>
    %cst_275 = arith.constant -1.000000e+30 : f32
    %304 = vector.broadcast %cst_275 : f32 to vector<2x128xf32>
    %305 = arith.select %303, %300, %304 : vector<2x128xi1>, vector<2x128xf32>
    %cst_276 = arith.constant dense<0xFF800000> : vector<2xf32>
    %306 = vector.multi_reduction <maximumf>, %305, %cst_276 [1] : vector<2x128xf32> to vector<2xf32>
    %307 = vector.shape_cast %306 : vector<2xf32> to vector<2x1xf32>
    %308 = vector.broadcast %307 : vector<2x1xf32> to vector<2x128xf32>
    %309 = arith.subf %305, %308 : vector<2x128xf32>
    %310 = math.exp %309 : vector<2x128xf32>
    %cst_277 = arith.constant dense<0.000000e+00> : vector<2xf32>
    %311 = vector.multi_reduction <add>, %310, %cst_277 [1] : vector<2x128xf32> to vector<2xf32>
    %312 = vector.shape_cast %311 : vector<2xf32> to vector<2x1xf32>
    %313 = math.log %312 : vector<2x1xf32>
    %314 = vector.broadcast %307 : vector<2x1xf32> to vector<2x128xf32>
    %315 = arith.subf %305, %314 : vector<2x128xf32>
    %316 = vector.broadcast %313 : vector<2x1xf32> to vector<2x128xf32>
    %317 = arith.subf %315, %316 : vector<2x128xf32>
    %c0_278 = arith.constant 0 : index
    %c0_279 = arith.constant 0 : index
    %c0_280 = arith.constant 0 : index
    %318 = vector.load %arg12[%c0_278, %c0_279, %c0_280] : memref<1x2x128xf32, #tpu.memory_space<vmem>>, vector<1x2x128xf32>
    %319 = vector.shape_cast %318 : vector<1x2x128xf32> to vector<2x128xf32>
    %320 = vector.shape_cast %317 : vector<2x128xf32> to vector<1x2x128xf32>
    tpu.vector_store %arg12[%c0_278, %c0_279, %c0_280], %320 {strides = array<i32>} : memref<1x2x128xf32, #tpu.memory_space<vmem>>, vector<1x2x128xf32>,
    return
  }
  func.func @transform_0(%arg0: i32) -> (i32, i32, i32, i32) {
    %c0_i32 = arith.constant 0 : i32
    %c0_i32_0 = arith.constant 0 : i32
    %c0_i32_1 = arith.constant 0 : i32
    %c0_i32_2 = arith.constant 0 : i32
    return %arg0, %c0_i32, %c0_i32_0, %c0_i32_1 : i32, i32, i32, i32
  }
  func.func @transform_1(%arg0: i32) -> (i32, i32) {
    %c0_i32 = arith.constant 0 : i32
    %c0_i32_0 = arith.constant 0 : i32
    %c0_i32_1 = arith.constant 0 : i32
    return %c0_i32, %c0_i32_0 : i32, i32
  }
  func.func @transform_2(%arg0: i32) -> (i32, i32) {
    %c0_i32 = arith.constant 0 : i32
    %c0_i32_0 = arith.constant 0 : i32
    %c0_i32_1 = arith.constant 0 : i32
    return %c0_i32, %c0_i32_0 : i32, i32
  }
  func.func @transform_3(%arg0: i32) -> (i32, i32, i32) {
    %c0_i32 = arith.constant 0 : i32
    %c0_i32_0 = arith.constant 0 : i32
    %c0_i32_1 = arith.constant 0 : i32
    %c0_i32_2 = arith.constant 0 : i32
    return %c0_i32, %c0_i32_0, %c0_i32_1 : i32, i32, i32
  }
  func.func @transform_4(%arg0: i32) -> (i32, i32) {
    %c0_i32 = arith.constant 0 : i32
    %c0_i32_0 = arith.constant 0 : i32
    %c0_i32_1 = arith.constant 0 : i32
    return %c0_i32, %c0_i32_0 : i32, i32
  }
  func.func @transform_5(%arg0: i32) -> (i32, i32, i32) {
    %c0_i32 = arith.constant 0 : i32
    %c0_i32_0 = arith.constant 0 : i32
    %c0_i32_1 = arith.constant 0 : i32
    %c0_i32_2 = arith.constant 0 : i32
    return %c0_i32, %c0_i32_0, %c0_i32_1 : i32, i32, i32
  }
  func.func @transform_6(%arg0: i32) -> (i32, i32) {
    %c0_i32 = arith.constant 0 : i32
    %c0_i32_0 = arith.constant 0 : i32
    %c0_i32_1 = arith.constant 0 : i32
    return %c0_i32, %c0_i32_0 : i32, i32
  }
  func.func @transform_7(%arg0: i32) -> (i32, i32) {
    %c0_i32 = arith.constant 0 : i32
    %c0_i32_0 = arith.constant 0 : i32
    %c0_i32_1 = arith.constant 0 : i32
    return %c0_i32, %c0_i32_0 : i32, i32
  }
  func.func @transform_8(%arg0: i32) -> (i32, i32) {
    %c0_i32 = arith.constant 0 : i32
    %c0_i32_0 = arith.constant 0 : i32
    %c0_i32_1 = arith.constant 0 : i32
    return %c0_i32, %c0_i32_0 : i32, i32
  }
  func.func @transform_9(%arg0: i32) -> (i32, i32) {
    %c0_i32 = arith.constant 0 : i32
    %c0_i32_0 = arith.constant 0 : i32
    %c0_i32_1 = arith.constant 0 : i32
    return %c0_i32, %c0_i32_0 : i32, i32
  }
  func.func @transform_10(%arg0: i32) -> (i32, i32) {
    %c0_i32 = arith.constant 0 : i32
    %c0_i32_0 = arith.constant 0 : i32
    %c0_i32_1 = arith.constant 0 : i32
    return %c0_i32, %c0_i32_0 : i32, i32
  }
  func.func @transform_11(%arg0: i32) -> (i32, i32, i32) {
    %c0_i32 = arith.constant 0 : i32
    %c0_i32_0 = arith.constant 0 : i32
    %c0_i32_1 = arith.constant 0 : i32
    return %arg0, %c0_i32, %c0_i32_0 : i32, i32, i32
  }
}

</mosaic_0001>

<bundles_post_ra>
// kernel: lenet5_forward.1
= control target key start
LH: loop header
LB: loop body
LE: loop exit
PB: predicated region body
PF: predicated region fallthrough
CT: control target
= control target key end

     0   :  { %vm255_vm0 = vcmask 1043456   ;;  %vm256_vm1 = vcmask 1044480   ;;  %vm158_vm2 = vcmask 203776   ;;  %v12567_v4 = vmov 65535   ;;  %s15133_s0 = inlined_call_operand.vmem [shape: f32[1,4,512,25], index: 0, kind: input, shape index: {}]   ;;  %s15134_s1 = inlined_call_operand.vmem [shape: bf16[25,128], index: 1, kind: input, shape index: {}]   ;;  %s15135_s2 = inlined_call_operand.vmem [shape: f32[1,128], index: 2, kind: input, shape index: {}]   ;;  %s15136_s3 = inlined_call_operand.vmem [shape: bf16[5,128,128], index: 3, kind: input, shape index: {}]   ;;  %s15137_s4 = inlined_call_operand.vmem [shape: f32[1,128], index: 4, kind: input, shape index: {}]   ;;  %s15138_s5 = inlined_call_operand.vmem [shape: bf16[7,128,128], index: 5, kind: input, shape index: {}]   ;;  %s15139_s6 = inlined_call_operand.vmem [shape: f32[1,128], index: 6, kind: input, shape index: {}]   ;;  %s15140_s7 = inlined_call_operand.vmem [shape: bf16[128,128], index: 7, kind: input, shape index: {}]   ;;  %s15141_s8 = inlined_call_operand.vmem [shape: f32[1,128], index: 8, kind: input, shape index: {}]   ;;  %s15142_s9 = inlined_call_operand.vmem [shape: bf16[128,128], index: 9, kind: input, shape index: {}]   ;;  %s15143_s10 = inlined_call_operand.vmem [shape: f32[1,128], index: 10, kind: input, shape index: {}]   ;;  %s15144_s11 = inlined_call_operand.hbm [shape: f32[1,2,128], index: 11, kind: output, shape index: {}]  }
   0x1   :  { %v12641_v0 = vld [vmem:[%s15134_s1] sm:$0xff]   ;;  %v12279_v1 = vld [vmem:[%s15134_s1 + $0x8] sm:$0x1f]   ;;  %v257_v5 = vsel %vm255_vm0, 4294967295, %v12567_v4  ;;  %v47_v8 = vld [vmem:[%s15133_s0 + $0x10] sm:$0xff] }
   0x2   :  { %11059 = vmatprep.subr.bf16.mxu1 %v12641_v0  ;;  %v45_v2 = vld [vmem:[%s15133_s0] sm:$0xff]  ;;  %v46_v3 = vld [vmem:[%s15133_s0 + $0x8] sm:$0xff]  ;;  %11195 = vmatprep.subr.bf16.mxu0 %v12641_v0  ;;  %v258_v7 = vsel %vm256_vm1, %v257_v5, 0  ;;  %v48_v9 = vld [vmem:[%s15133_s0 + $0x18] sm:$0xff] }
   0x3   :  { %11060 = vmatpush3.bf16.msra.mxu1 %v12641_v0  ;;  %v109_v6 = vpack.c.bf16 %v46_v3, %v45_v2  ;;  %11196 = vmatpush3.bf16.msra.mxu0 %v12641_v0  ;;  %v12663_v10 = vand.u32 %v12279_v1, %v258_v7  ;;  %v49_v11 = vld [vmem:[%s15133_s0 + $0x20] sm:$0xff]  ;;  %v50_v12 = vld [vmem:[%s15133_s0 + $0x28] sm:$0xff]  ;;  %v110_v13 = vpack.c.bf16 %v48_v9, %v47_v8  ;;  %v51_v15 = vld [vmem:[%s15133_s0 + $0x30] sm:$0xff] }
   0x4   :  { %v111_v14 = vpack.c.bf16 %v50_v12, %v49_v11  ;;  %v52_v16 = vld [vmem:[%s15133_s0 + $0x38] sm:$0xff]  ;;  %v53_v17 = vld [vmem:[%s15133_s0 + $0x40] sm:$0xff]  ;;  %v54_v18 = vld [vmem:[%s15133_s0 + $0x48] sm:$0xff] }
   0x5   :  { %11063 = vmatprep.mubr.msk.bf16.mxu1 %vm158_vm2, %v109_v6  ;;  %11061 = vmatprep.subr.bf16.mxu1 %v12663_v10  ;;  %v112_v19 = vpack.c.bf16 %v52_v16, %v51_v15  ;;  %v113_v20 = vpack.c.bf16 %v54_v18, %v53_v17  ;;  %v55_v21 = vld [vmem:[%s15133_s0 + $0x50] sm:$0xff]  ;;  %v56_v22 = vld [vmem:[%s15133_s0 + $0x58] sm:$0xff]  ;;  %v57_v23 = vld [vmem:[%s15133_s0 + $0x60] sm:$0xff] }
   0x6   :  { %11197 = vmatprep.subr.bf16.mxu0 %v12663_v10  ;;  %v58_v24 = vld [vmem:[%s15133_s0 + $0x68] sm:$0xff]  ;;  %v114_v25 = vpack.c.bf16 %v56_v22, %v55_v21  ;;  %v9740_v27 = vld [vmem:[%s15133_s0 + $0x400] sm:$0xff]  ;;  %v9742_v29 = vld [vmem:[%s15133_s0 + $0x410] sm:$0xff] }
   0x7   :  { %11062 = vmatpush3.bf16.msra.mxu1 %v12663_v10  ;;  %11198 = vmatpush3.bf16.msra.mxu0 %v12663_v10  ;;  %v115_v26 = vpack.c.bf16 %v58_v24, %v57_v23  ;;  %v9741_v28 = vld [vmem:[%s15133_s0 + $0x408] sm:$0xff]  ;;  %v9743_v31 = vld [vmem:[%s15133_s0 + $0x418] sm:$0xff]  ;;  %v59_v32 = vld [vmem:[%s15133_s0 + $0x70] sm:$0xff] }
   0x8   :  { %11127 = vmatprep.subr.bf16.mxu1 %v12641_v0  ;;  %v1482_v30 = vpack.c.bf16 %v9741_v28, %v9740_v27  ;;  %v60_v33 = vld [vmem:[%s15133_s0 + $0x78] sm:$0xff]  ;;  %v1483_v34 = vpack.c.bf16 %v9743_v31, %v9742_v29  ;;  %v9744_v35 = vld [vmem:[%s15133_s0 + $0x420] sm:$0xff]  ;;  %v62_v37 = vld [vmem:[%s15133_s0 + $0x88] sm:$0xff] }
   0x9   :  { %v61_v36 = vld [vmem:[%s15133_s0 + $0x80] sm:$0xff]  ;;  %v9745_v38 = vld [vmem:[%s15133_s0 + $0x428] sm:$0xff]  ;;  %v116_v40 = vpack.c.bf16 %v60_v33, %v59_v32  ;;  %v9746_v41 = vld [vmem:[%s15133_s0 + $0x430] sm:$0xff] }
   0xa   :  { %11064 = vmatmul.mubr.msk.bf16.vlgmr.msra.gmra.mrb[0].mxu1 %vm158_vm2, %v110_v13  ;;  %11199 = vmatprep.mubr.msk.bf16.mxu0 %vm158_vm2, %v1482_v30  ;;  %v1484_v39 = vpack.c.bf16 %v9745_v38, %v9744_v35  ;;  %v9747_v42 = vld [vmem:[%s15133_s0 + $0x438] sm:$0xff]  ;;  %v117_v43 = vpack.c.bf16 %v62_v37, %v61_v36  ;;  %v9748_v44 = vld [vmem:[%s15133_s0 + $0x440] sm:$0xff]  ;;  %v9749_v45 = vld [vmem:[%s15133_s0 + $0x448] sm:$0xff] }
   0xb   :  { %11128 = vmatpush3.bf16.msra.mxu1 %v12641_v0  ;;  %11067 = vmatprep.mubr.msk.bf16.mxu1 %vm158_vm2, %v111_v14  ;;  %v1485_v46 = vpack.c.bf16 %v9747_v42, %v9746_v41  ;;  %v63_v47 = vld [vmem:[%s15133_s0 + $0x90] sm:$0xff]  ;;  %v64_v48 = vld [vmem:[%s15133_s0 + $0x98] sm:$0xff]  ;;  %v1486_v49 = vpack.c.bf16 %v9749_v45, %v9748_v44  ;;  %v65_v50 = vld [vmem:[%s15133_s0 + $0xa0] sm:$0xff] }
   0xc   :  { %11129 = vmatprep.subr.bf16.mxu1 %v12663_v10  ;;  %11200 = vmatmul.mubr.msk.bf16.vlgmr.msra.gmra.mrb[0].mxu0 %vm158_vm2, %v1483_v34  ;;  %v66_v51 = vld [vmem:[%s15133_s0 + $0xa8] sm:$0xff]  ;;  %v9750_v52 = vld [vmem:[%s15133_s0 + $0x450] sm:$0xff]  ;;  %v9751_v53 = vld [vmem:[%s15133_s0 + $0x458] sm:$0xff]  ;;  %v118_v56 = vpack.c.bf16 %v64_v48, %v63_v47 }
   0xd   :  { %11203 = vmatprep.mubr.msk.bf16.mxu0 %vm158_vm2, %v1484_v39  ;;  %v9752_v54 = vld [vmem:[%s15133_s0 + $0x460] sm:$0xff]  ;;  %v9753_v55 = vld [vmem:[%s15133_s0 + $0x468] sm:$0xff]  ;;  %v119_v57 = vpack.c.bf16 %v66_v51, %v65_v50  ;;  %v1487_v58 = vpack.c.bf16 %v9751_v53, %v9750_v52  ;;  %v67_v59 = vld [vmem:[%s15133_s0 + $0xb0] sm:$0xff] }
   0xe   :  { %v68_v60 = vld [vmem:[%s15133_s0 + $0xb8] sm:$0xff]  ;;  %v1488_v61 = vpack.c.bf16 %v9753_v55, %v9752_v54  ;;  %v69_v62 = vld [vmem:[%s15133_s0 + $0xc0] sm:$0xff]  ;;  %v70_v63 = vld [vmem:[%s15133_s0 + $0xc8] sm:$0xff] }
   0xf   :  { %11130 = vmatpush3.bf16.msra.mxu1 %v12663_v10  ;;  %v9754_v1 = vld [vmem:[%s15133_s0 + $0x470] sm:$0xff]  ;;  %v9755_v2 = vld [vmem:[%s15133_s0 + $0x478] sm:$0xff]  ;;  %v9756_v3 = vld [vmem:[%s15133_s0 + $0x480] sm:$0xff]  ;;  %v120_v5 = vpack.c.bf16 %v68_v60, %v67_v59  ;;  %v121_v6 = vpack.c.bf16 %v70_v63, %v69_v62 }
  0x10   :  { %11871 = vmatprep.subr.bf16.mxu1 %v12641_v0  ;;  %v9757_v4 = vld [vmem:[%s15133_s0 + $0x488] sm:$0xff]  ;;  %v1489_v7 = vpack.c.bf16 %v9755_v2, %v9754_v1  ;;  %v71_v8 = vld [vmem:[%s15133_s0 + $0xd0] sm:$0xff]  ;;  %v72_v9 = vld [vmem:[%s15133_s0 + $0xd8] sm:$0xff] }
  0x11   :  { %v1490_v11 = vpack.c.bf16 %v9757_v4, %v9756_v3  ;;  %v73_v12 = vld [vmem:[%s15133_s0 + $0xe0] sm:$0xff]  ;;  %v74_v13 = vld [vmem:[%s15133_s0 + $0xe8] sm:$0xff]  ;;  %v9758_v14 = vld [vmem:[%s15133_s0 + $0x490] sm:$0xff]  ;;  %v122_v18 = vpack.c.bf16 %v72_v9, %v71_v8 }
  0x12   :  { %11068 = vmatmul.mubr.msk.bf16.gmra.mrb[4].mxu1 %vm158_vm2, %v112_v19  ;;  %v9759_v15 = vld [vmem:[%s15133_s0 + $0x498] sm:$0xff]  ;;  %v9760_v16 = vld [vmem:[%s15133_s0 + $0x4a0] sm:$0xff]  ;;  %v9761_v17 = vld [vmem:[%s15133_s0 + $0x4a8] sm:$0xff]  ;;  %v123_v19 = vpack.c.bf16 %v74_v13, %v73_v12 }
  0x13   :  { %11071 = vmatprep.mubr.msk.bf16.mxu1 %vm158_vm2, %v113_v20  ;;  %v1491_v20 = vpack.c.bf16 %v9759_v15, %v9758_v14  ;;  %v75_v21 = vld [vmem:[%s15133_s0 + $0xf0] sm:$0xff]  ;;  %v76_v22 = vld [vmem:[%s15133_s0 + $0xf8] sm:$0xff]  ;;  %v1492_v23 = vpack.c.bf16 %v9761_v17, %v9760_v16  ;;  %v77_v24 = vld [vmem:[%s15133_s0 + $0x100] sm:$0xff] }
  0x14   :  { %11204 = vmatmul.mubr.msk.bf16.gmra.mrb[4].mxu0 %vm158_vm2, %v1485_v46  ;;  %v9763_v27 = vld [vmem:[%s15133_s0 + $0x4b8] sm:$0xff]  ;;  %v9764_v28 = vld [vmem:[%s15133_s0 + $0x4c0] sm:$0xff]  ;;  %v9765_v29 = vld [vmem:[%s15133_s0 + $0x4c8] sm:$0xff]  ;;  %v124_v30 = vpack.c.bf16 %v76_v22, %v75_v21 }
  0x15   :  { %11207 = vmatprep.mubr.msk.bf16.mxu0 %vm158_vm2, %v1486_v49  ;;  %v79_v33 = vld [vmem:[%s15133_s0 + $0x110] sm:$0xff]  ;;  %v80_v34 = vld [vmem:[%s15133_s0 + $0x118] sm:$0xff]  ;;  %v1494_v35 = vpack.c.bf16 %v9765_v29, %v9764_v28  ;;  %v81_v36 = vld [vmem:[%s15133_s0 + $0x120] sm:$0xff] }
  0x16   :  { %v82_v37 = vld [vmem:[%s15133_s0 + $0x128] sm:$0xff]  ;;  %v9766_v38 = vld [vmem:[%s15133_s0 + $0x4d0] sm:$0xff]  ;;  %v9767_v39 = vld [vmem:[%s15133_s0 + $0x4d8] sm:$0xff]  ;;  %v126_v42 = vpack.c.bf16 %v80_v34, %v79_v33 }
  0x17   :  { %v9769_v41 = vld [vmem:[%s15133_s0 + $0x4e8] sm:$0xff]  ;;  %v1495_v44 = vpack.c.bf16 %v9767_v39, %v9766_v38  ;;  %v83_v45 = vld [vmem:[%s15133_s0 + $0x130] sm:$0xff]  ;;  %v84_v46 = vld [vmem:[%s15133_s0 + $0x138] sm:$0xff] }
  0x18   :  { %v85_v48 = vld [vmem:[%s15133_s0 + $0x140] sm:$0xff]  ;;  %v86_v49 = vld [vmem:[%s15133_s0 + $0x148] sm:$0xff]  ;;  %v9770_v50 = vld [vmem:[%s15133_s0 + $0x4f0] sm:$0xff]  ;;  %v128_v54 = vpack.c.bf16 %v84_v46, %v83_v45 }
  0x19   :  { %v9771_v51 = vld [vmem:[%s15133_s0 + $0x4f8] sm:$0xff]  ;;  %v9772_v52 = vld [vmem:[%s15133_s0 + $0x500] sm:$0xff]  ;;  %v9773_v53 = vld [vmem:[%s15133_s0 + $0x508] sm:$0xff]  ;;  %v129_v55 = vpack.c.bf16 %v86_v49, %v85_v48 }
  0x1a   :  { %11072 = vmatmul.mubr.msk.bf16.gmra.mrb[8].mxu1 %vm158_vm2, %v114_v25  ;;  %v78_v25 = vld [vmem:[%s15133_s0 + $0x108] sm:$0xff]  ;;  %v1498_v59 = vpack.c.bf16 %v9773_v53, %v9772_v52  ;;  %v89_v60 = vld [vmem:[%s15133_s0 + $0x160] sm:$0xff]  ;;  %v9774_v62 = vld [vmem:[%s15133_s0 + $0x510] sm:$0xff] }
  0x1b   :  { %11075 = vmatprep.mubr.msk.bf16.mxu1 %vm158_vm2, %v115_v26  ;;  %v9762_v26 = vld [vmem:[%s15133_s0 + $0x4b0] sm:$0xff]  ;;  %v125_v31 = vpack.c.bf16 %v78_v25, %v77_v24  ;;  %v9775_v63 = vld [vmem:[%s15133_s0 + $0x518] sm:$0xff]  ;;  %v9776_v1 = vld [vmem:[%s15133_s0 + $0x520] sm:$0xff] }
  0x1c   :  { %11208 = vmatmul.mubr.msk.bf16.gmra.mrb[8].mxu0 %vm158_vm2, %v1487_v58  ;;  %v1493_v32 = vpack.c.bf16 %v9763_v27, %v9762_v26  ;;  %v88_v58 = vld [vmem:[%s15133_s0 + $0x158] sm:$0xff]  ;;  %v9777_v2 = vld [vmem:[%s15133_s0 + $0x528] sm:$0xff]  ;;  %v93_v8 = vld [vmem:[%s15133_s0 + $0x180] sm:$0xff] }
  0x1d   :  { %11211 = vmatprep.mubr.msk.bf16.mxu0 %vm158_vm2, %v1488_v61  ;;  %v90_v61 = vld [vmem:[%s15133_s0 + $0x168] sm:$0xff]  ;;  %v9778_v13 = vld [vmem:[%s15133_s0 + $0x530] sm:$0xff]  ;;  %v9779_v14 = vld [vmem:[%s15133_s0 + $0x538] sm:$0xff] }
  0x1e   :  { %v131_v4 = vpack.c.bf16 %v90_v61, %v89_v60  ;;  %v94_v9 = vld [vmem:[%s15133_s0 + $0x188] sm:$0xff]  ;;  %v9780_v16 = vld [vmem:[%s15133_s0 + $0x540] sm:$0xff]  ;;  %v9782_v25 = vld [vmem:[%s15133_s0 + $0x550] sm:$0xff] }
  0x1f   :  { %v133_v15 = vpack.c.bf16 %v94_v9, %v93_v8  ;;  %v9781_v17 = vld [vmem:[%s15133_s0 + $0x548] sm:$0xff]  ;;  %v97_v21 = vld [vmem:[%s15133_s0 + $0x1a0] sm:$0xff]  ;;  %v9783_v26 = vld [vmem:[%s15133_s0 + $0x558] sm:$0xff] }
  0x20   :  { %v98_v22 = vld [vmem:[%s15133_s0 + $0x1a8] sm:$0xff]  ;;  %v9784_v28 = vld [vmem:[%s15133_s0 + $0x560] sm:$0xff]  ;;  %v9787_v38 = vld [vmem:[%s15133_s0 + $0x578] sm:$0xff] }
  0x21   :  { %v135_v27 = vpack.c.bf16 %v98_v22, %v97_v21  ;;  %v9785_v29 = vld [vmem:[%s15133_s0 + $0x568] sm:$0xff]  ;;  %v101_v33 = vld [vmem:[%s15133_s0 + $0x1c0] sm:$0xff]  ;;  %v9790_v49 = vld [vmem:[%s15133_s0 + $0x590] sm:$0xff] }
  0x22   :  { %11076 = vmatmul.mubr.msk.bf16.gmra.mrb[12].mxu1 %vm158_vm2, %v116_v40  ;;  %v9768_v40 = vld [vmem:[%s15133_s0 + $0x4e0] sm:$0xff]  ;;  %v102_v34 = vld [vmem:[%s15133_s0 + $0x1c8] sm:$0xff]  ;;  %v9794_v61 = vld [vmem:[%s15133_s0 + $0x5b0] sm:$0xff] }
  0x23   :  { %11079 = vmatprep.mubr.msk.bf16.mxu1 %vm158_vm2, %v117_v43  ;;  %v127_v43 = vpack.c.bf16 %v82_v37, %v81_v36  ;;  %v1496_v47 = vpack.c.bf16 %v9769_v41, %v9768_v40  ;;  %v9786_v37 = vld [vmem:[%s15133_s0 + $0x570] sm:$0xff]  ;;  %v137_v39 = vpack.c.bf16 %v102_v34, %v101_v33  ;;  %v9788_v40 = vld [vmem:[%s15133_s0 + $0x580] sm:$0xff]  ;;  %v9789_v41 = vld [vmem:[%s15133_s0 + $0x588] sm:$0xff] }
  0x24   :  { %11212 = vmatmul.mubr.msk.bf16.gmra.mrb[12].mxu0 %vm158_vm2, %v1489_v7  ;;  %v1499_v7 = vpack.c.bf16 %v9775_v63, %v9774_v62  ;;  %v105_v45 = vld [vmem:[%s15133_s0 + $0x1e0] sm:$0xff]  ;;  %v106_v46 = vld [vmem:[%s15133_s0 + $0x1e8] sm:$0xff]  ;;  %v9795_v62 = vld [vmem:[%s15133_s0 + $0x5b8] sm:$0xff] }
  0x25   :  { %11215 = vmatprep.mubr.msk.bf16.mxu0 %vm158_vm2, %v1490_v11  ;;  %v1500_v11 = vpack.c.bf16 %v9777_v2, %v9776_v1  ;;  %v9792_v52 = vld [vmem:[%s15133_s0 + $0x5a0] sm:$0xff]  ;;  %v9793_v53 = vld [vmem:[%s15133_s0 + $0x5a8] sm:$0xff]  ;;  %v9646_v1 = vld [vmem:[%s15133_s0 + $0x210] sm:$0xff] }
  0x26   :  { %v9647_v2 = vld [vmem:[%s15133_s0 + $0x218] sm:$0xff] }
  0x2a   :  { %11080 = vmatmul.mubr.msk.bf16.gmra.mrb[16].mxu1 %vm158_vm2, %v118_v56  ;;  %v1497_v56 = vpack.c.bf16 %v9771_v51, %v9770_v50  ;;  %v9791_v50 = vld [vmem:[%s15133_s0 + $0x598] sm:$0xff]  ;;  %v139_v51 = vpack.c.bf16 %v106_v46, %v105_v45 }
  0x2b   :  { %11083 = vmatprep.mubr.msk.bf16.mxu1 %vm158_vm2, %v119_v57  ;;  %v87_v57 = vld [vmem:[%s15133_s0 + $0x150] sm:$0xff] }
  0x2c   :  { %11216 = vmatmul.mubr.msk.bf16.gmra.mrb[16].mxu0 %vm158_vm2, %v1491_v20  ;;  %v130_v3 = vpack.c.bf16 %v88_v58, %v87_v57  ;;  %v1501_v20 = vpack.c.bf16 %v9779_v14, %v9778_v13  ;;  %v9644_v57 = vld [vmem:[%s15133_s0 + $0x200] sm:$0xff]  ;;  %v9645_v58 = vld [vmem:[%s15133_s0 + $0x208] sm:$0xff] }
  0x2d   :  { %11219 = vmatprep.mubr.msk.bf16.mxu0 %vm158_vm2, %v1492_v23  ;;  %v1502_v23 = vpack.c.bf16 %v9781_v17, %v9780_v16  ;;  %v744_v63 = vpack.c.bf16 %v9645_v58, %v9644_v57 }
  0x32   :  { %11084 = vmatmul.mubr.msk.bf16.gmra.mrb[20].mxu1 %vm158_vm2, %v120_v5  ;;  %v91_v5 = vld [vmem:[%s15133_s0 + $0x170] sm:$0xff] }
  0x33   :  { %11087 = vmatprep.mubr.msk.bf16.mxu1 %vm158_vm2, %v121_v6  ;;  %v92_v6 = vld [vmem:[%s15133_s0 + $0x178] sm:$0xff] }
  0x34   :  { %11220 = vmatmul.mubr.msk.bf16.gmra.mrb[20].mxu0 %vm158_vm2, %v1493_v32  ;;  %v132_v12 = vpack.c.bf16 %v92_v6, %v91_v5  ;;  %v1503_v32 = vpack.c.bf16 %v9783_v26, %v9782_v25  ;;  %v9649_v5 = vld [vmem:[%s15133_s0 + $0x228] sm:$0xff]  ;;  %v745_v6 = vpack.c.bf16 %v9647_v2, %v9646_v1 }
  0x35   :  { %11223 = vmatprep.mubr.msk.bf16.mxu0 %vm158_vm2, %v1494_v35  ;;  %v1504_v35 = vpack.c.bf16 %v9785_v29, %v9784_v28 }
  0x3a   :  { %11088 = vmatmul.mubr.msk.bf16.gmra.mrb[24].mxu1 %vm158_vm2, %v122_v18  ;;  %v95_v18 = vld [vmem:[%s15133_s0 + $0x190] sm:$0xff] }
  0x3b   :  { %11091 = vmatprep.mubr.msk.bf16.mxu1 %vm158_vm2, %v123_v19  ;;  %v96_v19 = vld [vmem:[%s15133_s0 + $0x198] sm:$0xff] }
  0x3c   :  { %11224 = vmatmul.mubr.msk.bf16.gmra.mrb[24].mxu0 %vm158_vm2, %v1495_v44  ;;  %v134_v24 = vpack.c.bf16 %v96_v19, %v95_v18  ;;  %v1505_v44 = vpack.c.bf16 %v9787_v38, %v9786_v37 }
  0x3d   :  { %11227 = vmatprep.mubr.msk.bf16.mxu0 %vm158_vm2, %v1496_v47  ;;  %v1506_v47 = vpack.c.bf16 %v9789_v41, %v9788_v40 }
  0x42   :  { %11092 = vmatmul.mubr.msk.bf16.gmra.mrb[28].mxu1 %vm158_vm2, %v124_v30  ;;  %v99_v30 = vld [vmem:[%s15133_s0 + $0x1b0] sm:$0xff] }
  0x43   :  { %11095 = vmatprep.mubr.msk.bf16.mxu1 %vm158_vm2, %v125_v31  ;;  %v100_v31 = vld [vmem:[%s15133_s0 + $0x1b8] sm:$0xff] }
  0x44   :  { %11228 = vmatmul.mubr.msk.bf16.gmra.mrb[28].mxu0 %vm158_vm2, %v1497_v56  ;;  %v136_v36 = vpack.c.bf16 %v100_v31, %v99_v30  ;;  %v1507_v56 = vpack.c.bf16 %v9791_v50, %v9790_v49 }
  0x45   :  { %11231 = vmatprep.mubr.msk.bf16.mxu0 %vm158_vm2, %v1498_v59  ;;  %v1508_v59 = vpack.c.bf16 %v9793_v53, %v9792_v52 }
  0x4a   :  { %11096 = vmatmul.mubr.msk.bf16.gmra.mrb[32].mxu1 %vm158_vm2, %v126_v42  ;;  %v103_v42 = vld [vmem:[%s15133_s0 + $0x1d0] sm:$0xff] }
  0x4b   :  { %11099 = vmatprep.mubr.msk.bf16.mxu1 %vm158_vm2, %v127_v43  ;;  %v104_v43 = vld [vmem:[%s15133_s0 + $0x1d8] sm:$0xff] }
  0x4c   :  { %11232 = vmatmul.mubr.msk.bf16.gmra.mrb[32].mxu0 %vm158_vm2, %v1499_v7  ;;  %v138_v48 = vpack.c.bf16 %v104_v43, %v103_v42 }
  0x4d   :  { %11235 = vmatprep.mubr.msk.bf16.mxu0 %vm158_vm2, %v1500_v11 }
  0x52   :  { %11100 = vmatmul.mubr.msk.bf16.gmra.mrb[36].mxu1 %vm158_vm2, %v128_v54  ;;  %v107_v54 = vld [vmem:[%s15133_s0 + $0x1f0] sm:$0xff] }
  0x53   :  { %11103 = vmatprep.mubr.msk.bf16.mxu1 %vm158_vm2, %v129_v55  ;;  %v108_v55 = vld [vmem:[%s15133_s0 + $0x1f8] sm:$0xff] }
  0x54   :  { %11236 = vmatmul.mubr.msk.bf16.gmra.mrb[36].mxu0 %vm158_vm2, %v1501_v20  ;;  %v140_v60 = vpack.c.bf16 %v108_v55, %v107_v54 }
  0x55   :  { %11239 = vmatprep.mubr.msk.bf16.mxu0 %vm158_vm2, %v1502_v23 }
  0x5a   :  { %11104 = vmatmul.mubr.msk.bf16.gmra.mrb[40].mxu1 %vm158_vm2, %v130_v3  ;;  %v1509_v3 = vpack.c.bf16 %v9795_v62, %v9794_v61 }
  0x5b   :  { %11107 = vmatprep.mubr.msk.bf16.mxu1 %vm158_vm2, %v131_v4  ;;  %v9648_v4 = vld [vmem:[%s15133_s0 + $0x220] sm:$0xff] }
  0x5c   :  { %11240 = vmatmul.mubr.msk.bf16.gmra.mrb[40].mxu0 %vm158_vm2, %v1503_v32  ;;  %v746_v7 = vpack.c.bf16 %v9649_v5, %v9648_v4 }
  0x5d   :  { %11243 = vmatprep.mubr.msk.bf16.mxu0 %vm158_vm2, %v1504_v35 }
  0x62   :  { %11108 = vmatmul.mubr.msk.bf16.gmra.mrb[44].mxu1 %vm158_vm2, %v132_v12 }
  0x63   :  { %11111 = vmatprep.mubr.msk.bf16.mxu1 %vm158_vm2, %v133_v15 }
  0x64   :  { %11244 = vmatmul.mubr.msk.bf16.gmra.mrb[44].mxu0 %vm158_vm2, %v1505_v44 }
  0x65   :  { %11247 = vmatprep.mubr.msk.bf16.mxu0 %vm158_vm2, %v1506_v47 }
  0x6a   :  { %11112 = vmatmul.mubr.msk.bf16.gmra.mrb[48].mxu1 %vm158_vm2, %v134_v24 }
  0x6b   :  { %11115 = vmatprep.mubr.msk.bf16.mxu1 %vm158_vm2, %v135_v27 }
  0x6c   :  { %11248 = vmatmul.mubr.msk.bf16.gmra.mrb[48].mxu0 %vm158_vm2, %v1507_v56 }
  0x6d   :  { %11251 = vmatprep.mubr.msk.bf16.mxu0 %vm158_vm2, %v1508_v59 }
  0x72   :  { %11116 = vmatmul.mubr.msk.bf16.gmra.mrb[52].mxu1 %vm158_vm2, %v136_v36 }
  0x73   :  { %11119 = vmatprep.mubr.msk.bf16.mxu1 %vm158_vm2, %v137_v39 }
  0x74   :  { %11252 = vmatmul.mubr.msk.bf16.gmra.mrb[52].mxu0 %vm158_vm2, %v1509_v3 }
  0x7a   :  { %11120 = vmatmul.mubr.msk.bf16.gmra.mrb[56].mxu1 %vm158_vm2, %v138_v48 }
  0x7b   :  { %11123 = vmatprep.mubr.msk.bf16.mxu1 %vm158_vm2, %v139_v51 }
  0x82   :  { %11124 = vmatmul.mubr.msk.bf16.gmra.mrb[60].mxu1 %vm158_vm2, %v140_v60 }
  0x83   :  { %11131 = vmatprep.mubr.msk.bf16.mxu1 %vm158_vm2, %v744_v63 }
  0x8a   :  { %11132 = vmatmul.mubr.msk.bf16.vlgmr.msra.gmra.mrb[64].mxu1 %vm158_vm2, %v745_v6 }
  0x8b   :  { %16 = vsyncpa [#allocation8], 0  ;;  %11873 = vmatpush3.bf16.msra.mxu1 %v12641_v0  ;;  %11135 = vmatprep.mubr.msk.bf16.mxu1 %vm158_vm2, %v746_v7  ;;  %v9650_v8 = vld [vmem:[%s15133_s0 + $0x230] sm:$0xff]  ;;  %v9651_v9 = vld [vmem:[%s15133_s0 + $0x238] sm:$0xff]  ;;  %s12568_s20 = smov 12   ;;  %s12569_s21 = smov 6  }
  0x8c   :  { %v9652_v11 = vld [vmem:[%s15133_s0 + $0x240] sm:$0xff]  ;;  %v9653_v12 = vld [vmem:[%s15133_s0 + $0x248] sm:$0xff]  ;;  %11872 = vmatprep.subr.bf16.mxu1 %v12663_v10  ;;  %v747_v13 = vpack.c.bf16 %v9651_v9, %v9650_v8  ;;  %v9654_v15 = vld [vmem:[%s15133_s0 + $0x250] sm:$0xff]  ;;  %s12570_s24 = smov 18   ;;  %s12571_s27 = smov 24   ;;  %vm5881_vm3 = vcmask 1045504  }
  0x8d   :  { %v748_v14 = vpack.c.bf16 %v9653_v12, %v9652_v11  ;;  %v9655_v16 = vld [vmem:[%s15133_s0 + $0x258] sm:$0xff]  ;;  %v9656_v17 = vld [vmem:[%s15133_s0 + $0x260] sm:$0xff]  ;;  %v9658_v20 = vld [vmem:[%s15133_s0 + $0x270] sm:$0xff]  ;;  %vm6657_vm4 = vcmask 1046528   ;;  %s12573_s17 = smov 32   ;;  %s12574_s18 = smov 64  }
  0x8e   :  { %v749_v18 = vpack.c.bf16 %v9655_v16, %v9654_v15  ;;  %v9659_v21 = vld [vmem:[%s15133_s0 + $0x278] sm:$0xff]  ;;  %v9660_v22 = vld [vmem:[%s15133_s0 + $0x280] sm:$0xff]  ;;  %v9661_v23 = vld [vmem:[%s15133_s0 + $0x288] sm:$0xff]  ;;  %s12575_s22 = smov 96   ;;  %vm12576_vm5 = vmmov 0   ;;  %vm9581_vm7 = vcmask 1041408  }
  0x8f   :  { %11874 = vmatpush3.bf16.msra.mxu1 %v12663_v10  ;;  %v751_v24 = vpack.c.bf16 %v9659_v21, %v9658_v20  ;;  %v752_v25 = vpack.c.bf16 %v9661_v23, %v9660_v22  ;;  %v9662_v26 = vld [vmem:[%s15133_s0 + $0x290] sm:$0xff]  ;;  %v9663_v27 = vld [vmem:[%s15133_s0 + $0x298] sm:$0xff]  ;;  %v9664_v28 = vld [vmem:[%s15133_s0 + $0x2a0] sm:$0xff] }
  0x90   :  { %11263 = vmatprep.subr.bf16.mxu1 %v12641_v0  ;;  %v9657_v0 = vld [vmem:[%s15133_s0 + $0x268] sm:$0xff]  ;;  %v753_v30 = vpack.c.bf16 %v9663_v27, %v9662_v26  ;;  %v9666_v32 = vld [vmem:[%s15133_s0 + $0x2b0] sm:$0xff]  ;;  %v9667_v33 = vld [vmem:[%s15133_s0 + $0x2b8] sm:$0xff] }
  0x91   :  { %v750_v19 = vpack.c.bf16 %v9657_v0, %v9656_v17  ;;  %v9665_v29 = vld [vmem:[%s15133_s0 + $0x2a8] sm:$0xff]  ;;  %v9668_v34 = vld [vmem:[%s15133_s0 + $0x2c0] sm:$0xff]  ;;  %v755_v36 = vpack.c.bf16 %v9667_v33, %v9666_v32  ;;  %v9670_v38 = vld [vmem:[%s15133_s0 + $0x2d0] sm:$0xff] }
  0x92   :  { %11136 = vmatmul.mubr.msk.bf16.gmra.mrb[68].mxu1 %vm158_vm2, %v747_v13  ;;  %v754_v31 = vpack.c.bf16 %v9665_v29, %v9664_v28  ;;  %v9669_v35 = vld [vmem:[%s15133_s0 + $0x2c8] sm:$0xff]  ;;  %v9671_v39 = vld [vmem:[%s15133_s0 + $0x2d8] sm:$0xff]  ;;  %v9672_v40 = vld [vmem:[%s15133_s0 + $0x2e0] sm:$0xff] }
  0x93   :  { %11139 = vmatprep.mubr.msk.bf16.mxu1 %vm158_vm2, %v748_v14  ;;  %v756_v37 = vpack.c.bf16 %v9669_v35, %v9668_v34  ;;  %v9673_v41 = vld [vmem:[%s15133_s0 + $0x2e8] sm:$0xff]  ;;  %v757_v42 = vpack.c.bf16 %v9671_v39, %v9670_v38  ;;  %v9674_v44 = vld [vmem:[%s15133_s0 + $0x2f0] sm:$0xff]  ;;  %v9675_v45 = vld [vmem:[%s15133_s0 + $0x2f8] sm:$0xff] }
  0x94   :  { %v758_v43 = vpack.c.bf16 %v9673_v41, %v9672_v40  ;;  %v9676_v46 = vld [vmem:[%s15133_s0 + $0x300] sm:$0xff]  ;;  %v9677_v47 = vld [vmem:[%s15133_s0 + $0x308] sm:$0xff]  ;;  %v759_v48 = vpack.c.bf16 %v9675_v45, %v9674_v44  ;;  %v9678_v50 = vld [vmem:[%s15133_s0 + $0x310] sm:$0xff] }
  0x95   :  { %v760_v49 = vpack.c.bf16 %v9677_v47, %v9676_v46  ;;  %v9679_v51 = vld [vmem:[%s15133_s0 + $0x318] sm:$0xff]  ;;  %v9680_v52 = vld [vmem:[%s15133_s0 + $0x320] sm:$0xff]  ;;  %v9681_v53 = vld [vmem:[%s15133_s0 + $0x328] sm:$0xff] }
  0x96   :  { %v761_v54 = vpack.c.bf16 %v9679_v51, %v9678_v50  ;;  %v762_v55 = vpack.c.bf16 %v9681_v53, %v9680_v52  ;;  %v9682_v56 = vld [vmem:[%s15133_s0 + $0x330] sm:$0xff]  ;;  %v9683_v57 = vld [vmem:[%s15133_s0 + $0x338] sm:$0xff]  ;;  %v9684_v58 = vld [vmem:[%s15133_s0 + $0x340] sm:$0xff] }
  0x97   :  { %v9685_v59 = vld [vmem:[%s15133_s0 + $0x348] sm:$0xff]  ;;  %v763_v60 = vpack.c.bf16 %v9683_v57, %v9682_v56  ;;  %v9686_v62 = vld [vmem:[%s15133_s0 + $0x350] sm:$0xff]  ;;  %v9687_v63 = vld [vmem:[%s15133_s0 + $0x358] sm:$0xff] }
  0x98   :  { %v764_v61 = vpack.c.bf16 %v9685_v59, %v9684_v58  ;;  %v9688_v1 = vld [vmem:[%s15133_s0 + $0x360] sm:$0xff]  ;;  %v9689_v2 = vld [vmem:[%s15133_s0 + $0x368] sm:$0xff]  ;;  %v765_v3 = vpack.c.bf16 %v9687_v63, %v9686_v62  ;;  %v9690_v5 = vld [vmem:[%s15133_s0 + $0x370] sm:$0xff] }
  0x99   :  { %v766_v4 = vpack.c.bf16 %v9689_v2, %v9688_v1  ;;  %v9691_v6 = vld [vmem:[%s15133_s0 + $0x378] sm:$0xff]  ;;  %v9692_v7 = vld [vmem:[%s15133_s0 + $0x380] sm:$0xff]  ;;  %v9693_v8 = vld [vmem:[%s15133_s0 + $0x388] sm:$0xff] }
  0x9a   :  { %11140 = vmatmul.mubr.msk.bf16.gmra.mrb[72].mxu1 %vm158_vm2, %v749_v18  ;;  %v767_v12 = vpack.c.bf16 %v9691_v6, %v9690_v5  ;;  %v768_v14 = vpack.c.bf16 %v9693_v8, %v9692_v7  ;;  %v9694_v16 = vld [vmem:[%s15133_s0 + $0x390] sm:$0xff]  ;;  %v9695_v17 = vld [vmem:[%s15133_s0 + $0x398] sm:$0xff]  ;;  %v9696_v0 = vld [vmem:[%s15133_s0 + $0x3a0] sm:$0xff] }
  0x9b   :  { %11143 = vmatprep.mubr.msk.bf16.mxu1 %vm158_vm2, %v750_v19  ;;  %v9697_v18 = vld [vmem:[%s15133_s0 + $0x3a8] sm:$0xff]  ;;  %v769_v21 = vpack.c.bf16 %v9695_v17, %v9694_v16  ;;  %v9699_v26 = vld [vmem:[%s15133_s0 + $0x3b8] sm:$0xff]  ;;  %v9700_v27 = vld [vmem:[%s15133_s0 + $0x3c0] sm:$0xff] }
  0x9c   :  { %v770_v23 = vpack.c.bf16 %v9697_v18, %v9696_v0  ;;  %v9701_v28 = vld [vmem:[%s15133_s0 + $0x3c8] sm:$0xff]  ;;  %v9702_v38 = vld [vmem:[%s15133_s0 + $0x3d0] sm:$0xff]  ;;  %v9703_v39 = vld [vmem:[%s15133_s0 + $0x3d8] sm:$0xff] }
  0x9d   :  { %v772_v33 = vpack.c.bf16 %v9701_v28, %v9700_v27  ;;  %v9704_v41 = vld [vmem:[%s15133_s0 + $0x3e0] sm:$0xff]  ;;  %v773_v45 = vpack.c.bf16 %v9703_v39, %v9702_v38  ;;  %v9706_v52 = vld [vmem:[%s15133_s0 + $0x3f0] sm:$0xff]  ;;  %v9707_v53 = vld [vmem:[%s15133_s0 + $0x3f8] sm:$0xff] }
  0x9e   :  { %v9797_v56 = vld [vmem:[%s15133_s0 + $0x5c8] sm:$0xff]  ;;  %v775_v59 = vpack.c.bf16 %v9707_v53, %v9706_v52  ;;  %v9800_v6 = vld [vmem:[%s15133_s0 + $0x5e0] sm:$0xff] }
  0x9f   :  { %v9801_v7 = vld [vmem:[%s15133_s0 + $0x5e8] sm:$0xff]  ;;  %v13396_v8 = vld [vmem:[%s15135_s2] ss:$0 sm:$0xff] }
  0xa0   :  { %v9836_v53 = vld [vmem:[%s15133_s0 + $0x600] sm:$0xff] }
  0xa2   :  { %11144 = vmatmul.mubr.msk.bf16.gmra.mrb[76].mxu1 %vm158_vm2, %v751_v24 }
  0xa3   :  { %11147 = vmatprep.mubr.msk.bf16.mxu1 %vm158_vm2, %v752_v25  ;;  %v9698_v25 = vld [vmem:[%s15133_s0 + $0x3b0] sm:$0xff] }
  0xaa   :  { %11148 = vmatmul.mubr.msk.bf16.gmra.mrb[80].mxu1 %vm158_vm2, %v753_v30 }
  0xab   :  { %11151 = vmatprep.mubr.msk.bf16.mxu1 %vm158_vm2, %v754_v31  ;;  %v771_v31 = vpack.c.bf16 %v9699_v26, %v9698_v25 }
  0xb2   :  { %11152 = vmatmul.mubr.msk.bf16.gmra.mrb[84].mxu1 %vm158_vm2, %v755_v36 }
  0xb3   :  { %11155 = vmatprep.mubr.msk.bf16.mxu1 %vm158_vm2, %v756_v37 }
  0xba   :  { %11156 = vmatmul.mubr.msk.bf16.gmra.mrb[88].mxu1 %vm158_vm2, %v757_v42  ;;  %v9705_v42 = vld [vmem:[%s15133_s0 + $0x3e8] sm:$0xff] }
  0xbb   :  { %11159 = vmatprep.mubr.msk.bf16.mxu1 %vm158_vm2, %v758_v43  ;;  %v774_v47 = vpack.c.bf16 %v9705_v42, %v9704_v41  ;;  %v12539_v42 = vld [vmem:[%s15134_s1] sm:$0xff]  }
  0xc2   :  { %11160 = vmatmul.mubr.msk.bf16.gmra.mrb[92].mxu1 %vm158_vm2, %v759_v48 }
  0xc3   :  { %11163 = vmatprep.mubr.msk.bf16.mxu1 %vm158_vm2, %v760_v49 }
  0xca   :  { %11164 = vmatmul.mubr.msk.bf16.gmra.mrb[96].mxu1 %vm158_vm2, %v761_v54 }
  0xcb   :  { %11167 = vmatprep.mubr.msk.bf16.mxu1 %vm158_vm2, %v762_v55  ;;  %v9796_v55 = vld [vmem:[%s15133_s0 + $0x5c0] sm:$0xff] }
  0xd2   :  { %11168 = vmatmul.mubr.msk.bf16.gmra.mrb[100].mxu1 %vm158_vm2, %v763_v60 }
  0xd3   :  { %11171 = vmatprep.mubr.msk.bf16.mxu1 %vm158_vm2, %v764_v61  ;;  %v1510_v61 = vpack.c.bf16 %v9797_v56, %v9796_v55  ;;  %v9837_v55 = vld [vmem:[%s15133_s0 + $0x608] sm:$0xff] }
  0xda   :  { %11172 = vmatmul.mubr.msk.bf16.gmra.mrb[104].mxu1 %vm158_vm2, %v765_v3  ;;  %v9798_v3 = vld [vmem:[%s15133_s0 + $0x5d0] sm:$0xff] }
  0xdb   :  { %11175 = vmatprep.mubr.msk.bf16.mxu1 %vm158_vm2, %v766_v4  ;;  %v9799_v4 = vld [vmem:[%s15133_s0 + $0x5d8] sm:$0xff] }
  0xdc   :  { %v1511_v17 = vpack.c.bf16 %v9799_v4, %v9798_v3 }
  0xdd   :  { %v13259_v9 = vpop.f32.mrb[0].mxu1 }
  0xde   :  { %v13261_v11 = vpop.f32.mrb[1].mxu1 }
  0xdf   :  { %v13263_v13 = vpop.f32.mrb[2].mxu1  ;;  %v13311_v35 = vpop.f32.mrb[0].mxu0 }
  0xe0   :  { %v13265_v15 = vpop.f32.mrb[3].mxu1  ;;  %v13313_v36 = vpop.f32.mrb[1].mxu0 }
  0xe1   :  { %v13316_v37 = vpop.f32.mrb[2].mxu0 }
  0xe2   :  { %11176 = vmatmul.mubr.msk.bf16.gmra.mrb[108].mxu1 %vm158_vm2, %v767_v12  ;;  %v13325_v40 = vpop.f32.mrb[3].mxu0 }
  0xe3   :  { %11179 = vmatprep.mubr.msk.bf16.mxu1 %vm158_vm2, %v768_v14 }
  0xe5   :  { %v13281_v19 = vpop.f32.mrb[4].mxu1 }
  0xe6   :  { %v13283_v20 = vpop.f32.mrb[5].mxu1 }
  0xe7   :  { %v13285_v22 = vpop.f32.mrb[6].mxu1  ;;  %v13341_v49 = vpop.f32.mrb[4].mxu0 }
  0xe8   :  { %v13287_v24 = vpop.f32.mrb[7].mxu1  ;;  %v13343_v50 = vpop.f32.mrb[5].mxu0 }
  0xe9   :  { %v13346_v51 = vpop.f32.mrb[6].mxu0 }
  0xea   :  { %11180 = vmatmul.mubr.msk.bf16.gmra.mrb[112].mxu1 %vm158_vm2, %v769_v21  ;;  %v13355_v54 = vpop.f32.mrb[7].mxu0  ;;  %v1512_v21 = vpack.c.bf16 %v9801_v7, %v9800_v6  ;;  %v2220_v7 = vpack.c.bf16 %v9837_v55, %v9836_v53 }
  0xeb   :  { %11183 = vmatprep.mubr.msk.bf16.mxu1 %vm158_vm2, %v770_v23 }
  0xed   :  { %v13303_v29 = vpop.f32.mrb[8].mxu1 }
  0xee   :  { %v13305_v30 = vpop.f32.mrb[9].mxu1 }
  0xef   :  { %v13307_v32 = vpop.f32.mrb[10].mxu1  ;;  %v13371_v63 = vpop.f32.mrb[8].mxu0 }
  0xf0   :  { %v13309_v34 = vpop.f32.mrb[11].mxu1  ;;  %v13373_v1 = vpop.f32.mrb[9].mxu0 }
  0xf1   :  { %v13376_v2 = vpop.f32.mrb[10].mxu0 }
  0xf2   :  { %11184 = vmatmul.mubr.msk.bf16.gmra.mrb[116].mxu1 %vm158_vm2, %v771_v31  ;;  %v13385_v5 = vpop.f32.mrb[11].mxu0 }
  0xf3   :  { %11187 = vmatprep.mubr.msk.bf16.mxu1 %vm158_vm2, %v772_v33 }
  0xf5   :  { %v13333_v43 = vpop.f32.mrb[12].mxu1 }
  0xf6   :  { %v13335_v44 = vpop.f32.mrb[13].mxu1 }
  0xf7   :  { %v13337_v46 = vpop.f32.mrb[14].mxu1  ;;  %v13401_v27 = vpop.f32.mrb[12].mxu0 }
  0xf8   :  { %v13339_v48 = vpop.f32.mrb[15].mxu1  ;;  %v13404_v33 = vpop.f32.mrb[13].mxu0 }
  0xf9   :  { %v13407_v39 = vpop.f32.mrb[14].mxu0 }
  0xfa   :  { %11188 = vmatmul.mubr.msk.bf16.gmra.mrb[120].mxu1 %vm158_vm2, %v773_v45  ;;  %v9802_v45 = vld [vmem:[%s15133_s0 + $0x5f0] sm:$0xff]  ;;  %v13419_v52 = vpop.f32.mrb[15].mxu0 }
  0xfb   :  { %11191 = vmatprep.mubr.msk.bf16.mxu1 %vm158_vm2, %v774_v47  ;;  %v9803_v47 = vld [vmem:[%s15133_s0 + $0x5f8] sm:$0xff] }
  0xfc   :  { %v1513_v3 = vpack.c.bf16 %v9803_v47, %v9802_v45 }
  0xfd   :  { %v13363_v57 = vpop.f32.mrb[16].mxu1 }
  0xfe   :  { %v13365_v58 = vpop.f32.mrb[17].mxu1 }
  0xff   :  { %v13367_v60 = vpop.f32.mrb[18].mxu1 }
 0x100   :  { %v13369_v62 = vpop.f32.mrb[19].mxu1 }
 0x102   :  { %11192 = vmatmul.mubr.msk.bf16.gmra.mrb[124].mxu1 %vm158_vm2, %v775_v59 }
 0x103   :  { %11255 = vmatprep.mubr.msk.bf16.mxu1 %vm158_vm2, %v1510_v61 }
 0x105   :  { %v11085_v12 = vpop.f32.mrb[20].mxu1 }
 0x106   :  { %v385_v14 = vadd.f32 %v11085_v12, %v13396_v8  ;;  %v376_v16 = vpop.f32.mrb[21].mxu1 }
 0x107   :  { %v377_v0 = vadd.f32 %v13396_v8, %v376_v16  ;;  %v11086_v18 = vpop.f32.mrb[22].mxu1 }
 0x108   :  { %v573_v23 = vmax.f32 %v385_v14, 0.0  ;;  %v388_v25 = vadd.f32 %v11086_v18, %v13396_v8  ;;  %v379_v26 = vpop.f32.mrb[23].mxu1 }
 0x109   :  { %v571_v28 = vmax.f32 %v377_v0, 0.0  ;;  %v380_v31 = vadd.f32 %v13396_v8, %v379_v26  ;;  %v9838_v26 = vld [vmem:[%s15133_s0 + $0x610] sm:$0xff] }
 0x10a   :  { %637 = vst [vmem:[#allocation2 + $0xb0] sm:$0xff] %v573_v23  ;;  %v574_v38 = vmax.f32 %v388_v25, 0.0  ;;  %11256 = vmatmul.mubr.msk.bf16.vlgmr.msra.gmra.mrb[128].mxu1 %vm158_vm2, %v1511_v17  ;;  %v13432_v17 = vpop.f32.mrb[16].mxu0 }
 0x10b   :  { %635 = vst [vmem:[#allocation2 + $0xa0] sm:$0xff] %v571_v28  ;;  %v572_v41 = vmax.f32 %v380_v31, 0.0  ;;  %11264 = vmatpush3.bf16.msra.mxu1 %v12539_v42  ;;  %11259 = vmatprep.mubr.msk.bf16.mxu1 %vm158_vm2, %v1512_v21  ;;  %v13435_v21 = vpop.f32.mrb[17].mxu0  ;;  %v9839_v28 = vld [vmem:[%s15133_s0 + $0x618] sm:$0xff] }
 0x10c   :  { %638 = vst [vmem:[#allocation2 + $0xb8] sm:$0xff] %v574_v38  ;;  %11265 = vmatprep.subr.bf16.mxu1 %v12663_v10  ;;  %v13438_v25 = vpop.f32.mrb[18].mxu0  ;;  %v9840_v38 = vld [vmem:[%s15133_s0 + $0x620] sm:$0xff]  ;;  %v2221_v53 = vpack.c.bf16 %v9839_v28, %v9838_v26 }
 0x10d   :  { %636 = vst [vmem:[#allocation2 + $0xa8] sm:$0xff] %v572_v41  ;;  %v11089_v56 = vpop.f32.mrb[24].mxu1  ;;  %v13447_v31 = vpop.f32.mrb[19].mxu0  ;;  %v9841_v41 = vld [vmem:[%s15133_s0 + $0x628] sm:$0xff]  ;;  %v9844_v28 = vld [vmem:[%s15133_s0 + $0x640] sm:$0xff] }
 0x10e   :  { %v401_v59 = vadd.f32 %v11089_v56, %v13396_v8  ;;  %v392_v61 = vpop.f32.mrb[25].mxu1 }
 0x10f   :  { %v393_v4 = vadd.f32 %v13396_v8, %v392_v61  ;;  %v11090_v6 = vpop.f32.mrb[26].mxu1  ;;  %11266 = vmatpush3.bf16.msra.mxu1 %v12663_v10 }
 0x110   :  { %v577_v12 = vmax.f32 %v401_v59, 0.0  ;;  %v404_v14 = vadd.f32 %v11090_v6, %v13396_v8  ;;  %v395_v16 = vpop.f32.mrb[27].mxu1  ;;  %v2222_v59 = vpack.c.bf16 %v9841_v41, %v9840_v38  ;;  %v13458_v6 = vpop.f32.mrb[20].mxu0  ;;  %v9845_v38 = vld [vmem:[%s15133_s0 + $0x648] sm:$0xff] }
 0x111   :  { %v575_v0 = vmax.f32 %v393_v4, 0.0  ;;  %v396_v18 = vadd.f32 %v13396_v8, %v395_v16 }
 0x112   :  { %641 = vst [vmem:[#allocation2 + $0xd0] sm:$0xff] %v577_v12  ;;  %v578_v23 = vmax.f32 %v404_v14, 0.0  ;;  %11260 = vmatmul.mubr.msk.bf16.gmra.mrb[132].mxu1 %vm158_vm2, %v1513_v3  ;;  %v13461_v14 = vpop.f32.mrb[21].mxu0 }
 0x113   :  { %639 = vst [vmem:[#allocation2 + $0xc0] sm:$0xff] %v575_v0  ;;  %v576_v10 = vmax.f32 %v396_v18, 0.0  ;;  %11267 = vmatprep.mubr.msk.bf16.mxu1 %vm158_vm2, %v2220_v7  ;;  %v13464_v0 = vpop.f32.mrb[22].mxu0 }
 0x114   :  { %642 = vst [vmem:[#allocation2 + $0xd8] sm:$0xff] %v578_v23  ;;  %v9842_v23 = vld [vmem:[%s15133_s0 + $0x630] sm:$0xff]  ;;  %v13473_v26 = vpop.f32.mrb[23].mxu0 }
 0x115   :  { %640 = vst [vmem:[#allocation2 + $0xc8] sm:$0xff] %v576_v10  ;;  %v11093_v42 = vpop.f32.mrb[28].mxu1  ;;  %v9843_v10 = vld [vmem:[%s15133_s0 + $0x638] sm:$0xff]  ;;  %15145 = vst [vmem:[#allocation10_spill] sm:$0xff] %v13473_v26 }
 0x116   :  { %v417_v45 = vadd.f32 %v11093_v42, %v13396_v8  ;;  %v408_v47 = vpop.f32.mrb[29].mxu1 }
 0x117   :  { %v409_v55 = vadd.f32 %v13396_v8, %v408_v47  ;;  %v11094_v56 = vpop.f32.mrb[30].mxu1  ;;  %v2223_v47 = vpack.c.bf16 %v9843_v10, %v9842_v23 }
 0x118   :  { %v581_v61 = vmax.f32 %v417_v45, 0.0  ;;  %v420_v3 = vadd.f32 %v11094_v56, %v13396_v8  ;;  %v411_v4 = vpop.f32.mrb[31].mxu1  ;;  %v2224_v56 = vpack.c.bf16 %v9845_v38, %v9844_v28  ;;  %v9846_v28 = vld [vmem:[%s15133_s0 + $0x650] sm:$0xff]  ;;  %v9847_v38 = vld [vmem:[%s15133_s0 + $0x658] sm:$0xff] }
 0x119   :  { %v579_v7 = vmax.f32 %v409_v55, 0.0  ;;  %v412_v12 = vadd.f32 %v13396_v8, %v411_v4  ;;  %v13484_v4 = vpop.f32.mrb[24].mxu0 }
 0x11a   :  { %645 = vst [vmem:[#allocation2 + $0xf0] sm:$0xff] %v581_v61  ;;  %v582_v16 = vmax.f32 %v420_v3, 0.0  ;;  %11268 = vmatmul.mubr.msk.bf16.vlgmr.msra.gmra.mrb[136].mxu1 %vm158_vm2, %v2221_v53  ;;  %15146 = vst [vmem:[#allocation11_spill] sm:$0xff] %v13484_v4 }
 0x11b   :  { %643 = vst [vmem:[#allocation2 + $0xe0] sm:$0xff] %v579_v7  ;;  %v580_v18 = vmax.f32 %v412_v12, 0.0  ;;  %11271 = vmatprep.mubr.msk.bf16.mxu1 %vm158_vm2, %v2222_v59 }
 0x11c   :  { %646 = vst [vmem:[#allocation2 + $0xf8] sm:$0xff] %v582_v16  ;;  %v13487_v16 = vpop.f32.mrb[25].mxu0 }
 0x11d   :  { %644 = vst [vmem:[#allocation2 + $0xe8] sm:$0xff] %v580_v18  ;;  %v11097_v41 = vpop.f32.mrb[32].mxu1  ;;  %15147 = vst [vmem:[#allocation12_spill] sm:$0xff] %v13487_v16  ;;  %v13490_v23 = vpop.f32.mrb[26].mxu0 }
 0x11e   :  { %v433_v42 = vadd.f32 %v11097_v41, %v13396_v8  ;;  %v424_v45 = vpop.f32.mrb[33].mxu1  ;;  %15148 = vst [vmem:[#allocation13_spill] sm:$0xff] %v13490_v23  ;;  %v13499_v41 = vpop.f32.mrb[27].mxu0 }
 0x11f   :  { %v425_v53 = vadd.f32 %v13396_v8, %v424_v45  ;;  %v11098_v55 = vpop.f32.mrb[34].mxu1  ;;  %15149 = vst [vmem:[#allocation14_spill] sm:$0xff] %v13499_v41  ;;  %v9849_v45 = vld [vmem:[%s15133_s0 + $0x668] sm:$0xff]  ;;  %v13510_v41 = vpop.f32.mrb[28].mxu0 }
 0x120   :  { %v585_v59 = vmax.f32 %v433_v42, 0.0  ;;  %v436_v61 = vadd.f32 %v11098_v55, %v13396_v8  ;;  %v427_v3 = vpop.f32.mrb[35].mxu1  ;;  %v9848_v42 = vld [vmem:[%s15133_s0 + $0x660] sm:$0xff]  ;;  %15150 = vst [vmem:[#allocation15_spill] sm:$0xff] %v13510_v41  ;;  %v13513_v4 = vpop.f32.mrb[29].mxu0 }
 0x121   :  { %v583_v7 = vmax.f32 %v425_v53, 0.0  ;;  %v428_v12 = vadd.f32 %v13396_v8, %v427_v3  ;;  %v2226_v3 = vpack.c.bf16 %v9849_v45, %v9848_v42  ;;  %15151 = vst [vmem:[#allocation16_spill] sm:$0xff] %v13513_v4  ;;  %v9850_v42 = vld [vmem:[%s15133_s0 + $0x670] sm:$0xff]  ;;  %v9851_v45 = vld [vmem:[%s15133_s0 + $0x678] sm:$0xff] }
 0x122   :  { %649 = vst [vmem:[#allocation2 + $0x110] sm:$0xff] %v585_v59  ;;  %v586_v18 = vmax.f32 %v436_v61, 0.0  ;;  %11272 = vmatmul.mubr.msk.bf16.gmra.mrb[140].mxu1 %vm158_vm2, %v2223_v47 }
 0x123   :  { %647 = vst [vmem:[#allocation2 + $0x100] sm:$0xff] %v583_v7  ;;  %v584_v10 = vmax.f32 %v428_v12, 0.0  ;;  %11275 = vmatprep.mubr.msk.bf16.mxu1 %vm158_vm2, %v2224_v56  ;;  %v2225_v56 = vpack.c.bf16 %v9847_v38, %v9846_v28  ;;  %v13516_v28 = vpop.f32.mrb[30].mxu0 }
 0x124   :  { %650 = vst [vmem:[#allocation2 + $0x118] sm:$0xff] %v586_v18  ;;  %15152 = vst [vmem:[#allocation17_spill] sm:$0xff] %v13516_v28 }
 0x125   :  { %648 = vst [vmem:[#allocation2 + $0x108] sm:$0xff] %v584_v10  ;;  %v11101_v47 = vpop.f32.mrb[36].mxu1 }
 0x126   :  { %v449_v53 = vadd.f32 %v11101_v47, %v13396_v8  ;;  %v440_v55 = vpop.f32.mrb[37].mxu1  ;;  %v13525_v47 = vpop.f32.mrb[31].mxu0 }
 0x127   :  { %v441_v59 = vadd.f32 %v13396_v8, %v440_v55  ;;  %v11102_v61 = vpop.f32.mrb[38].mxu1  ;;  %15153 = vst [vmem:[#allocation18_spill] sm:$0xff] %v13525_v47  ;;  %v13536_v47 = vpop.f32.mrb[32].mxu0 }
 0x128   :  { %v589_v7 = vmax.f32 %v449_v53, 0.0  ;;  %v452_v12 = vadd.f32 %v11102_v61, %v13396_v8  ;;  %v443_v18 = vpop.f32.mrb[39].mxu1  ;;  %v9852_v53 = vld [vmem:[%s15133_s0 + $0x680] sm:$0xff]  ;;  %15154 = vst [vmem:[#allocation19_spill] sm:$0xff] %v13536_v47  ;;  %v13539_v41 = vpop.f32.mrb[33].mxu0 }
 0x129   :  { %v587_v23 = vmax.f32 %v441_v59, 0.0  ;;  %v444_v16 = vadd.f32 %v13396_v8, %v443_v18  ;;  %v2227_v59 = vpack.c.bf16 %v9851_v45, %v9850_v42  ;;  %15155 = vst [vmem:[#allocation20_spill] sm:$0xff] %v13539_v41  ;;  %v13542_v42 = vpop.f32.mrb[34].mxu0 }
 0x12a   :  { %653 = vst [vmem:[#allocation2 + $0x130] sm:$0xff] %v589_v7  ;;  %v590_v10 = vmax.f32 %v452_v12, 0.0  ;;  %11276 = vmatmul.mubr.msk.bf16.gmra.mrb[144].mxu1 %vm158_vm2, %v2225_v56  ;;  %15156 = vst [vmem:[#allocation21_spill] sm:$0xff] %v13542_v42 }
 0x12b   :  { %651 = vst [vmem:[#allocation2 + $0x120] sm:$0xff] %v587_v23  ;;  %v588_v38 = vmax.f32 %v444_v16, 0.0  ;;  %11279 = vmatprep.mubr.msk.bf16.mxu1 %vm158_vm2, %v2226_v3  ;;  %v9853_v16 = vld [vmem:[%s15133_s0 + $0x688] sm:$0xff] }
 0x12c   :  { %654 = vst [vmem:[#allocation2 + $0x138] sm:$0xff] %v590_v10  ;;  %v2228_v7 = vpack.c.bf16 %v9853_v16, %v9852_v53  ;;  %v9854_v53 = vld [vmem:[%s15133_s0 + $0x690] sm:$0xff]  ;;  %v9855_v16 = vld [vmem:[%s15133_s0 + $0x698] sm:$0xff] }
 0x12d   :  { %652 = vst [vmem:[#allocation2 + $0x128] sm:$0xff] %v588_v38  ;;  %v11105_v23 = vpop.f32.mrb[40].mxu1 }
 0x12e   :  { %v465_v55 = vadd.f32 %v11105_v23, %v13396_v8  ;;  %v456_v56 = vpop.f32.mrb[41].mxu1  ;;  %v13551_v23 = vpop.f32.mrb[35].mxu0 }
 0x12f   :  { %v457_v61 = vadd.f32 %v13396_v8, %v456_v56  ;;  %v11106_v3 = vpop.f32.mrb[42].mxu1  ;;  %15157 = vst [vmem:[#allocation22_spill] sm:$0xff] %v13551_v23  ;;  %v13562_v23 = vpop.f32.mrb[36].mxu0 }
 0x130   :  { %v593_v12 = vmax.f32 %v465_v55, 0.0  ;;  %v468_v18 = vadd.f32 %v11106_v3, %v13396_v8  ;;  %v459_v10 = vpop.f32.mrb[43].mxu1  ;;  %v9856_v55 = vld [vmem:[%s15133_s0 + $0x6a0] sm:$0xff]  ;;  %15158 = vst [vmem:[#allocation23_spill] sm:$0xff] %v13562_v23  ;;  %v13565_v47 = vpop.f32.mrb[37].mxu0 }
 0x131   :  { %v591_v28 = vmax.f32 %v457_v61, 0.0  ;;  %v460_v4 = vadd.f32 %v13396_v8, %v459_v10  ;;  %v2229_v61 = vpack.c.bf16 %v9855_v16, %v9854_v53  ;;  %15159 = vst [vmem:[#allocation24_spill] sm:$0xff] %v13565_v47  ;;  %v13568_v53 = vpop.f32.mrb[38].mxu0 }
 0x132   :  { %657 = vst [vmem:[#allocation2 + $0x150] sm:$0xff] %v593_v12  ;;  %v594_v38 = vmax.f32 %v468_v18, 0.0  ;;  %11280 = vmatmul.mubr.msk.bf16.gmra.mrb[148].mxu1 %vm158_vm2, %v2227_v59  ;;  %15160 = vst [vmem:[#allocation25_spill] sm:$0xff] %v13568_v53 }
 0x133   :  { %655 = vst [vmem:[#allocation2 + $0x140] sm:$0xff] %v591_v28  ;;  %v592_v45 = vmax.f32 %v460_v4, 0.0  ;;  %11283 = vmatprep.mubr.msk.bf16.mxu1 %vm158_vm2, %v2228_v7  ;;  %v9857_v4 = vld [vmem:[%s15133_s0 + $0x6a8] sm:$0xff] }
 0x134   :  { %658 = vst [vmem:[#allocation2 + $0x158] sm:$0xff] %v594_v38  ;;  %v2230_v12 = vpack.c.bf16 %v9857_v4, %v9856_v55  ;;  %v9858_v55 = vld [vmem:[%s15133_s0 + $0x6b0] sm:$0xff]  ;;  %v9859_v4 = vld [vmem:[%s15133_s0 + $0x6b8] sm:$0xff] }
 0x135   :  { %656 = vst [vmem:[#allocation2 + $0x148] sm:$0xff] %v592_v45  ;;  %v11109_v28 = vpop.f32.mrb[44].mxu1 }
 0x136   :  { %v481_v56 = vadd.f32 %v11109_v28, %v13396_v8  ;;  %v472_v59 = vpop.f32.mrb[45].mxu1  ;;  %v13577_v28 = vpop.f32.mrb[39].mxu0 }
 0x137   :  { %v473_v3 = vadd.f32 %v13396_v8, %v472_v59  ;;  %v11110_v7 = vpop.f32.mrb[46].mxu1  ;;  %15161 = vst [vmem:[#allocation26_spill] sm:$0xff] %v13577_v28  ;;  %v13588_v28 = vpop.f32.mrb[40].mxu0 }
 0x138   :  { %v597_v18 = vmax.f32 %v481_v56, 0.0  ;;  %v484_v10 = vadd.f32 %v11110_v7, %v13396_v8  ;;  %v475_v38 = vpop.f32.mrb[47].mxu1  ;;  %v9860_v56 = vld [vmem:[%s15133_s0 + $0x6c0] sm:$0xff]  ;;  %15162 = vst [vmem:[#allocation27_spill] sm:$0xff] %v13588_v28  ;;  %v13591_v23 = vpop.f32.mrb[41].mxu0 }
 0x139   :  { %v595_v42 = vmax.f32 %v473_v3, 0.0  ;;  %v476_v41 = vadd.f32 %v13396_v8, %v475_v38  ;;  %v2231_v3 = vpack.c.bf16 %v9859_v4, %v9858_v55  ;;  %15163 = vst [vmem:[#allocation28_spill] sm:$0xff] %v13591_v23  ;;  %v13594_v55 = vpop.f32.mrb[42].mxu0 }
 0x13a   :  { %661 = vst [vmem:[#allocation2 + $0x170] sm:$0xff] %v597_v18  ;;  %v598_v45 = vmax.f32 %v484_v10, 0.0  ;;  %11284 = vmatmul.mubr.msk.bf16.gmra.mrb[152].mxu1 %vm158_vm2, %v2229_v61  ;;  %15164 = vst [vmem:[#allocation29_spill] sm:$0xff] %v13594_v55 }
 0x13b   :  { %659 = vst [vmem:[#allocation2 + $0x160] sm:$0xff] %v595_v42  ;;  %v596_v16 = vmax.f32 %v476_v41, 0.0  ;;  %11287 = vmatprep.mubr.msk.bf16.mxu1 %vm158_vm2, %v2230_v12  ;;  %v9861_v41 = vld [vmem:[%s15133_s0 + $0x6c8] sm:$0xff] }
 0x13c   :  { %662 = vst [vmem:[#allocation2 + $0x178] sm:$0xff] %v598_v45  ;;  %v2232_v18 = vpack.c.bf16 %v9861_v41, %v9860_v56  ;;  %v9862_v56 = vld [vmem:[%s15133_s0 + $0x6d0] sm:$0xff]  ;;  %v9863_v41 = vld [vmem:[%s15133_s0 + $0x6d8] sm:$0xff] }
 0x13d   :  { %660 = vst [vmem:[#allocation2 + $0x168] sm:$0xff] %v596_v16  ;;  %v11113_v42 = vpop.f32.mrb[48].mxu1 }
 0x13e   :  { %v497_v59 = vadd.f32 %v11113_v42, %v13396_v8  ;;  %v488_v61 = vpop.f32.mrb[49].mxu1  ;;  %v13603_v42 = vpop.f32.mrb[43].mxu0 }
 0x13f   :  { %v489_v7 = vadd.f32 %v13396_v8, %v488_v61  ;;  %v11114_v12 = vpop.f32.mrb[50].mxu1  ;;  %15165 = vst [vmem:[#allocation30_spill] sm:$0xff] %v13603_v42  ;;  %v13614_v42 = vpop.f32.mrb[44].mxu0 }
 0x140   :  { %v601_v10 = vmax.f32 %v497_v59, 0.0  ;;  %v500_v38 = vadd.f32 %v11114_v12, %v13396_v8  ;;  %v491_v45 = vpop.f32.mrb[51].mxu1  ;;  %v9864_v59 = vld [vmem:[%s15133_s0 + $0x6e0] sm:$0xff]  ;;  %15166 = vst [vmem:[#allocation31_spill] sm:$0xff] %v13614_v42  ;;  %v13617_v28 = vpop.f32.mrb[45].mxu0 }
 0x141   :  { %v599_v53 = vmax.f32 %v489_v7, 0.0  ;;  %v492_v47 = vadd.f32 %v13396_v8, %v491_v45  ;;  %v2233_v7 = vpack.c.bf16 %v9863_v41, %v9862_v56  ;;  %15167 = vst [vmem:[#allocation32_spill] sm:$0xff] %v13617_v28  ;;  %v13620_v56 = vpop.f32.mrb[46].mxu0 }
 0x142   :  { %665 = vst [vmem:[#allocation2 + $0x190] sm:$0xff] %v601_v10  ;;  %v602_v16 = vmax.f32 %v500_v38, 0.0  ;;  %11288 = vmatmul.mubr.msk.bf16.gmra.mrb[156].mxu1 %vm158_vm2, %v2231_v3  ;;  %15168 = vst [vmem:[#allocation33_spill] sm:$0xff] %v13620_v56 }
 0x143   :  { %663 = vst [vmem:[#allocation2 + $0x180] sm:$0xff] %v599_v53  ;;  %v600_v4 = vmax.f32 %v492_v47, 0.0  ;;  %11291 = vmatprep.mubr.msk.bf16.mxu1 %vm158_vm2, %v2232_v18  ;;  %v9865_v47 = vld [vmem:[%s15133_s0 + $0x6e8] sm:$0xff] }
 0x144   :  { %666 = vst [vmem:[#allocation2 + $0x198] sm:$0xff] %v602_v16  ;;  %v2234_v10 = vpack.c.bf16 %v9865_v47, %v9864_v59  ;;  %v9866_v59 = vld [vmem:[%s15133_s0 + $0x6f0] sm:$0xff]  ;;  %v9867_v47 = vld [vmem:[%s15133_s0 + $0x6f8] sm:$0xff] }
 0x145   :  { %664 = vst [vmem:[#allocation2 + $0x188] sm:$0xff] %v600_v4  ;;  %v11117_v53 = vpop.f32.mrb[52].mxu1 }
 0x146   :  { %v513_v61 = vadd.f32 %v11117_v53, %v13396_v8  ;;  %v504_v3 = vpop.f32.mrb[53].mxu1  ;;  %v13629_v53 = vpop.f32.mrb[47].mxu0 }
 0x147   :  { %v505_v12 = vadd.f32 %v13396_v8, %v504_v3  ;;  %v11118_v18 = vpop.f32.mrb[54].mxu1  ;;  %15169 = vst [vmem:[#allocation34_spill] sm:$0xff] %v13629_v53  ;;  %v13640_v53 = vpop.f32.mrb[48].mxu0 }
 0x148   :  { %v605_v38 = vmax.f32 %v513_v61, 0.0  ;;  %v516_v45 = vadd.f32 %v11118_v18, %v13396_v8  ;;  %v507_v16 = vpop.f32.mrb[55].mxu1  ;;  %v9868_v61 = vld [vmem:[%s15133_s0 + $0x700] sm:$0xff]  ;;  %15170 = vst [vmem:[#allocation35_spill] sm:$0xff] %v13640_v53  ;;  %v13643_v42 = vpop.f32.mrb[49].mxu0 }
 0x149   :  { %v603_v55 = vmax.f32 %v505_v12, 0.0  ;;  %v508_v23 = vadd.f32 %v13396_v8, %v507_v16  ;;  %v2235_v12 = vpack.c.bf16 %v9867_v47, %v9866_v59  ;;  %15171 = vst [vmem:[#allocation36_spill] sm:$0xff] %v13643_v42  ;;  %v13646_v59 = vpop.f32.mrb[50].mxu0 }
 0x14a   :  { %669 = vst [vmem:[#allocation2 + $0x1b0] sm:$0xff] %v605_v38  ;;  %v606_v4 = vmax.f32 %v516_v45, 0.0  ;;  %11292 = vmatmul.mubr.msk.bf16.gmra.mrb[160].mxu1 %vm158_vm2, %v2233_v7  ;;  %15172 = vst [vmem:[#allocation37_spill] sm:$0xff] %v13646_v59 }
 0x14b   :  { %667 = vst [vmem:[#allocation2 + $0x1a0] sm:$0xff] %v603_v55  ;;  %v604_v41 = vmax.f32 %v508_v23, 0.0  ;;  %11295 = vmatprep.mubr.msk.bf16.mxu1 %vm158_vm2, %v2234_v10  ;;  %v9869_v23 = vld [vmem:[%s15133_s0 + $0x708] sm:$0xff] }
 0x14c   :  { %670 = vst [vmem:[#allocation2 + $0x1b8] sm:$0xff] %v606_v4  ;;  %v2236_v38 = vpack.c.bf16 %v9869_v23, %v9868_v61  ;;  %v9870_v61 = vld [vmem:[%s15133_s0 + $0x710] sm:$0xff]  ;;  %v9871_v23 = vld [vmem:[%s15133_s0 + $0x718] sm:$0xff] }
 0x14d   :  { %668 = vst [vmem:[#allocation2 + $0x1a8] sm:$0xff] %v604_v41  ;;  %v11121_v55 = vpop.f32.mrb[56].mxu1 }
 0x14e   :  { %v529_v3 = vadd.f32 %v11121_v55, %v13396_v8  ;;  %v520_v7 = vpop.f32.mrb[57].mxu1  ;;  %v13655_v55 = vpop.f32.mrb[51].mxu0 }
 0x14f   :  { %v521_v18 = vadd.f32 %v13396_v8, %v520_v7  ;;  %v11122_v10 = vpop.f32.mrb[58].mxu1  ;;  %15173 = vst [vmem:[#allocation38_spill] sm:$0xff] %v13655_v55 }
 0x150   :  { %v609_v45 = vmax.f32 %v529_v3, 0.0  ;;  %v532_v16 = vadd.f32 %v11122_v10, %v13396_v8  ;;  %v523_v4 = vpop.f32.mrb[59].mxu1  ;;  %v9872_v3 = vld [vmem:[%s15133_s0 + $0x720] sm:$0xff] }
 0x151   :  { %v607_v56 = vmax.f32 %v521_v18, 0.0  ;;  %v524_v28 = vadd.f32 %v13396_v8, %v523_v4  ;;  %v2237_v18 = vpack.c.bf16 %v9871_v23, %v9870_v61  ;;  %v297_v4 = vadd.f32 %v13396_v8, %v13261_v11  ;;  %v9875_v11 = vld [vmem:[%s15133_s0 + $0x738] sm:$0xff] }
 0x152   :  { %673 = vst [vmem:[#allocation2 + $0x1d0] sm:$0xff] %v609_v45  ;;  %v610_v41 = vmax.f32 %v532_v16, 0.0  ;;  %11296 = vmatmul.mubr.msk.bf16.gmra.mrb[164].mxu1 %vm158_vm2, %v2235_v12  ;;  %v305_v16 = vadd.f32 %v13259_v9, %v13396_v8  ;;  %v13676_v61 = vadd.f32 %v13396_v8, %v13265_v15  ;;  %v9874_v9 = vld [vmem:[%s15133_s0 + $0x730] sm:$0xff]  ;;  %v13692_v15 = vadd.f32 %v13281_v19, %v13396_v8 }
 0x153   :  { %671 = vst [vmem:[#allocation2 + $0x1c0] sm:$0xff] %v607_v56  ;;  %v608_v47 = vmax.f32 %v524_v28, 0.0  ;;  %11299 = vmatprep.mubr.msk.bf16.mxu1 %vm158_vm2, %v2236_v38  ;;  %v9873_v28 = vld [vmem:[%s15133_s0 + $0x728] sm:$0xff]  ;;  %v1653_v19 = vadd.f32 %v13311_v35, %v13396_v8  ;;  %v13720_v35 = vadd.f32 %v13396_v8, %v13283_v20  ;;  %v1648_v20 = vadd.f32 %v13396_v8, %v13325_v40 }
 0x154   :  { %674 = vst [vmem:[#allocation2 + $0x1d8] sm:$0xff] %v610_v41  ;;  %v2238_v45 = vpack.c.bf16 %v9873_v28, %v9872_v3 }
 0x155   :  { %672 = vst [vmem:[#allocation2 + $0x1c8] sm:$0xff] %v608_v47  ;;  %v11125_v56 = vpop.f32.mrb[60].mxu1  ;;  %v13670_v47 = vpop.f32.mrb[52].mxu0  ;;  %v1901_v42 = vmax.f32 %v1653_v19, 0.0 }
 0x156   :  { %v545_v7 = vadd.f32 %v11125_v56, %v13396_v8  ;;  %v536_v12 = vpop.f32.mrb[61].mxu1  ;;  %15174 = vst [vmem:[#allocation39_spill] sm:$0xff] %v13670_v47  ;;  %v308_v56 = vadd.f32 %v13263_v13, %v13396_v8  ;;  %v13685_v28 = vpop.f32.mrb[53].mxu0 }
 0x157   :  { %v537_v10 = vadd.f32 %v13396_v8, %v536_v12  ;;  %v11126_v38 = vpop.f32.mrb[62].mxu1  ;;  %15175 = vst [vmem:[#allocation40_spill] sm:$0xff] %v13685_v28  ;;  %v13688_v13 = vpop.f32.mrb[54].mxu0  ;;  %v9876_v12 = vld [vmem:[%s15133_s0 + $0x740] sm:$0xff]  ;;  %v13711_v28 = vld [vmem:[%s15133_s0 + $0x750] sm:$0xff] }
 0x158   :  { %v613_v41 = vmax.f32 %v545_v7, 0.0  ;;  %v548_v55 = vadd.f32 %v11126_v38, %v13396_v8  ;;  %v539_v59 = vpop.f32.mrb[63].mxu1  ;;  %15176 = vst [vmem:[#allocation41_spill] sm:$0xff] %v13688_v13  ;;  %v2239_v38 = vpack.c.bf16 %v9875_v11, %v9874_v9  ;;  %v1645_v13 = vadd.f32 %v13396_v8, %v13313_v36 }
 0x159   :  { %v611_v23 = vmax.f32 %v537_v10, 0.0  ;;  %v540_v3 = vadd.f32 %v13396_v8, %v539_v59  ;;  %v13701_v10 = vpop.f32.mrb[55].mxu0  ;;  %v1656_v36 = vadd.f32 %v13316_v37, %v13396_v8  ;;  %v557_v9 = vmax.f32 %v13692_v15, 0.0 }
 0x15a   :  { %677 = vst [vmem:[#allocation2 + $0x1f0] sm:$0xff] %v613_v41  ;;  %v614_v7 = vmax.f32 %v548_v55, 0.0  ;;  %11300 = vmatmul.mubr.msk.bf16.gmra.mrb[168].mxu1 %vm158_vm2, %v2237_v18  ;;  %v9877_v55 = vld [vmem:[%s15133_s0 + $0x748] sm:$0xff]  ;;  %15177 = vst [vmem:[#allocation42_spill] sm:$0xff] %v13701_v10  ;;  %v553_v18 = vmax.f32 %v305_v16, 0.0  ;;  %v551_v41 = vmax.f32 %v297_v4, 0.0  ;;  %v13728_v11 = vadd.f32 %v13285_v22, %v13396_v8 }
 0x15b   :  { %675 = vst [vmem:[#allocation2 + $0x1e0] sm:$0xff] %v611_v23  ;;  %v612_v59 = vmax.f32 %v540_v3, 0.0  ;;  %11303 = vmatprep.mubr.msk.bf16.mxu1 %vm158_vm2, %v2238_v45  ;;  %v554_v23 = vmax.f32 %v308_v56, 0.0  ;;  %v552_v45 = vmax.f32 %v13676_v61, 0.0  ;;  %v13716_v16 = vld [vmem:[%s15133_s0 + $0x758] sm:$0xff]  ;;  %v2240_v61 = vpack.c.bf16 %v9877_v55, %v9876_v12 }
 0x15c   :  { %678 = vst [vmem:[#allocation2 + $0x1f8] sm:$0xff] %v614_v7  ;;  %v2241_v37 = vpack.c.bf16 %v13716_v16, %v13711_v28  ;;  %v13738_v15 = vadd.f32 %v13396_v8, %v13287_v24  ;;  %v1899_v55 = vmax.f32 %v1645_v13, 0.0  ;;  %v558_v19 = vmax.f32 %v13728_v11, 0.0 }
 0x15d   :  { %676 = vst [vmem:[#allocation2 + $0x1e8] sm:$0xff] %v612_v59  ;;  %v11133_v3 = vpop.f32.mrb[64].mxu1  ;;  %v1900_v28 = vmax.f32 %v1648_v20, 0.0  ;;  %v13747_v24 = vadd.f32 %v13303_v29, %v13396_v8  ;;  %v1661_v29 = vadd.f32 %v13396_v8, %v13343_v50  ;;  %v1664_v50 = vadd.f32 %v13396_v8, %v13355_v54  ;;  %v9883_v20 = vld [vmem:[%s15133_s0 + $0x778] sm:$0xff] }
 0x15e   :  { %v915_v4 = vadd.f32 %v11133_v3, %v13396_v8  ;;  %v906_v56 = vpop.f32.mrb[65].mxu1  ;;  %v340_v54 = vadd.f32 %v13307_v32, %v13396_v8  ;;  %v332_v32 = vadd.f32 %v13396_v8, %v13309_v34  ;;  %v1677_v34 = vadd.f32 %v13396_v8, %v13373_v1 }
 0x15f   :  { %v907_v7 = vadd.f32 %v13396_v8, %v906_v56  ;;  %v11134_v59 = vpop.f32.mrb[66].mxu1  ;;  %v555_v56 = vmax.f32 %v13720_v35, 0.0  ;;  %v1680_v1 = vadd.f32 %v13396_v8, %v13385_v5  ;;  %v9887_v5 = vld [vmem:[%s15133_s0 + $0x798] sm:$0xff] }
 0x160   :  { %v1163_v10 = vmax.f32 %v915_v4, 0.0  ;;  %v918_v3 = vadd.f32 %v11134_v59, %v13396_v8  ;;  %v909_v47 = vpop.f32.mrb[67].mxu1  ;;  %v1902_v4 = vmax.f32 %v1656_v36, 0.0 }
 0x161   :  { %v1161_v22 = vmax.f32 %v907_v7, 0.0  ;;  %v910_v12 = vadd.f32 %v13396_v8, %v909_v47 }
 0x162   :  { %v1291_v53 = vmax.f32 %v553_v18, %v1163_v10  ;;  %v1164_v40 = vmax.f32 %v918_v3, 0.0  ;;  %11304 = vmatmul.mubr.msk.bf16.gmra.mrb[172].mxu1 %vm158_vm2, %v2239_v38  ;;  %v1669_v10 = vadd.f32 %v13341_v49, %v13396_v8  ;;  %v9880_v18 = vld [vmem:[%s15133_s0 + $0x760] sm:$0xff]  ;;  %v9881_v38 = vld [vmem:[%s15133_s0 + $0x768] sm:$0xff] }
 0x163   :  { %v1289_v59 = vmax.f32 %v551_v41, %v1161_v22  ;;  %v1162_v26 = vmax.f32 %v910_v12, 0.0  ;;  %11307 = vmatprep.mubr.msk.bf16.mxu1 %vm158_vm2, %v2240_v61  ;;  %v556_v41 = vmax.f32 %v13738_v15, 0.0  ;;  %v1672_v61 = vadd.f32 %v13346_v51, %v13396_v8 }
 0x164   :  { %v1292_v47 = vmax.f32 %v554_v23, %v1164_v40  ;;  %v2029_v13 = vmax.f32 %v1291_v53, %v1901_v42  ;;  %v13762_v42 = vadd.f32 %v13396_v8, %v13305_v30  ;;  %v2242_v7 = vpack.c.bf16 %v9881_v38, %v9880_v18  ;;  %v13773_v30 = vld [vmem:[%s15133_s0 + $0x770] sm:$0xff] }
 0x165   :  { %v1290_v16 = vmax.f32 %v552_v45, %v1162_v26  ;;  %v11137_v35 = vpop.f32.mrb[68].mxu1  ;;  %v2027_v36 = vmax.f32 %v1289_v59, %v1899_v55  ;;  %v561_v51 = vmax.f32 %v13747_v24, 0.0  ;;  %v1905_v12 = vmax.f32 %v1669_v10, 0.0 }
 0x166   :  { %v931_v49 = vadd.f32 %v11137_v35, %v13396_v8  ;;  %v922_v53 = vpop.f32.mrb[69].mxu1  ;;  %2093 = vst [vmem:[#allocation2 + $0x10] sm:$0xff] %v2029_v13  ;;  %v2030_v23 = vmax.f32 %v1292_v47, %v1902_v4  ;;  %v1903_v4 = vmax.f32 %v1661_v29, 0.0  ;;  %v1906_v47 = vmax.f32 %v1672_v61, 0.0 }
 0x167   :  { %v923_v11 = vadd.f32 %v13396_v8, %v922_v53  ;;  %v11138_v26 = vpop.f32.mrb[70].mxu1  ;;  %2091 = vst [vmem:[#allocation2] sm:$0xff] %v2027_v36  ;;  %v2028_v45 = vmax.f32 %v1290_v16, %v1900_v28  ;;  %v2243_v24 = vpack.c.bf16 %v9883_v20, %v13773_v30  ;;  %v559_v13 = vmax.f32 %v13762_v42, 0.0 }
 0x168   :  { %v1167_v3 = vmax.f32 %v931_v49, 0.0  ;;  %v934_v15 = vadd.f32 %v11138_v26, %v13396_v8  ;;  %v925_v22 = vpop.f32.mrb[71].mxu1  ;;  %2094 = vst [vmem:[#allocation2 + $0x18] sm:$0xff] %v2030_v23  ;;  %v1904_v10 = vmax.f32 %v1664_v50, 0.0  ;;  %v562_v36 = vmax.f32 %v340_v54, 0.0 }
 0x169   :  { %v1165_v55 = vmax.f32 %v923_v11, 0.0  ;;  %v926_v40 = vadd.f32 %v13396_v8, %v925_v22  ;;  %2092 = vst [vmem:[#allocation2 + $0x8] sm:$0xff] %v2028_v45  ;;  %v1688_v61 = vadd.f32 %v13376_v2, %v13396_v8  ;;  %v1907_v22 = vmax.f32 %v1677_v34, 0.0 }
 0x16a   :  { %v1295_v59 = vmax.f32 %v557_v9, %v1167_v3  ;;  %v1168_v28 = vmax.f32 %v934_v15, 0.0  ;;  %11308 = vmatmul.mubr.msk.bf16.gmra.mrb[176].mxu1 %vm158_vm2, %v2241_v37  ;;  %v1685_v9 = vadd.f32 %v13371_v63, %v13396_v8  ;;  %v9884_v37 = vld [vmem:[%s15133_s0 + $0x780] sm:$0xff]  ;;  %v345_v3 = vadd.f32 %v13396_v8, %v13335_v44 }
 0x16b   :  { %v1293_v18 = vmax.f32 %v555_v56, %v1165_v55  ;;  %v1166_v38 = vmax.f32 %v926_v40, 0.0  ;;  %11311 = vmatprep.mubr.msk.bf16.mxu1 %vm158_vm2, %v2242_v7  ;;  %v9885_v56 = vld [vmem:[%s15133_s0 + $0x788] sm:$0xff]  ;;  %v560_v7 = vmax.f32 %v332_v32, 0.0  ;;  %v1910_v44 = vmax.f32 %v1688_v61, 0.0 }
 0x16c   :  { %v1296_v16 = vmax.f32 %v558_v19, %v1168_v28  ;;  %v2033_v35 = vmax.f32 %v1295_v59, %v1905_v12  ;;  %v13801_v19 = vadd.f32 %v13333_v43, %v13396_v8  ;;  %v2244_v45 = vpack.c.bf16 %v9885_v56, %v9884_v37  ;;  %v9886_v12 = vld [vmem:[%s15133_s0 + $0x790] sm:$0xff] }
 0x16d   :  { %v1294_v29 = vmax.f32 %v556_v41, %v1166_v38  ;;  %v11141_v42 = vpop.f32.mrb[72].mxu1  ;;  %v2031_v49 = vmax.f32 %v1293_v18, %v1903_v4  ;;  %v1909_v20 = vmax.f32 %v1685_v9, 0.0  ;;  %v356_v4 = vadd.f32 %v13337_v46, %v13396_v8 }
 0x16e   :  { %v947_v63 = vadd.f32 %v11141_v42, %v13396_v8  ;;  %v938_v53 = vpop.f32.mrb[73].mxu1  ;;  %2097 = vst [vmem:[#allocation2 + $0x30] sm:$0xff] %v2033_v35  ;;  %v2034_v23 = vmax.f32 %v1296_v16, %v1906_v47  ;;  %v565_v54 = vmax.f32 %v13801_v19, 0.0  ;;  %v1908_v47 = vmax.f32 %v1680_v1, 0.0 }
 0x16f   :  { %v939_v11 = vadd.f32 %v13396_v8, %v938_v53  ;;  %v11142_v41 = vpop.f32.mrb[74].mxu1  ;;  %2095 = vst [vmem:[#allocation2 + $0x20] sm:$0xff] %v2031_v49  ;;  %v2032_v26 = vmax.f32 %v1294_v29, %v1904_v10  ;;  %v2245_v10 = vpack.c.bf16 %v9887_v5, %v9886_v12  ;;  %v1701_v32 = vadd.f32 %v13401_v27, %v13396_v8  ;;  %v9892_v5 = vld [vmem:[%s15133_s0 + $0x7c0] sm:$0xff] }
 0x170   :  { %v1171_v43 = vmax.f32 %v947_v63, 0.0  ;;  %v950_v50 = vadd.f32 %v11142_v41, %v13396_v8  ;;  %v941_v30 = vpop.f32.mrb[75].mxu1  ;;  %2098 = vst [vmem:[#allocation2 + $0x38] sm:$0xff] %v2034_v23  ;;  %v348_v46 = vadd.f32 %v13396_v8, %v13339_v48  ;;  %v1693_v9 = vadd.f32 %v13396_v8, %v13404_v33 }
 0x171   :  { %v1169_v2 = vmax.f32 %v939_v11, 0.0  ;;  %v942_v15 = vadd.f32 %v13396_v8, %v941_v30  ;;  %2096 = vst [vmem:[#allocation2 + $0x28] sm:$0xff] %v2032_v26  ;;  %v563_v37 = vmax.f32 %v345_v3, 0.0  ;;  %v1704_v29 = vadd.f32 %v13407_v39, %v13396_v8 }
 0x172   :  { %v1299_v55 = vmax.f32 %v561_v51, %v1171_v43  ;;  %v1172_v40 = vmax.f32 %v950_v50, 0.0  ;;  %11312 = vmatmul.mubr.msk.bf16.gmra.mrb[180].mxu1 %vm158_vm2, %v2243_v24  ;;  %v9888_v51 = vld [vmem:[%s15133_s0 + $0x7a0] sm:$0xff]  ;;  %v9889_v24 = vld [vmem:[%s15133_s0 + $0x7a8] sm:$0xff]  ;;  %v1696_v19 = vadd.f32 %v13396_v8, %v13419_v52  ;;  %v566_v63 = vmax.f32 %v356_v4, 0.0  ;;  %v9890_v43 = vld [vmem:[%s15133_s0 + $0x7b0] sm:$0xff] }
 0x173   :  { %v1297_v59 = vmax.f32 %v559_v13, %v1169_v2  ;;  %v1170_v28 = vmax.f32 %v942_v15, 0.0  ;;  %11315 = vmatprep.mubr.msk.bf16.mxu1 %vm158_vm2, %v2244_v45  ;;  %v2246_v34 = vpack.c.bf16 %v9889_v24, %v9888_v51  ;;  %v1913_v61 = vmax.f32 %v1701_v32, 0.0  ;;  %v9891_v50 = vld [vmem:[%s15133_s0 + $0x7b8] sm:$0xff] }
 0x174   :  { %v1300_v18 = vmax.f32 %v562_v36, %v1172_v40  ;;  %v2037_v38 = vmax.f32 %v1299_v55, %v1909_v20  ;;  %v564_v11 = vmax.f32 %v348_v46, 0.0  ;;  %v1911_v26 = vmax.f32 %v1693_v9, 0.0 }
 0x175   :  { %v1298_v13 = vmax.f32 %v560_v7, %v1170_v28  ;;  %v11145_v16 = vpop.f32.mrb[76].mxu1  ;;  %v2035_v35 = vmax.f32 %v1297_v59, %v1907_v22  ;;  %v369_v45 = vadd.f32 %v13363_v57, %v13396_v8  ;;  %v1914_v52 = vmax.f32 %v1704_v29, 0.0 }
 0x176   :  { %v963_v27 = vadd.f32 %v11145_v16, %v13396_v8  ;;  %v954_v56 = vpop.f32.mrb[77].mxu1  ;;  %2101 = vst [vmem:[#allocation2 + $0x50] sm:$0xff] %v2037_v38  ;;  %v2038_v36 = vmax.f32 %v1300_v18, %v1910_v44  ;;  %v361_v30 = vadd.f32 %v13396_v8, %v13365_v58  ;;  %v1912_v57 = vmax.f32 %v1696_v19, 0.0  ;;  %v9893_v58 = vld [vmem:[%s15133_s0 + $0x7c8] sm:$0xff] }
 0x177   :  { %v955_v42 = vadd.f32 %v13396_v8, %v954_v56  ;;  %v11146_v49 = vpop.f32.mrb[78].mxu1  ;;  %2099 = vst [vmem:[#allocation2 + $0x40] sm:$0xff] %v2035_v35  ;;  %v2036_v48 = vmax.f32 %v1298_v13, %v1908_v47  ;;  %v372_v2 = vadd.f32 %v13367_v60, %v13396_v8  ;;  %v1717_v12 = vadd.f32 %v13432_v17, %v13396_v8 }
 0x178   :  { %v1175_v33 = vmax.f32 %v963_v27, 0.0  ;;  %v966_v53 = vadd.f32 %v11146_v49, %v13396_v8  ;;  %v957_v23 = vpop.f32.mrb[79].mxu1  ;;  %2102 = vst [vmem:[#allocation2 + $0x58] sm:$0xff] %v2038_v36  ;;  %v2247_v44 = vpack.c.bf16 %v9891_v50, %v9890_v43  ;;  %v1709_v60 = vadd.f32 %v13396_v8, %v13435_v21  ;;  %v13877_v21 = vld [vmem:[%s15135_s2] ss:$0 sm:$0xff] }
 0x179   :  { %v1173_v41 = vmax.f32 %v955_v42, 0.0  ;;  %v958_v39 = vadd.f32 %v13396_v8, %v957_v23  ;;  %2100 = vst [vmem:[#allocation2 + $0x48] sm:$0xff] %v2036_v48  ;;  %v364_v4 = vadd.f32 %v13396_v8, %v13369_v62  ;;  %v1720_v47 = vadd.f32 %v13438_v25, %v13396_v8  ;;  %v9894_v48 = vld [vmem:[%s15133_s0 + $0x7d0] sm:$0xff]  ;;  %v9897_v23 = vld [vmem:[%s15133_s0 + $0x7e8] sm:$0xff] }
 0x17a   :  { %v1303_v1 = vmax.f32 %v565_v54, %v1175_v33  ;;  %v1176_v7 = vmax.f32 %v966_v53, 0.0  ;;  %11316 = vmatmul.mubr.msk.bf16.gmra.mrb[184].mxu1 %vm158_vm2, %v2245_v10  ;;  %v2248_v32 = vpack.c.bf16 %v9893_v58, %v9892_v5  ;;  %v1712_v62 = vadd.f32 %v13877_v21, %v13447_v31  ;;  %v9896_v53 = vld [vmem:[%s15133_s0 + $0x7e0] sm:$0xff] }
 0x17b   :  { %v1301_v20 = vmax.f32 %v563_v37, %v1173_v41  ;;  %v1174_v3 = vmax.f32 %v958_v39, 0.0  ;;  %11319 = vmatprep.mubr.msk.bf16.mxu1 %vm158_vm2, %v2246_v34  ;;  %v569_v51 = vmax.f32 %v369_v45, 0.0  ;;  %v1917_v25 = vmax.f32 %v1717_v12, 0.0  ;;  %v9895_v34 = vld [vmem:[%s15133_s0 + $0x7d8] sm:$0xff] }
 0x17c   :  { %v1304_v15 = vmax.f32 %v566_v63, %v1176_v7  ;;  %v2041_v22 = vmax.f32 %v1303_v1, %v1913_v61  ;;  %v1915_v9 = vmax.f32 %v1709_v60, 0.0  ;;  %v570_v37 = vmax.f32 %v372_v2, 0.0  ;;  %v1248_v60 = vld [vmem:[#allocation2 + $0xb8] sm:$0xff] }
 0x17d   :  { %v1302_v54 = vmax.f32 %v564_v11, %v1174_v3  ;;  %v11149_v55 = vpop.f32.mrb[80].mxu1  ;;  %v2039_v40 = vmax.f32 %v1301_v20, %v1911_v26  ;;  %v1918_v36 = vmax.f32 %v1720_v47, 0.0  ;;  %v568_v31 = vmax.f32 %v364_v4, 0.0  ;;  %v15178_v20 = vld [vmem:[#allocation10_spill] sm:$0xff] }
 0x17e   :  { %v979_v17 = vadd.f32 %v11149_v55, %v13396_v8  ;;  %v970_v59 = vpop.f32.mrb[81].mxu1  ;;  %2105 = vst [vmem:[#allocation2 + $0x70] sm:$0xff] %v2041_v22  ;;  %v2042_v28 = vmax.f32 %v1304_v15, %v1914_v52  ;;  %v1916_v49 = vmax.f32 %v1712_v62, 0.0  ;;  %v1733_v33 = vadd.f32 %v13877_v21, %v13458_v6  ;;  %v1247_v22 = vld [vmem:[#allocation2 + $0xb0] sm:$0xff] }
 0x17f   :  { %v971_v18 = vadd.f32 %v13396_v8, %v970_v59  ;;  %v11150_v38 = vpop.f32.mrb[82].mxu1  ;;  %2103 = vst [vmem:[#allocation2 + $0x60] sm:$0xff] %v2039_v40  ;;  %v2040_v10 = vmax.f32 %v1302_v54, %v1912_v57  ;;  %v567_v8 = vmax.f32 %v361_v30, 0.0  ;;  %v1725_v39 = vadd.f32 %v13877_v21, %v13461_v14  ;;  %v1245_v54 = vld [vmem:[#allocation2 + $0xa0] sm:$0xff]  ;;  %v9898_v59 = vld [vmem:[%s15133_s0 + $0x7f0] sm:$0xff] }
 0x180   :  { %v1179_v24 = vmax.f32 %v979_v17, 0.0  ;;  %v982_v46 = vadd.f32 %v13877_v21, %v11150_v38  ;;  %v973_v13 = vpop.f32.mrb[83].mxu1  ;;  %2106 = vst [vmem:[#allocation2 + $0x78] sm:$0xff] %v2042_v28  ;;  %v2249_v6 = vpack.c.bf16 %v9895_v34, %v9894_v48  ;;  %v1736_v7 = vadd.f32 %v13877_v21, %v13464_v0  ;;  %v9899_v28 = vld [vmem:[%s15133_s0 + $0x7f8] sm:$0xff] }
 0x181   :  { %v1177_v16 = vmax.f32 %v971_v18, 0.0  ;;  %v974_v35 = vadd.f32 %v13877_v21, %v973_v13  ;;  %2104 = vst [vmem:[#allocation2 + $0x68] sm:$0xff] %v2040_v10  ;;  %v2250_v30 = vpack.c.bf16 %v9897_v23, %v9896_v53  ;;  %v1728_v3 = vadd.f32 %v13877_v21, %v15178_v20  ;;  %v1246_v18 = vld [vmem:[#allocation2 + $0xa8] sm:$0xff]  ;;  %v15179_v10 = vld [vmem:[#allocation11_spill] sm:$0xff] }
 0x182   :  { %v1307_v27 = vmax.f32 %v569_v51, %v1179_v24  ;;  %v1180_v56 = vmax.f32 %v982_v46, 0.0  ;;  %11320 = vmatmul.mubr.msk.bf16.gmra.mrb[188].mxu1 %vm158_vm2, %v2247_v44  ;;  %v1921_v15 = vmax.f32 %v1733_v33, 0.0  ;;  %v1919_v0 = vmax.f32 %v1725_v39, 0.0  ;;  %v15180_v46 = vld [vmem:[#allocation12_spill] sm:$0xff] }
 0x183   :  { %v1305_v29 = vmax.f32 %v567_v8, %v1177_v16  ;;  %v1178_v42 = vmax.f32 %v974_v35, 0.0  ;;  %11323 = vmatprep.mubr.msk.bf16.mxu1 %vm158_vm2, %v2248_v32  ;;  %v1922_v40 = vmax.f32 %v1736_v7, 0.0  ;;  %v1920_v17 = vmax.f32 %v1728_v3, 0.0  ;;  %v1250_v7 = vld [vmem:[#allocation2 + $0xc8] sm:$0xff] }
 0x184   :  { %v1308_v19 = vmax.f32 %v570_v37, %v1180_v56  ;;  %v2045_v63 = vmax.f32 %v1307_v27, %v1917_v25  ;;  %v1749_v32 = vadd.f32 %v13877_v21, %v15179_v10  ;;  %v1741_v13 = vadd.f32 %v13877_v21, %v15180_v46  ;;  %v1253_v10 = vld [vmem:[#allocation2 + $0xe0] sm:$0xff] }
 0x185   :  { %v1306_v61 = vmax.f32 %v568_v31, %v1178_v42  ;;  %v11153_v11 = vpop.f32.mrb[84].mxu1  ;;  %v2043_v41 = vmax.f32 %v1305_v29, %v1915_v9  ;;  %v2251_v35 = vpack.c.bf16 %v9899_v28, %v9898_v59  ;;  %v15181_v9 = vld [vmem:[#allocation13_spill] sm:$0xff]  ;;  %v15182_v31 = vld [vmem:[#allocation14_spill] sm:$0xff] }
 0x186   :  { %v995_v26 = vadd.f32 %v13877_v21, %v11153_v11  ;;  %v986_v45 = vpop.f32.mrb[85].mxu1  ;;  %2109 = vst [vmem:[#allocation2 + $0x90] sm:$0xff] %v2045_v63  ;;  %v2046_v1 = vmax.f32 %v1308_v19, %v1918_v36  ;;  %v1752_v37 = vadd.f32 %v13877_v21, %v15181_v9  ;;  %v1744_v29 = vadd.f32 %v13877_v21, %v15182_v31  ;;  %v1251_v19 = vld [vmem:[#allocation2 + $0xd0] sm:$0xff] }
 0x187   :  { %v987_v52 = vadd.f32 %v13877_v21, %v986_v45  ;;  %v11154_v43 = vpop.f32.mrb[86].mxu1  ;;  %2107 = vst [vmem:[#allocation2 + $0x80] sm:$0xff] %v2043_v41  ;;  %v2044_v50 = vmax.f32 %v1306_v61, %v1916_v49  ;;  %v1925_v34 = vmax.f32 %v1749_v32, 0.0  ;;  %v1923_v53 = vmax.f32 %v1741_v13, 0.0  ;;  %v1249_v61 = vld [vmem:[#allocation2 + $0xc0] sm:$0xff]  ;;  %v1255_v59 = vld [vmem:[#allocation2 + $0xf0] sm:$0xff] }
 0x188   :  { %v1183_v57 = vmax.f32 %v995_v26, 0.0  ;;  %v998_v14 = vadd.f32 %v13877_v21, %v11154_v43  ;;  %v989_v2 = vpop.f32.mrb[87].mxu1  ;;  %2110 = vst [vmem:[#allocation2 + $0x98] sm:$0xff] %v2046_v1  ;;  %v1926_v41 = vmax.f32 %v1752_v37, 0.0  ;;  %v1252_v26 = vld [vmem:[#allocation2 + $0xd8] sm:$0xff]  ;;  %v1924_v1 = vmax.f32 %v1744_v29, 0.0 }
 0x189   :  { %v1181_v12 = vmax.f32 %v987_v52, 0.0  ;;  %v990_v5 = vadd.f32 %v13877_v21, %v989_v2  ;;  %2108 = vst [vmem:[#allocation2 + $0x88] sm:$0xff] %v2044_v50  ;;  %v15183_v43 = vld [vmem:[#allocation15_spill] sm:$0xff] }
 0x18a   :  { %v1311_v58 = vmax.f32 %v1247_v22, %v1183_v57  ;;  %v1184_v55 = vmax.f32 %v998_v14, 0.0  ;;  %11324 = vmatmul.mubr.msk.bf16.gmra.mrb[192].mxu1 %vm158_vm2, %v2249_v6  ;;  %v1765_v50 = vadd.f32 %v13877_v21, %v15183_v43  ;;  %v15184_v57 = vld [vmem:[#allocation16_spill] sm:$0xff] }
 0x18b   :  { %v1309_v44 = vmax.f32 %v1245_v54, %v1181_v12  ;;  %v1182_v4 = vmax.f32 %v990_v5, 0.0  ;;  %11327 = vmatprep.mubr.msk.bf16.mxu1 %vm158_vm2, %v2250_v30  ;;  %v1757_v14 = vadd.f32 %v13877_v21, %v15184_v57  ;;  %v15185_v12 = vld [vmem:[#allocation17_spill] sm:$0xff] }
 0x18c   :  { %v1312_v47 = vmax.f32 %v1248_v60, %v1184_v55  ;;  %v2049_v38 = vmax.f32 %v1311_v58, %v1921_v15  ;;  %v1768_v5 = vadd.f32 %v13877_v21, %v15185_v12  ;;  %v15186_v55 = vld [vmem:[#allocation18_spill] sm:$0xff] }
 0x18d   :  { %v1310_v62 = vmax.f32 %v1246_v18, %v1182_v4  ;;  %v11157_v51 = vpop.f32.mrb[88].mxu1  ;;  %v2047_v24 = vmax.f32 %v1309_v44, %v1919_v0  ;;  %v1927_v18 = vmax.f32 %v1757_v14, 0.0 }
 0x18e   :  { %v1011_v25 = vadd.f32 %v13877_v21, %v11157_v51  ;;  %v1002_v8 = vpop.f32.mrb[89].mxu1  ;;  %2113 = vst [vmem:[#allocation2 + $0xb0] sm:$0xff] %v2049_v38  ;;  %v2050_v16 = vmax.f32 %v1312_v47, %v1922_v40  ;;  %v1760_v40 = vadd.f32 %v13877_v21, %v15186_v55 }
 0x18f   :  { %v1003_v27 = vadd.f32 %v13877_v21, %v1002_v8  ;;  %v11158_v56 = vpop.f32.mrb[90].mxu1  ;;  %2111 = vst [vmem:[#allocation2 + $0xa0] sm:$0xff] %v2047_v24  ;;  %v2048_v36 = vmax.f32 %v1310_v62, %v1920_v17  ;;  %v1929_v17 = vmax.f32 %v1765_v50, 0.0  ;;  %v1930_v62 = vmax.f32 %v1768_v5, 0.0  ;;  %v1256_v24 = vld [vmem:[#allocation2 + $0xf8] sm:$0xff]  ;;  %v1254_v8 = vld [vmem:[#allocation2 + $0xe8] sm:$0xff] }
 0x190   :  { %v1187_v42 = vmax.f32 %v1011_v25, 0.0  ;;  %v1014_v49 = vadd.f32 %v13877_v21, %v11158_v56  ;;  %v1005_v48 = vpop.f32.mrb[91].mxu1  ;;  %2114 = vst [vmem:[#allocation2 + $0xb8] sm:$0xff] %v2050_v16  ;;  %v1928_v13 = vmax.f32 %v1760_v40, 0.0 }
 0x191   :  { %v1185_v63 = vmax.f32 %v1003_v27, 0.0  ;;  %v1006_v33 = vadd.f32 %v13877_v21, %v1005_v48  ;;  %2112 = vst [vmem:[#allocation2 + $0xa8] sm:$0xff] %v2048_v36  ;;  %v15188_v36 = vld [vmem:[#allocation20_spill] sm:$0xff]  ;;  %v15189_v48 = vld [vmem:[#allocation21_spill] sm:$0xff] }
 0x192   :  { %v1315_v23 = vmax.f32 %v1251_v19, %v1187_v42  ;;  %v1188_v11 = vmax.f32 %v1014_v49, 0.0  ;;  %11328 = vmatmul.mubr.msk.bf16.gmra.mrb[196].mxu1 %vm158_vm2, %v2251_v35  ;;  %v15187_v35 = vld [vmem:[#allocation19_spill] sm:$0xff]  ;;  %v1773_v31 = vadd.f32 %v13877_v21, %v15188_v36 }
 0x193   :  { %v1313_v39 = vmax.f32 %v1249_v61, %v1185_v63  ;;  %v1186_v45 = vmax.f32 %v1006_v33, 0.0  ;;  %v1781_v9 = vadd.f32 %v13877_v21, %v15187_v35 }
 0x194   :  { %v1316_v6 = vmax.f32 %v1252_v26, %v1188_v11  ;;  %v2053_v52 = vmax.f32 %v1315_v23, %v1925_v34  ;;  %v1784_v34 = vadd.f32 %v13877_v21, %v15189_v48  ;;  %v1259_v26 = vld [vmem:[#allocation2 + $0x110] sm:$0xff] }
 0x195   :  { %v1314_v30 = vmax.f32 %v1250_v7, %v1186_v45  ;;  %v11161_v20 = vpop.f32.mrb[92].mxu1  ;;  %v2051_v3 = vmax.f32 %v1313_v39, %v1923_v53  ;;  %v15190_v53 = vld [vmem:[#allocation22_spill] sm:$0xff]  ;;  %v1933_v39 = vmax.f32 %v1781_v9, 0.0 }
 0x196   :  { %v1027_v2 = vadd.f32 %v13877_v21, %v11161_v20  ;;  %v1018_v15 = vpop.f32.mrb[93].mxu1  ;;  %2117 = vst [vmem:[#allocation2 + $0xd0] sm:$0xff] %v2053_v52  ;;  %v2054_v22 = vmax.f32 %v1316_v6, %v1926_v41  ;;  %v1776_v23 = vadd.f32 %v13877_v21, %v15190_v53  ;;  %v1931_v6 = vmax.f32 %v1773_v31, 0.0  ;;  %v1257_v52 = vld [vmem:[#allocation2 + $0x100] sm:$0xff]  ;;  %v1260_v20 = vld [vmem:[#allocation2 + $0x118] sm:$0xff] }
 0x197   :  { %v1019_v0 = vadd.f32 %v13877_v21, %v1018_v15  ;;  %v11162_v58 = vpop.f32.mrb[94].mxu1  ;;  %2115 = vst [vmem:[#allocation2 + $0xc0] sm:$0xff] %v2051_v3  ;;  %v2052_v54 = vmax.f32 %v1314_v30, %v1924_v1  ;;  %v1934_v50 = vmax.f32 %v1784_v34, 0.0 }
 0x198   :  { %v1191_v44 = vmax.f32 %v1027_v2, 0.0  ;;  %v1030_v60 = vadd.f32 %v13877_v21, %v11162_v58  ;;  %v1021_v4 = vpop.f32.mrb[95].mxu1  ;;  %2118 = vst [vmem:[#allocation2 + $0xd8] sm:$0xff] %v2054_v22  ;;  %v1932_v57 = vmax.f32 %v1776_v23, 0.0  ;;  %v1258_v2 = vld [vmem:[#allocation2 + $0x108] sm:$0xff]  ;;  %v15191_v22 = vld [vmem:[#allocation23_spill] sm:$0xff] }
 0x199   :  { %v1189_v28 = vmax.f32 %v1019_v0, 0.0  ;;  %v1022_v47 = vadd.f32 %v13877_v21, %v1021_v4  ;;  %2116 = vst [vmem:[#allocation2 + $0xc8] sm:$0xff] %v2052_v54  ;;  %v1797_v12 = vadd.f32 %v13877_v21, %v15191_v22  ;;  %v15192_v54 = vld [vmem:[#allocation24_spill] sm:$0xff]  ;;  %v15193_v4 = vld [vmem:[#allocation25_spill] sm:$0xff] }
 0x19a   :  { %v1319_v38 = vmax.f32 %v1255_v59, %v1191_v44  ;;  %v1192_v32 = vmax.f32 %v1030_v60, 0.0  ;;  %v1789_v55 = vadd.f32 %v13877_v21, %v15192_v54 }
 0x19b   :  { %v1317_v51 = vmax.f32 %v1253_v10, %v1189_v28  ;;  %v1190_v46 = vmax.f32 %v1022_v47, 0.0 }
 0x19c   :  { %v1320_v25 = vmax.f32 %v1256_v24, %v1192_v32  ;;  %v2057_v16 = vmax.f32 %v1319_v38, %v1929_v17  ;;  %v1800_v17 = vadd.f32 %v13877_v21, %v15193_v4  ;;  %v1263_v24 = vld [vmem:[#allocation2 + $0x130] sm:$0xff] }
 0x19d   :  { %v1318_v37 = vmax.f32 %v1254_v8, %v1190_v46  ;;  %v11165_v27 = vpop.f32.mrb[96].mxu1  ;;  %v2055_v56 = vmax.f32 %v1317_v51, %v1927_v18  ;;  %v15194_v18 = vld [vmem:[#allocation26_spill] sm:$0xff]  ;;  %v1937_v51 = vmax.f32 %v1797_v12, 0.0 }
 0x19e   :  { %v1043_v29 = vadd.f32 %v13877_v21, %v11165_v27  ;;  %v1034_v42 = vpop.f32.mrb[97].mxu1  ;;  %2121 = vst [vmem:[#allocation2 + $0xf0] sm:$0xff] %v2057_v16  ;;  %v2058_v49 = vmax.f32 %v1320_v25, %v1930_v62  ;;  %v1792_v38 = vadd.f32 %v13877_v21, %v15194_v18  ;;  %v1935_v25 = vmax.f32 %v1789_v55, 0.0  ;;  %v1261_v16 = vld [vmem:[#allocation2 + $0x120] sm:$0xff]  ;;  %v1264_v27 = vld [vmem:[#allocation2 + $0x138] sm:$0xff] }
 0x19f   :  { %v1035_v19 = vadd.f32 %v13877_v21, %v1034_v42  ;;  %v11166_v63 = vpop.f32.mrb[98].mxu1  ;;  %2119 = vst [vmem:[#allocation2 + $0xe0] sm:$0xff] %v2055_v56  ;;  %v2056_v33 = vmax.f32 %v1318_v37, %v1928_v13  ;;  %v1938_v9 = vmax.f32 %v1800_v17, 0.0 }
 0x1a0   :  { %v1195_v61 = vmax.f32 %v1043_v29, 0.0  ;;  %v1046_v11 = vadd.f32 %v13877_v21, %v11166_v63  ;;  %v1037_v41 = vpop.f32.mrb[99].mxu1  ;;  %2122 = vst [vmem:[#allocation2 + $0xf8] sm:$0xff] %v2058_v49  ;;  %v1936_v36 = vmax.f32 %v1792_v38, 0.0  ;;  %v1262_v29 = vld [vmem:[#allocation2 + $0x128] sm:$0xff]  ;;  %v15195_v49 = vld [vmem:[#allocation27_spill] sm:$0xff] }
 0x1a1   :  { %v1193_v45 = vmax.f32 %v1035_v19, 0.0  ;;  %v1038_v1 = vadd.f32 %v13877_v21, %v1037_v41  ;;  %2120 = vst [vmem:[#allocation2 + $0xe8] sm:$0xff] %v2056_v33  ;;  %v1813_v48 = vadd.f32 %v13877_v21, %v15195_v49  ;;  %v15196_v33 = vld [vmem:[#allocation28_spill] sm:$0xff]  ;;  %v15197_v41 = vld [vmem:[#allocation29_spill] sm:$0xff] }
 0x1a2   :  { %v1323_v7 = vmax.f32 %v1259_v26, %v1195_v61  ;;  %v1196_v43 = vmax.f32 %v1046_v11, 0.0  ;;  %v1805_v53 = vadd.f32 %v13877_v21, %v15196_v33 }
 0x1a3   :  { %v1321_v30 = vmax.f32 %v1257_v52, %v1193_v45  ;;  %v1194_v3 = vmax.f32 %v1038_v1, 0.0 }
 0x1a4   :  { %v1324_v14 = vmax.f32 %v1260_v20, %v1196_v43  ;;  %v2061_v15 = vmax.f32 %v1323_v7, %v1933_v39  ;;  %v1816_v39 = vadd.f32 %v13877_v21, %v15197_v41  ;;  %v1267_v20 = vld [vmem:[#allocation2 + $0x150] sm:$0xff] }
 0x1a5   :  { %v1322_v5 = vmax.f32 %v1258_v2, %v1194_v3  ;;  %v11169_v0 = vpop.f32.mrb[100].mxu1  ;;  %v2059_v58 = vmax.f32 %v1321_v30, %v1931_v6  ;;  %v15198_v6 = vld [vmem:[#allocation30_spill] sm:$0xff]  ;;  %v1941_v30 = vmax.f32 %v1813_v48, 0.0 }
 0x1a6   :  { %v1059_v40 = vadd.f32 %v13877_v21, %v11169_v0  ;;  %v1050_v44 = vpop.f32.mrb[101].mxu1  ;;  %2125 = vst [vmem:[#allocation2 + $0x110] sm:$0xff] %v2061_v15  ;;  %v2062_v60 = vmax.f32 %v1324_v14, %v1934_v50  ;;  %v1808_v7 = vadd.f32 %v13877_v21, %v15198_v6  ;;  %v1939_v14 = vmax.f32 %v1805_v53, 0.0  ;;  %v1265_v15 = vld [vmem:[#allocation2 + $0x140] sm:$0xff]  ;;  %v1268_v0 = vld [vmem:[#allocation2 + $0x158] sm:$0xff] }
 0x1a7   :  { %v1051_v59 = vadd.f32 %v13877_v21, %v1050_v44  ;;  %v11170_v28 = vpop.f32.mrb[102].mxu1  ;;  %2123 = vst [vmem:[#allocation2 + $0x100] sm:$0xff] %v2059_v58  ;;  %v2060_v47 = vmax.f32 %v1322_v5, %v1932_v57  ;;  %v1942_v12 = vmax.f32 %v1816_v39, 0.0 }
 0x1a8   :  { %v1199_v10 = vmax.f32 %v1059_v40, 0.0  ;;  %v1062_v32 = vadd.f32 %v13877_v21, %v11170_v28  ;;  %v1053_v62 = vpop.f32.mrb[103].mxu1  ;;  %2126 = vst [vmem:[#allocation2 + $0x118] sm:$0xff] %v2062_v60  ;;  %v1940_v54 = vmax.f32 %v1808_v7, 0.0  ;;  %v1266_v40 = vld [vmem:[#allocation2 + $0x148] sm:$0xff]  ;;  %v15199_v60 = vld [vmem:[#allocation31_spill] sm:$0xff] }
 0x1a9   :  { %v1197_v46 = vmax.f32 %v1051_v59, 0.0  ;;  %v1054_v13 = vadd.f32 %v13877_v21, %v1053_v62  ;;  %2124 = vst [vmem:[#allocation2 + $0x108] sm:$0xff] %v2060_v47  ;;  %v1829_v4 = vadd.f32 %v13877_v21, %v15199_v60  ;;  %v15200_v47 = vld [vmem:[#allocation32_spill] sm:$0xff]  ;;  %v15201_v62 = vld [vmem:[#allocation33_spill] sm:$0xff] }
 0x1aa   :  { %v1327_v8 = vmax.f32 %v1263_v24, %v1199_v10  ;;  %v1200_v35 = vmax.f32 %v1062_v32, 0.0  ;;  %v1821_v18 = vadd.f32 %v13877_v21, %v15200_v47 }
 0x1ab   :  { %v1325_v37 = vmax.f32 %v1261_v16, %v1197_v46  ;;  %v1198_v56 = vmax.f32 %v1054_v13, 0.0 }
 0x1ac   :  { %v1328_v31 = vmax.f32 %v1264_v27, %v1200_v35  ;;  %v2065_v42 = vmax.f32 %v1327_v8, %v1937_v51  ;;  %v1832_v51 = vadd.f32 %v13877_v21, %v15201_v62  ;;  %v1271_v27 = vld [vmem:[#allocation2 + $0x170] sm:$0xff] }
 0x1ad   :  { %v1326_v34 = vmax.f32 %v1262_v29, %v1198_v56  ;;  %v11173_v19 = vpop.f32.mrb[104].mxu1  ;;  %v2063_v63 = vmax.f32 %v1325_v37, %v1935_v25  ;;  %v15202_v25 = vld [vmem:[#allocation34_spill] sm:$0xff]  ;;  %v1945_v37 = vmax.f32 %v1829_v4, 0.0 }
 0x1ae   :  { %v1075_v23 = vadd.f32 %v13877_v21, %v11173_v19  ;;  %v1066_v61 = vpop.f32.mrb[105].mxu1  ;;  %2129 = vst [vmem:[#allocation2 + $0x130] sm:$0xff] %v2065_v42  ;;  %v2066_v11 = vmax.f32 %v1328_v31, %v1938_v9  ;;  %v1824_v8 = vadd.f32 %v13877_v21, %v15202_v25  ;;  %v1943_v31 = vmax.f32 %v1821_v18, 0.0  ;;  %v1269_v42 = vld [vmem:[#allocation2 + $0x160] sm:$0xff]  ;;  %v1272_v19 = vld [vmem:[#allocation2 + $0x178] sm:$0xff] }
 0x1af   :  { %v1067_v26 = vadd.f32 %v13877_v21, %v1066_v61  ;;  %v11174_v45 = vpop.f32.mrb[106].mxu1  ;;  %2127 = vst [vmem:[#allocation2 + $0x120] sm:$0xff] %v2063_v63  ;;  %v2064_v1 = vmax.f32 %v1326_v34, %v1936_v36  ;;  %v1946_v48 = vmax.f32 %v1832_v51, 0.0 }
 0x1b0   :  { %v1203_v52 = vmax.f32 %v1075_v23, 0.0  ;;  %v1078_v43 = vadd.f32 %v13877_v21, %v11174_v45  ;;  %v1069_v50 = vpop.f32.mrb[107].mxu1  ;;  %2130 = vst [vmem:[#allocation2 + $0x138] sm:$0xff] %v2066_v11  ;;  %v1944_v33 = vmax.f32 %v1824_v8, 0.0  ;;  %v1270_v23 = vld [vmem:[#allocation2 + $0x168] sm:$0xff]  ;;  %v15203_v11 = vld [vmem:[#allocation35_spill] sm:$0xff] }
 0x1b1   :  { %v1201_v3 = vmax.f32 %v1067_v26, 0.0  ;;  %v1070_v57 = vadd.f32 %v13877_v21, %v1069_v50  ;;  %2128 = vst [vmem:[#allocation2 + $0x128] sm:$0xff] %v2064_v1  ;;  %v1845_v41 = vadd.f32 %v13877_v21, %v15203_v11  ;;  %v15204_v1 = vld [vmem:[#allocation36_spill] sm:$0xff]  ;;  %v15205_v50 = vld [vmem:[#allocation37_spill] sm:$0xff] }
 0x1b2   :  { %v1331_v2 = vmax.f32 %v1267_v20, %v1203_v52  ;;  %v1204_v22 = vmax.f32 %v1078_v43, 0.0  ;;  %v1837_v6 = vadd.f32 %v13877_v21, %v15204_v1 }
 0x1b3   :  { %v1329_v5 = vmax.f32 %v1265_v15, %v1201_v3  ;;  %v1202_v58 = vmax.f32 %v1070_v57, 0.0 }
 0x1b4   :  { %v1332_v55 = vmax.f32 %v1268_v0, %v1204_v22  ;;  %v2069_v44 = vmax.f32 %v1331_v2, %v1941_v30  ;;  %v1848_v30 = vadd.f32 %v13877_v21, %v15205_v50  ;;  %v1275_v0 = vld [vmem:[#allocation2 + $0x190] sm:$0xff] }
 0x1b5   :  { %v1330_v17 = vmax.f32 %v1266_v40, %v1202_v58  ;;  %v11177_v59 = vpop.f32.mrb[108].mxu1  ;;  %v2067_v28 = vmax.f32 %v1329_v5, %v1939_v14  ;;  %v15206_v14 = vld [vmem:[#allocation38_spill] sm:$0xff]  ;;  %v1949_v5 = vmax.f32 %v1845_v41, 0.0 }
 0x1b6   :  { %v1091_v38 = vadd.f32 %v13877_v21, %v11177_v59  ;;  %v1082_v10 = vpop.f32.mrb[109].mxu1  ;;  %2133 = vst [vmem:[#allocation2 + $0x150] sm:$0xff] %v2069_v44  ;;  %v2070_v32 = vmax.f32 %v1332_v55, %v1942_v12  ;;  %v1840_v2 = vadd.f32 %v13877_v21, %v15206_v14  ;;  %v1947_v55 = vmax.f32 %v1837_v6, 0.0  ;;  %v1273_v44 = vld [vmem:[#allocation2 + $0x180] sm:$0xff]  ;;  %v1276_v59 = vld [vmem:[#allocation2 + $0x198] sm:$0xff] }
 0x1b7   :  { %v1083_v24 = vadd.f32 %v13877_v21, %v1082_v10  ;;  %v11178_v46 = vpop.f32.mrb[110].mxu1  ;;  %2131 = vst [vmem:[#allocation2 + $0x140] sm:$0xff] %v2067_v28  ;;  %v2068_v13 = vmax.f32 %v1330_v17, %v1940_v54  ;;  %v1950_v4 = vmax.f32 %v1848_v30, 0.0 }
 0x1b8   :  { %v1207_v16 = vmax.f32 %v1091_v38, 0.0  ;;  %v1094_v35 = vadd.f32 %v13877_v21, %v11178_v46  ;;  %v1085_v9 = vpop.f32.mrb[111].mxu1  ;;  %2134 = vst [vmem:[#allocation2 + $0x158] sm:$0xff] %v2070_v32  ;;  %v1948_v47 = vmax.f32 %v1840_v2, 0.0  ;;  %v1274_v38 = vld [vmem:[#allocation2 + $0x188] sm:$0xff]  ;;  %v15207_v32 = vld [vmem:[#allocation39_spill] sm:$0xff] }
 0x1b9   :  { %v1205_v56 = vmax.f32 %v1083_v24, 0.0  ;;  %v1086_v36 = vadd.f32 %v13877_v21, %v1085_v9  ;;  %2132 = vst [vmem:[#allocation2 + $0x148] sm:$0xff] %v2068_v13  ;;  %v1861_v62 = vadd.f32 %v13877_v21, %v15207_v32  ;;  %v15208_v13 = vld [vmem:[#allocation40_spill] sm:$0xff]  ;;  %v15209_v9 = vld [vmem:[#allocation41_spill] sm:$0xff] }
 0x1ba   :  { %v1335_v29 = vmax.f32 %v1271_v27, %v1207_v16  ;;  %v1208_v49 = vmax.f32 %v1094_v35, 0.0  ;;  %v1853_v25 = vadd.f32 %v13877_v21, %v15208_v13  ;;  %v1281_v32 = vld [vmem:[#allocation2 + $0x1c0] sm:$0xff] }
 0x1bb   :  { %v1333_v34 = vmax.f32 %v1269_v42, %v1205_v56  ;;  %v1206_v63 = vmax.f32 %v1086_v36, 0.0 }
 0x1bc   :  { %v1336_v53 = vmax.f32 %v1272_v19, %v1208_v49  ;;  %v2073_v61 = vmax.f32 %v1335_v29, %v1945_v37  ;;  %v1864_v37 = vadd.f32 %v13877_v21, %v15209_v9  ;;  %v1279_v19 = vld [vmem:[#allocation2 + $0x1b0] sm:$0xff] }
 0x1bd   :  { %v1334_v39 = vmax.f32 %v1270_v23, %v1206_v63  ;;  %v11181_v26 = vpop.f32.mrb[112].mxu1  ;;  %v2071_v45 = vmax.f32 %v1333_v34, %v1943_v31  ;;  %v15210_v31 = vld [vmem:[#allocation42_spill] sm:$0xff]  ;;  %v1953_v34 = vmax.f32 %v1861_v62, 0.0 }
 0x1be   :  { %v1107_v7 = vadd.f32 %v13877_v21, %v11181_v26  ;;  %v1098_v52 = vpop.f32.mrb[113].mxu1  ;;  %2137 = vst [vmem:[#allocation2 + $0x170] sm:$0xff] %v2073_v61  ;;  %v2074_v43 = vmax.f32 %v1336_v53, %v1946_v48  ;;  %v1856_v29 = vadd.f32 %v13877_v21, %v15210_v31  ;;  %v1951_v53 = vmax.f32 %v1853_v25, 0.0  ;;  %v1277_v61 = vld [vmem:[#allocation2 + $0x1a0] sm:$0xff]  ;;  %v1280_v26 = vld [vmem:[#allocation2 + $0x1b8] sm:$0xff] }
 0x1bf   :  { %v1099_v20 = vadd.f32 %v13877_v21, %v1098_v52  ;;  %v11182_v3 = vpop.f32.mrb[114].mxu1  ;;  %2135 = vst [vmem:[#allocation2 + $0x160] sm:$0xff] %v2071_v45  ;;  %v2072_v57 = vmax.f32 %v1334_v39, %v1944_v33  ;;  %v1954_v41 = vmax.f32 %v1864_v37, 0.0  ;;  %v1284_v25 = vld [vmem:[#allocation2 + $0x1d8] sm:$0xff]  ;;  %v1282_v37 = vld [vmem:[#allocation2 + $0x1c8] sm:$0xff] }
 0x1c0   :  { %v1211_v15 = vmax.f32 %v1107_v7, 0.0  ;;  %v1110_v22 = vadd.f32 %v13877_v21, %v11182_v3  ;;  %v1101_v12 = vpop.f32.mrb[115].mxu1  ;;  %2138 = vst [vmem:[#allocation2 + $0x178] sm:$0xff] %v2074_v43  ;;  %v1952_v1 = vmax.f32 %v1856_v29, 0.0  ;;  %v1278_v7 = vld [vmem:[#allocation2 + $0x1a8] sm:$0xff] }
 0x1c1   :  { %v1209_v58 = vmax.f32 %v1099_v20, 0.0  ;;  %v1102_v54 = vadd.f32 %v13877_v21, %v1101_v12  ;;  %2136 = vst [vmem:[#allocation2 + $0x168] sm:$0xff] %v2072_v57 }
 0x1c2   :  { %v1339_v40 = vmax.f32 %v1275_v0, %v1211_v15  ;;  %v1212_v60 = vmax.f32 %v1110_v22, 0.0 }
 0x1c3   :  { %v1337_v17 = vmax.f32 %v1273_v44, %v1209_v58  ;;  %v1210_v28 = vmax.f32 %v1102_v54, 0.0 }
 0x1c4   :  { %v1340_v18 = vmax.f32 %v1276_v59, %v1212_v60  ;;  %v2077_v10 = vmax.f32 %v1339_v40, %v1949_v5 }
 0x1c5   :  { %v1338_v51 = vmax.f32 %v1274_v38, %v1210_v28  ;;  %v11185_v24 = vpop.f32.mrb[116].mxu1  ;;  %v2075_v46 = vmax.f32 %v1337_v17, %v1947_v55  ;;  %v1283_v28 = vld [vmem:[#allocation2 + $0x1d0] sm:$0xff] }
 0x1c6   :  { %v1123_v8 = vadd.f32 %v13877_v21, %v11185_v24  ;;  %v1114_v16 = vpop.f32.mrb[117].mxu1  ;;  %2141 = vst [vmem:[#allocation2 + $0x190] sm:$0xff] %v2077_v10  ;;  %v2078_v35 = vmax.f32 %v1340_v18, %v1950_v4 }
 0x1c7   :  { %v1115_v27 = vadd.f32 %v13877_v21, %v1114_v16  ;;  %v11186_v56 = vpop.f32.mrb[118].mxu1  ;;  %2139 = vst [vmem:[#allocation2 + $0x180] sm:$0xff] %v2075_v46  ;;  %v2076_v36 = vmax.f32 %v1338_v51, %v1948_v47 }
 0x1c8   :  { %v1215_v42 = vmax.f32 %v1123_v8, 0.0  ;;  %v1126_v49 = vadd.f32 %v13877_v21, %v11186_v56  ;;  %v1117_v48 = vpop.f32.mrb[119].mxu1  ;;  %2142 = vst [vmem:[#allocation2 + $0x198] sm:$0xff] %v2078_v35 }
 0x1c9   :  { %v1213_v63 = vmax.f32 %v1115_v27, 0.0  ;;  %v1118_v33 = vadd.f32 %v13877_v21, %v1117_v48  ;;  %2140 = vst [vmem:[#allocation2 + $0x188] sm:$0xff] %v2076_v36 }
 0x1ca   :  { %v1343_v23 = vmax.f32 %v1279_v19, %v1215_v42  ;;  %v1216_v11 = vmax.f32 %v1126_v49, 0.0 }
 0x1cb   :  { %v1341_v39 = vmax.f32 %v1277_v61, %v1213_v63  ;;  %v1214_v45 = vmax.f32 %v1118_v33, 0.0 }
 0x1cc   :  { %v1344_v6 = vmax.f32 %v1280_v26, %v1216_v11  ;;  %v14014_v52 = vmax.f32 %v1343_v23, %v1953_v34  ;;  %v1287_v11 = vld [vmem:[#allocation2 + $0x1f0] sm:$0xff] }
 0x1cd   :  { %v1342_v43 = vmax.f32 %v1278_v7, %v1214_v45  ;;  %v11189_v50 = vpop.f32.mrb[120].mxu1  ;;  %v14016_v30 = vmax.f32 %v1341_v39, %v1951_v53 }
 0x1ce   :  { %v1130_v20 = vpop.f32.mrb[121].mxu1  ;;  %v14018_v3 = vmax.f32 %v1344_v6, %v1954_v41  ;;  %v1139_v5 = vadd.f32 %v13877_v21, %v11189_v50 }
 0x1cf   :  { %v11190_v57 = vpop.f32.mrb[122].mxu1  ;;  %v14020_v14 = vmax.f32 %v1342_v43, %v1952_v1  ;;  %v1131_v58 = vadd.f32 %v13877_v21, %v1130_v20  ;;  %v1285_v1 = vld [vmem:[#allocation2 + $0x1e0] sm:$0xff]  ;;  %v1288_v20 = vld [vmem:[#allocation2 + $0x1f8] sm:$0xff] }
 0x1d0   :  { %v1133_v2 = vpop.f32.mrb[123].mxu1  ;;  %v1142_v54 = vadd.f32 %v13877_v21, %v11190_v57  ;;  %v1219_v40 = vmax.f32 %v1139_v5, 0.0 }
 0x1d1   :  { %v1134_v55 = vadd.f32 %v13877_v21, %v1133_v2  ;;  %v1217_v44 = vmax.f32 %v1131_v58, 0.0 }
 0x1d2   :  { %v1220_v4 = vmax.f32 %v1142_v54, 0.0  ;;  %v1347_v10 = vmax.f32 %v1283_v28, %v1219_v40 }
 0x1d3   :  { %v1218_v47 = vmax.f32 %v1134_v55, 0.0  ;;  %v1345_v13 = vmax.f32 %v1281_v32, %v1217_v44 }
 0x1d4   :  { %v1348_v9 = vmax.f32 %v1284_v25, %v1220_v4 }
 0x1d5   :  { %v11193_v15 = vpop.f32.mrb[124].mxu1  ;;  %v1346_v31 = vmax.f32 %v1282_v37, %v1218_v47 }
 0x1d6   :  { %v1146_v22 = vpop.f32.mrb[125].mxu1  ;;  %v1155_v62 = vadd.f32 %v13877_v21, %v11193_v15 }
 0x1d7   :  { %v11194_v12 = vpop.f32.mrb[126].mxu1  ;;  %v1147_v8 = vadd.f32 %v13877_v21, %v1146_v22  ;;  %v1286_v22 = vld [vmem:[#allocation2 + $0x1e8] sm:$0xff] }
 0x1d8   :  { %v1149_v0 = vpop.f32.mrb[127].mxu1  ;;  %v1158_v27 = vadd.f32 %v13877_v21, %v11194_v12  ;;  %v1223_v48 = vmax.f32 %v1155_v62, 0.0 }
 0x1d9   :  { %v1150_v29 = vadd.f32 %v13877_v21, %v1149_v0  ;;  %v1221_v19 = vmax.f32 %v1147_v8, 0.0 }
 0x1da   :  { %v1224_v53 = vmax.f32 %v1158_v27, 0.0  ;;  %v1351_v45 = vmax.f32 %v1287_v11, %v1223_v48 }
 0x1db   :  { %v1222_v41 = vmax.f32 %v1150_v29, 0.0  ;;  %v1349_v50 = vmax.f32 %v1285_v1, %v1221_v19  ;;  %v2707_v19 = vld [vmem:[#allocation2 + $0x30] sm:$0xff] }
 0x1dc   :  { %v1352_v15 = vmax.f32 %v1288_v20, %v1224_v53 }
 0x1dd   :  { %v11257_v60 = vpop.f32.mrb[128].mxu1  ;;  %v1350_v0 = vmax.f32 %v1286_v22, %v1222_v41  ;;  %v12280_v41 = vld [vmem:[%s15136_s3] sm:$0xff]  }
 0x1de   :  { %v1877_v17 = vadd.f32 %v13877_v21, %v11257_v60  ;;  %v1868_v59 = vpop.f32.mrb[129].mxu1  ;;  %11331 = vmatprep.subr.bf16.mxu0 %v12280_v41 }
 0x1df   :  { %v1869_v18 = vadd.f32 %v13877_v21, %v1868_v59  ;;  %v11258_v38 = vpop.f32.mrb[130].mxu1  ;;  %11332 = vmatpush3.bf16.msra.mxu0 %v12280_v41 }
 0x1e0   :  { %v1957_v51 = vmax.f32 %v1877_v17, 0.0  ;;  %v1880_v24 = vadd.f32 %v13877_v21, %v11258_v38  ;;  %v1871_v46 = vpop.f32.mrb[131].mxu1  ;;  %v2703_v38 = vld [vmem:[#allocation2 + $0x10] sm:$0xff] }
 0x1e1   :  { %v1955_v16 = vmax.f32 %v1869_v18, 0.0  ;;  %v1872_v35 = vadd.f32 %v13877_v21, %v1871_v46 }
 0x1e2   :  { %v14033_v56 = vmax.f32 %v1347_v10, %v1957_v51  ;;  %v1958_v36 = vmax.f32 %v1880_v24, 0.0  ;;  %v2701_v51 = vld [vmem:[#allocation2] sm:$0xff] }
 0x1e3   :  { %v14036_v42 = vmax.f32 %v1345_v13, %v1955_v16  ;;  %v1956_v49 = vmax.f32 %v1872_v35, 0.0  ;;  %v2704_v13 = vld [vmem:[#allocation2 + $0x18] sm:$0xff]  ;;  %v2702_v16 = vld [vmem:[#allocation2 + $0x8] sm:$0xff] }
 0x1e4   :  { %v14038_v34 = vmax.f32 %v1348_v9, %v1958_v36 }
 0x1e5   :  { %v14040_v63 = vmax.f32 %v1346_v31, %v1956_v49  ;;  %v11261_v33 = vpop.f32.mrb[132].mxu1 }
 0x1e6   :  { %v1893_v23 = vadd.f32 %v13877_v21, %v11261_v33  ;;  %v1884_v61 = vpop.f32.mrb[133].mxu1 }
 0x1e7   :  { %v1885_v39 = vadd.f32 %v13877_v21, %v1884_v61  ;;  %v11262_v26 = vpop.f32.mrb[134].mxu1  ;;  %v2705_v61 = vld [vmem:[#allocation2 + $0x20] sm:$0xff] }
 0x1e8   :  { %v1961_v6 = vmax.f32 %v1893_v23, 0.0  ;;  %v1896_v7 = vadd.f32 %v13877_v21, %v11262_v26  ;;  %v1887_v43 = vpop.f32.mrb[135].mxu1  ;;  %v2708_v26 = vld [vmem:[#allocation2 + $0x38] sm:$0xff] }
 0x1e9   :  { %v1959_v57 = vmax.f32 %v1885_v39, 0.0  ;;  %v1888_v2 = vadd.f32 %v13877_v21, %v1887_v43 }
 0x1ea   :  { %v14046_v12 = vmax.f32 %v1351_v45, %v1961_v6  ;;  %v1962_v5 = vmax.f32 %v1896_v7, 0.0  ;;  %v2706_v6 = vld [vmem:[#allocation2 + $0x28] sm:$0xff] }
 0x1eb   :  { %v14048_v58 = vmax.f32 %v1349_v50, %v1959_v57  ;;  %v1960_v54 = vmax.f32 %v1888_v2, 0.0 }
 0x1ec   :  { %v14050_v55 = vmax.f32 %v1352_v15, %v1962_v5 }
 0x1ed   :  { %v14052_v40 = vmax.f32 %v1350_v0, %v1960_v54  ;;  %v11269_v44 = vpop.f32.mrb[136].mxu1  ;;  %v2711_v0 = vld [vmem:[#allocation2 + $0x50] sm:$0xff] }
 0x1ee   :  { %v2391_v60 = vadd.f32 %v13877_v21, %v11269_v44  ;;  %v2382_v4 = vpop.f32.mrb[137].mxu1 }
 0x1ef   :  { %v2383_v17 = vadd.f32 %v13877_v21, %v2382_v4  ;;  %v11270_v59 = vpop.f32.mrb[138].mxu1 }
 0x1f0   :  { %v2639_v28 = vmax.f32 %v2391_v60, 0.0  ;;  %v2394_v47 = vadd.f32 %v13877_v21, %v11270_v59  ;;  %v2385_v18 = vpop.f32.mrb[139].mxu1 }
 0x1f1   :  { %v2637_v10 = vmax.f32 %v2383_v17, 0.0  ;;  %v2386_v32 = vadd.f32 %v13877_v21, %v2385_v18  ;;  %v2709_v18 = vld [vmem:[#allocation2 + $0x40] sm:$0xff] }
 0x1f2   :  { %v2767_v62 = vmax.f32 %v2703_v38, %v2639_v28  ;;  %v2640_v24 = vmax.f32 %v2394_v47, 0.0  ;;  %v12281_v28 = vld [vmem:[%s15136_s3 + $0x8] sm:$0xff]  }
 0x1f3   :  { %v2765_v46 = vmax.f32 %v2701_v51, %v2637_v10  ;;  %v2638_v25 = vmax.f32 %v2386_v32, 0.0  ;;  %v2712_v32 = vld [vmem:[#allocation2 + $0x58] sm:$0xff]  ;;  %11333 = vmatprep.subr.bf16.mxu0 %v12281_v28  ;;  %v2710_v51 = vld [vmem:[#allocation2 + $0x48] sm:$0xff] }
 0x1f4   :  { %2831 = vst [vmem:[#allocation2 + $0x10] sm:$0xff] %v2767_v62  ;;  %v2768_v8 = vmax.f32 %v2704_v13, %v2640_v24  ;;  %11334 = vmatpush3.bf16.msra.mxu0 %v12281_v28 }
 0x1f5   :  { %2829 = vst [vmem:[#allocation2] sm:$0xff] %v2765_v46  ;;  %v2766_v35 = vmax.f32 %v2702_v16, %v2638_v25  ;;  %v11273_v9 = vpop.f32.mrb[140].mxu1 }
 0x1f6   :  { %2832 = vst [vmem:[#allocation2 + $0x18] sm:$0xff] %v2768_v8  ;;  %v2407_v37 = vadd.f32 %v13877_v21, %v11273_v9  ;;  %v2398_v27 = vpop.f32.mrb[141].mxu1  ;;  %v14079_v8 = vld [vmem:[%s15135_s2] ss:$0 sm:$0xff] }
 0x1f7   :  { %2830 = vst [vmem:[#allocation2 + $0x8] sm:$0xff] %v2766_v35  ;;  %v2399_v36 = vadd.f32 %v13877_v21, %v2398_v27  ;;  %v11274_v31 = vpop.f32.mrb[142].mxu1 }
 0x1f8   :  { %v2643_v29 = vmax.f32 %v2407_v37, 0.0  ;;  %v2410_v49 = vadd.f32 %v13877_v21, %v11274_v31  ;;  %v2401_v48 = vpop.f32.mrb[143].mxu1 }
 0x1f9   :  { %v2641_v33 = vmax.f32 %v2399_v36, 0.0  ;;  %v2402_v53 = vadd.f32 %v13877_v21, %v2401_v48  ;;  %v2715_v36 = vld [vmem:[#allocation2 + $0x70] sm:$0xff] }
 0x1fa   :  { %v2771_v23 = vmax.f32 %v2707_v19, %v2643_v29  ;;  %v2644_v11 = vmax.f32 %v2410_v49, 0.0 }
 0x1fb   :  { %v2769_v39 = vmax.f32 %v2705_v61, %v2641_v33  ;;  %v2642_v45 = vmax.f32 %v2402_v53, 0.0  ;;  %v12282_v53 = vld [vmem:[%s15136_s3 + $0x10] sm:$0xff]  }
 0x1fc   :  { %2835 = vst [vmem:[#allocation2 + $0x30] sm:$0xff] %v2771_v23  ;;  %v2772_v1 = vmax.f32 %v2708_v26, %v2644_v11  ;;  %v12283_v23 = vld [vmem:[%s15136_s3 + $0x18] sm:$0xff]   ;;  %v2713_v11 = vld [vmem:[#allocation2 + $0x60] sm:$0xff]  ;;  %11335 = vmatprep.subr.bf16.mxu0 %v12282_v53 }
 0x1fd   :  { %2833 = vst [vmem:[#allocation2 + $0x20] sm:$0xff] %v2769_v39  ;;  %v2770_v7 = vmax.f32 %v2706_v6, %v2642_v45  ;;  %v11277_v43 = vpop.f32.mrb[144].mxu1  ;;  %v3210_v50 = vld [vmem:[#allocation2 + $0x12] sm:$0xff]  ;;  %v2714_v6 = vld [vmem:[#allocation2 + $0x68] sm:$0xff]  ;;  %11336 = vmatpush3.bf16.msra.mxu0 %v12282_v53 }
 0x1fe   :  { %v2958_v20 = vld [vmem:[#allocation2 + $0x11] sm:$0xff]  ;;  %2836 = vst [vmem:[#allocation2 + $0x38] sm:$0xff] %v2772_v1  ;;  %v2423_v57 = vadd.f32 %v13877_v21, %v11277_v43  ;;  %3275 = vrot.lane.b32.xlu0 %v3210_v50, %s12568_s20  ;;  %v2414_v2 = vpop.f32.mrb[145].mxu1  ;;  %v2956_v33 = vld [vmem:[#allocation2 + $0x1] sm:$0xff]  ;;  %11337 = vmatprep.subr.bf16.mxu0 %v12283_v23 }
 0x1ff   :  { %3023 = vrot.lane.b32.xlu1 %v2958_v20, %s12569_s21  ;;  %2834 = vst [vmem:[#allocation2 + $0x28] sm:$0xff] %v2770_v7  ;;  %v2415_v15 = vadd.f32 %v13877_v21, %v2414_v2  ;;  %v11278_v22 = vpop.f32.mrb[146].mxu1  ;;  %v3462_v17 = vld [vmem:[#allocation2 + $0x13] sm:$0xff]  ;;  %v3209_v59 = vld [vmem:[#allocation2 + $0xa] sm:$0xff]  ;;  %v3208_v28 = vld [vmem:[#allocation2 + $0x2] sm:$0xff] }
 0x200   :  { %v2647_v5 = vmax.f32 %v2423_v57, 0.0  ;;  %v2426_v54 = vadd.f32 %v13877_v21, %v11278_v22  ;;  %v2417_v44 = vpop.f32.mrb[147].mxu1  ;;  %v3714_v13 = vld [vmem:[#allocation2 + $0x14] sm:$0xff]  ;;  %v3461_v25 = vld [vmem:[#allocation2 + $0xb] sm:$0xff]  ;;  %v12284_v57 = vld [vmem:[%s15136_s3 + $0x20] sm:$0xff]  }
 0x201   :  { %v2645_v60 = vmax.f32 %v2415_v15, 0.0  ;;  %v2418_v4 = vadd.f32 %v13877_v21, %v2417_v44  ;;  %v3713_v49 = vld [vmem:[#allocation2 + $0xc] sm:$0xff]  ;;  %v2716_v26 = vld [vmem:[#allocation2 + $0x78] sm:$0xff]  ;;  %11338 = vmatpush3.bf16.msra.mxu0 %v12283_v23  ;;  %v3712_v23 = vld [vmem:[#allocation2 + $0x4] sm:$0xff] }
 0x202   :  { %v2775_v47 = vmax.f32 %v2711_v0, %v2647_v5  ;;  %v2648_v38 = vmax.f32 %v2426_v54, 0.0  ;;  %3527 = vrot.lane.b32.xlu0 %v3462_v17, %s12570_s24  ;;  %v2957_v20 = vld [vmem:[#allocation2 + $0x9] sm:$0xff]  ;;  %11339 = vmatprep.subr.bf16.mxu0 %v12284_v57 }
 0x203   :  { %3273 = vrot.lane.b32.xlu1 %v3209_v59, %s12568_s20  ;;  %v2773_v10 = vmax.f32 %v2709_v18, %v2645_v60  ;;  %v2646_v62 = vmax.f32 %v2418_v4, 0.0  ;;  %v2719_v54 = vld [vmem:[#allocation2 + $0x90] sm:$0xff] }
 0x204   :  { %2839 = vst [vmem:[#allocation2 + $0x50] sm:$0xff] %v2775_v47  ;;  %v2776_v21 = vmax.f32 %v2712_v32, %v2648_v38  ;;  %v2959_v50 = vld [vmem:[#allocation2 + $0x19] sm:$0xff]  ;;  %v12285_v47 = vld [vmem:[%s15136_s3 + $0x28] sm:$0xff]  }
 0x205   :  { %2837 = vst [vmem:[#allocation2 + $0x40] sm:$0xff] %v2773_v10  ;;  %v2774_v24 = vmax.f32 %v2710_v51, %v2646_v62  ;;  %v11281_v46 = vpop.f32.mrb[148].mxu1  ;;  %v3211_v59 = vld [vmem:[#allocation2 + $0x1a] sm:$0xff]  ;;  %11340 = vmatpush3.bf16.msra.mxu0 %v12284_v57  ;;  %v2962_v57 = vld [vmem:[#allocation2 + $0x31] sm:$0xff] }
 0x206   :  { %2840 = vst [vmem:[#allocation2 + $0x58] sm:$0xff] %v2776_v21  ;;  %v2439_v16 = vadd.f32 %v14079_v8, %v11281_v46  ;;  %3779 = vrot.lane.b32.xlu0 %v3714_v13, %s12571_s27  ;;  %v2430_v35 = vpop.f32.mrb[149].mxu1  ;;  %v2717_v38 = vld [vmem:[#allocation2 + $0x80] sm:$0xff]  ;;  %v2720_v62 = vld [vmem:[#allocation2 + $0x98] sm:$0xff]  ;;  %11341 = vmatprep.subr.bf16.mxu0 %v12285_v47 }
 0x207   :  { %3525 = vrot.lane.b32.xlu1 %v3461_v25, %s12570_s24  ;;  %2838 = vst [vmem:[#allocation2 + $0x48] sm:$0xff] %v2774_v24  ;;  %v2431_v9 = vadd.f32 %v14079_v8, %v2430_v35  ;;  %v11282_v37 = vpop.f32.mrb[150].mxu1  ;;  %v2718_v24 = vld [vmem:[#allocation2 + $0x88] sm:$0xff]  ;;  %v3463_v25 = vld [vmem:[#allocation2 + $0x1b] sm:$0xff]  ;;  %v12286_v35 = vld [vmem:[%s15136_s3 + $0x30] sm:$0xff]  }
 0x208   :  { %v2651_v27 = vmax.f32 %v2439_v16, 0.0  ;;  %v2442_v31 = vadd.f32 %v14079_v8, %v11282_v37  ;;  %v2433_v29 = vpop.f32.mrb[151].mxu1  ;;  %v3460_v16 = vld [vmem:[#allocation2 + $0x3] sm:$0xff] }
 0x209   :  { %v2649_v48 = vmax.f32 %v2431_v9, 0.0  ;;  %v2434_v19 = vadd.f32 %v14079_v8, %v2433_v29  ;;  %v2723_v29 = vld [vmem:[#allocation2 + $0xb0] sm:$0xff]  ;;  %11342 = vmatpush3.bf16.msra.mxu0 %v12285_v47  ;;  %v3715_v53 = vld [vmem:[#allocation2 + $0x1c] sm:$0xff] }
 0x20a   :  { %v2779_v61 = vmax.f32 %v2715_v36, %v2651_v27  ;;  %v2652_v41 = vmax.f32 %v2442_v31, 0.0  ;;  %3019 = vrot.lane.b32.xlu0 %v2956_v33, %s12569_s21  ;;  %11343 = vmatprep.subr.bf16.mxu0 %v12286_v35 }
 0x20b   :  { %3777 = vrot.lane.b32.xlu1 %v3713_v49, %s12571_s27  ;;  %v2777_v39 = vmax.f32 %v2713_v11, %v2649_v48  ;;  %v2650_v45 = vmax.f32 %v2434_v19, 0.0 }
 0x20c   :  { %2843 = vst [vmem:[#allocation2 + $0x70] sm:$0xff] %v2779_v61  ;;  %v2780_v1 = vmax.f32 %v2716_v26, %v2652_v41  ;;  %v12287_v61 = vld [vmem:[%s15136_s3 + $0x38] sm:$0xff]   ;;  %v2721_v41 = vld [vmem:[#allocation2 + $0xa0] sm:$0xff] }
 0x20d   :  { %2841 = vst [vmem:[#allocation2 + $0x60] sm:$0xff] %v2777_v39  ;;  %v2778_v7 = vmax.f32 %v2714_v6, %v2650_v45  ;;  %v11285_v43 = vpop.f32.mrb[152].mxu1  ;;  %v2724_v45 = vld [vmem:[#allocation2 + $0xb8] sm:$0xff]  ;;  %11344 = vmatpush3.bf16.msra.mxu0 %v12286_v35 }
 0x20e   :  { %2844 = vst [vmem:[#allocation2 + $0x78] sm:$0xff] %v2780_v1  ;;  %v2455_v2 = vadd.f32 %v14079_v8, %v11285_v43  ;;  %v2446_v15 = vpop.f32.mrb[153].mxu1  ;;  %3021 = vrot.lane.b32.xlu0 %v2957_v20, %s12569_s21  ;;  %v2961_v20 = vld [vmem:[#allocation2 + $0x29] sm:$0xff]  ;;  %11345 = vmatprep.subr.bf16.mxu0 %v12287_v61 }
 0x20f   :  { %3025 = vrot.lane.b32.xlu1 %v2959_v50, %s12569_s21  ;;  %2842 = vst [vmem:[#allocation2 + $0x68] sm:$0xff] %v2778_v7  ;;  %v2447_v22 = vadd.f32 %v14079_v8, %v2446_v15  ;;  %v11286_v5 = vpop.f32.mrb[154].mxu1  ;;  %v2722_v7 = vld [vmem:[#allocation2 + $0xa8] sm:$0xff] }
 0x210   :  { %v2655_v0 = vmax.f32 %v2455_v2, 0.0  ;;  %v2458_v44 = vadd.f32 %v14079_v8, %v11286_v5  ;;  %v2449_v60 = vpop.f32.mrb[155].mxu1 }
 0x211   :  { %v2653_v4 = vmax.f32 %v2447_v22, 0.0  ;;  %v2450_v17 = vadd.f32 %v14079_v8, %v2449_v60  ;;  %11346 = vmatpush3.bf16.msra.mxu0 %v12287_v61  ;;  %v2727_v60 = vld [vmem:[#allocation2 + $0xd0] sm:$0xff] }
 0x212   :  { %v2783_v18 = vmax.f32 %v2719_v54, %v2655_v0  ;;  %v2656_v10 = vmax.f32 %v2458_v44, 0.0  ;;  %3271 = vrot.lane.b32.xlu0 %v3208_v28, %s12568_s20  ;;  %v3214_v28 = vld [vmem:[#allocation2 + $0x32] sm:$0xff] }
 0x213   :  { %3277 = vrot.lane.b32.xlu1 %v3211_v59, %s12568_s20  ;;  %v2781_v32 = vmax.f32 %v2717_v38, %v2653_v4  ;;  %v2654_v21 = vmax.f32 %v2450_v17, 0.0  ;;  %v3213_v59 = vld [vmem:[#allocation2 + $0x2a] sm:$0xff] }
 0x214   :  { %2847 = vst [vmem:[#allocation2 + $0x90] sm:$0xff] %v2783_v18  ;;  %v2784_v51 = vmax.f32 %v2720_v62, %v2656_v10  ;;  %v2725_v18 = vld [vmem:[#allocation2 + $0xc0] sm:$0xff] }
 0x215   :  { %2845 = vst [vmem:[#allocation2 + $0x80] sm:$0xff] %v2781_v32  ;;  %v2782_v46 = vmax.f32 %v2718_v24, %v2654_v21  ;;  %v11289_v13 = vpop.f32.mrb[156].mxu1  ;;  %v2728_v32 = vld [vmem:[#allocation2 + $0xd8] sm:$0xff] }
 0x216   :  { %2848 = vst [vmem:[#allocation2 + $0x98] sm:$0xff] %v2784_v51  ;;  %v2471_v9 = vadd.f32 %v14079_v8, %v11289_v13  ;;  %v2462_v37 = vpop.f32.mrb[157].mxu1  ;;  %3523 = vrot.lane.b32.xlu0 %v3460_v16, %s12570_s24  ;;  %v2726_v51 = vld [vmem:[#allocation2 + $0xc8] sm:$0xff] }
 0x217   :  { %3529 = vrot.lane.b32.xlu1 %v3463_v25, %s12570_s24  ;;  %2846 = vst [vmem:[#allocation2 + $0x88] sm:$0xff] %v2782_v46  ;;  %v2463_v27 = vadd.f32 %v14079_v8, %v2462_v37  ;;  %v11290_v36 = vpop.f32.mrb[158].mxu1  ;;  %v3465_v13 = vld [vmem:[#allocation2 + $0x2b] sm:$0xff]  ;;  %v3466_v25 = vld [vmem:[#allocation2 + $0x33] sm:$0xff] }
 0x218   :  { %v2659_v31 = vmax.f32 %v2471_v9, 0.0  ;;  %v2474_v49 = vadd.f32 %v14079_v8, %v11290_v36  ;;  %v2465_v48 = vpop.f32.mrb[159].mxu1 }
 0x219   :  { %v2657_v19 = vmax.f32 %v2463_v27, 0.0  ;;  %v2466_v33 = vadd.f32 %v14079_v8, %v2465_v48 }
 0x21a   :  { %v2787_v11 = vmax.f32 %v2723_v29, %v2659_v31  ;;  %v2660_v39 = vmax.f32 %v2474_v49, 0.0  ;;  %3775 = vrot.lane.b32.xlu0 %v3712_v23, %s12571_s27  ;;  %v2731_v29 = vld [vmem:[#allocation2 + $0xf0] sm:$0xff]  ;;  %v2729_v23 = vld [vmem:[#allocation2 + $0xe0] sm:$0xff] }
 0x21b   :  { %3781 = vrot.lane.b32.xlu1 %v3715_v53, %s12571_s27  ;;  %v2785_v26 = vmax.f32 %v2721_v41, %v2657_v19  ;;  %v2658_v1 = vmax.f32 %v2466_v33, 0.0  ;;  %v3717_v19 = vld [vmem:[#allocation2 + $0x2c] sm:$0xff]  ;;  %v3718_v33 = vld [vmem:[#allocation2 + $0x34] sm:$0xff] }
 0x21c   :  { %2851 = vst [vmem:[#allocation2 + $0xb0] sm:$0xff] %v2787_v11  ;;  %v2788_v6 = vmax.f32 %v2724_v45, %v2660_v39  ;;  %v2732_v41 = vld [vmem:[#allocation2 + $0xf8] sm:$0xff]  ;;  %v2730_v45 = vld [vmem:[#allocation2 + $0xe8] sm:$0xff] }
 0x21d   :  { %2849 = vst [vmem:[#allocation2 + $0xa0] sm:$0xff] %v2785_v26  ;;  %v2786_v43 = vmax.f32 %v2722_v7, %v2658_v1  ;;  %v11293_v50 = vpop.f32.mrb[160].mxu1  ;;  %v2963_v7 = vld [vmem:[#allocation2 + $0x39] sm:$0xff] }
 0x21e   :  { %2852 = vst [vmem:[#allocation2 + $0xb8] sm:$0xff] %v2788_v6  ;;  %v2487_v2 = vadd.f32 %v14079_v8, %v11293_v50  ;;  %v2478_v15 = vpop.f32.mrb[161].mxu1  ;;  %3031 = vrot.lane.b32.xlu0 %v2962_v57, %s12569_s21 }
 0x21f   :  { %3029 = vrot.lane.b32.xlu1 %v2961_v20, %s12569_s21  ;;  %2850 = vst [vmem:[#allocation2 + $0xa8] sm:$0xff] %v2786_v43  ;;  %v2479_v22 = vadd.f32 %v14079_v8, %v2478_v15  ;;  %v11294_v5 = vpop.f32.mrb[162].mxu1  ;;  %v2960_v43 = vld [vmem:[#allocation2 + $0x21] sm:$0xff] }
 0x220   :  { %v2663_v0 = vmax.f32 %v2487_v2, 0.0  ;;  %v2490_v54 = vadd.f32 %v14079_v8, %v11294_v5  ;;  %v2481_v44 = vpop.f32.mrb[163].mxu1 }
 0x221   :  { %v2661_v4 = vmax.f32 %v2479_v22, 0.0  ;;  %v2482_v17 = vadd.f32 %v14079_v8, %v2481_v44 }
 0x222   :  { %v2791_v47 = vmax.f32 %v2727_v60, %v2663_v0  ;;  %v2664_v38 = vmax.f32 %v2490_v54, 0.0  ;;  %3283 = vrot.lane.b32.xlu0 %v3214_v28, %s12568_s20  ;;  %v2735_v0 = vld [vmem:[#allocation2 + $0x110] sm:$0xff]  ;;  %v3215_v60 = vld [vmem:[#allocation2 + $0x3a] sm:$0xff] }
 0x223   :  { %3281 = vrot.lane.b32.xlu1 %v3213_v59, %s12568_s20  ;;  %v2789_v10 = vmax.f32 %v2725_v18, %v2661_v4  ;;  %v2662_v62 = vmax.f32 %v2482_v17, 0.0  ;;  %v3212_v4 = vld [vmem:[#allocation2 + $0x22] sm:$0xff]  ;;  %v2736_v18 = vld [vmem:[#allocation2 + $0x118] sm:$0xff] }
 0x224   :  { %2855 = vst [vmem:[#allocation2 + $0xd0] sm:$0xff] %v2791_v47  ;;  %v2792_v21 = vmax.f32 %v2728_v32, %v2664_v38  ;;  %v2733_v59 = vld [vmem:[#allocation2 + $0x100] sm:$0xff]  ;;  %v2734_v32 = vld [vmem:[#allocation2 + $0x108] sm:$0xff] }
 0x225   :  { %2853 = vst [vmem:[#allocation2 + $0xc0] sm:$0xff] %v2789_v10  ;;  %v2790_v24 = vmax.f32 %v2726_v51, %v2662_v62  ;;  %v11297_v46 = vpop.f32.mrb[164].mxu1  ;;  %v3467_v51 = vld [vmem:[#allocation2 + $0x3b] sm:$0xff] }
 0x226   :  { %2856 = vst [vmem:[#allocation2 + $0xd8] sm:$0xff] %v2792_v21  ;;  %v2503_v16 = vadd.f32 %v14079_v8, %v11297_v46  ;;  %v2494_v35 = vpop.f32.mrb[165].mxu1  ;;  %3535 = vrot.lane.b32.xlu0 %v3466_v25, %s12570_s24 }
 0x227   :  { %3533 = vrot.lane.b32.xlu1 %v3465_v13, %s12570_s24  ;;  %2854 = vst [vmem:[#allocation2 + $0xc8] sm:$0xff] %v2790_v24  ;;  %v2495_v9 = vadd.f32 %v14079_v8, %v2494_v35  ;;  %v11298_v37 = vpop.f32.mrb[166].mxu1  ;;  %v3464_v24 = vld [vmem:[#allocation2 + $0x23] sm:$0xff] }
 0x228   :  { %v2667_v27 = vmax.f32 %v2503_v16, 0.0  ;;  %v2506_v36 = vadd.f32 %v14079_v8, %v11298_v37  ;;  %v2497_v31 = vpop.f32.mrb[167].mxu1 }
 0x229   :  { %v2665_v49 = vmax.f32 %v2495_v9, 0.0  ;;  %v2498_v48 = vadd.f32 %v14079_v8, %v2497_v31 }
 0x22a   :  { %v2795_v53 = vmax.f32 %v2731_v29, %v2667_v27  ;;  %v2668_v61 = vmax.f32 %v2506_v36, 0.0  ;;  %3787 = vrot.lane.b32.xlu0 %v3718_v33, %s12571_s27  ;;  %v2739_v27 = vld [vmem:[#allocation2 + $0x130] sm:$0xff]  ;;  %v3719_v29 = vld [vmem:[#allocation2 + $0x3c] sm:$0xff] }
 0x22b   :  { %3785 = vrot.lane.b32.xlu1 %v3717_v19, %s12571_s27  ;;  %v2793_v11 = vmax.f32 %v2729_v23, %v2665_v49  ;;  %v2666_v39 = vmax.f32 %v2498_v48, 0.0  ;;  %v3716_v49 = vld [vmem:[#allocation2 + $0x24] sm:$0xff]  ;;  %v2740_v23 = vld [vmem:[#allocation2 + $0x138] sm:$0xff] }
 0x22c   :  { %2859 = vst [vmem:[#allocation2 + $0xf0] sm:$0xff] %v2795_v53  ;;  %v2796_v26 = vmax.f32 %v2732_v41, %v2668_v61  ;;  %v2737_v19 = vld [vmem:[#allocation2 + $0x120] sm:$0xff]  ;;  %v2738_v41 = vld [vmem:[#allocation2 + $0x128] sm:$0xff] }
 0x22d   :  { %2857 = vst [vmem:[#allocation2 + $0xe0] sm:$0xff] %v2793_v11  ;;  %v2794_v1 = vmax.f32 %v2730_v45, %v2666_v39  ;;  %v11301_v6 = vpop.f32.mrb[168].mxu1  ;;  %v2965_v45 = vld [vmem:[#allocation2 + $0x49] sm:$0xff] }
 0x22e   :  { %2860 = vst [vmem:[#allocation2 + $0xf8] sm:$0xff] %v2796_v26  ;;  %v2519_v50 = vadd.f32 %v14079_v8, %v11301_v6  ;;  %v2510_v20 = vpop.f32.mrb[169].mxu1  ;;  %3027 = vrot.lane.b32.xlu0 %v2960_v43, %s12569_s21 }
 0x22f   :  { %3033 = vrot.lane.b32.xlu1 %v2963_v7, %s12569_s21  ;;  %2858 = vst [vmem:[#allocation2 + $0xe8] sm:$0xff] %v2794_v1  ;;  %v2511_v57 = vadd.f32 %v14079_v8, %v2510_v20  ;;  %v11302_v2 = vpop.f32.mrb[170].mxu1  ;;  %v2966_v1 = vld [vmem:[#allocation2 + $0x51] sm:$0xff] }
 0x230   :  { %v2671_v15 = vmax.f32 %v2519_v50, 0.0  ;;  %v2522_v22 = vadd.f32 %v14079_v8, %v11302_v2  ;;  %v2513_v5 = vpop.f32.mrb[171].mxu1 }
 0x231   :  { %v2669_v54 = vmax.f32 %v2511_v57, 0.0  ;;  %v2514_v44 = vadd.f32 %v14079_v8, %v2513_v5 }
 0x232   :  { %v2799_v17 = vmax.f32 %v2735_v0, %v2671_v15  ;;  %v2672_v28 = vmax.f32 %v2522_v22, 0.0  ;;  %3279 = vrot.lane.b32.xlu0 %v3212_v4, %s12568_s20  ;;  %v2743_v15 = vld [vmem:[#allocation2 + $0x150] sm:$0xff] }
 0x233   :  { %3285 = vrot.lane.b32.xlu1 %v3215_v60, %s12568_s20  ;;  %v2797_v47 = vmax.f32 %v2733_v59, %v2669_v54  ;;  %v2670_v38 = vmax.f32 %v2514_v44, 0.0  ;;  %v3217_v0 = vld [vmem:[#allocation2 + $0x4a] sm:$0xff]  ;;  %v3218_v54 = vld [vmem:[#allocation2 + $0x52] sm:$0xff]  ;;  %v2741_v60 = vld [vmem:[#allocation2 + $0x140] sm:$0xff] }
 0x234   :  { %2863 = vst [vmem:[#allocation2 + $0x110] sm:$0xff] %v2799_v17  ;;  %v2800_v10 = vmax.f32 %v2736_v18, %v2672_v28  ;;  %v2744_v59 = vld [vmem:[#allocation2 + $0x158] sm:$0xff]  ;;  %v2742_v18 = vld [vmem:[#allocation2 + $0x148] sm:$0xff] }
 0x235   :  { %2861 = vst [vmem:[#allocation2 + $0x100] sm:$0xff] %v2797_v47  ;;  %v2798_v62 = vmax.f32 %v2734_v32, %v2670_v38  ;;  %v11305_v21 = vpop.f32.mrb[172].mxu1  ;;  %v3469_v32 = vld [vmem:[#allocation2 + $0x4b] sm:$0xff] }
 0x236   :  { %2864 = vst [vmem:[#allocation2 + $0x118] sm:$0xff] %v2800_v10  ;;  %v2535_v46 = vadd.f32 %v14079_v8, %v11305_v21  ;;  %v2526_v13 = vpop.f32.mrb[173].mxu1  ;;  %3531 = vrot.lane.b32.xlu0 %v3464_v24, %s12570_s24 }
 0x237   :  { %3537 = vrot.lane.b32.xlu1 %v3467_v51, %s12570_s24  ;;  %2862 = vst [vmem:[#allocation2 + $0x108] sm:$0xff] %v2798_v62  ;;  %v2527_v25 = vadd.f32 %v14079_v8, %v2526_v13  ;;  %v11306_v16 = vpop.f32.mrb[174].mxu1  ;;  %v3470_v62 = vld [vmem:[#allocation2 + $0x53] sm:$0xff] }
 0x238   :  { %v2675_v35 = vmax.f32 %v2535_v46, 0.0  ;;  %v2538_v9 = vadd.f32 %v14079_v8, %v11306_v16  ;;  %v2529_v37 = vpop.f32.mrb[175].mxu1 }
 0x239   :  { %v2673_v36 = vmax.f32 %v2527_v25, 0.0  ;;  %v2530_v31 = vadd.f32 %v14079_v8, %v2529_v37 }
 0x23a   :  { %v2803_v48 = vmax.f32 %v2739_v27, %v2675_v35  ;;  %v2676_v33 = vmax.f32 %v2538_v9, 0.0  ;;  %3783 = vrot.lane.b32.xlu0 %v3716_v49, %s12571_s27  ;;  %v2747_v35 = vld [vmem:[#allocation2 + $0x170] sm:$0xff] }
 0x23b   :  { %3789 = vrot.lane.b32.xlu1 %v3719_v29, %s12571_s27  ;;  %v2801_v53 = vmax.f32 %v2737_v19, %v2673_v36  ;;  %v2674_v61 = vmax.f32 %v2530_v31, 0.0  ;;  %v3721_v27 = vld [vmem:[#allocation2 + $0x4c] sm:$0xff]  ;;  %v3722_v36 = vld [vmem:[#allocation2 + $0x54] sm:$0xff]  ;;  %v2745_v29 = vld [vmem:[#allocation2 + $0x160] sm:$0xff] }
 0x23c   :  { %2867 = vst [vmem:[#allocation2 + $0x130] sm:$0xff] %v2803_v48  ;;  %v2804_v11 = vmax.f32 %v2740_v23, %v2676_v33  ;;  %v2748_v19 = vld [vmem:[#allocation2 + $0x178] sm:$0xff]  ;;  %v2746_v23 = vld [vmem:[#allocation2 + $0x168] sm:$0xff] }
 0x23d   :  { %2865 = vst [vmem:[#allocation2 + $0x120] sm:$0xff] %v2801_v53  ;;  %v2802_v39 = vmax.f32 %v2738_v41, %v2674_v61  ;;  %v11309_v26 = vpop.f32.mrb[176].mxu1  ;;  %v2967_v41 = vld [vmem:[#allocation2 + $0x59] sm:$0xff] }
 0x23e   :  { %2868 = vst [vmem:[#allocation2 + $0x138] sm:$0xff] %v2804_v11  ;;  %v2551_v6 = vadd.f32 %v14079_v8, %v11309_v26  ;;  %v2542_v7 = vpop.f32.mrb[177].mxu1  ;;  %3039 = vrot.lane.b32.xlu0 %v2966_v1, %s12569_s21 }
 0x23f   :  { %3037 = vrot.lane.b32.xlu1 %v2965_v45, %s12569_s21  ;;  %2866 = vst [vmem:[#allocation2 + $0x128] sm:$0xff] %v2802_v39  ;;  %v2543_v43 = vadd.f32 %v14079_v8, %v2542_v7  ;;  %v11310_v50 = vpop.f32.mrb[178].mxu1  ;;  %v2964_v39 = vld [vmem:[#allocation2 + $0x41] sm:$0xff] }
 0x240   :  { %v2679_v20 = vmax.f32 %v2551_v6, 0.0  ;;  %v2554_v57 = vadd.f32 %v14079_v8, %v11310_v50  ;;  %v2545_v2 = vpop.f32.mrb[179].mxu1 }
 0x241   :  { %v2677_v22 = vmax.f32 %v2543_v43, 0.0  ;;  %v2546_v5 = vadd.f32 %v14079_v8, %v2545_v2 }
 0x242   :  { %v2807_v44 = vmax.f32 %v2743_v15, %v2679_v20  ;;  %v2680_v4 = vmax.f32 %v2554_v57, 0.0  ;;  %3291 = vrot.lane.b32.xlu0 %v3218_v54, %s12568_s20  ;;  %v2751_v20 = vld [vmem:[#allocation2 + $0x190] sm:$0xff]  ;;  %v3219_v15 = vld [vmem:[#allocation2 + $0x5a] sm:$0xff] }
 0x243   :  { %3289 = vrot.lane.b32.xlu1 %v3217_v0, %s12568_s20  ;;  %v2805_v17 = vmax.f32 %v2741_v60, %v2677_v22  ;;  %v2678_v28 = vmax.f32 %v2546_v5, 0.0  ;;  %v3216_v22 = vld [vmem:[#allocation2 + $0x42] sm:$0xff]  ;;  %v2752_v60 = vld [vmem:[#allocation2 + $0x198] sm:$0xff] }
 0x244   :  { %2871 = vst [vmem:[#allocation2 + $0x150] sm:$0xff] %v2807_v44  ;;  %v2808_v47 = vmax.f32 %v2744_v59, %v2680_v4  ;;  %v2749_v0 = vld [vmem:[#allocation2 + $0x180] sm:$0xff]  ;;  %v2750_v59 = vld [vmem:[#allocation2 + $0x188] sm:$0xff] }
 0x245   :  { %2869 = vst [vmem:[#allocation2 + $0x140] sm:$0xff] %v2805_v17  ;;  %v2806_v38 = vmax.f32 %v2742_v18, %v2678_v28  ;;  %v11313_v10 = vpop.f32.mrb[180].mxu1  ;;  %v3471_v18 = vld [vmem:[#allocation2 + $0x5b] sm:$0xff] }
 0x246   :  { %2872 = vst [vmem:[#allocation2 + $0x158] sm:$0xff] %v2808_v47  ;;  %v2567_v21 = vadd.f32 %v14079_v8, %v11313_v10  ;;  %v2558_v51 = vpop.f32.mrb[181].mxu1  ;;  %3543 = vrot.lane.b32.xlu0 %v3470_v62, %s12570_s24 }
 0x247   :  { %3541 = vrot.lane.b32.xlu1 %v3469_v32, %s12570_s24  ;;  %2870 = vst [vmem:[#allocation2 + $0x148] sm:$0xff] %v2806_v38  ;;  %v2559_v24 = vadd.f32 %v14079_v8, %v2558_v51  ;;  %v11314_v46 = vpop.f32.mrb[182].mxu1  ;;  %v3468_v38 = vld [vmem:[#allocation2 + $0x43] sm:$0xff] }
 0x248   :  { %v2683_v13 = vmax.f32 %v2567_v21, 0.0  ;;  %v2570_v25 = vadd.f32 %v14079_v8, %v11314_v46  ;;  %v2561_v16 = vpop.f32.mrb[183].mxu1 }
 0x249   :  { %v2681_v9 = vmax.f32 %v2559_v24, 0.0  ;;  %v2562_v37 = vadd.f32 %v14079_v8, %v2561_v16  ;;  %v3723_v16 = vld [vmem:[#allocation2 + $0x5c] sm:$0xff] }
 0x24a   :  { %v2811_v31 = vmax.f32 %v2747_v35, %v2683_v13  ;;  %v2684_v49 = vmax.f32 %v2570_v25, 0.0  ;;  %3795 = vrot.lane.b32.xlu0 %v3722_v36, %s12571_s27  ;;  %v3720_v35 = vld [vmem:[#allocation2 + $0x44] sm:$0xff] }
 0x24b   :  { %3793 = vrot.lane.b32.xlu1 %v3721_v27, %s12571_s27  ;;  %v2809_v48 = vmax.f32 %v2745_v29, %v2681_v9  ;;  %v2682_v33 = vmax.f32 %v2562_v37, 0.0 }
 0x24c   :  { %2875 = vst [vmem:[#allocation2 + $0x170] sm:$0xff] %v2811_v31  ;;  %v2812_v53 = vmax.f32 %v2748_v19, %v2684_v49  ;;  %v2970_v19 = vld [vmem:[#allocation2 + $0x71] sm:$0xff] }
 0x24d   :  { %2873 = vst [vmem:[#allocation2 + $0x160] sm:$0xff] %v2809_v48  ;;  %v2810_v61 = vmax.f32 %v2746_v23, %v2682_v33  ;;  %v11317_v11 = vpop.f32.mrb[184].mxu1  ;;  %v2969_v48 = vld [vmem:[#allocation2 + $0x69] sm:$0xff] }
 0x24e   :  { %2876 = vst [vmem:[#allocation2 + $0x178] sm:$0xff] %v2812_v53  ;;  %v2583_v26 = vadd.f32 %v14079_v8, %v11317_v11  ;;  %v2574_v45 = vpop.f32.mrb[185].mxu1  ;;  %3035 = vrot.lane.b32.xlu0 %v2964_v39, %s12569_s21  ;;  %v3222_v39 = vld [vmem:[#allocation2 + $0x72] sm:$0xff] }
 0x24f   :  { %3041 = vrot.lane.b32.xlu1 %v2967_v41, %s12569_s21  ;;  %2874 = vst [vmem:[#allocation2 + $0x168] sm:$0xff] %v2810_v61  ;;  %v2575_v1 = vadd.f32 %v14079_v8, %v2574_v45  ;;  %v11318_v6 = vpop.f32.mrb[186].mxu1  ;;  %v3221_v41 = vld [vmem:[#allocation2 + $0x6a] sm:$0xff] }
 0x250   :  { %v2687_v7 = vmax.f32 %v2583_v26, 0.0  ;;  %v2586_v43 = vadd.f32 %v14079_v8, %v11318_v6  ;;  %v2577_v50 = vpop.f32.mrb[187].mxu1 }
 0x251   :  { %v2685_v57 = vmax.f32 %v2575_v1, 0.0  ;;  %v2578_v2 = vadd.f32 %v14079_v8, %v2577_v50 }
 0x252   :  { %v2815_v5 = vmax.f32 %v2751_v20, %v2687_v7  ;;  %v2688_v54 = vmax.f32 %v2586_v43, 0.0  ;;  %3287 = vrot.lane.b32.xlu0 %v3216_v22, %s12568_s20  ;;  %v3473_v20 = vld [vmem:[#allocation2 + $0x6b] sm:$0xff] }
 0x253   :  { %3293 = vrot.lane.b32.xlu1 %v3219_v15, %s12568_s20  ;;  %v2813_v44 = vmax.f32 %v2749_v0, %v2685_v57  ;;  %v2686_v4 = vmax.f32 %v2578_v2, 0.0  ;;  %v3474_v57 = vld [vmem:[#allocation2 + $0x73] sm:$0xff] }
 0x254   :  { %2879 = vst [vmem:[#allocation2 + $0x190] sm:$0xff] %v2815_v5  ;;  %v2816_v17 = vmax.f32 %v2752_v60, %v2688_v54  ;;  %v3725_v54 = vld [vmem:[#allocation2 + $0x6c] sm:$0xff] }
 0x255   :  { %2877 = vst [vmem:[#allocation2 + $0x180] sm:$0xff] %v2813_v44  ;;  %v2814_v28 = vmax.f32 %v2750_v59, %v2686_v4  ;;  %v11321_v47 = vpop.f32.mrb[188].mxu1  ;;  %v3726_v44 = vld [vmem:[#allocation2 + $0x74] sm:$0xff] }
 0x256   :  { %2880 = vst [vmem:[#allocation2 + $0x198] sm:$0xff] %v2816_v17  ;;  %v2599_v10 = vadd.f32 %v14079_v8, %v11321_v47  ;;  %v2590_v32 = vpop.f32.mrb[189].mxu1  ;;  %3539 = vrot.lane.b32.xlu0 %v3468_v38, %s12570_s24 }
 0x257   :  { %3545 = vrot.lane.b32.xlu1 %v3471_v18, %s12570_s24  ;;  %2878 = vst [vmem:[#allocation2 + $0x188] sm:$0xff] %v2814_v28  ;;  %v2591_v62 = vadd.f32 %v14079_v8, %v2590_v32  ;;  %v11322_v21 = vpop.f32.mrb[190].mxu1  ;;  %v2971_v18 = vld [vmem:[#allocation2 + $0x79] sm:$0xff]  ;;  %v3220_v32 = vld [vmem:[#allocation2 + $0x62] sm:$0xff] }
 0x258   :  { %v2691_v51 = vmax.f32 %v2599_v10, 0.0  ;;  %v2602_v24 = vadd.f32 %v14079_v8, %v11322_v21  ;;  %v2593_v46 = vpop.f32.mrb[191].mxu1  ;;  %v3223_v10 = vld [vmem:[#allocation2 + $0x7a] sm:$0xff] }
 0x259   :  { %v2689_v13 = vmax.f32 %v2591_v62, 0.0  ;;  %v2594_v25 = vadd.f32 %v14079_v8, %v2593_v46  ;;  %v3475_v62 = vld [vmem:[#allocation2 + $0x7b] sm:$0xff]  ;;  %v3724_v46 = vld [vmem:[#allocation2 + $0x64] sm:$0xff] }
 0x25a   :  { %v2819_v9 = vmax.f32 %v14014_v52, %v2691_v51  ;;  %v2692_v37 = vmax.f32 %v2602_v24, 0.0  ;;  %3791 = vrot.lane.b32.xlu0 %v3720_v35, %s12571_s27  ;;  %v3727_v24 = vld [vmem:[#allocation2 + $0x7c] sm:$0xff]  ;;  %v2974_v35 = vld [vmem:[#allocation2 + $0x91] sm:$0xff] }
 0x25b   :  { %3797 = vrot.lane.b32.xlu1 %v3723_v16, %s12571_s27  ;;  %v2817_v27 = vmax.f32 %v14016_v30, %v2689_v13  ;;  %v2690_v36 = vmax.f32 %v2594_v25, 0.0  ;;  %v2973_v16 = vld [vmem:[#allocation2 + $0x89] sm:$0xff] }
 0x25c   :  { %2883 = vst [vmem:[#allocation2 + $0x1b0] sm:$0xff] %v2819_v9  ;;  %v2820_v31 = vmax.f32 %v14018_v3, %v2692_v37  ;;  %v2894_v37 = vld [vmem:[#allocation2 + $0x8] sm:$0xff] }
 0x25d   :  { %2881 = vst [vmem:[#allocation2 + $0x1a0] sm:$0xff] %v2817_v27  ;;  %v2818_v29 = vmax.f32 %v14020_v14, %v2690_v36  ;;  %v11325_v49 = vpop.f32.mrb[192].mxu1 }
 0x25e   :  { %2884 = vst [vmem:[#allocation2 + $0x1b8] sm:$0xff] %v2820_v31  ;;  %v2615_v52 = vadd.f32 %v14079_v8, %v11325_v49  ;;  %v2606_v33 = vpop.f32.mrb[193].mxu1  ;;  %3047 = vrot.lane.b32.xlu0 %v2970_v19, %s12569_s21  ;;  %v3225_v31 = vld [vmem:[#allocation2 + $0x8a] sm:$0xff] }
 0x25f   :  { %3045 = vrot.lane.b32.xlu1 %v2969_v48, %s12569_s21  ;;  %2882 = vst [vmem:[#allocation2 + $0x1a8] sm:$0xff] %v2818_v29  ;;  %v2607_v30 = vadd.f32 %v14079_v8, %v2606_v33  ;;  %v11326_v53 = vpop.f32.mrb[194].mxu1  ;;  %v3226_v29 = vld [vmem:[#allocation2 + $0x92] sm:$0xff] }
 0x260   :  { %v2695_v23 = vmax.f32 %v2615_v52, 0.0  ;;  %v2618_v3 = vadd.f32 %v14079_v8, %v11326_v53  ;;  %v2609_v61 = vpop.f32.mrb[195].mxu1  ;;  %v12542_v49 = vld [vmem:[#allocation2 + $0x10] sm:$0xff] }
 0x261   :  { %v2693_v14 = vmax.f32 %v2607_v30, 0.0  ;;  %v2610_v11 = vadd.f32 %v14079_v8, %v2609_v61  ;;  %v3477_v30 = vld [vmem:[#allocation2 + $0x8b] sm:$0xff]  ;;  %v3478_v53 = vld [vmem:[#allocation2 + $0x93] sm:$0xff] }
 0x262   :  { %v2823_v26 = vmax.f32 %v14033_v56, %v2695_v23  ;;  %v2696_v45 = vmax.f32 %v2618_v3, 0.0  ;;  %3299 = vrot.lane.b32.xlu0 %v3222_v39, %s12568_s20  ;;  %v2893_v23 = vld [vmem:[#allocation2] sm:$0xff]  ;;  %v2896_v3 = vld [vmem:[#allocation2 + $0x18] sm:$0xff] }
 0x263   :  { %3297 = vrot.lane.b32.xlu1 %v3221_v41, %s12568_s20  ;;  %v2821_v1 = vmax.f32 %v14036_v42, %v2693_v14  ;;  %v2694_v6 = vmax.f32 %v2610_v11, 0.0 }
 0x264   :  { %2887 = vst [vmem:[#allocation2 + $0x1d0] sm:$0xff] %v2823_v26  ;;  %v2824_v7 = vmax.f32 %v14038_v34, %v2696_v45 }
 0x265   :  { %2885 = vst [vmem:[#allocation2 + $0x1c0] sm:$0xff] %v2821_v1  ;;  %v2822_v43 = vmax.f32 %v14040_v63, %v2694_v6  ;;  %v11329_v50 = vpop.f32.mrb[196].mxu1  ;;  %v3729_v6 = vld [vmem:[#allocation2 + $0x8c] sm:$0xff] }
 0x266   :  { %2888 = vst [vmem:[#allocation2 + $0x1d8] sm:$0xff] %v2824_v7  ;;  %v2631_v56 = vadd.f32 %v14079_v8, %v11329_v50  ;;  %v2622_v2 = vpop.f32.mrb[197].mxu1  ;;  %3551 = vrot.lane.b32.xlu0 %v3474_v57, %s12570_s24  ;;  %v3730_v7 = vld [vmem:[#allocation2 + $0x94] sm:$0xff] }
 0x267   :  { %3549 = vrot.lane.b32.xlu1 %v3473_v20, %s12570_s24  ;;  %2886 = vst [vmem:[#allocation2 + $0x1c8] sm:$0xff] %v2822_v43  ;;  %v2623_v42 = vadd.f32 %v14079_v8, %v2622_v2  ;;  %v11330_v15 = vpop.f32.mrb[198].mxu1 }
 0x268   :  { %v2699_v22 = vmax.f32 %v2631_v56, 0.0  ;;  %v2634_v34 = vadd.f32 %v14079_v8, %v11330_v15  ;;  %v2625_v5 = vpop.f32.mrb[199].mxu1 }
 0x269   :  { %v2697_v63 = vmax.f32 %v2623_v42, 0.0  ;;  %v2626_v0 = vadd.f32 %v14079_v8, %v2625_v5  ;;  %v2968_v8 = vld [vmem:[#allocation2 + $0x61] sm:$0xff] }
 0x26a   :  { %v2827_v60 = vmax.f32 %v14046_v12, %v2699_v22  ;;  %v2700_v4 = vmax.f32 %v2634_v34, 0.0  ;;  %3803 = vrot.lane.b32.xlu0 %v3726_v44, %s12571_s27  ;;  %v2975_v34 = vld [vmem:[#allocation2 + $0x99] sm:$0xff]  ;;  %v2972_v5 = vld [vmem:[#allocation2 + $0x81] sm:$0xff] }
 0x26b   :  { %3801 = vrot.lane.b32.xlu1 %v3725_v54, %s12571_s27  ;;  %v2825_v17 = vmax.f32 %v14048_v58, %v2697_v63  ;;  %v2698_v59 = vmax.f32 %v2626_v0, 0.0 }
 0x26c   :  { %2891 = vst [vmem:[#allocation2 + $0x1f0] sm:$0xff] %v2827_v60  ;;  %v2828_v28 = vmax.f32 %v14050_v55, %v2700_v4  ;;  %v3227_v60 = vld [vmem:[#allocation2 + $0x9a] sm:$0xff]  ;;  %v3224_v4 = vld [vmem:[#allocation2 + $0x82] sm:$0xff] }
 0x26d   :  { %2889 = vst [vmem:[#allocation2 + $0x1e0] sm:$0xff] %v2825_v17  ;;  %v2826_v47 = vmax.f32 %v14052_v40, %v2698_v59  ;;  %v3472_v40 = vld [vmem:[#allocation2 + $0x63] sm:$0xff] }
 0x26e   :  { %2892 = vst [vmem:[#allocation2 + $0x1f8] sm:$0xff] %v2828_v28  ;;  %3043 = vrot.lane.b32.xlu0 %v2968_v8, %s12569_s21  ;;  %v3479_v28 = vld [vmem:[#allocation2 + $0x9b] sm:$0xff]  ;;  %v3728_v8 = vld [vmem:[#allocation2 + $0x84] sm:$0xff] }
 0x26f   :  { %3049 = vrot.lane.b32.xlu1 %v2971_v18, %s12569_s21  ;;  %2890 = vst [vmem:[#allocation2 + $0x1e8] sm:$0xff] %v2826_v47  ;;  %v3476_v47 = vld [vmem:[#allocation2 + $0x83] sm:$0xff] }
 0x270   :  { %v3276_v12 = vpop.permute.xlu0 %3275  ;;  %v3731_v18 = vld [vmem:[#allocation2 + $0x9c] sm:$0xff] }
 0x271   :  { %v3024_v38 = vpop.permute.xlu1 %3023 }
 0x272   :  { %3295 = vrot.lane.b32.xlu0 %v3220_v32, %s12568_s20  ;;  %v3147_v48 = vadd.f32 %v12542_v49, %v3024_v38 }
 0x273   :  { %3301 = vrot.lane.b32.xlu1 %v3223_v10, %s12568_s20 }
 0x274   :  { %v3528_v58 = vpop.permute.xlu0 %3527  ;;  %v3399_v61 = vadd.f32 %v3276_v12, %v3147_v48 }
 0x275   :  { %v3274_v55 = vpop.permute.xlu1 %3273 }
 0x276   :  { %3547 = vrot.lane.b32.xlu0 %v3472_v40, %s12570_s24  ;;  %v3651_v43 = vadd.f32 %v3528_v58, %v3399_v61  ;;  %v2978_v40 = vld [vmem:[#allocation2 + $0xb1] sm:$0xff] }
 0x277   :  { %3553 = vrot.lane.b32.xlu1 %v3475_v62, %s12570_s24  ;;  %v2977_v62 = vld [vmem:[#allocation2 + $0xa9] sm:$0xff]  ;;  %v3734_v61 = vld [vmem:[#allocation2 + $0xb4] sm:$0xff] }
 0x278   :  { %v3780_v21 = vpop.permute.xlu0 %3779 }
 0x279   :  { %v3526_v51 = vpop.permute.xlu1 %3525  ;;  %v3903_v2 = vadd.f32 %v3780_v21, %v3651_v43 }
 0x27a   :  { %3799 = vrot.lane.b32.xlu0 %v3724_v46, %s12571_s27  ;;  %v3230_v46 = vld [vmem:[#allocation2 + $0xb2] sm:$0xff] }
 0x27b   :  { %3805 = vrot.lane.b32.xlu1 %v3727_v24, %s12571_s27  ;;  %v3229_v24 = vld [vmem:[#allocation2 + $0xaa] sm:$0xff] }
 0x27c   :  { %v3020_v25 = vpop.permute.xlu0 %3019 }
 0x27d   :  { %v3778_v13 = vpop.permute.xlu1 %3777  ;;  %v3145_v14 = vadd.f32 %v3020_v25, %v2893_v23 }
 0x27e   :  { %3055 = vrot.lane.b32.xlu0 %v2974_v35, %s12569_s21  ;;  %v3481_v35 = vld [vmem:[#allocation2 + $0xab] sm:$0xff] }
 0x27f   :  { %3053 = vrot.lane.b32.xlu1 %v2973_v16, %s12569_s21  ;;  %v2899_v16 = vld [vmem:[#allocation2 + $0x30] sm:$0xff] }
 0x280   :  { %v3022_v27 = vpop.permute.xlu0 %3021 }
 0x281   :  { %v3026_v9 = vpop.permute.xlu1 %3025  ;;  %v3146_v36 = vadd.f32 %v3022_v27, %v2894_v37  ;;  %v2898_v37 = vld [vmem:[#allocation2 + $0x28] sm:$0xff]  ;;  %v2900_v27 = vld [vmem:[#allocation2 + $0x38] sm:$0xff] }
 0x282   :  { %3307 = vrot.lane.b32.xlu0 %v3226_v29, %s12568_s20  ;;  %v3148_v11 = vadd.f32 %v3026_v9, %v2896_v3  ;;  %v3482_v9 = vld [vmem:[#allocation2 + $0xb3] sm:$0xff] }
 0x283   :  { %3305 = vrot.lane.b32.xlu1 %v3225_v31, %s12568_s20  ;;  %v3398_v33 = vadd.f32 %v3274_v55, %v3146_v36  ;;  %v2897_v36 = vld [vmem:[#allocation2 + $0x20] sm:$0xff]  ;;  %v3733_v3 = vld [vmem:[#allocation2 + $0xac] sm:$0xff] }
 0x284   :  { %v3272_v52 = vpop.permute.xlu0 %3271 }
 0x285   :  { %v3278_v19 = vpop.permute.xlu1 %3277  ;;  %v3650_v26 = vadd.f32 %v3526_v51, %v3398_v33  ;;  %v3397_v1 = vadd.f32 %v3272_v52, %v3145_v14 }
 0x286   :  { %3559 = vrot.lane.b32.xlu0 %v3478_v53, %s12570_s24  ;;  %v3400_v45 = vadd.f32 %v3278_v19, %v3148_v11 }
 0x287   :  { %3557 = vrot.lane.b32.xlu1 %v3477_v30, %s12570_s24  ;;  %v3902_v15 = vadd.f32 %v3778_v13, %v3650_v26 }
 0x288   :  { %v3524_v39 = vpop.permute.xlu0 %3523 }
 0x289   :  { %v3530_v41 = vpop.permute.xlu1 %3529  ;;  %v3649_v20 = vadd.f32 %v3524_v39, %v3397_v1 }
 0x28a   :  { %3811 = vrot.lane.b32.xlu0 %v3730_v7, %s12571_s27  ;;  %v3652_v50 = vadd.f32 %v3530_v41, %v3400_v45 }
 0x28b   :  { %3809 = vrot.lane.b32.xlu1 %v3729_v6, %s12571_s27 }
 0x28c   :  { %v3776_v56 = vpop.permute.xlu0 %3775 }
 0x28d   :  { %v3782_v57 = vpop.permute.xlu1 %3781  ;;  %v3901_v22 = vadd.f32 %v3776_v56, %v3649_v20  ;;  %v2976_v20 = vld [vmem:[#allocation2 + $0xa1] sm:$0xff] }
 0x28e   :  { %v3904_v42 = vadd.f32 %v3782_v57, %v3652_v50  ;;  %3051 = vrot.lane.b32.xlu0 %v2972_v5, %s12569_s21  ;;  %v2979_v50 = vld [vmem:[#allocation2 + $0xb9] sm:$0xff] }
 0x28f   :  { %3057 = vrot.lane.b32.xlu1 %v2975_v34, %s12569_s21  ;;  %v10480_v0 = vpack.c.bf16 %v3902_v15, %v3901_v22  ;;  %v3231_v15 = vld [vmem:[#allocation2 + $0xba] sm:$0xff]  ;;  %v3228_v22 = vld [vmem:[#allocation2 + $0xa2] sm:$0xff] }
 0x290   :  { %v10485_v63 = vpack.c.bf16 %v3904_v42, %v3903_v2  ;;  %v3032_v44 = vpop.permute.xlu0 %3031 }
 0x291   :  { %v3030_v54 = vpop.permute.xlu1 %3029  ;;  %10481 = vst [vmem:[#allocation3] sm:$0xff] %v10480_v0   ;;  %v3151_v29 = vadd.f32 %v3032_v44, %v2899_v16  ;;  %v3480_v0 = vld [vmem:[#allocation2 + $0xa3] sm:$0xff] }
 0x292   :  { %10632 = vst [vmem:[#allocation3 + $0x8] sm:$0xff] %v10485_v63   ;;  %3303 = vrot.lane.b32.xlu0 %v3224_v4, %s12568_s20  ;;  %v3150_v31 = vadd.f32 %v3030_v54, %v2898_v37  ;;  %v3483_v63 = vld [vmem:[#allocation2 + $0xbb] sm:$0xff]  ;;  %v3732_v44 = vld [vmem:[#allocation2 + $0xa4] sm:$0xff] }
 0x293   :  { %3309 = vrot.lane.b32.xlu1 %v3227_v60, %s12568_s20  ;;  %v3735_v54 = vld [vmem:[#allocation2 + $0xbc] sm:$0xff] }
 0x294   :  { %v3284_v59 = vpop.permute.xlu0 %3283 }
 0x295   :  { %v3282_v17 = vpop.permute.xlu1 %3281  ;;  %v3403_v30 = vadd.f32 %v3284_v59, %v3151_v29 }
 0x296   :  { %3555 = vrot.lane.b32.xlu0 %v3476_v47, %s12570_s24  ;;  %v3402_v33 = vadd.f32 %v3282_v17, %v3150_v31 }
 0x297   :  { %3561 = vrot.lane.b32.xlu1 %v3479_v28, %s12570_s24 }
 0x298   :  { %v3536_v38 = vpop.permute.xlu0 %3535  ;;  %v12288_v10 = vld [vmem:[#allocation3] sm:$0xff]  }
 0x299   :  { %v3534_v12 = vpop.permute.xlu1 %3533  ;;  %v12289_v32 = vld [vmem:[#allocation3 + $0x8] sm:$0xff]   ;;  %11347 = vmatprep.mubr.bf16.mxu0 %v12288_v10  ;;  %v3655_v11 = vadd.f32 %v3536_v38, %v3403_v30 }
 0x29a   :  { %3807 = vrot.lane.b32.xlu0 %v3728_v8, %s12571_s27  ;;  %11348 = vmatmul.mubr.bf16.vlgmr.msra.gmra.mrb[56].mxu0 %v12289_v32  ;;  %v3654_v14 = vadd.f32 %v3534_v12, %v3402_v33  ;;  %v2982_v8 = vld [vmem:[#allocation2 + $0xd1] sm:$0xff] }
 0x29b   :  { %3813 = vrot.lane.b32.xlu1 %v3731_v18, %s12571_s27  ;;  %v2981_v18 = vld [vmem:[#allocation2 + $0xc9] sm:$0xff]  ;;  %v3234_v32 = vld [vmem:[#allocation2 + $0xd2] sm:$0xff] }
 0x29c   :  { %v3788_v55 = vpop.permute.xlu0 %3787  ;;  %v3233_v10 = vld [vmem:[#allocation2 + $0xca] sm:$0xff] }
 0x29d   :  { %v3786_v58 = vpop.permute.xlu1 %3785  ;;  %v3907_v6 = vadd.f32 %v3788_v55, %v3655_v11 }
 0x29e   :  { %3063 = vrot.lane.b32.xlu0 %v2978_v40, %s12569_s21  ;;  %v3906_v1 = vadd.f32 %v3786_v58, %v3654_v14  ;;  %v3485_v40 = vld [vmem:[#allocation2 + $0xcb] sm:$0xff] }
 0x29f   :  { %3061 = vrot.lane.b32.xlu1 %v2977_v62, %s12569_s21  ;;  %v2903_v62 = vld [vmem:[#allocation2 + $0x50] sm:$0xff] }
 0x2a0   :  { %v3028_v51 = vpop.permute.xlu0 %3027 }
 0x2a1   :  { %v3034_v21 = vpop.permute.xlu1 %3033  ;;  %v3149_v48 = vadd.f32 %v3028_v51, %v2897_v36  ;;  %v2902_v51 = vld [vmem:[#allocation2 + $0x48] sm:$0xff] }
 0x2a2   :  { %3315 = vrot.lane.b32.xlu0 %v3230_v46, %s12568_s20  ;;  %v3152_v49 = vadd.f32 %v3034_v21, %v2900_v27  ;;  %v3486_v21 = vld [vmem:[#allocation2 + $0xd3] sm:$0xff]  ;;  %v2901_v46 = vld [vmem:[#allocation2 + $0x40] sm:$0xff] }
 0x2a3   :  { %3313 = vrot.lane.b32.xlu1 %v3229_v24, %s12568_s20  ;;  %v2904_v24 = vld [vmem:[#allocation2 + $0x58] sm:$0xff] }
 0x2a4   :  { %v3280_v25 = vpop.permute.xlu0 %3279 }
 0x2a5   :  { %v3286_v13 = vpop.permute.xlu1 %3285  ;;  %v3401_v23 = vadd.f32 %v3280_v25, %v3149_v48  ;;  %v3738_v48 = vld [vmem:[#allocation2 + $0xd4] sm:$0xff] }
 0x2a6   :  { %3567 = vrot.lane.b32.xlu0 %v3482_v9, %s12570_s24  ;;  %v3404_v53 = vadd.f32 %v3286_v13, %v3152_v49  ;;  %v3737_v49 = vld [vmem:[#allocation2 + $0xcc] sm:$0xff] }
 0x2a7   :  { %3565 = vrot.lane.b32.xlu1 %v3481_v35, %s12570_s24 }
 0x2a8   :  { %v3532_v52 = vpop.permute.xlu0 %3531 }
 0x2a9   :  { %v3538_v19 = vpop.permute.xlu1 %3537  ;;  %v3653_v39 = vadd.f32 %v3532_v52, %v3401_v23 }
 0x2aa   :  { %3819 = vrot.lane.b32.xlu0 %v3734_v61, %s12571_s27  ;;  %v3656_v41 = vadd.f32 %v3538_v19, %v3404_v53 }
 0x2ab   :  { %3817 = vrot.lane.b32.xlu1 %v3733_v3, %s12571_s27 }
 0x2ac   :  { %v3784_v45 = vpop.permute.xlu0 %3783 }
 0x2ad   :  { %v3790_v26 = vpop.permute.xlu1 %3789  ;;  %v3905_v43 = vadd.f32 %v3784_v45, %v3653_v39  ;;  %v2980_v39 = vld [vmem:[#allocation2 + $0xc1] sm:$0xff] }
 0x2ae   :  { %v3908_v7 = vadd.f32 %v3790_v26, %v3656_v41  ;;  %3059 = vrot.lane.b32.xlu0 %v2976_v20, %s12569_s21  ;;  %v2983_v41 = vld [vmem:[#allocation2 + $0xd9] sm:$0xff] }
 0x2af   :  { %3065 = vrot.lane.b32.xlu1 %v2979_v50, %s12569_s21  ;;  %v10490_v56 = vpack.c.bf16 %v3906_v1, %v3905_v43  ;;  %v3232_v43 = vld [vmem:[#allocation2 + $0xc2] sm:$0xff] }
 0x2b0   :  { %v10495_v57 = vpack.c.bf16 %v3908_v7, %v3907_v6  ;;  %v3040_v42 = vpop.permute.xlu0 %3039  ;;  %v3235_v7 = vld [vmem:[#allocation2 + $0xda] sm:$0xff] }
 0x2b1   :  { %v3038_v2 = vpop.permute.xlu1 %3037  ;;  %10633 = vst [vmem:[#allocation3 + $0x10] sm:$0xff] %v10490_v56   ;;  %v3155_v25 = vadd.f32 %v3040_v42, %v2903_v62  ;;  %v3484_v56 = vld [vmem:[#allocation2 + $0xc3] sm:$0xff] }
 0x2b2   :  { %10634 = vst [vmem:[#allocation3 + $0x18] sm:$0xff] %v10495_v57   ;;  %3311 = vrot.lane.b32.xlu0 %v3228_v22, %s12568_s20  ;;  %v3154_v13 = vadd.f32 %v3038_v2, %v2902_v51  ;;  %v3487_v57 = vld [vmem:[#allocation2 + $0xdb] sm:$0xff]  ;;  %v3736_v42 = vld [vmem:[#allocation2 + $0xc4] sm:$0xff] }
 0x2b3   :  { %3317 = vrot.lane.b32.xlu1 %v3231_v15, %s12568_s20  ;;  %v3739_v2 = vld [vmem:[#allocation2 + $0xdc] sm:$0xff] }
 0x2b4   :  { %v3292_v5 = vpop.permute.xlu0 %3291 }
 0x2b5   :  { %v3290_v34 = vpop.permute.xlu1 %3289  ;;  %v3407_v36 = vadd.f32 %v3292_v5, %v3155_v25 }
 0x2b6   :  { %3563 = vrot.lane.b32.xlu0 %v3480_v0, %s12570_s24  ;;  %v3406_v27 = vadd.f32 %v3290_v34, %v3154_v13 }
 0x2b7   :  { %3569 = vrot.lane.b32.xlu1 %v3483_v63, %s12570_s24 }
 0x2b8   :  { %v3544_v4 = vpop.permute.xlu0 %3543  ;;  %v12290_v17 = vld [vmem:[#allocation3 + $0x10] sm:$0xff]  }
 0x2b9   :  { %v3542_v60 = vpop.permute.xlu1 %3541  ;;  %v12291_v59 = vld [vmem:[#allocation3 + $0x18] sm:$0xff]   ;;  %11351 = vmatprep.mubr.bf16.mxu0 %v12290_v17  ;;  %v3659_v52 = vadd.f32 %v3544_v4, %v3407_v36 }
 0x2ba   :  { %3815 = vrot.lane.b32.xlu0 %v3732_v44, %s12571_s27  ;;  %11352 = vmatmul.mubr.bf16.gmra.mrb[60].mxu0 %v12291_v59  ;;  %v3658_v19 = vadd.f32 %v3542_v60, %v3406_v27  ;;  %v2985_v44 = vld [vmem:[#allocation2 + $0xe9] sm:$0xff]  ;;  %v3238_v17 = vld [vmem:[#allocation2 + $0xf2] sm:$0xff] }
 0x2bb   :  { %3821 = vrot.lane.b32.xlu1 %v3735_v54, %s12571_s27  ;;  %v2986_v54 = vld [vmem:[#allocation2 + $0xf1] sm:$0xff] }
 0x2bc   :  { %v3796_v47 = vpop.permute.xlu0 %3795  ;;  %v3237_v59 = vld [vmem:[#allocation2 + $0xea] sm:$0xff] }
 0x2bd   :  { %v3794_v28 = vpop.permute.xlu1 %3793  ;;  %v3911_v61 = vadd.f32 %v3796_v47, %v3659_v52 }
 0x2be   :  { %3071 = vrot.lane.b32.xlu0 %v2982_v8, %s12569_s21  ;;  %v3910_v3 = vadd.f32 %v3794_v28, %v3658_v19  ;;  %v3489_v8 = vld [vmem:[#allocation2 + $0xeb] sm:$0xff] }
 0x2bf   :  { %3069 = vrot.lane.b32.xlu1 %v2981_v18, %s12569_s21  ;;  %v2907_v18 = vld [vmem:[#allocation2 + $0x70] sm:$0xff] }
 0x2c0   :  { %v3036_v38 = vpop.permute.xlu0 %3035 }
 0x2c1   :  { %v3042_v12 = vpop.permute.xlu1 %3041  ;;  %v3153_v35 = vadd.f32 %v3036_v38, %v2901_v46  ;;  %v2906_v38 = vld [vmem:[#allocation2 + $0x68] sm:$0xff] }
 0x2c2   :  { %3323 = vrot.lane.b32.xlu0 %v3234_v32, %s12568_s20  ;;  %v3156_v16 = vadd.f32 %v3042_v12, %v2904_v24  ;;  %v3490_v12 = vld [vmem:[#allocation2 + $0xf3] sm:$0xff]  ;;  %v2905_v32 = vld [vmem:[#allocation2 + $0x60] sm:$0xff] }
 0x2c3   :  { %3321 = vrot.lane.b32.xlu1 %v3233_v10, %s12568_s20  ;;  %v2908_v10 = vld [vmem:[#allocation2 + $0x78] sm:$0xff] }
 0x2c4   :  { %v3288_v55 = vpop.permute.xlu0 %3287 }
 0x2c5   :  { %v3294_v58 = vpop.permute.xlu1 %3293  ;;  %v3405_v29 = vadd.f32 %v3288_v55, %v3153_v35  ;;  %v3742_v35 = vld [vmem:[#allocation2 + $0xf4] sm:$0xff] }
 0x2c6   :  { %3575 = vrot.lane.b32.xlu0 %v3486_v21, %s12570_s24  ;;  %v3408_v31 = vadd.f32 %v3294_v58, %v3156_v16  ;;  %v3741_v16 = vld [vmem:[#allocation2 + $0xec] sm:$0xff] }
 0x2c7   :  { %3573 = vrot.lane.b32.xlu1 %v3485_v40, %s12570_s24 }
 0x2c8   :  { %v3540_v37 = vpop.permute.xlu0 %3539 }
 0x2c9   :  { %v3546_v9 = vpop.permute.xlu1 %3545  ;;  %v3657_v30 = vadd.f32 %v3540_v37, %v3405_v29 }
 0x2ca   :  { %3827 = vrot.lane.b32.xlu0 %v3738_v48, %s12571_s27  ;;  %v3660_v33 = vadd.f32 %v3546_v9, %v3408_v31 }
 0x2cb   :  { %3825 = vrot.lane.b32.xlu1 %v3737_v49, %s12571_s27 }
 0x2cc   :  { %v3792_v23 = vpop.permute.xlu0 %3791 }
 0x2cd   :  { %v3798_v53 = vpop.permute.xlu1 %3797  ;;  %v3909_v11 = vadd.f32 %v3792_v23, %v3657_v30  ;;  %v2984_v30 = vld [vmem:[#allocation2 + $0xe1] sm:$0xff] }
 0x2ce   :  { %v3912_v14 = vadd.f32 %v3798_v53, %v3660_v33  ;;  %3067 = vrot.lane.b32.xlu0 %v2980_v39, %s12569_s21  ;;  %v2987_v33 = vld [vmem:[#allocation2 + $0xf9] sm:$0xff] }
 0x2cf   :  { %3073 = vrot.lane.b32.xlu1 %v2983_v41, %s12569_s21  ;;  %v10500_v45 = vpack.c.bf16 %v3910_v3, %v3909_v11  ;;  %v3236_v11 = vld [vmem:[#allocation2 + $0xe2] sm:$0xff] }
 0x2d0   :  { %v10505_v26 = vpack.c.bf16 %v3912_v14, %v3911_v61  ;;  %v3048_v6 = vpop.permute.xlu0 %3047  ;;  %v3239_v14 = vld [vmem:[#allocation2 + $0xfa] sm:$0xff] }
 0x2d1   :  { %v3046_v1 = vpop.permute.xlu1 %3045  ;;  %10635 = vst [vmem:[#allocation3 + $0x20] sm:$0xff] %v10500_v45   ;;  %v3159_v55 = vadd.f32 %v3048_v6, %v2907_v18  ;;  %v3488_v45 = vld [vmem:[#allocation2 + $0xe3] sm:$0xff] }
 0x2d2   :  { %10636 = vst [vmem:[#allocation3 + $0x28] sm:$0xff] %v10505_v26   ;;  %3319 = vrot.lane.b32.xlu0 %v3232_v43, %s12568_s20  ;;  %v3158_v58 = vadd.f32 %v3046_v1, %v2906_v38  ;;  %v3491_v26 = vld [vmem:[#allocation2 + $0xfb] sm:$0xff]  ;;  %v3740_v6 = vld [vmem:[#allocation2 + $0xe4] sm:$0xff] }
 0x2d3   :  { %3325 = vrot.lane.b32.xlu1 %v3235_v7, %s12568_s20  ;;  %v3743_v1 = vld [vmem:[#allocation2 + $0xfc] sm:$0xff] }
 0x2d4   :  { %v3300_v20 = vpop.permute.xlu0 %3299 }
 0x2d5   :  { %v3298_v50 = vpop.permute.xlu1 %3297  ;;  %v3411_v46 = vadd.f32 %v3300_v20, %v3159_v55 }
 0x2d6   :  { %3571 = vrot.lane.b32.xlu0 %v3484_v56, %s12570_s24  ;;  %v3410_v24 = vadd.f32 %v3298_v50, %v3158_v58 }
 0x2d7   :  { %3577 = vrot.lane.b32.xlu1 %v3487_v57, %s12570_s24 }
 0x2d8   :  { %v3552_v22 = vpop.permute.xlu0 %3551  ;;  %v12292_v34 = vld [vmem:[#allocation3 + $0x20] sm:$0xff]  }
 0x2d9   :  { %v3550_v15 = vpop.permute.xlu1 %3549  ;;  %v12293_v5 = vld [vmem:[#allocation3 + $0x28] sm:$0xff]   ;;  %11355 = vmatprep.mubr.bf16.mxu0 %v12292_v34  ;;  %v3663_v37 = vadd.f32 %v3552_v22, %v3411_v46  ;;  %v3242_v34 = vld [vmem:[#allocation2 + $0x112] sm:$0xff] }
 0x2da   :  { %3823 = vrot.lane.b32.xlu0 %v3736_v42, %s12571_s27  ;;  %11356 = vmatmul.mubr.bf16.gmra.mrb[64].mxu0 %v12293_v5  ;;  %v3662_v9 = vadd.f32 %v3550_v15, %v3410_v24  ;;  %v2989_v42 = vld [vmem:[#allocation2 + $0x109] sm:$0xff] }
 0x2db   :  { %3829 = vrot.lane.b32.xlu1 %v3739_v2, %s12571_s27  ;;  %v2990_v2 = vld [vmem:[#allocation2 + $0x111] sm:$0xff] }
 0x2dc   :  { %v3804_v0 = vpop.permute.xlu0 %3803  ;;  %v3241_v5 = vld [vmem:[#allocation2 + $0x10a] sm:$0xff] }
 0x2dd   :  { %v3802_v63 = vpop.permute.xlu1 %3801  ;;  %v3915_v48 = vadd.f32 %v3804_v0, %v3663_v37 }
 0x2de   :  { %3079 = vrot.lane.b32.xlu0 %v2986_v54, %s12569_s21  ;;  %v3914_v49 = vadd.f32 %v3802_v63, %v3662_v9  ;;  %v2911_v54 = vld [vmem:[#allocation2 + $0x90] sm:$0xff] }
 0x2df   :  { %3077 = vrot.lane.b32.xlu1 %v2985_v44, %s12569_s21  ;;  %v3493_v44 = vld [vmem:[#allocation2 + $0x10b] sm:$0xff] }
 0x2e0   :  { %v3044_v4 = vpop.permute.xlu0 %3043 }
 0x2e1   :  { %v3050_v60 = vpop.permute.xlu1 %3049  ;;  %v3157_v40 = vadd.f32 %v3044_v4, %v2905_v32  ;;  %v2910_v4 = vld [vmem:[#allocation2 + $0x88] sm:$0xff] }
 0x2e2   :  { %3331 = vrot.lane.b32.xlu0 %v3238_v17, %s12568_s20  ;;  %v3160_v62 = vadd.f32 %v3050_v60, %v2908_v10  ;;  %v3494_v60 = vld [vmem:[#allocation2 + $0x113] sm:$0xff] }
 0x2e3   :  { %3329 = vrot.lane.b32.xlu1 %v3237_v59, %s12568_s20  ;;  %v2912_v17 = vld [vmem:[#allocation2 + $0x98] sm:$0xff]  ;;  %v2909_v59 = vld [vmem:[#allocation2 + $0x80] sm:$0xff] }
 0x2e4   :  { %v3296_v47 = vpop.permute.xlu0 %3295 }
 0x2e5   :  { %v3302_v28 = vpop.permute.xlu1 %3301  ;;  %v3409_v25 = vadd.f32 %v3296_v47, %v3157_v40  ;;  %v3746_v40 = vld [vmem:[#allocation2 + $0x114] sm:$0xff] }
 0x2e6   :  { %3583 = vrot.lane.b32.xlu0 %v3490_v12, %s12570_s24  ;;  %v3412_v13 = vadd.f32 %v3302_v28, %v3160_v62  ;;  %v3745_v62 = vld [vmem:[#allocation2 + $0x10c] sm:$0xff] }
 0x2e7   :  { %3581 = vrot.lane.b32.xlu1 %v3489_v8, %s12570_s24 }
 0x2e8   :  { %v3548_v51 = vpop.permute.xlu0 %3547 }
 0x2e9   :  { %v3554_v21 = vpop.permute.xlu1 %3553  ;;  %v3661_v36 = vadd.f32 %v3548_v51, %v3409_v25 }
 0x2ea   :  { %3835 = vrot.lane.b32.xlu0 %v3742_v35, %s12571_s27  ;;  %v3664_v27 = vadd.f32 %v3554_v21, %v3412_v13 }
 0x2eb   :  { %3833 = vrot.lane.b32.xlu1 %v3741_v16, %s12571_s27 }
 0x2ec   :  { %v3800_v29 = vpop.permute.xlu0 %3799 }
 0x2ed   :  { %v3806_v31 = vpop.permute.xlu1 %3805  ;;  %v3913_v52 = vadd.f32 %v3800_v29, %v3661_v36  ;;  %v2988_v36 = vld [vmem:[#allocation2 + $0x101] sm:$0xff] }
 0x2ee   :  { %v3916_v19 = vadd.f32 %v3806_v31, %v3664_v27  ;;  %3075 = vrot.lane.b32.xlu0 %v2984_v30, %s12569_s21  ;;  %v2991_v27 = vld [vmem:[#allocation2 + $0x119] sm:$0xff] }
 0x2ef   :  { %3081 = vrot.lane.b32.xlu1 %v2987_v33, %s12569_s21  ;;  %v10510_v23 = vpack.c.bf16 %v3914_v49, %v3913_v52  ;;  %v3240_v52 = vld [vmem:[#allocation2 + $0x102] sm:$0xff] }
 0x2f0   :  { %v10515_v53 = vpack.c.bf16 %v3916_v19, %v3915_v48  ;;  %v3056_v61 = vpop.permute.xlu0 %3055  ;;  %v3243_v19 = vld [vmem:[#allocation2 + $0x11a] sm:$0xff] }
 0x2f1   :  { %v3054_v3 = vpop.permute.xlu1 %3053  ;;  %10637 = vst [vmem:[#allocation3 + $0x30] sm:$0xff] %v10510_v23   ;;  %v3163_v47 = vadd.f32 %v3056_v61, %v2911_v54  ;;  %v3492_v23 = vld [vmem:[#allocation2 + $0x103] sm:$0xff] }
 0x2f2   :  { %10638 = vst [vmem:[#allocation3 + $0x38] sm:$0xff] %v10515_v53   ;;  %3327 = vrot.lane.b32.xlu0 %v3236_v11, %s12568_s20  ;;  %v3162_v28 = vadd.f32 %v3054_v3, %v2910_v4  ;;  %v3495_v53 = vld [vmem:[#allocation2 + $0x11b] sm:$0xff]  ;;  %v3744_v61 = vld [vmem:[#allocation2 + $0x104] sm:$0xff] }
 0x2f3   :  { %3333 = vrot.lane.b32.xlu1 %v3239_v14, %s12568_s20  ;;  %v3747_v3 = vld [vmem:[#allocation2 + $0x11c] sm:$0xff] }
 0x2f4   :  { %v3308_v39 = vpop.permute.xlu0 %3307 }
 0x2f5   :  { %v3306_v41 = vpop.permute.xlu1 %3305  ;;  %v3415_v32 = vadd.f32 %v3308_v39, %v3163_v47 }
 0x2f6   :  { %3579 = vrot.lane.b32.xlu0 %v3488_v45, %s12570_s24  ;;  %v3414_v10 = vadd.f32 %v3306_v41, %v3162_v28 }
 0x2f7   :  { %3585 = vrot.lane.b32.xlu1 %v3491_v26, %s12570_s24 }
 0x2f8   :  { %v3560_v43 = vpop.permute.xlu0 %3559  ;;  %v12294_v50 = vld [vmem:[#allocation3 + $0x30] sm:$0xff]  }
 0x2f9   :  { %v3558_v7 = vpop.permute.xlu1 %3557  ;;  %v12295_v20 = vld [vmem:[#allocation3 + $0x38] sm:$0xff]   ;;  %11359 = vmatprep.mubr.bf16.mxu0 %v12294_v50  ;;  %v3667_v51 = vadd.f32 %v3560_v43, %v3415_v32 }
 0x2fa   :  { %3831 = vrot.lane.b32.xlu0 %v3740_v6, %s12571_s27  ;;  %11360 = vmatmul.mubr.bf16.gmra.mrb[68].mxu0 %v12295_v20  ;;  %v3666_v21 = vadd.f32 %v3558_v7, %v3414_v10  ;;  %v2993_v6 = vld [vmem:[#allocation2 + $0x129] sm:$0xff]  ;;  %v3246_v50 = vld [vmem:[#allocation2 + $0x132] sm:$0xff] }
 0x2fb   :  { %3837 = vrot.lane.b32.xlu1 %v3743_v1, %s12571_s27  ;;  %v2994_v1 = vld [vmem:[#allocation2 + $0x131] sm:$0xff] }
 0x2fc   :  { %v3812_v56 = vpop.permute.xlu0 %3811  ;;  %v3245_v20 = vld [vmem:[#allocation2 + $0x12a] sm:$0xff] }
 0x2fd   :  { %v3810_v57 = vpop.permute.xlu1 %3809  ;;  %v3919_v35 = vadd.f32 %v3812_v56, %v3667_v51 }
 0x2fe   :  { %3087 = vrot.lane.b32.xlu0 %v2990_v2, %s12569_s21  ;;  %v3918_v16 = vadd.f32 %v3810_v57, %v3666_v21  ;;  %v2915_v2 = vld [vmem:[#allocation2 + $0xb0] sm:$0xff] }
 0x2ff   :  { %3085 = vrot.lane.b32.xlu1 %v2989_v42, %s12569_s21  ;;  %v3497_v42 = vld [vmem:[#allocation2 + $0x12b] sm:$0xff] }
 0x300   :  { %v3052_v22 = vpop.permute.xlu0 %3051 }
 0x301   :  { %v3058_v15 = vpop.permute.xlu1 %3057  ;;  %v3161_v8 = vadd.f32 %v3052_v22, %v2909_v59  ;;  %v2914_v22 = vld [vmem:[#allocation2 + $0xa8] sm:$0xff] }
 0x302   :  { %3339 = vrot.lane.b32.xlu0 %v3242_v34, %s12568_s20  ;;  %v3164_v18 = vadd.f32 %v3058_v15, %v2912_v17  ;;  %v3498_v15 = vld [vmem:[#allocation2 + $0x133] sm:$0xff] }
 0x303   :  { %3337 = vrot.lane.b32.xlu1 %v3241_v5, %s12568_s20  ;;  %v2916_v34 = vld [vmem:[#allocation2 + $0xb8] sm:$0xff]  ;;  %v2913_v5 = vld [vmem:[#allocation2 + $0xa0] sm:$0xff] }
 0x304   :  { %v3304_v0 = vpop.permute.xlu0 %3303 }
 0x305   :  { %v3310_v63 = vpop.permute.xlu1 %3309  ;;  %v3413_v55 = vadd.f32 %v3304_v0, %v3161_v8  ;;  %v3750_v8 = vld [vmem:[#allocation2 + $0x134] sm:$0xff] }
 0x306   :  { %3591 = vrot.lane.b32.xlu0 %v3494_v60, %s12570_s24  ;;  %v3416_v58 = vadd.f32 %v3310_v63, %v3164_v18  ;;  %v3749_v18 = vld [vmem:[#allocation2 + $0x12c] sm:$0xff] }
 0x307   :  { %3589 = vrot.lane.b32.xlu1 %v3493_v44, %s12570_s24 }
 0x308   :  { %v3556_v38 = vpop.permute.xlu0 %3555 }
 0x309   :  { %v3562_v12 = vpop.permute.xlu1 %3561  ;;  %v3665_v46 = vadd.f32 %v3556_v38, %v3413_v55 }
 0x30a   :  { %3843 = vrot.lane.b32.xlu0 %v3746_v40, %s12571_s27  ;;  %v3668_v24 = vadd.f32 %v3562_v12, %v3416_v58 }
 0x30b   :  { %3841 = vrot.lane.b32.xlu1 %v3745_v62, %s12571_s27 }
 0x30c   :  { %v3808_v25 = vpop.permute.xlu0 %3807 }
 0x30d   :  { %v3814_v13 = vpop.permute.xlu1 %3813  ;;  %v3917_v37 = vadd.f32 %v3808_v25, %v3665_v46  ;;  %v2992_v46 = vld [vmem:[#allocation2 + $0x121] sm:$0xff] }
 0x30e   :  { %v3920_v9 = vadd.f32 %v3814_v13, %v3668_v24  ;;  %3083 = vrot.lane.b32.xlu0 %v2988_v36, %s12569_s21  ;;  %v2995_v24 = vld [vmem:[#allocation2 + $0x139] sm:$0xff] }
 0x30f   :  { %3089 = vrot.lane.b32.xlu1 %v2991_v27, %s12569_s21  ;;  %v10520_v29 = vpack.c.bf16 %v3918_v16, %v3917_v37  ;;  %v3244_v37 = vld [vmem:[#allocation2 + $0x122] sm:$0xff] }
 0x310   :  { %v10525_v31 = vpack.c.bf16 %v3920_v9, %v3919_v35  ;;  %v3064_v48 = vpop.permute.xlu0 %3063  ;;  %v3247_v9 = vld [vmem:[#allocation2 + $0x13a] sm:$0xff] }
 0x311   :  { %v3062_v49 = vpop.permute.xlu1 %3061  ;;  %10639 = vst [vmem:[#allocation3 + $0x40] sm:$0xff] %v10520_v29   ;;  %v3167_v0 = vadd.f32 %v3064_v48, %v2915_v2  ;;  %v3496_v29 = vld [vmem:[#allocation2 + $0x123] sm:$0xff] }
 0x312   :  { %10640 = vst [vmem:[#allocation3 + $0x48] sm:$0xff] %v10525_v31   ;;  %3335 = vrot.lane.b32.xlu0 %v3240_v52, %s12568_s20  ;;  %v3166_v63 = vadd.f32 %v3062_v49, %v2914_v22  ;;  %v3499_v31 = vld [vmem:[#allocation2 + $0x13b] sm:$0xff]  ;;  %v3748_v48 = vld [vmem:[#allocation2 + $0x124] sm:$0xff] }
 0x313   :  { %3341 = vrot.lane.b32.xlu1 %v3243_v19, %s12568_s20  ;;  %v3751_v49 = vld [vmem:[#allocation2 + $0x13c] sm:$0xff] }
 0x314   :  { %v3316_v30 = vpop.permute.xlu0 %3315 }
 0x315   :  { %v3314_v33 = vpop.permute.xlu1 %3313  ;;  %v3419_v59 = vadd.f32 %v3316_v30, %v3167_v0 }
 0x316   :  { %3587 = vrot.lane.b32.xlu0 %v3492_v23, %s12570_s24  ;;  %v3418_v17 = vadd.f32 %v3314_v33, %v3166_v63 }
 0x317   :  { %3593 = vrot.lane.b32.xlu1 %v3495_v53, %s12570_s24 }
 0x318   :  { %v3568_v11 = vpop.permute.xlu0 %3567  ;;  %v12296_v41 = vld [vmem:[#allocation3 + $0x40] sm:$0xff]  }
 0x319   :  { %v3566_v14 = vpop.permute.xlu1 %3565  ;;  %v12297_v39 = vld [vmem:[#allocation3 + $0x48] sm:$0xff]   ;;  %11363 = vmatprep.mubr.bf16.mxu0 %v12296_v41  ;;  %v3671_v38 = vadd.f32 %v3568_v11, %v3419_v59  ;;  %v3250_v41 = vld [vmem:[#allocation2 + $0x152] sm:$0xff] }
 0x31a   :  { %3839 = vrot.lane.b32.xlu0 %v3744_v61, %s12571_s27  ;;  %11364 = vmatmul.mubr.bf16.gmra.mrb[72].mxu0 %v12297_v39  ;;  %v3670_v12 = vadd.f32 %v3566_v14, %v3418_v17  ;;  %v2997_v61 = vld [vmem:[#allocation2 + $0x149] sm:$0xff] }
 0x31b   :  { %3845 = vrot.lane.b32.xlu1 %v3747_v3, %s12571_s27  ;;  %v2998_v3 = vld [vmem:[#allocation2 + $0x151] sm:$0xff] }
 0x31c   :  { %v3820_v45 = vpop.permute.xlu0 %3819  ;;  %v3249_v39 = vld [vmem:[#allocation2 + $0x14a] sm:$0xff] }
 0x31d   :  { %v3818_v26 = vpop.permute.xlu1 %3817  ;;  %v3923_v40 = vadd.f32 %v3820_v45, %v3671_v38 }
 0x31e   :  { %3095 = vrot.lane.b32.xlu0 %v2994_v1, %s12569_s21  ;;  %v3922_v62 = vadd.f32 %v3818_v26, %v3670_v12  ;;  %v2919_v1 = vld [vmem:[#allocation2 + $0xd0] sm:$0xff] }
 0x31f   :  { %3093 = vrot.lane.b32.xlu1 %v2993_v6, %s12569_s21  ;;  %v3501_v6 = vld [vmem:[#allocation2 + $0x14b] sm:$0xff] }
 0x320   :  { %v3060_v43 = vpop.permute.xlu0 %3059 }
 0x321   :  { %v3066_v7 = vpop.permute.xlu1 %3065  ;;  %v3165_v44 = vadd.f32 %v3060_v43, %v2913_v5  ;;  %v2918_v43 = vld [vmem:[#allocation2 + $0xc8] sm:$0xff] }
 0x322   :  { %3347 = vrot.lane.b32.xlu0 %v3246_v50, %s12568_s20  ;;  %v3168_v54 = vadd.f32 %v3066_v7, %v2916_v34  ;;  %v3502_v7 = vld [vmem:[#allocation2 + $0x153] sm:$0xff] }
 0x323   :  { %3345 = vrot.lane.b32.xlu1 %v3245_v20, %s12568_s20  ;;  %v2920_v50 = vld [vmem:[#allocation2 + $0xd8] sm:$0xff]  ;;  %v2917_v20 = vld [vmem:[#allocation2 + $0xc0] sm:$0xff] }
 0x324   :  { %v3312_v56 = vpop.permute.xlu0 %3311 }
 0x325   :  { %v3318_v57 = vpop.permute.xlu1 %3317  ;;  %v3417_v47 = vadd.f32 %v3312_v56, %v3165_v44  ;;  %v3754_v44 = vld [vmem:[#allocation2 + $0x154] sm:$0xff] }
 0x326   :  { %3599 = vrot.lane.b32.xlu0 %v3498_v15, %s12570_s24  ;;  %v3420_v28 = vadd.f32 %v3318_v57, %v3168_v54  ;;  %v3753_v54 = vld [vmem:[#allocation2 + $0x14c] sm:$0xff] }
 0x327   :  { %3597 = vrot.lane.b32.xlu1 %v3497_v42, %s12570_s24 }
 0x328   :  { %v3564_v4 = vpop.permute.xlu0 %3563 }
 0x329   :  { %v3570_v60 = vpop.permute.xlu1 %3569  ;;  %v3669_v32 = vadd.f32 %v3564_v4, %v3417_v47 }
 0x32a   :  { %3851 = vrot.lane.b32.xlu0 %v3750_v8, %s12571_s27  ;;  %v3672_v10 = vadd.f32 %v3570_v60, %v3420_v28 }
 0x32b   :  { %3849 = vrot.lane.b32.xlu1 %v3749_v18, %s12571_s27 }
 0x32c   :  { %v3816_v55 = vpop.permute.xlu0 %3815 }
 0x32d   :  { %v3822_v58 = vpop.permute.xlu1 %3821  ;;  %v3921_v51 = vadd.f32 %v3816_v55, %v3669_v32  ;;  %v2996_v32 = vld [vmem:[#allocation2 + $0x141] sm:$0xff] }
 0x32e   :  { %v3924_v21 = vadd.f32 %v3822_v58, %v3672_v10  ;;  %3091 = vrot.lane.b32.xlu0 %v2992_v46, %s12569_s21  ;;  %v2999_v10 = vld [vmem:[#allocation2 + $0x159] sm:$0xff] }
 0x32f   :  { %3097 = vrot.lane.b32.xlu1 %v2995_v24, %s12569_s21  ;;  %v10530_v25 = vpack.c.bf16 %v3922_v62, %v3921_v51  ;;  %v3248_v51 = vld [vmem:[#allocation2 + $0x142] sm:$0xff] }
 0x330   :  { %v10535_v13 = vpack.c.bf16 %v3924_v21, %v3923_v40  ;;  %v3072_v35 = vpop.permute.xlu0 %3071  ;;  %v3251_v21 = vld [vmem:[#allocation2 + $0x15a] sm:$0xff] }
 0x331   :  { %v3070_v16 = vpop.permute.xlu1 %3069  ;;  %10641 = vst [vmem:[#allocation3 + $0x50] sm:$0xff] %v10530_v25   ;;  %v3171_v56 = vadd.f32 %v3072_v35, %v2919_v1  ;;  %v12308_v24 = vld [vmem:[%s15136_s3 + $0x40] sm:$0xff]  }
 0x332   :  { %10642 = vst [vmem:[#allocation3 + $0x58] sm:$0xff] %v10535_v13   ;;  %3343 = vrot.lane.b32.xlu0 %v3244_v37, %s12568_s20  ;;  %v3170_v57 = vadd.f32 %v3070_v16, %v2918_v43  ;;  %11403 = vmatprep.subr.bf16.mxu0 %v12308_v24  ;;  %v3503_v25 = vld [vmem:[#allocation2 + $0x15b] sm:$0xff]  ;;  %v3500_v16 = vld [vmem:[#allocation2 + $0x143] sm:$0xff] }
 0x333   :  { %3349 = vrot.lane.b32.xlu1 %v3247_v9, %s12568_s20  ;;  %11404 = vmatpush3.bf16.msra.mxu0 %v12308_v24  ;;  %v3755_v35 = vld [vmem:[#allocation2 + $0x15c] sm:$0xff]  ;;  %v3752_v9 = vld [vmem:[#allocation2 + $0x144] sm:$0xff] }
 0x334   :  { %v3324_v36 = vpop.permute.xlu0 %3323  ;;  %v3756_v24 = vld [vmem:[#allocation2 + $0x164] sm:$0xff] }
 0x335   :  { %v3322_v27 = vpop.permute.xlu1 %3321  ;;  %v3423_v5 = vadd.f32 %v3324_v36, %v3171_v56 }
 0x336   :  { %3595 = vrot.lane.b32.xlu0 %v3496_v29, %s12570_s24  ;;  %v3422_v34 = vadd.f32 %v3322_v27, %v3170_v57 }
 0x337   :  { %3601 = vrot.lane.b32.xlu1 %v3499_v31, %s12570_s24 }
 0x338   :  { %v3576_v52 = vpop.permute.xlu0 %3575  ;;  %v12298_v33 = vld [vmem:[#allocation3 + $0x50] sm:$0xff]  }
 0x339   :  { %v3574_v19 = vpop.permute.xlu1 %3573  ;;  %v12299_v30 = vld [vmem:[#allocation3 + $0x58] sm:$0xff]   ;;  %11367 = vmatprep.mubr.bf16.mxu0 %v12298_v33  ;;  %v3675_v4 = vadd.f32 %v3576_v52, %v3423_v5 }
 0x33a   :  { %3847 = vrot.lane.b32.xlu0 %v3748_v48, %s12571_s27  ;;  %11368 = vmatmul.mubr.bf16.gmra.mrb[76].mxu0 %v12299_v30  ;;  %v3674_v60 = vadd.f32 %v3574_v19, %v3422_v34  ;;  %v3002_v48 = vld [vmem:[#allocation2 + $0x171] sm:$0xff]  ;;  %v3001_v19 = vld [vmem:[#allocation2 + $0x169] sm:$0xff] }
 0x33b   :  { %3853 = vrot.lane.b32.xlu1 %v3751_v49, %s12571_s27  ;;  %v3254_v30 = vld [vmem:[#allocation2 + $0x172] sm:$0xff] }
 0x33c   :  { %v3828_v23 = vpop.permute.xlu0 %3827 }
 0x33d   :  { %v3826_v53 = vpop.permute.xlu1 %3825  ;;  %v3927_v8 = vadd.f32 %v3828_v23, %v3675_v4  ;;  %v12311_v23 = vld [vmem:[%s15136_s3 + $0x48] sm:$0xff]  }
 0x33e   :  { %3103 = vrot.lane.b32.xlu0 %v2998_v3, %s12569_s21  ;;  %v3926_v18 = vadd.f32 %v3826_v53, %v3674_v60  ;;  %v3253_v53 = vld [vmem:[#allocation2 + $0x16a] sm:$0xff]  ;;  %11405 = vmatprep.subr.bf16.mxu0 %v12311_v23 }
 0x33f   :  { %3101 = vrot.lane.b32.xlu1 %v2997_v61, %s12569_s21  ;;  %11406 = vmatpush3.bf16.msra.mxu0 %v12311_v23  ;;  %v2926_v23 = vld [vmem:[#allocation2 + $0x108] sm:$0xff] }
 0x340   :  { %v3068_v11 = vpop.permute.xlu0 %3067 }
 0x341   :  { %v3074_v14 = vpop.permute.xlu1 %3073  ;;  %v3169_v42 = vadd.f32 %v3068_v11, %v2917_v20  ;;  %v3505_v11 = vld [vmem:[#allocation2 + $0x16b] sm:$0xff] }
 0x342   :  { %3355 = vrot.lane.b32.xlu0 %v3250_v41, %s12568_s20  ;;  %v3172_v2 = vadd.f32 %v3074_v14, %v2920_v50  ;;  %v2923_v14 = vld [vmem:[#allocation2 + $0xf0] sm:$0xff] }
 0x343   :  { %3353 = vrot.lane.b32.xlu1 %v3249_v39, %s12568_s20  ;;  %v3506_v41 = vld [vmem:[#allocation2 + $0x173] sm:$0xff]  ;;  %v2922_v39 = vld [vmem:[#allocation2 + $0xe8] sm:$0xff] }
 0x344   :  { %v3320_v45 = vpop.permute.xlu0 %3319 }
 0x345   :  { %v3326_v26 = vpop.permute.xlu1 %3325  ;;  %v3421_v0 = vadd.f32 %v3320_v45, %v3169_v42  ;;  %v2921_v45 = vld [vmem:[#allocation2 + $0xe0] sm:$0xff] }
 0x346   :  { %3607 = vrot.lane.b32.xlu0 %v3502_v7, %s12570_s24  ;;  %v3424_v63 = vadd.f32 %v3326_v26, %v3172_v2  ;;  %v2924_v26 = vld [vmem:[#allocation2 + $0xf8] sm:$0xff] }
 0x347   :  { %3605 = vrot.lane.b32.xlu1 %v3501_v6, %s12570_s24 }
 0x348   :  { %v3572_v22 = vpop.permute.xlu0 %3571 }
 0x349   :  { %v3578_v15 = vpop.permute.xlu1 %3577  ;;  %v3673_v59 = vadd.f32 %v3572_v22, %v3421_v0  ;;  %v3758_v22 = vld [vmem:[#allocation2 + $0x174] sm:$0xff] }
 0x34a   :  { %3859 = vrot.lane.b32.xlu0 %v3754_v44, %s12571_s27  ;;  %v3676_v17 = vadd.f32 %v3578_v15, %v3424_v63  ;;  %v3757_v15 = vld [vmem:[#allocation2 + $0x16c] sm:$0xff] }
 0x34b   :  { %3857 = vrot.lane.b32.xlu1 %v3753_v54, %s12571_s27 }
 0x34c   :  { %v3824_v47 = vpop.permute.xlu0 %3823 }
 0x34d   :  { %v3830_v28 = vpop.permute.xlu1 %3829  ;;  %v3925_v38 = vadd.f32 %v3824_v47, %v3673_v59  ;;  %v3000_v47 = vld [vmem:[#allocation2 + $0x161] sm:$0xff] }
 0x34e   :  { %v3928_v12 = vadd.f32 %v3830_v28, %v3676_v17  ;;  %3099 = vrot.lane.b32.xlu0 %v2996_v32, %s12569_s21  ;;  %v3003_v28 = vld [vmem:[#allocation2 + $0x179] sm:$0xff]  ;;  %v3252_v32 = vld [vmem:[#allocation2 + $0x162] sm:$0xff] }
 0x34f   :  { %3105 = vrot.lane.b32.xlu1 %v2999_v10, %s12569_s21  ;;  %v10540_v55 = vpack.c.bf16 %v3926_v18, %v3925_v38  ;;  %v3255_v10 = vld [vmem:[#allocation2 + $0x17a] sm:$0xff] }
 0x350   :  { %v10545_v58 = vpack.c.bf16 %v3928_v12, %v3927_v8  ;;  %v3080_v40 = vpop.permute.xlu0 %3079 }
 0x351   :  { %v3078_v62 = vpop.permute.xlu1 %3077  ;;  %10643 = vst [vmem:[#allocation3 + $0x60] sm:$0xff] %v10540_v55   ;;  %v3175_v6 = vadd.f32 %v3080_v40, %v2923_v14  ;;  %v3507_v40 = vld [vmem:[#allocation2 + $0x17b] sm:$0xff] }
 0x352   :  { %10644 = vst [vmem:[#allocation3 + $0x68] sm:$0xff] %v10545_v58   ;;  %3351 = vrot.lane.b32.xlu0 %v3248_v51, %s12568_s20  ;;  %v3174_v1 = vadd.f32 %v3078_v62, %v2922_v39  ;;  %v12312_v58 = vld [vmem:[%s15136_s3 + $0x50] sm:$0xff]   ;;  %v3759_v51 = vld [vmem:[#allocation2 + $0x17c] sm:$0xff] }
 0x353   :  { %3357 = vrot.lane.b32.xlu1 %v3251_v21, %s12568_s20  ;;  %11407 = vmatprep.subr.bf16.mxu0 %v12312_v58  ;;  %v3504_v21 = vld [vmem:[#allocation2 + $0x163] sm:$0xff] }
 0x354   :  { %v3332_v13 = vpop.permute.xlu0 %3331  ;;  %11408 = vmatpush3.bf16.msra.mxu0 %v12312_v58  ;;  %v3760_v58 = vld [vmem:[#allocation2 + $0x184] sm:$0xff] }
 0x355   :  { %v3330_v46 = vpop.permute.xlu1 %3329  ;;  %v3427_v56 = vadd.f32 %v3332_v13, %v3175_v6 }
 0x356   :  { %3603 = vrot.lane.b32.xlu0 %v3500_v16, %s12570_s24  ;;  %v3426_v57 = vadd.f32 %v3330_v46, %v3174_v1 }
 0x357   :  { %3609 = vrot.lane.b32.xlu1 %v3503_v25, %s12570_s24 }
 0x358   :  { %v3584_v27 = vpop.permute.xlu0 %3583  ;;  %v12300_v36 = vld [vmem:[#allocation3 + $0x60] sm:$0xff]  }
 0x359   :  { %v3582_v37 = vpop.permute.xlu1 %3581  ;;  %v12301_v31 = vld [vmem:[#allocation3 + $0x68] sm:$0xff]   ;;  %11371 = vmatprep.mubr.bf16.mxu0 %v12300_v36  ;;  %v3679_v5 = vadd.f32 %v3584_v27, %v3427_v56  ;;  %v12315_v36 = vld [vmem:[%s15136_s3 + $0x58] sm:$0xff]  }
 0x35a   :  { %3855 = vrot.lane.b32.xlu0 %v3752_v9, %s12571_s27  ;;  %11372 = vmatmul.mubr.bf16.gmra.mrb[80].mxu0 %v12301_v31  ;;  %v3678_v34 = vadd.f32 %v3582_v37, %v3426_v57  ;;  %v3006_v37 = vld [vmem:[#allocation2 + $0x191] sm:$0xff]  ;;  %v3005_v27 = vld [vmem:[#allocation2 + $0x189] sm:$0xff]  ;;  %v12316_v57 = vld [vmem:[%s15136_s3 + $0x60] sm:$0xff]  }
 0x35b   :  { %3861 = vrot.lane.b32.xlu1 %v3755_v35, %s12571_s27  ;;  %11409 = vmatprep.subr.bf16.mxu0 %v12315_v36 }
 0x35c   :  { %v3836_v49 = vpop.permute.xlu0 %3835  ;;  %11410 = vmatpush3.bf16.msra.mxu0 %v12315_v36 }
 0x35d   :  { %v3834_v29 = vpop.permute.xlu1 %3833  ;;  %v3931_v4 = vadd.f32 %v3836_v49, %v3679_v5  ;;  %v3258_v49 = vld [vmem:[#allocation2 + $0x192] sm:$0xff]  ;;  %11411 = vmatprep.subr.bf16.mxu0 %v12316_v57 }
 0x35e   :  { %3111 = vrot.lane.b32.xlu0 %v3002_v48, %s12569_s21  ;;  %v3930_v60 = vadd.f32 %v3834_v29, %v3678_v34  ;;  %v3257_v48 = vld [vmem:[#allocation2 + $0x18a] sm:$0xff] }
 0x35f   :  { %3109 = vrot.lane.b32.xlu1 %v3001_v19, %s12569_s21 }
 0x360   :  { %v3076_v33 = vpop.permute.xlu0 %3075  ;;  %11412 = vmatpush3.bf16.msra.mxu0 %v12316_v57 }
 0x361   :  { %v3082_v52 = vpop.permute.xlu1 %3081  ;;  %v3173_v43 = vadd.f32 %v3076_v33, %v2921_v45  ;;  %v2927_v33 = vld [vmem:[#allocation2 + $0x110] sm:$0xff] }
 0x362   :  { %3363 = vrot.lane.b32.xlu0 %v3254_v30, %s12568_s20  ;;  %v3176_v7 = vadd.f32 %v3082_v52, %v2924_v26  ;;  %v3509_v30 = vld [vmem:[#allocation2 + $0x18b] sm:$0xff] }
 0x363   :  { %3361 = vrot.lane.b32.xlu1 %v3253_v53, %s12568_s20  ;;  %v3510_v53 = vld [vmem:[#allocation2 + $0x193] sm:$0xff] }
 0x364   :  { %v3328_v61 = vpop.permute.xlu0 %3327 }
 0x365   :  { %v3334_v3 = vpop.permute.xlu1 %3333  ;;  %v3425_v42 = vadd.f32 %v3328_v61, %v3173_v43  ;;  %v2925_v61 = vld [vmem:[#allocation2 + $0x100] sm:$0xff] }
 0x366   :  { %3615 = vrot.lane.b32.xlu0 %v3506_v41, %s12570_s24  ;;  %v3428_v2 = vadd.f32 %v3334_v3, %v3176_v7  ;;  %v2928_v3 = vld [vmem:[#allocation2 + $0x118] sm:$0xff] }
 0x367   :  { %3613 = vrot.lane.b32.xlu1 %v3505_v11, %s12570_s24 }
 0x368   :  { %v3580_v20 = vpop.permute.xlu0 %3579 }
 0x369   :  { %v3586_v50 = vpop.permute.xlu1 %3585  ;;  %v3677_v0 = vadd.f32 %v3580_v20, %v3425_v42  ;;  %v3762_v20 = vld [vmem:[#allocation2 + $0x194] sm:$0xff] }
 0x36a   :  { %3867 = vrot.lane.b32.xlu0 %v3758_v22, %s12571_s27  ;;  %v3680_v63 = vadd.f32 %v3586_v50, %v3428_v2  ;;  %v3761_v50 = vld [vmem:[#allocation2 + $0x18c] sm:$0xff] }
 0x36b   :  { %3865 = vrot.lane.b32.xlu1 %v3757_v15, %s12571_s27 }
 0x36c   :  { %v3832_v44 = vpop.permute.xlu0 %3831 }
 0x36d   :  { %v3838_v54 = vpop.permute.xlu1 %3837  ;;  %v3929_v59 = vadd.f32 %v3832_v44, %v3677_v0  ;;  %v3007_v44 = vld [vmem:[#allocation2 + $0x199] sm:$0xff] }
 0x36e   :  { %v3932_v17 = vadd.f32 %v3838_v54, %v3680_v63  ;;  %3107 = vrot.lane.b32.xlu0 %v3000_v47, %s12569_s21  ;;  %v3259_v47 = vld [vmem:[#allocation2 + $0x19a] sm:$0xff] }
 0x36f   :  { %3113 = vrot.lane.b32.xlu1 %v3003_v28, %s12569_s21  ;;  %v10550_v8 = vpack.c.bf16 %v3930_v60, %v3929_v59  ;;  %v3004_v60 = vld [vmem:[#allocation2 + $0x181] sm:$0xff] }
 0x370   :  { %v10555_v18 = vpack.c.bf16 %v3932_v17, %v3931_v4  ;;  %v3088_v38 = vpop.permute.xlu0 %3087 }
 0x371   :  { %v3086_v12 = vpop.permute.xlu1 %3085  ;;  %10645 = vst [vmem:[#allocation3 + $0x70] sm:$0xff] %v10550_v8   ;;  %v3179_v11 = vadd.f32 %v3088_v38, %v2927_v33  ;;  %v3511_v38 = vld [vmem:[#allocation2 + $0x19b] sm:$0xff] }
 0x372   :  { %10646 = vst [vmem:[#allocation3 + $0x78] sm:$0xff] %v10555_v18   ;;  %3359 = vrot.lane.b32.xlu0 %v3252_v32, %s12568_s20  ;;  %v3178_v14 = vadd.f32 %v3086_v12, %v2926_v23  ;;  %v3256_v18 = vld [vmem:[#allocation2 + $0x182] sm:$0xff] }
 0x373   :  { %3365 = vrot.lane.b32.xlu1 %v3255_v10, %s12568_s20  ;;  %v3508_v10 = vld [vmem:[#allocation2 + $0x183] sm:$0xff] }
 0x374   :  { %v3340_v62 = vpop.permute.xlu0 %3339  ;;  %v3763_v32 = vld [vmem:[#allocation2 + $0x19c] sm:$0xff] }
 0x375   :  { %v3338_v55 = vpop.permute.xlu1 %3337  ;;  %v3431_v6 = vadd.f32 %v3340_v62, %v3179_v11  ;;  %v2929_v33 = vld [vmem:[#allocation2 + $0x120] sm:$0xff] }
 0x376   :  { %3611 = vrot.lane.b32.xlu0 %v3504_v21, %s12570_s24  ;;  %v3430_v1 = vadd.f32 %v3338_v55, %v3178_v14 }
 0x377   :  { %3617 = vrot.lane.b32.xlu1 %v3507_v40, %s12570_s24 }
 0x378   :  { %v3592_v13 = vpop.permute.xlu0 %3591  ;;  %v12302_v25 = vld [vmem:[#allocation3 + $0x70] sm:$0xff]  }
 0x379   :  { %v3590_v46 = vpop.permute.xlu1 %3589  ;;  %v12303_v16 = vld [vmem:[#allocation3 + $0x78] sm:$0xff]   ;;  %11375 = vmatprep.mubr.bf16.mxu0 %v12302_v25  ;;  %v3683_v2 = vadd.f32 %v3592_v13, %v3431_v6  ;;  %v3009_v25 = vld [vmem:[#allocation2 + $0x1a9] sm:$0xff] }
 0x37a   :  { %3863 = vrot.lane.b32.xlu0 %v3756_v24, %s12571_s27  ;;  %11376 = vmatmul.mubr.bf16.gmra.mrb[84].mxu0 %v12303_v16  ;;  %v3682_v56 = vadd.f32 %v3590_v46, %v3430_v1  ;;  %v3010_v13 = vld [vmem:[#allocation2 + $0x1b1] sm:$0xff]  ;;  %v3008_v1 = vld [vmem:[#allocation2 + $0x1a1] sm:$0xff] }
 0x37b   :  { %3869 = vrot.lane.b32.xlu1 %v3759_v51, %s12571_s27  ;;  %v12317_v51 = vld [vmem:[%s15136_s3 + $0x68] sm:$0xff]  }
 0x37c   :  { %v3844_v9 = vpop.permute.xlu0 %3843  ;;  %11413 = vmatprep.subr.bf16.mxu0 %v12317_v51 }
 0x37d   :  { %v3842_v35 = vpop.permute.xlu1 %3841  ;;  %v3935_v63 = vadd.f32 %v3844_v9, %v3683_v2  ;;  %11414 = vmatpush3.bf16.msra.mxu0 %v12317_v51  ;;  %v3262_v9 = vld [vmem:[#allocation2 + $0x1b2] sm:$0xff] }
 0x37e   :  { %3119 = vrot.lane.b32.xlu0 %v3006_v37, %s12569_s21  ;;  %v3934_v5 = vadd.f32 %v3842_v35, %v3682_v56  ;;  %v3261_v37 = vld [vmem:[#allocation2 + $0x1aa] sm:$0xff] }
 0x37f   :  { %3117 = vrot.lane.b32.xlu1 %v3005_v27, %s12569_s21  ;;  %v2931_v27 = vld [vmem:[#allocation2 + $0x130] sm:$0xff] }
 0x380   :  { %v3084_v29 = vpop.permute.xlu0 %3083 }
 0x381   :  { %v3090_v31 = vpop.permute.xlu1 %3089  ;;  %v3177_v39 = vadd.f32 %v3084_v29, %v2925_v61  ;;  %v3513_v29 = vld [vmem:[#allocation2 + $0x1ab] sm:$0xff] }
 0x382   :  { %3371 = vrot.lane.b32.xlu0 %v3258_v49, %s12568_s20  ;;  %v3180_v41 = vadd.f32 %v3090_v31, %v2928_v3  ;;  %v3514_v49 = vld [vmem:[#allocation2 + $0x1b3] sm:$0xff] }
 0x383   :  { %3369 = vrot.lane.b32.xlu1 %v3257_v48, %s12568_s20  ;;  %v12320_v48 = vld [vmem:[%s15136_s3 + $0x70] sm:$0xff]  }
 0x384   :  { %v3336_v52 = vpop.permute.xlu0 %3335  ;;  %11415 = vmatprep.subr.bf16.mxu0 %v12320_v48 }
 0x385   :  { %v3342_v19 = vpop.permute.xlu1 %3341  ;;  %v3429_v43 = vadd.f32 %v3336_v52, %v3177_v39  ;;  %v2932_v52 = vld [vmem:[#allocation2 + $0x138] sm:$0xff]  ;;  %11416 = vmatpush3.bf16.msra.mxu0 %v12320_v48 }
 0x386   :  { %3623 = vrot.lane.b32.xlu0 %v3510_v53, %s12570_s24  ;;  %v3432_v7 = vadd.f32 %v3342_v19, %v3180_v41  ;;  %v2930_v19 = vld [vmem:[#allocation2 + $0x128] sm:$0xff] }
 0x387   :  { %3621 = vrot.lane.b32.xlu1 %v3509_v30, %s12570_s24 }
 0x388   :  { %v3588_v45 = vpop.permute.xlu0 %3587 }
 0x389   :  { %v3594_v26 = vpop.permute.xlu1 %3593  ;;  %v3681_v15 = vadd.f32 %v3588_v45, %v3429_v43  ;;  %v3765_v45 = vld [vmem:[#allocation2 + $0x1ac] sm:$0xff] }
 0x38a   :  { %3875 = vrot.lane.b32.xlu0 %v3762_v20, %s12571_s27  ;;  %v3684_v42 = vadd.f32 %v3594_v26, %v3432_v7 }
 0x38b   :  { %3873 = vrot.lane.b32.xlu1 %v3761_v50, %s12571_s27 }
 0x38c   :  { %v3840_v34 = vpop.permute.xlu0 %3839 }
 0x38d   :  { %v3846_v22 = vpop.permute.xlu1 %3845  ;;  %v3933_v54 = vadd.f32 %v3840_v34, %v3681_v15  ;;  %v3260_v34 = vld [vmem:[#allocation2 + $0x1a2] sm:$0xff] }
 0x38e   :  { %v3936_v0 = vadd.f32 %v3846_v22, %v3684_v42  ;;  %3115 = vrot.lane.b32.xlu0 %v3004_v60, %s12569_s21  ;;  %v3011_v22 = vld [vmem:[#allocation2 + $0x1b9] sm:$0xff]  ;;  %v3512_v60 = vld [vmem:[#allocation2 + $0x1a3] sm:$0xff] }
 0x38f   :  { %3121 = vrot.lane.b32.xlu1 %v3007_v44, %s12569_s21  ;;  %v10560_v17 = vpack.c.bf16 %v3934_v5, %v3933_v54  ;;  %v3263_v44 = vld [vmem:[#allocation2 + $0x1ba] sm:$0xff] }
 0x390   :  { %v10565_v4 = vpack.c.bf16 %v3936_v0, %v3935_v63  ;;  %v3096_v28 = vpop.permute.xlu0 %3095 }
 0x391   :  { %v3094_v59 = vpop.permute.xlu1 %3093  ;;  %10647 = vst [vmem:[#allocation3 + $0x80] sm:$0xff] %v10560_v17   ;;  %v3183_v53 = vadd.f32 %v3096_v28, %v2931_v27  ;;  %v3764_v28 = vld [vmem:[#allocation2 + $0x1a4] sm:$0xff] }
 0x392   :  { %10648 = vst [vmem:[#allocation3 + $0x88] sm:$0xff] %v10565_v4   ;;  %3367 = vrot.lane.b32.xlu0 %v3256_v18, %s12568_s20  ;;  %v3182_v30 = vadd.f32 %v3094_v59, %v2930_v19  ;;  %v3515_v59 = vld [vmem:[#allocation2 + $0x1bb] sm:$0xff]  ;;  %v2934_v27 = vld [vmem:[#allocation2 + $0x148] sm:$0xff] }
 0x393   :  { %3373 = vrot.lane.b32.xlu1 %v3259_v47, %s12568_s20  ;;  %v12321_v47 = vld [vmem:[%s15136_s3 + $0x78] sm:$0xff]  }
 0x394   :  { %v3348_v12 = vpop.permute.xlu0 %3347  ;;  %v3767_v18 = vld [vmem:[#allocation2 + $0x1bc] sm:$0xff]  ;;  %11417 = vmatprep.subr.bf16.mxu0 %v12321_v47 }
 0x395   :  { %v3346_v8 = vpop.permute.xlu1 %3345  ;;  %v3435_v41 = vadd.f32 %v3348_v12, %v3183_v53  ;;  %11418 = vmatpush3.bf16.msra.mxu0 %v12321_v47 }
 0x396   :  { %3619 = vrot.lane.b32.xlu0 %v3508_v10, %s12570_s24  ;;  %v3434_v11 = vadd.f32 %v3346_v8, %v3182_v30  ;;  %v3766_v8 = vld [vmem:[#allocation2 + $0x1b4] sm:$0xff] }
 0x397   :  { %3625 = vrot.lane.b32.xlu1 %v3511_v38, %s12570_s24 }
 0x398   :  { %v3600_v62 = vpop.permute.xlu0 %3599  ;;  %v12304_v40 = vld [vmem:[#allocation3 + $0x80] sm:$0xff]  }
 0x399   :  { %v3598_v55 = vpop.permute.xlu1 %3597  ;;  %v12305_v21 = vld [vmem:[#allocation3 + $0x88] sm:$0xff]   ;;  %11379 = vmatprep.mubr.bf16.mxu0 %v12304_v40  ;;  %v3687_v7 = vadd.f32 %v3600_v62, %v3435_v41 }
 0x39a   :  { %3871 = vrot.lane.b32.xlu0 %v3760_v58, %s12571_s27  ;;  %11380 = vmatmul.mubr.bf16.gmra.mrb[88].mxu0 %v12305_v21  ;;  %v3686_v6 = vadd.f32 %v3598_v55, %v3434_v11  ;;  %v3013_v62 = vld [vmem:[#allocation2 + $0x1c9] sm:$0xff]  ;;  %v3012_v40 = vld [vmem:[#allocation2 + $0x1c1] sm:$0xff] }
 0x39b   :  { %3877 = vrot.lane.b32.xlu1 %v3763_v32, %s12571_s27 }
 0x39c   :  { %v3852_v46 = vpop.permute.xlu0 %3851 }
 0x39d   :  { %v3850_v24 = vpop.permute.xlu1 %3849  ;;  %v3939_v2 = vadd.f32 %v3852_v46, %v3687_v7  ;;  %v3264_v46 = vld [vmem:[#allocation2 + $0x1c2] sm:$0xff] }
 0x39e   :  { %3127 = vrot.lane.b32.xlu0 %v3010_v13, %s12569_s21  ;;  %v3938_v56 = vadd.f32 %v3850_v24, %v3686_v6  ;;  %v3265_v24 = vld [vmem:[#allocation2 + $0x1ca] sm:$0xff]  ;;  %v14414_v13 = vld [vmem:[%s15136_s3 + $0x80] sm:$0xff]  }
 0x39f   :  { %3125 = vrot.lane.b32.xlu1 %v3009_v25, %s12569_s21  ;;  %11475 = vmatprep.subr.bf16.mxu0 %v14414_v13 }
 0x3a0   :  { %v3092_v35 = vpop.permute.xlu0 %3091 }
 0x3a1   :  { %v3098_v16 = vpop.permute.xlu1 %3097  ;;  %v3181_v3 = vadd.f32 %v3092_v35, %v2929_v33  ;;  %v2935_v35 = vld [vmem:[#allocation2 + $0x150] sm:$0xff] }
 0x3a2   :  { %3379 = vrot.lane.b32.xlu0 %v3262_v9, %s12568_s20  ;;  %v3184_v23 = vadd.f32 %v3098_v16, %v2932_v52  ;;  %v3517_v9 = vld [vmem:[#allocation2 + $0x1cb] sm:$0xff] }
 0x3a3   :  { %3377 = vrot.lane.b32.xlu1 %v3261_v37, %s12568_s20  ;;  %v3516_v37 = vld [vmem:[#allocation2 + $0x1c3] sm:$0xff] }
 0x3a4   :  { %v3344_v31 = vpop.permute.xlu0 %3343 }
 0x3a5   :  { %v3350_v36 = vpop.permute.xlu1 %3349  ;;  %v3433_v26 = vadd.f32 %v3344_v31, %v3181_v3  ;;  %v2933_v31 = vld [vmem:[#allocation2 + $0x140] sm:$0xff] }
 0x3a6   :  { %3631 = vrot.lane.b32.xlu0 %v3514_v49, %s12570_s24  ;;  %v3436_v39 = vadd.f32 %v3350_v36, %v3184_v23  ;;  %v2936_v36 = vld [vmem:[#allocation2 + $0x158] sm:$0xff] }
 0x3a7   :  { %3629 = vrot.lane.b32.xlu1 %v3513_v29, %s12570_s24 }
 0x3a8   :  { %v3596_v14 = vpop.permute.xlu0 %3595 }
 0x3a9   :  { %v3602_v61 = vpop.permute.xlu1 %3601  ;;  %v3685_v50 = vadd.f32 %v3596_v14, %v3433_v26  ;;  %v3768_v14 = vld [vmem:[#allocation2 + $0x1c4] sm:$0xff] }
 0x3aa   :  { %3123 = vrot.lane.b32.xlu0 %v3008_v1, %s12569_s21  ;;  %v3688_v43 = vadd.f32 %v3602_v61, %v3436_v39  ;;  %v3769_v61 = vld [vmem:[#allocation2 + $0x1cc] sm:$0xff] }
 0x3ab   :  { %3881 = vrot.lane.b32.xlu1 %v3765_v45, %s12571_s27 }
 0x3ac   :  { %v3848_v57 = vpop.permute.xlu0 %3847 }
 0x3ad   :  { %v3854_v20 = vpop.permute.xlu1 %3853  ;;  %v3937_v15 = vadd.f32 %v3848_v57, %v3685_v50  ;;  %v3014_v57 = vld [vmem:[#allocation2 + $0x1d1] sm:$0xff] }
 0x3ae   :  { %v3940_v42 = vadd.f32 %v3854_v20, %v3688_v43  ;;  %3375 = vrot.lane.b32.xlu0 %v3260_v34, %s12568_s20  ;;  %v3015_v20 = vld [vmem:[#allocation2 + $0x1d9] sm:$0xff] }
 0x3af   :  { %3129 = vrot.lane.b32.xlu1 %v3011_v22, %s12569_s21  ;;  %v10570_v63 = vpack.c.bf16 %v3938_v56, %v3937_v15  ;;  %v3267_v22 = vld [vmem:[#allocation2 + $0x1da] sm:$0xff]  ;;  %v3266_v34 = vld [vmem:[#allocation2 + $0x1d2] sm:$0xff] }
 0x3b0   :  { %v10575_v5 = vpack.c.bf16 %v3940_v42, %v3939_v2  ;;  %v3104_v54 = vpop.permute.xlu0 %3103 }
 0x3b1   :  { %v3102_v0 = vpop.permute.xlu1 %3101  ;;  %10649 = vst [vmem:[#allocation3 + $0x90] sm:$0xff] %v10570_v63   ;;  %v3187_v49 = vadd.f32 %v3104_v54, %v2935_v35  ;;  %v3518_v54 = vld [vmem:[#allocation2 + $0x1d3] sm:$0xff] }
 0x3b2   :  { %10650 = vst [vmem:[#allocation3 + $0x98] sm:$0xff] %v10575_v5   ;;  %3627 = vrot.lane.b32.xlu0 %v3512_v60, %s12570_s24  ;;  %v3186_v29 = vadd.f32 %v3102_v0, %v2934_v27  ;;  %v3519_v0 = vld [vmem:[#allocation2 + $0x1db] sm:$0xff] }
 0x3b3   :  { %3381 = vrot.lane.b32.xlu1 %v3263_v44, %s12568_s20  ;;  %v3771_v44 = vld [vmem:[#allocation2 + $0x1dc] sm:$0xff]  ;;  %v3770_v60 = vld [vmem:[#allocation2 + $0x1d4] sm:$0xff] }
 0x3b4   :  { %v3356_v17 = vpop.permute.xlu0 %3355 }
 0x3b5   :  { %v3354_v4 = vpop.permute.xlu1 %3353  ;;  %v3439_v53 = vadd.f32 %v3356_v17, %v3187_v49 }
 0x3b6   :  { %3879 = vrot.lane.b32.xlu0 %v3764_v28, %s12571_s27  ;;  %v3438_v30 = vadd.f32 %v3354_v4, %v3186_v29 }
 0x3b7   :  { %3633 = vrot.lane.b32.xlu1 %v3515_v59, %s12570_s24 }
 0x3b8   :  { %v3608_v38 = vpop.permute.xlu0 %3607  ;;  %v12306_v10 = vld [vmem:[#allocation3 + $0x90] sm:$0xff]  }
 0x3b9   :  { %v3606_v12 = vpop.permute.xlu1 %3605  ;;  %v12307_v32 = vld [vmem:[#allocation3 + $0x98] sm:$0xff]   ;;  %11383 = vmatprep.mubr.bf16.mxu0 %v12306_v10  ;;  %v3691_v41 = vadd.f32 %v3608_v38, %v3439_v53 }
 0x3ba   :  { %3883 = vrot.lane.b32.xlu0 %v3766_v8, %s12571_s27  ;;  %11384 = vmatmul.mubr.bf16.gmra.mrb[92].mxu0 %v12307_v32  ;;  %v3690_v11 = vadd.f32 %v3606_v12, %v3438_v30  ;;  %v3017_v8 = vld [vmem:[#allocation2 + $0x1e9] sm:$0xff]  ;;  %v3016_v12 = vld [vmem:[#allocation2 + $0x1e1] sm:$0xff] }
 0x3bb   :  { %3885 = vrot.lane.b32.xlu1 %v3767_v18, %s12571_s27  ;;  %v3269_v32 = vld [vmem:[#allocation2 + $0x1ea] sm:$0xff] }
 0x3bc   :  { %v3860_v55 = vpop.permute.xlu0 %3859 }
 0x3bd   :  { %v3858_v58 = vpop.permute.xlu1 %3857  ;;  %v3943_v7 = vadd.f32 %v3860_v55, %v3691_v41 }
 0x3be   :  { %3131 = vrot.lane.b32.xlu0 %v3012_v40, %s12569_s21  ;;  %v3942_v6 = vadd.f32 %v3858_v58, %v3690_v11  ;;  %v3268_v58 = vld [vmem:[#allocation2 + $0x1e2] sm:$0xff]  ;;  %v2939_v40 = vld [vmem:[#allocation2 + $0x170] sm:$0xff] }
 0x3bf   :  { %3133 = vrot.lane.b32.xlu1 %v3013_v62, %s12569_s21 }
 0x3c0   :  { %v3100_v51 = vpop.permute.xlu0 %3099 }
 0x3c1   :  { %v3106_v21 = vpop.permute.xlu1 %3105  ;;  %v3185_v19 = vadd.f32 %v3100_v51, %v2933_v31  ;;  %v3520_v51 = vld [vmem:[#allocation2 + $0x1e3] sm:$0xff] }
 0x3c2   :  { %3383 = vrot.lane.b32.xlu0 %v3264_v46, %s12568_s20  ;;  %v3188_v48 = vadd.f32 %v3106_v21, %v2936_v36  ;;  %v3521_v21 = vld [vmem:[#allocation2 + $0x1eb] sm:$0xff]  ;;  %v2940_v46 = vld [vmem:[#allocation2 + $0x178] sm:$0xff] }
 0x3c3   :  { %3385 = vrot.lane.b32.xlu1 %v3265_v24, %s12568_s20  ;;  %v2938_v24 = vld [vmem:[#allocation2 + $0x168] sm:$0xff] }
 0x3c4   :  { %v3352_v16 = vpop.permute.xlu0 %3351 }
 0x3c5   :  { %v3358_v25 = vpop.permute.xlu1 %3357  ;;  %v3437_v3 = vadd.f32 %v3352_v16, %v3185_v19  ;;  %v3773_v19 = vld [vmem:[#allocation2 + $0x1ec] sm:$0xff] }
 0x3c6   :  { %3635 = vrot.lane.b32.xlu0 %v3516_v37, %s12570_s24  ;;  %v3440_v23 = vadd.f32 %v3358_v25, %v3188_v48  ;;  %v2937_v25 = vld [vmem:[#allocation2 + $0x160] sm:$0xff] }
 0x3c7   :  { %3637 = vrot.lane.b32.xlu1 %v3517_v9, %s12570_s24 }
 0x3c8   :  { %v3604_v33 = vpop.permute.xlu0 %3603 }
 0x3c9   :  { %v3610_v52 = vpop.permute.xlu1 %3609  ;;  %v3689_v26 = vadd.f32 %v3604_v33, %v3437_v3 }
 0x3ca   :  { %3887 = vrot.lane.b32.xlu0 %v3768_v14, %s12571_s27  ;;  %v3692_v39 = vadd.f32 %v3610_v52, %v3440_v23  ;;  %v3772_v52 = vld [vmem:[#allocation2 + $0x1e4] sm:$0xff] }
 0x3cb   :  { %3889 = vrot.lane.b32.xlu1 %v3769_v61, %s12571_s27 }
 0x3cc   :  { %v3856_v1 = vpop.permute.xlu0 %3855 }
 0x3cd   :  { %v3862_v45 = vpop.permute.xlu1 %3861  ;;  %v3941_v50 = vadd.f32 %v3856_v1, %v3689_v26 }
 0x3ce   :  { %v3944_v43 = vadd.f32 %v3862_v45, %v3692_v39  ;;  %3135 = vrot.lane.b32.xlu0 %v3014_v57, %s12569_s21 }
 0x3cf   :  { %3137 = vrot.lane.b32.xlu1 %v3015_v20, %s12569_s21  ;;  %v10580_v2 = vpack.c.bf16 %v3942_v6, %v3941_v50 }
 0x3d0   :  { %v10585_v56 = vpack.c.bf16 %v3944_v43, %v3943_v7  ;;  %v3112_v15 = vpop.permute.xlu0 %3111 }
 0x3d1   :  { %v3110_v42 = vpop.permute.xlu1 %3109  ;;  %10651 = vst [vmem:[#allocation3 + $0xa0] sm:$0xff] %v10580_v2   ;;  %v3191_v35 = vadd.f32 %v3112_v15, %v2939_v40 }
 0x3d2   :  { %10652 = vst [vmem:[#allocation3 + $0xa8] sm:$0xff] %v10585_v56   ;;  %3387 = vrot.lane.b32.xlu0 %v3266_v34, %s12568_s20  ;;  %v3190_v16 = vadd.f32 %v3110_v42, %v2938_v24 }
 0x3d3   :  { %3389 = vrot.lane.b32.xlu1 %v3267_v22, %s12568_s20 }
 0x3d4   :  { %v3364_v63 = vpop.permute.xlu0 %3363 }
 0x3d5   :  { %v3362_v5 = vpop.permute.xlu1 %3361  ;;  %v3443_v29 = vadd.f32 %v3364_v63, %v3191_v35  ;;  %v2943_v63 = vld [vmem:[#allocation2 + $0x190] sm:$0xff] }
 0x3d6   :  { %3639 = vrot.lane.b32.xlu0 %v3518_v54, %s12570_s24  ;;  %v3442_v31 = vadd.f32 %v3362_v5, %v3190_v16  ;;  %v2944_v54 = vld [vmem:[#allocation2 + $0x198] sm:$0xff] }
 0x3d7   :  { %3641 = vrot.lane.b32.xlu1 %v3519_v0, %s12570_s24  ;;  %v2942_v0 = vld [vmem:[#allocation2 + $0x188] sm:$0xff] }
 0x3d8   :  { %v3616_v17 = vpop.permute.xlu0 %3615  ;;  %v12309_v59 = vld [vmem:[#allocation3 + $0xa0] sm:$0xff]  }
 0x3d9   :  { %v3614_v4 = vpop.permute.xlu1 %3613  ;;  %v12310_v28 = vld [vmem:[#allocation3 + $0xa8] sm:$0xff]   ;;  %11387 = vmatprep.mubr.bf16.mxu0 %v12309_v59  ;;  %v3695_v30 = vadd.f32 %v3616_v17, %v3443_v29 }
 0x3da   :  { %3891 = vrot.lane.b32.xlu0 %v3770_v60, %s12571_s27  ;;  %11388 = vmatmul.mubr.bf16.gmra.mrb[96].mxu0 %v12310_v28  ;;  %v3694_v33 = vadd.f32 %v3614_v4, %v3442_v31 }
 0x3db   :  { %3893 = vrot.lane.b32.xlu1 %v3771_v44, %s12571_s27  ;;  %v2941_v44 = vld [vmem:[#allocation2 + $0x180] sm:$0xff] }
 0x3dc   :  { %v3868_v18 = vpop.permute.xlu0 %3867 }
 0x3dd   :  { %v3866_v47 = vpop.permute.xlu1 %3865  ;;  %v3947_v11 = vadd.f32 %v3868_v18, %v3695_v30  ;;  %v2946_v30 = vld [vmem:[#allocation2 + $0x1a8] sm:$0xff] }
 0x3de   :  { %3139 = vrot.lane.b32.xlu0 %v3016_v12, %s12569_s21  ;;  %v3946_v14 = vadd.f32 %v3866_v47, %v3694_v33 }
 0x3df   :  { %3141 = vrot.lane.b32.xlu1 %v3017_v8, %s12569_s21 }
 0x3e0   :  { %v3108_v10 = vpop.permute.xlu0 %3107 }
 0x3e1   :  { %v3114_v38 = vpop.permute.xlu1 %3113  ;;  %v3189_v37 = vadd.f32 %v3108_v10, %v2937_v25 }
 0x3e2   :  { %3391 = vrot.lane.b32.xlu0 %v3268_v58, %s12568_s20  ;;  %v3192_v9 = vadd.f32 %v3114_v38, %v2940_v46 }
 0x3e3   :  { %3393 = vrot.lane.b32.xlu1 %v3269_v32, %s12568_s20 }
 0x3e4   :  { %v3360_v62 = vpop.permute.xlu0 %3359 }
 0x3e5   :  { %v3366_v55 = vpop.permute.xlu1 %3365  ;;  %v3441_v48 = vadd.f32 %v3360_v62, %v3189_v37 }
 0x3e6   :  { %3643 = vrot.lane.b32.xlu0 %v3520_v51, %s12570_s24  ;;  %v3444_v49 = vadd.f32 %v3366_v55, %v3192_v9 }
 0x3e7   :  { %3645 = vrot.lane.b32.xlu1 %v3521_v21, %s12570_s24 }
 0x3e8   :  { %v3612_v36 = vpop.permute.xlu0 %3611 }
 0x3e9   :  { %v3618_v27 = vpop.permute.xlu1 %3617  ;;  %v3693_v23 = vadd.f32 %v3612_v36, %v3441_v48 }
 0x3ea   :  { %3895 = vrot.lane.b32.xlu0 %v3772_v52, %s12571_s27  ;;  %v3696_v53 = vadd.f32 %v3618_v27, %v3444_v49 }
 0x3eb   :  { %3897 = vrot.lane.b32.xlu1 %v3773_v19, %s12571_s27 }
 0x3ec   :  { %v3864_v61 = vpop.permute.xlu0 %3863 }
 0x3ed   :  { %v3870_v3 = vpop.permute.xlu1 %3869  ;;  %v3945_v39 = vadd.f32 %v3864_v61, %v3693_v23 }
 0x3ee   :  { %v3948_v41 = vadd.f32 %v3870_v3, %v3696_v53  ;;  %v2945_v53 = vld [vmem:[#allocation2 + $0x1a0] sm:$0xff] }
 0x3ef   :  { %v10590_v45 = vpack.c.bf16 %v3946_v14, %v3945_v39  ;;  %v2947_v39 = vld [vmem:[#allocation2 + $0x1b0] sm:$0xff] }
 0x3f0   :  { %v10595_v26 = vpack.c.bf16 %v3948_v41, %v3947_v11  ;;  %v3120_v6 = vpop.permute.xlu0 %3119 }
 0x3f1   :  { %v3118_v1 = vpop.permute.xlu1 %3117  ;;  %10653 = vst [vmem:[#allocation3 + $0xb0] sm:$0xff] %v10590_v45   ;;  %v3195_v4 = vadd.f32 %v3120_v6, %v2943_v63 }
 0x3f2   :  { %10654 = vst [vmem:[#allocation3 + $0xb8] sm:$0xff] %v10595_v26   ;;  %v3194_v60 = vadd.f32 %v3118_v1, %v2942_v0  ;;  %v2948_v26 = vld [vmem:[#allocation2 + $0x1b8] sm:$0xff] }
 0x3f4   :  { %v3372_v43 = vpop.permute.xlu0 %3371 }
 0x3f5   :  { %v3370_v7 = vpop.permute.xlu1 %3369  ;;  %v3447_v8 = vadd.f32 %v3372_v43, %v3195_v4  ;;  %v12325_v4 = vld [vmem:[#allocation3 + $0xc] sm:$0xff]  }
 0x3f6   :  { %v3446_v18 = vadd.f32 %v3370_v7, %v3194_v60 }
 0x3f8   :  { %v3624_v20 = vpop.permute.xlu0 %3623  ;;  %v12313_v57 = vld [vmem:[#allocation3 + $0xb0] sm:$0xff]  }
 0x3f9   :  { %v3622_v50 = vpop.permute.xlu1 %3621  ;;  %v12314_v56 = vld [vmem:[#allocation3 + $0xb8] sm:$0xff]   ;;  %11391 = vmatprep.mubr.bf16.mxu0 %v12313_v57  ;;  %v3699_v32 = vadd.f32 %v3624_v20, %v3447_v8  ;;  %v2949_v8 = vld [vmem:[#allocation2 + $0x1c0] sm:$0xff] }
 0x3fa   :  { %11392 = vmatmul.mubr.bf16.gmra.mrb[100].mxu0 %v12314_v56  ;;  %v3698_v10 = vadd.f32 %v3622_v50, %v3446_v18  ;;  %v2950_v18 = vld [vmem:[#allocation2 + $0x1c8] sm:$0xff] }
 0x3fc   :  { %v3876_v42 = vpop.permute.xlu0 %3875 }
 0x3fd   :  { %v3874_v2 = vpop.permute.xlu1 %3873  ;;  %v3951_v51 = vadd.f32 %v3876_v42, %v3699_v32 }
 0x3fe   :  { %v3950_v21 = vadd.f32 %v3874_v2, %v3698_v10 }
 0x400   :  { %v3116_v22 = vpop.permute.xlu0 %3115 }
 0x401   :  { %v3122_v15 = vpop.permute.xlu1 %3121  ;;  %v3193_v59 = vadd.f32 %v3116_v22, %v2941_v44 }
 0x402   :  { %v3196_v17 = vadd.f32 %v3122_v15, %v2944_v54 }
 0x404   :  { %v3368_v5 = vpop.permute.xlu0 %3367 }
 0x405   :  { %v3374_v34 = vpop.permute.xlu1 %3373  ;;  %v3445_v38 = vadd.f32 %v3368_v5, %v3193_v59 }
 0x406   :  { %v3448_v12 = vadd.f32 %v3374_v34, %v3196_v17  ;;  %v12324_v17 = vld [vmem:[#allocation3 + $0x4] sm:$0xf8]  }
 0x408   :  { %v3620_v47 = vpop.permute.xlu0 %3619 }
 0x409   :  { %v3626_v28 = vpop.permute.xlu1 %3625  ;;  %v3697_v55 = vadd.f32 %v3620_v47, %v3445_v38 }
 0x40a   :  { %v3700_v58 = vadd.f32 %v3626_v28, %v3448_v12  ;;  %v5107_v12 = vrot.slane %v12325_v4, 3 }
 0x40c   :  { %v3872_v40 = vpop.permute.xlu0 %3871 }
 0x40d   :  { %v3878_v62 = vpop.permute.xlu1 %3877  ;;  %v3949_v46 = vadd.f32 %v3872_v40, %v3697_v55 }
 0x40e   :  { %v3952_v24 = vadd.f32 %v3878_v62, %v3700_v58  ;;  %v5106_v62 = vrot.slane %v12324_v17, 3  ;;  %v12349_v17 = vld [vmem:[%s15136_s3 + $0xa8] sm:$0xff]  }
 0x40f   :  { %v10600_v16 = vpack.c.bf16 %v3950_v21, %v3949_v46  ;;  %v12328_v46 = vld [vmem:[#allocation3 + $0x1c] sm:$0xff]  }
 0x410   :  { %v10605_v25 = vpack.c.bf16 %v3952_v24, %v3951_v51  ;;  %v3128_v9 = vpop.permute.xlu0 %3127  ;;  %v12326_v51 = vld [vmem:[#allocation3 + $0x14] sm:$0xff]   ;;  %v5108_v24 = vsel %vm256_vm1, %v5106_v62, %v5107_v12 }
 0x411   :  { %v3126_v35 = vpop.permute.xlu1 %3125  ;;  %10655 = vst [vmem:[#allocation3 + $0xc0] sm:$0xff] %v10600_v16   ;;  %v3199_v45 = vadd.f32 %v3128_v9, %v2947_v39 }
 0x412   :  { %10656 = vst [vmem:[#allocation3 + $0xc8] sm:$0xff] %v10605_v25   ;;  %v3198_v23 = vadd.f32 %v3126_v35, %v2946_v30 }
 0x414   :  { %v3380_v27 = vpop.permute.xlu0 %3379 }
 0x415   :  { %v3378_v37 = vpop.permute.xlu1 %3377  ;;  %v3451_v20 = vadd.f32 %v3380_v27, %v3199_v45 }
 0x416   :  { %v3450_v11 = vadd.f32 %v3378_v37, %v3198_v23 }
 0x418   :  { %v3632_v31 = vpop.permute.xlu0 %3631  ;;  %v12318_v29 = vld [vmem:[#allocation3 + $0xc0] sm:$0xff]  }
 0x419   :  { %v3630_v36 = vpop.permute.xlu1 %3629  ;;  %v12319_v49 = vld [vmem:[#allocation3 + $0xc8] sm:$0xff]   ;;  %11395 = vmatprep.mubr.bf16.mxu0 %v12318_v29  ;;  %v3703_v42 = vadd.f32 %v3632_v31, %v3451_v20  ;;  %v5111_v31 = vrot.slane %v12328_v46, 3  ;;  %v12332_v20 = vld [vmem:[#allocation3 + $0x34] sm:$0xff]  }
 0x41a   :  { %11396 = vmatmul.mubr.bf16.gmra.mrb[104].mxu0 %v12319_v49  ;;  %v3702_v1 = vadd.f32 %v3630_v36, %v3450_v11  ;;  %v5109_v36 = vrot.slane %v12326_v51, 3  ;;  %v2952_v11 = vld [vmem:[#allocation2 + $0x1d8] sm:$0xff] }
 0x41c   :  { %v3124_v19 = vpop.permute.xlu0 %3123  ;;  %v5112_v30 = vsel %vm256_vm1, %v5109_v36, %v5111_v31 }
 0x41d   :  { %v3882_v48 = vpop.permute.xlu1 %3881  ;;  %v3197_v3 = vadd.f32 %v3124_v19, %v2945_v53  ;;  %v12331_v19 = vld [vmem:[%s15136_s3 + $0x88] sm:$0xff]  }
 0x41e   :  { %v3954_v57 = vadd.f32 %v3882_v48, %v3702_v1  ;;  %v12330_v53 = vld [vmem:[#allocation3 + $0x2c] sm:$0xff]  }
 0x41f   :  { %v5115_v39 = vrot.slane %v12330_v53, 3 }
 0x420   :  { %v3376_v33 = vpop.permute.xlu0 %3375 }
 0x421   :  { %v3130_v52 = vpop.permute.xlu1 %3129  ;;  %v3449_v41 = vadd.f32 %v3376_v33, %v3197_v3  ;;  %v12329_v33 = vld [vmem:[#allocation3 + $0x24] sm:$0xff]  }
 0x422   :  { %v3200_v6 = vadd.f32 %v3130_v52, %v2948_v26  ;;  %v5110_v52 = vsel %vm256_vm1, %v5107_v12, %v5109_v36 }
 0x424   :  { %v3628_v14 = vpop.permute.xlu0 %3627 }
 0x425   :  { %v3382_v61 = vpop.permute.xlu1 %3381  ;;  %v3701_v7 = vadd.f32 %v3628_v14, %v3449_v41  ;;  %v5113_v14 = vrot.slane %v12329_v33, 3  ;;  %v2951_v41 = vld [vmem:[#allocation2 + $0x1d0] sm:$0xff] }
 0x426   :  { %v3452_v56 = vadd.f32 %v3382_v61, %v3200_v6  ;;  %v12336_v61 = vld [vmem:[%s15136_s3 + $0x90] sm:$0xff]  }
 0x428   :  { %v3880_v50 = vpop.permute.xlu0 %3879 }
 0x429   :  { %v3634_v43 = vpop.permute.xlu1 %3633  ;;  %v3953_v2 = vadd.f32 %v3880_v50, %v3701_v7  ;;  %v5114_v50 = vsel %vm256_vm1, %v5111_v31, %v5113_v14 }
 0x42a   :  { %v3704_v15 = vadd.f32 %v3634_v43, %v3452_v56  ;;  %v12333_v56 = vld [vmem:[#allocation3 + $0x3c] sm:$0xff]  }
 0x42b   :  { %v10610_v22 = vpack.c.bf16 %v3954_v57, %v3953_v2  ;;  %v5116_v57 = vsel %vm256_vm1, %v5113_v14, %v5115_v39 }
 0x42c   :  { %v3884_v5 = vpop.permute.xlu0 %3883 }
 0x42d   :  { %v3886_v34 = vpop.permute.xlu1 %3885  ;;  %10657 = vst [vmem:[#allocation3 + $0xd0] sm:$0xff] %v10610_v22   ;;  %v3955_v0 = vadd.f32 %v3884_v5, %v3703_v42 }
 0x42e   :  { %v3956_v63 = vadd.f32 %v3886_v34, %v3704_v15  ;;  %v12345_v34 = vld [vmem:[%s15136_s3 + $0xa0] sm:$0xff]  }
 0x430   :  { %v10615_v54 = vpack.c.bf16 %v3956_v63, %v3955_v0  ;;  %v3132_v60 = vpop.permute.xlu0 %3131  ;;  %v5117_v0 = vrot.slane %v12332_v20, 3 }
 0x431   :  { %v3134_v44 = vpop.permute.xlu1 %3133  ;;  %v3201_v10 = vadd.f32 %v3132_v60, %v2949_v8 }
 0x432   :  { %10658 = vst [vmem:[#allocation3 + $0xd8] sm:$0xff] %v10615_v54   ;;  %v3202_v38 = vadd.f32 %v3134_v44, %v2950_v18  ;;  %v5119_v54 = vrot.slane %v12333_v56, 3  ;;  %v12335_v18 = vld [vmem:[#allocation3 + $0x4c] sm:$0xff]  }
 0x434   :  { %v3384_v28 = vpop.permute.xlu0 %3383  ;;  %v12322_v47 = vld [vmem:[#allocation3 + $0xd0] sm:$0xff]  }
 0x435   :  { %v3386_v59 = vpop.permute.xlu1 %3385  ;;  %11399 = vmatprep.mubr.bf16.mxu0 %v12322_v47  ;;  %v3453_v21 = vadd.f32 %v3384_v28, %v3201_v10  ;;  %v12334_v28 = vld [vmem:[#allocation3 + $0x44] sm:$0xff]   ;;  %v5120_v47 = vsel %vm256_vm1, %v5117_v0, %v5119_v54 }
 0x436   :  { %v3454_v40 = vadd.f32 %v3386_v59, %v3202_v38  ;;  %v5118_v59 = vsel %vm256_vm1, %v5115_v39, %v5117_v0  ;;  %v12354_v38 = vld [vmem:[%s15136_s3 + $0xb0] sm:$0xff]   ;;  %v5121_v10 = vrot.slane %v12334_v28, 3  ;;  %v12353_v28 = vld [vmem:[#allocation3 + $0xbc] sm:$0xff]  }
 0x437   :  { %v12342_v39 = vld [vmem:[#allocation3 + $0x74] sm:$0xff]  }
 0x438   :  { %v3636_v58 = vpop.permute.xlu0 %3635 }
 0x439   :  { %v3638_v32 = vpop.permute.xlu1 %3637  ;;  %v12323_v55 = vld [vmem:[#allocation3 + $0xd8] sm:$0xff]   ;;  %v3705_v16 = vadd.f32 %v3636_v58, %v3453_v21  ;;  %v2953_v58 = vld [vmem:[#allocation2 + $0x1e0] sm:$0xff] }
 0x43a   :  { %11400 = vmatmul.mubr.bf16.gmra.mrb[108].mxu0 %v12323_v55  ;;  %v3706_v25 = vadd.f32 %v3638_v32, %v3454_v40  ;;  %v2954_v32 = vld [vmem:[#allocation2 + $0x1e8] sm:$0xff]  ;;  %v5123_v55 = vrot.slane %v12335_v18, 3  ;;  %v5151_v18 = vrot.slane %v12353_v28, 3  ;;  %v12377_v28 = vld [vmem:[#allocation3 + $0x74] sm:$0xff]  }
 0x43b   :  { %11419 = vmatprep.mubr.bf16.mxu0 %v5108_v24  ;;  %v12359_v24 = vld [vmem:[%s15136_s3 + $0xb8] sm:$0xff]  }
 0x43c   :  { %v3888_v9 = vpop.permute.xlu0 %3887 }
 0x43d   :  { %v3890_v35 = vpop.permute.xlu1 %3889  ;;  %v3957_v27 = vadd.f32 %v3888_v9, %v3705_v16  ;;  %v5122_v16 = vsel %vm256_vm1, %v5119_v54, %v5121_v10  ;;  %v5124_v9 = vsel %vm256_vm1, %v5121_v10, %v5123_v55  ;;  %v12351_v54 = vld [vmem:[#allocation3 + $0xac] sm:$0xff]  }
 0x43e   :  { %v3958_v37 = vadd.f32 %v3890_v35, %v3706_v25  ;;  %v12337_v35 = vld [vmem:[#allocation3 + $0x54] sm:$0xff]   ;;  %v12356_v10 = vld [vmem:[#allocation3 + $0xcc] sm:$0xff]  }
 0x440   :  { %v10620_v29 = vpack.c.bf16 %v3958_v37, %v3957_v27  ;;  %v3136_v48 = vpop.permute.xlu0 %3135  ;;  %v12338_v37 = vld [vmem:[#allocation3 + $0x5c] sm:$0xff]  }
 0x441   :  { %v3138_v49 = vpop.permute.xlu1 %3137  ;;  %v3203_v45 = vadd.f32 %v3136_v48, %v2951_v41  ;;  %v5127_v33 = vrot.slane %v12338_v37, 3 }
 0x442   :  { %10659 = vst [vmem:[#allocation3 + $0xe0] sm:$0xff] %v10620_v29   ;;  %11420 = vmatmul.mubr.bf16.vlgmr.msra.gmra.mrb[56].mxu0 %v5110_v52  ;;  %v3204_v26 = vadd.f32 %v3138_v49, %v2952_v11  ;;  %v14471_v49 = vld [vmem:[%s15136_s3 + $0xc0] sm:$0xff]   ;;  %v5125_v52 = vrot.slane %v12337_v35, 3  ;;  %v12361_v35 = vld [vmem:[#allocation3 + $0xc] sm:$0xfc]  }
 0x443   :  { %11423 = vmatprep.mubr.bf16.mxu0 %v5112_v30  ;;  %11476 = vmatpush3.bf16.msra.mxu0 %v14414_v13  ;;  %v12341_v13 = vld [vmem:[%s15136_s3 + $0x98] sm:$0xff]  }
 0x444   :  { %v3388_v3 = vpop.permute.xlu0 %3387  ;;  %11477 = vmatprep.subr.bf16.mxu0 %v12331_v19  ;;  %v5126_v53 = vsel %vm256_vm1, %v5123_v55, %v5125_v52 }
 0x445   :  { %v3390_v23 = vpop.permute.xlu1 %3389  ;;  %v3455_v43 = vadd.f32 %v3388_v3, %v3203_v45  ;;  %v5128_v3 = vsel %vm256_vm1, %v5125_v52, %v5127_v33  ;;  %v12343_v45 = vld [vmem:[#allocation3 + $0x7c] sm:$0xff]  }
 0x446   :  { %v3456_v7 = vadd.f32 %v3390_v23, %v3204_v26  ;;  %v12339_v23 = vld [vmem:[#allocation3 + $0x64] sm:$0xff]  }
 0x447   :  { %11478 = vmatpush3.bf16.msra.mxu0 %v12331_v19  ;;  %v5129_v14 = vrot.slane %v12339_v23, 3  ;;  %v12366_v23 = vld [vmem:[#allocation3 + $0x2c] sm:$0xff]  }
 0x448   :  { %v3640_v6 = vpop.permute.xlu0 %3639  ;;  %11479 = vmatprep.subr.bf16.mxu0 %v12336_v61 }
 0x449   :  { %v3642_v1 = vpop.permute.xlu1 %3641  ;;  %v3707_v42 = vadd.f32 %v3640_v6, %v3455_v43  ;;  %v5130_v41 = vsel %vm256_vm1, %v5127_v33, %v5129_v14  ;;  %v5135_v6 = vrot.slane %v12343_v45, 3  ;;  %v12369_v45 = vld [vmem:[#allocation3 + $0x3c] sm:$0xff]  }
 0x44a   :  { %11424 = vmatmul.mubr.bf16.gmra.mrb[60].mxu0 %v5114_v50  ;;  %v3708_v2 = vadd.f32 %v3642_v1, %v3456_v7  ;;  %v5133_v1 = vrot.slane %v12342_v39, 3  ;;  %v12344_v7 = vld [vmem:[#allocation3 + $0x84] sm:$0xff]   ;;  %v12346_v50 = vld [vmem:[#allocation3 + $0x8c] sm:$0xff]   ;;  %v12378_v39 = vld [vmem:[%s15136_s3 + $0xd8] sm:$0xff]  }
 0x44b   :  { %11427 = vmatprep.mubr.bf16.mxu0 %v5116_v57  ;;  %11480 = vmatpush3.bf16.msra.mxu0 %v12336_v61  ;;  %v12340_v61 = vld [vmem:[#allocation3 + $0x6c] sm:$0xff]   ;;  %v5137_v20 = vrot.slane %v12344_v7, 3  ;;  %v5139_v57 = vrot.slane %v12346_v50, 3 }
 0x44c   :  { %v3892_v22 = vpop.permute.xlu0 %3891  ;;  %11481 = vmatprep.subr.bf16.mxu0 %v12341_v13  ;;  %v5131_v11 = vrot.slane %v12340_v61, 3  ;;  %v5136_v43 = vsel %vm256_vm1, %v5133_v1, %v5135_v6  ;;  %v12367_v61 = vld [vmem:[#allocation3 + $0x34] sm:$0xff]  }
 0x44d   :  { %v3894_v15 = vpop.permute.xlu1 %3893  ;;  %v3959_v63 = vadd.f32 %v3892_v22, %v3707_v42  ;;  %v5138_v56 = vsel %vm256_vm1, %v5135_v6, %v5137_v20  ;;  %v5140_v42 = vsel %vm256_vm1, %v5137_v20, %v5139_v57  ;;  %v12382_v6 = vld [vmem:[%s15136_s3 + $0xe0] sm:$0xff]   ;;  %v12371_v20 = vld [vmem:[#allocation3 + $0x4c] sm:$0xff]  }
 0x44e   :  { %v3960_v5 = vadd.f32 %v3894_v15, %v3708_v2  ;;  %v5132_v26 = vsel %vm256_vm1, %v5129_v14, %v5131_v11  ;;  %v12347_v2 = vld [vmem:[#allocation3 + $0x94] sm:$0xff]   ;;  %v12348_v15 = vld [vmem:[#allocation3 + $0x9c] sm:$0xff]  }
 0x44f   :  { %11482 = vmatpush3.bf16.msra.mxu0 %v12341_v13  ;;  %v5134_v13 = vsel %vm256_vm1, %v5131_v11, %v5133_v1  ;;  %v5141_v22 = vrot.slane %v12347_v2, 3  ;;  %v12373_v14 = vld [vmem:[%s15136_s3 + $0xd0] sm:$0xff]   ;;  %v5889_v11 = vrot.slane %v12366_v23, 2 }
 0x450   :  { %v10625_v44 = vpack.c.bf16 %v3960_v5, %v3959_v63  ;;  %v3140_v4 = vpop.permute.xlu0 %3139  ;;  %11483 = vmatprep.subr.bf16.mxu0 %v12345_v34  ;;  %v12350_v63 = vld [vmem:[#allocation3 + $0xa4] sm:$0xff]   ;;  %v12391_v2 = vld [vmem:[%s15136_s3 + $0xf0] sm:$0xff]  }
 0x451   :  { %v3142_v60 = vpop.permute.xlu1 %3141  ;;  %v3205_v40 = vadd.f32 %v3140_v4, %v2953_v58  ;;  %v5142_v5 = vsel %vm256_vm1, %v5139_v57, %v5141_v22  ;;  %v5155_v58 = vrot.slane %v12356_v10, 3  ;;  %v12380_v10 = vld [vmem:[#allocation3 + $0x84] sm:$0xff]  }
 0x452   :  { %10660 = vst [vmem:[#allocation3 + $0xe8] sm:$0xff] %v10625_v44   ;;  %11428 = vmatmul.mubr.bf16.gmra.mrb[64].mxu0 %v5118_v59  ;;  %v3206_v62 = vadd.f32 %v3142_v60, %v2954_v32  ;;  %v5145_v44 = vrot.slane %v12350_v63, 3  ;;  %v5147_v60 = vrot.slane %v12351_v54, 3  ;;  %v14527_v54 = vld [vmem:[%s15136_s3 + $0x100] sm:$0xff]  }
 0x453   :  { %11431 = vmatprep.mubr.bf16.mxu0 %v5120_v47  ;;  %11484 = vmatpush3.bf16.msra.mxu0 %v12345_v34  ;;  %v5143_v34 = vrot.slane %v12348_v15, 3 }
 0x454   :  { %v3392_v12 = vpop.permute.xlu0 %3391  ;;  %11485 = vmatprep.subr.bf16.mxu0 %v12349_v17  ;;  %v5148_v59 = vsel %vm256_vm1, %v5145_v44, %v5147_v60 }
 0x455   :  { %v3394_v8 = vpop.permute.xlu1 %3393  ;;  %v3457_v25 = vadd.f32 %v3392_v12, %v3205_v40  ;;  %v5144_v0 = vsel %vm256_vm1, %v5141_v22, %v5143_v34  ;;  %v5146_v4 = vsel %vm256_vm1, %v5143_v34, %v5145_v44  ;;  %v12355_v12 = vld [vmem:[#allocation3 + $0xc4] sm:$0xff]   ;;  %v12396_v22 = vld [vmem:[%s15136_s3 + $0xf8] sm:$0xff]  }
 0x456   :  { %v3458_v46 = vadd.f32 %v3394_v8, %v3206_v62  ;;  %v5153_v32 = vrot.slane %v12355_v12, 3  ;;  %v12357_v62 = vld [vmem:[#allocation3 + $0xd4] sm:$0xff]   ;;  %v12379_v12 = vld [vmem:[#allocation3 + $0x7c] sm:$0xff]  }
 0x457   :  { %11486 = vmatpush3.bf16.msra.mxu0 %v12349_v17  ;;  %v12352_v17 = vld [vmem:[#allocation3 + $0xb4] sm:$0xff]  }
 0x458   :  { %v3644_v51 = vpop.permute.xlu0 %3643  ;;  %11487 = vmatprep.subr.bf16.mxu0 %v12354_v38  ;;  %v5149_v47 = vrot.slane %v12352_v17, 3  ;;  %v5154_v55 = vsel %vm256_vm1, %v5151_v18, %v5153_v32  ;;  %v5156_v40 = vsel %vm256_vm1, %v5153_v32, %v5155_v58  ;;  %v12376_v17 = vld [vmem:[#allocation3 + $0x6c] sm:$0xff]   ;;  %v5909_v32 = vrot.slane %v12379_v12, 2  ;;  %v12415_v12 = vld [vmem:[%s15136_s3 + $0x118] sm:$0xff]  }
 0x459   :  { %v3646_v21 = vpop.permute.xlu1 %3645  ;;  %v3709_v36 = vadd.f32 %v3644_v51, %v3457_v25  ;;  %v5157_v51 = vrot.slane %v12357_v62, 3  ;;  %v12360_v25 = vld [vmem:[#allocation3 + $0xe4] ss:$0 sps:$4 sm:$0x77]   ;;  %v12381_v62 = vld [vmem:[#allocation3 + $0x8c] sm:$0xff]  }
 0x45a   :  { %11432 = vmatmul.mubr.bf16.gmra.mrb[68].mxu0 %v5122_v16  ;;  %v3710_v27 = vadd.f32 %v3646_v21, %v3458_v46  ;;  %v5150_v8 = vsel %vm256_vm1, %v5147_v60, %v5149_v47  ;;  %v12358_v21 = vld [vmem:[#allocation3 + $0xdc] sm:$0xff]   ;;  %v5161_v37 = vrot.slane %v12360_v25, 3 }
 0x45b   :  { %11435 = vmatprep.mubr.bf16.mxu0 %v5124_v9  ;;  %11488 = vmatpush3.bf16.msra.mxu0 %v12354_v38  ;;  %v5152_v38 = vsel %vm256_vm1, %v5149_v47, %v5151_v18  ;;  %v5158_v46 = vsel %vm256_vm1, %v5155_v58, %v5157_v51  ;;  %v12362_v9 = vld [vmem:[#allocation3 + $0x14] sm:$0xff]   ;;  %v5905_v47 = vrot.slane %v12376_v17, 2  ;;  %v5907_v18 = vrot.slane %v12377_v28, 2  ;;  %v12384_v25 = vld [vmem:[#allocation3 + $0x9c] sm:$0xff]  }
 0x45c   :  { %v3896_v29 = vpop.permute.xlu0 %3895  ;;  %11489 = vmatprep.subr.bf16.mxu0 %v12359_v24  ;;  %v5911_v58 = vrot.slane %v12380_v10, 2  ;;  %v12403_v17 = vld [vmem:[#allocation3 + $0x34] sm:$0xff]   ;;  %v12404_v28 = vld [vmem:[#allocation3 + $0x3c] sm:$0xff]   ;;  %v12406_v10 = vld [vmem:[#allocation3 + $0x44] sm:$0xff]  }
 0x45d   :  { %v3898_v31 = vpop.permute.xlu1 %3897  ;;  %v3961_v19 = vadd.f32 %v3896_v29, %v3709_v36  ;;  %v5883_v36 = vrot.slane %v12362_v9, 2  ;;  %v12363_v29 = vld [vmem:[#allocation3 + $0x1c] sm:$0xff]   ;;  %v5917_v9 = vrot.slane %v12384_v25, 2  ;;  %v12428_v25 = vld [vmem:[%s15136_s3 + $0x130] sm:$0xff]  }
 0x45e   :  { %v3962_v48 = vadd.f32 %v3898_v31, %v3710_v27  ;;  %v5882_v27 = vrot.slane %v12361_v35, 2  ;;  %v5885_v52 = vrot.slane %v12363_v29, 2  ;;  %v12385_v35 = vld [vmem:[#allocation3 + $0xa4] sm:$0xff]   ;;  %v12388_v29 = vld [vmem:[#allocation3 + $0xb4] sm:$0xff]  }
 0x45f   :  { %11490 = vmatpush3.bf16.msra.mxu0 %v12359_v24  ;;  %v5159_v24 = vrot.slane %v12358_v21, 3  ;;  %v12383_v21 = vld [vmem:[#allocation3 + $0x94] sm:$0xff]  }
 0x460   :  { %v10630_v30 = vpack.c.bf16 %v3962_v48, %v3961_v19  ;;  %11547 = vmatprep.subr.bf16.mxu0 %v14471_v49  ;;  %v5884_v48 = vsel %vm5881_vm3, %v5882_v27, %v5883_v36  ;;  %v12365_v19 = vld [vmem:[#allocation3 + $0x24] sm:$0xff]  }
 0x461   :  { %v5160_v16 = vsel %vm256_vm1, %v5157_v51, %v5159_v24  ;;  %v5162_v31 = vsel %vm256_vm1, %v5159_v24, %v5161_v37  ;;  %v5887_v33 = vrot.slane %v12365_v19, 2  ;;  %v5913_v51 = vrot.slane %v12381_v62, 2 }
 0x462   :  { %10661 = vst [vmem:[#allocation3 + $0xf0] sm:$0xff] %v10630_v30   ;;  %11436 = vmatmul.mubr.bf16.gmra.mrb[72].mxu0 %v5126_v53  ;;  %v12368_v30 = vld [vmem:[%s15136_s3 + $0xc8] sm:$0xff]   ;;  %v5886_v53 = vsel %vm5881_vm3, %v5883_v36, %v5885_v52  ;;  %v5915_v24 = vrot.slane %v12383_v21, 2  ;;  %v5919_v37 = vrot.slane %v12385_v35, 2  ;;  %v5923_v19 = vrot.slane %v12388_v29, 2 }
 0x463   :  { %11439 = vmatprep.mubr.bf16.mxu0 %v5128_v3  ;;  %v5888_v3 = vsel %vm5881_vm3, %v5885_v52, %v5887_v33  ;;  %v12387_v36 = vld [vmem:[#allocation3 + $0xac] sm:$0xff]  }
 0x464   :  { %v5918_v27 = vsel %vm5881_vm3, %v5915_v24, %v5917_v9 }
 0x46a   :  { %11440 = vmatmul.mubr.bf16.gmra.mrb[76].mxu0 %v5130_v41  ;;  %v5891_v41 = vrot.slane %v12367_v61, 2 }
 0x46b   :  { %11443 = vmatprep.mubr.bf16.mxu0 %v5132_v26  ;;  %v5890_v26 = vsel %vm5881_vm3, %v5887_v33, %v5889_v11  ;;  %v12389_v33 = vld [vmem:[#allocation3 + $0xbc] sm:$0xff]  }
 0x46c   :  { %v5892_v1 = vsel %vm5881_vm3, %v5889_v11, %v5891_v41  ;;  %v5925_v23 = vrot.slane %v12389_v33, 2 }
 0x46e   :  { %v5926_v61 = vsel %vm5881_vm3, %v5923_v19, %v5925_v23 }
 0x472   :  { %11444 = vmatmul.mubr.bf16.gmra.mrb[80].mxu0 %v5134_v13  ;;  %v5893_v13 = vrot.slane %v12369_v45, 2 }
 0x473   :  { %11447 = vmatprep.mubr.bf16.mxu0 %v5136_v43  ;;  %v12386_v43 = vld [vmem:[%s15136_s3 + $0xe8] sm:$0xff]  }
 0x474   :  { %v5894_v50 = vsel %vm5881_vm3, %v5891_v41, %v5893_v13  ;;  %v12393_v41 = vld [vmem:[#allocation3 + $0xd4] sm:$0xff]  }
 0x47a   :  { %11448 = vmatmul.mubr.bf16.gmra.mrb[84].mxu0 %v5138_v56  ;;  %v12372_v56 = vld [vmem:[#allocation3 + $0x54] sm:$0xff]  }
 0x47b   :  { %11451 = vmatprep.mubr.bf16.mxu0 %v5140_v42  ;;  %v5897_v42 = vrot.slane %v12371_v20, 2  ;;  %v5899_v15 = vrot.slane %v12372_v56, 2  ;;  %v12398_v56 = vld [vmem:[#allocation3 + $0x14] sm:$0xfe]  }
 0x47d   :  { %v5900_v63 = vsel %vm5881_vm3, %v5897_v42, %v5899_v15 }
 0x482   :  { %11452 = vmatmul.mubr.bf16.gmra.mrb[88].mxu0 %v5142_v5  ;;  %v12374_v5 = vld [vmem:[#allocation3 + $0x5c] sm:$0xff]  }
 0x483   :  { %11455 = vmatprep.mubr.bf16.mxu0 %v5144_v0  ;;  %v12375_v0 = vld [vmem:[#allocation3 + $0x64] sm:$0xff]   ;;  %v5901_v44 = vrot.slane %v12374_v5, 2 }
 0x484   :  { %v5903_v60 = vrot.slane %v12375_v0, 2 }
 0x48a   :  { %11456 = vmatmul.mubr.bf16.gmra.mrb[92].mxu0 %v5146_v4  ;;  %v5902_v4 = vsel %vm5881_vm3, %v5899_v15, %v5901_v44  ;;  %v6658_v15 = vrot.slane %v12398_v56, 1 }
 0x48b   :  { %11459 = vmatprep.mubr.bf16.mxu0 %v5148_v59  ;;  %v5904_v59 = vsel %vm5881_vm3, %v5901_v44, %v5903_v60 }
 0x492   :  { %11460 = vmatmul.mubr.bf16.gmra.mrb[96].mxu0 %v5150_v8  ;;  %v5906_v8 = vsel %vm5881_vm3, %v5903_v60, %v5905_v47  ;;  %v12405_v60 = vld [vmem:[%s15136_s3 + $0x108] sm:$0xff]  }
 0x493   :  { %11463 = vmatprep.mubr.bf16.mxu0 %v5152_v38  ;;  %v5908_v38 = vsel %vm5881_vm3, %v5905_v47, %v5907_v18  ;;  %v12410_v47 = vld [vmem:[%s15136_s3 + $0x110] sm:$0xff]  }
 0x49a   :  { %11464 = vmatmul.mubr.bf16.gmra.mrb[100].mxu0 %v5154_v55  ;;  %v5910_v55 = vsel %vm5881_vm3, %v5907_v18, %v5909_v32  ;;  %v6665_v18 = vrot.slane %v12403_v17, 1 }
 0x49b   :  { %11467 = vmatprep.mubr.bf16.mxu0 %v5156_v40  ;;  %v5912_v40 = vsel %vm5881_vm3, %v5909_v32, %v5911_v58 }
 0x4a2   :  { %11468 = vmatmul.mubr.bf16.gmra.mrb[104].mxu0 %v5158_v46  ;;  %v5914_v46 = vsel %vm5881_vm3, %v5911_v58, %v5913_v51  ;;  %v12419_v58 = vld [vmem:[%s15136_s3 + $0x120] sm:$0xff]  }
 0x4a3   :  { %11471 = vmatprep.mubr.bf16.mxu0 %v5160_v16  ;;  %v5916_v16 = vsel %vm5881_vm3, %v5913_v51, %v5915_v24  ;;  %v12408_v51 = vld [vmem:[#allocation3 + $0x54] sm:$0xff]  }
 0x4aa   :  { %11472 = vmatmul.mubr.bf16.gmra.mrb[108].mxu0 %v5162_v31  ;;  %v5920_v31 = vsel %vm5881_vm3, %v5917_v9, %v5919_v37  ;;  %v12433_v9 = vld [vmem:[%s15136_s3 + $0x138] sm:$0xff]  }
 0x4ab   :  { %11491 = vmatprep.mubr.bf16.mxu0 %v5884_v48  ;;  %v5921_v48 = vrot.slane %v12387_v36, 2 }
 0x4ad   :  { %v5922_v52 = vsel %vm5881_vm3, %v5919_v37, %v5921_v48 }
 0x4b2   :  { %11492 = vmatmul.mubr.bf16.vlgmr.msra.gmra.mrb[56].mxu0 %v5886_v53  ;;  %v12390_v53 = vld [vmem:[#allocation3 + $0xc4] sm:$0xff]  }
 0x4b3   :  { %11495 = vmatprep.mubr.bf16.mxu0 %v5888_v3  ;;  %11548 = vmatpush3.bf16.msra.mxu0 %v14471_v49  ;;  %v12370_v49 = vld [vmem:[#allocation3 + $0x44] sm:$0xff]   ;;  %v5927_v3 = vrot.slane %v12390_v53, 2 }
 0x4b4   :  { %11549 = vmatprep.subr.bf16.mxu0 %v12368_v30  ;;  %v5895_v7 = vrot.slane %v12370_v49, 2 }
 0x4b5   :  { %v5928_v11 = vsel %vm5881_vm3, %v5925_v23, %v5927_v3 }
 0x4b6   :  { %v5896_v57 = vsel %vm5881_vm3, %v5893_v13, %v5895_v7  ;;  %v5898_v34 = vsel %vm5881_vm3, %v5895_v7, %v5897_v42 }
 0x4b7   :  { %11550 = vmatpush3.bf16.msra.mxu0 %v12368_v30  ;;  %v5924_v30 = vsel %vm5881_vm3, %v5921_v48, %v5923_v19 }
 0x4b8   :  { %11551 = vmatprep.subr.bf16.mxu0 %v12373_v14 }
 0x4ba   :  { %11496 = vmatmul.mubr.bf16.gmra.mrb[60].mxu0 %v5890_v26  ;;  %v5931_v26 = vrot.slane %v12393_v41, 2 }
 0x4bb   :  { %11499 = vmatprep.mubr.bf16.mxu0 %v5892_v1  ;;  %11552 = vmatpush3.bf16.msra.mxu0 %v12373_v14  ;;  %v12392_v14 = vld [vmem:[#allocation3 + $0xcc] sm:$0xff]   ;;  %v12394_v1 = vld [vmem:[#allocation3 + $0xdc] sm:$0xff]  }
 0x4bc   :  { %11553 = vmatprep.subr.bf16.mxu0 %v12378_v39  ;;  %v5933_v13 = vrot.slane %v12394_v1, 2 }
 0x4bf   :  { %11554 = vmatpush3.bf16.msra.mxu0 %v12378_v39  ;;  %v5929_v39 = vrot.slane %v12392_v14, 2 }
 0x4c0   :  { %11555 = vmatprep.subr.bf16.mxu0 %v12382_v6 }
 0x4c1   :  { %v5930_v45 = vsel %vm5881_vm3, %v5927_v3, %v5929_v39  ;;  %v5932_v49 = vsel %vm5881_vm3, %v5929_v39, %v5931_v26 }
 0x4c2   :  { %11500 = vmatmul.mubr.bf16.gmra.mrb[64].mxu0 %v5894_v50  ;;  %v12397_v50 = vld [vmem:[#allocation3 + $0xec] ss:$0 sps:$4 sm:$0x33]  }
 0x4c3   :  { %11503 = vmatprep.mubr.bf16.mxu0 %v5896_v57  ;;  %11556 = vmatpush3.bf16.msra.mxu0 %v12382_v6  ;;  %v12395_v6 = vld [vmem:[#allocation3 + $0xe4] sm:$0xff]   ;;  %v12399_v57 = vld [vmem:[#allocation3 + $0x1c] sm:$0xff]  }
 0x4c4   :  { %11557 = vmatprep.subr.bf16.mxu0 %v12386_v43  ;;  %v5935_v7 = vrot.slane %v12395_v6, 2  ;;  %v6659_v42 = vrot.slane %v12399_v57, 1 }
 0x4c6   :  { %v5936_v20 = vsel %vm5881_vm3, %v5933_v13, %v5935_v7  ;;  %v6660_v5 = vsel %vm6657_vm4, %v6658_v15, %v6659_v42 }
 0x4c7   :  { %11558 = vmatpush3.bf16.msra.mxu0 %v12386_v43  ;;  %v5934_v43 = vsel %vm5881_vm3, %v5931_v26, %v5933_v13 }
 0x4c8   :  { %11559 = vmatprep.subr.bf16.mxu0 %v12391_v2 }
 0x4ca   :  { %11504 = vmatmul.mubr.bf16.gmra.mrb[68].mxu0 %v5898_v34  ;;  %v12400_v34 = vld [vmem:[#allocation3 + $0x24] sm:$0xff]  }
 0x4cb   :  { %11507 = vmatprep.mubr.bf16.mxu0 %v5900_v63  ;;  %11560 = vmatpush3.bf16.msra.mxu0 %v12391_v2  ;;  %v5937_v2 = vrot.slane %v12397_v50, 2  ;;  %v12402_v63 = vld [vmem:[#allocation3 + $0x2c] sm:$0xff]   ;;  %v6661_v0 = vrot.slane %v12400_v34, 1 }
 0x4cc   :  { %11561 = vmatprep.subr.bf16.mxu0 %v12396_v22  ;;  %v6663_v44 = vrot.slane %v12402_v63, 1 }
 0x4cf   :  { %11562 = vmatpush3.bf16.msra.mxu0 %v12396_v22  ;;  %v5938_v22 = vsel %vm5881_vm3, %v5935_v7, %v5937_v2 }
 0x4d0   :  { %11619 = vmatprep.subr.bf16.mxu0 %v14527_v54 }
 0x4d2   :  { %11508 = vmatmul.mubr.bf16.gmra.mrb[72].mxu0 %v5902_v4  ;;  %v6662_v4 = vsel %vm6657_vm4, %v6659_v42, %v6661_v0  ;;  %v12424_v42 = vld [vmem:[#allocation3 + $0xb4] sm:$0xff]  }
 0x4d3   :  { %11511 = vmatprep.mubr.bf16.mxu0 %v5904_v59  ;;  %v6664_v59 = vsel %vm6657_vm4, %v6661_v0, %v6663_v44  ;;  %v6697_v34 = vrot.slane %v12424_v42, 1  ;;  %v12426_v0 = vld [vmem:[#allocation3 + $0xc4] sm:$0xff]  }
 0x4da   :  { %11512 = vmatmul.mubr.bf16.gmra.mrb[76].mxu0 %v5906_v8  ;;  %v6667_v8 = vrot.slane %v12404_v28, 1  ;;  %v12429_v28 = vld [vmem:[#allocation3 + $0xd4] sm:$0xff]  }
 0x4db   :  { %11515 = vmatprep.mubr.bf16.mxu0 %v5908_v38  ;;  %v6666_v38 = vsel %vm6657_vm4, %v6663_v44, %v6665_v18 }
 0x4dc   :  { %v6668_v32 = vsel %vm6657_vm4, %v6665_v18, %v6667_v8  ;;  %v12430_v18 = vld [vmem:[#allocation3 + $0xdc] sm:$0xff]  }
 0x4e2   :  { %11516 = vmatmul.mubr.bf16.gmra.mrb[80].mxu0 %v5910_v55  ;;  %v6669_v55 = vrot.slane %v12406_v10, 1 }
 0x4e3   :  { %11519 = vmatprep.mubr.bf16.mxu0 %v5912_v40  ;;  %v12423_v40 = vld [vmem:[%s15136_s3 + $0x128] sm:$0xff]  }
 0x4e4   :  { %v6670_v21 = vsel %vm6657_vm4, %v6667_v8, %v6669_v55  ;;  %v14597_v8 = vld [vmem:[%s15137_s4] ss:$0 sm:$0xff] }
 0x4e5   :  { %11992 = vst [vmem:[#allocation4 + $0x128] sm:$0xff] %v14597_v8  ;;  %11998 = vst [vmem:[#allocation4 + $0x140] sm:$0xff] %v14597_v8 }
 0x4e6   :  { %12004 = vst [vmem:[#allocation4 + $0x148] sm:$0xff] %v14597_v8  ;;  %11995 = vst [vmem:[#allocation4 + $0x150] sm:$0xff] %v14597_v8 }
 0x4e7   :  { %12001 = vst [vmem:[#allocation4 + $0x158] sm:$0xff] %v14597_v8  ;;  %12010 = vst [vmem:[#allocation4 + $0x160] sm:$0xff] %v14597_v8 }
 0x4e8   :  { %12016 = vst [vmem:[#allocation4 + $0x168] sm:$0xff] %v14597_v8  ;;  %12007 = vst [vmem:[#allocation4 + $0x170] sm:$0xff] %v14597_v8 }
 0x4e9   :  { %12013 = vst [vmem:[#allocation4 + $0x178] sm:$0xff] %v14597_v8  ;;  %12022 = vst [vmem:[#allocation4 + $0x180] sm:$0xff] %v14597_v8 }
 0x4ea   :  { %11520 = vmatmul.mubr.bf16.gmra.mrb[84].mxu0 %v5914_v46  ;;  %v12409_v46 = vld [vmem:[#allocation3 + $0x5c] sm:$0xff]   ;;  %12028 = vst [vmem:[#allocation4 + $0x188] sm:$0xff] %v14597_v8  ;;  %12019 = vst [vmem:[#allocation4 + $0x190] sm:$0xff] %v14597_v8 }
 0x4eb   :  { %11523 = vmatprep.mubr.bf16.mxu0 %v5916_v16  ;;  %v6673_v16 = vrot.slane %v12408_v51, 1  ;;  %v6675_v35 = vrot.slane %v12409_v46, 1  ;;  %12025 = vst [vmem:[#allocation4 + $0x198] sm:$0xff] %v14597_v8  ;;  %12034 = vst [vmem:[#allocation4 + $0x1a0] sm:$0xff] %v14597_v8 }
 0x4ec   :  { %12040 = vst [vmem:[#allocation4 + $0x1a8] sm:$0xff] %v14597_v8  ;;  %12031 = vst [vmem:[#allocation4 + $0x1b0] sm:$0xff] %v14597_v8 }
 0x4ed   :  { %v6676_v36 = vsel %vm6657_vm4, %v6673_v16, %v6675_v35  ;;  %12037 = vst [vmem:[#allocation4 + $0x1b8] sm:$0xff] %v14597_v8 }
 0x4f2   :  { %11524 = vmatmul.mubr.bf16.gmra.mrb[88].mxu0 %v5918_v27  ;;  %v12411_v27 = vld [vmem:[#allocation3 + $0x64] sm:$0xff]  }
 0x4f3   :  { %11527 = vmatprep.mubr.bf16.mxu0 %v5920_v31  ;;  %v12412_v31 = vld [vmem:[#allocation3 + $0x6c] sm:$0xff]   ;;  %v6677_v29 = vrot.slane %v12411_v27, 1  ;;  %v12440_v27 = vld [vmem:[#allocation3 + $0x44] sm:$0xff]  }
 0x4f4   :  { %v6679_v48 = vrot.slane %v12412_v31, 1  ;;  %v12442_v31 = vld [vmem:[#allocation3 + $0x54] sm:$0xff]  }
 0x4f5   :  { %v6678_v19 = vsel %vm6657_vm4, %v6675_v35, %v6677_v29  ;;  %v12437_v35 = vld [vmem:[#allocation3 + $0x2c] sm:$0xff]  }
 0x4f6   :  { %v6680_v33 = vsel %vm6657_vm4, %v6677_v29, %v6679_v48  ;;  %v12443_v29 = vld [vmem:[#allocation3 + $0x5c] sm:$0xff]  }
 0x4fa   :  { %11528 = vmatmul.mubr.bf16.gmra.mrb[92].mxu0 %v5922_v52  ;;  %v12413_v52 = vld [vmem:[#allocation3 + $0x74] sm:$0xff]  }
 0x4fb   :  { %11531 = vmatprep.mubr.bf16.mxu0 %v5924_v30  ;;  %v12414_v30 = vld [vmem:[#allocation3 + $0x7c] sm:$0xff]   ;;  %v6681_v53 = vrot.slane %v12413_v52, 1  ;;  %v12446_v52 = vld [vmem:[#allocation3 + $0x74] sm:$0xff]  }
 0x4fc   :  { %v6683_v23 = vrot.slane %v12414_v30, 1  ;;  %v12448_v30 = vld [vmem:[#allocation3 + $0x84] sm:$0xff]  }
 0x4fd   :  { %v6682_v3 = vsel %vm6657_vm4, %v6679_v48, %v6681_v53  ;;  %v12444_v48 = vld [vmem:[#allocation3 + $0x64] sm:$0xff]  }
 0x4fe   :  { %v6684_v14 = vsel %vm6657_vm4, %v6681_v53, %v6683_v23  ;;  %v12449_v53 = vld [vmem:[#allocation3 + $0x8c] sm:$0xff]  }
 0x502   :  { %11532 = vmatmul.mubr.bf16.gmra.mrb[96].mxu0 %v5926_v61  ;;  %v12416_v61 = vld [vmem:[#allocation3 + $0x84] sm:$0xff]  }
 0x503   :  { %11535 = vmatprep.mubr.bf16.mxu0 %v5928_v11  ;;  %v12417_v11 = vld [vmem:[#allocation3 + $0x8c] sm:$0xff]   ;;  %v6685_v41 = vrot.slane %v12416_v61, 1  ;;  %v12452_v61 = vld [vmem:[#allocation3 + $0xa4] sm:$0xff]  }
 0x504   :  { %v6687_v39 = vrot.slane %v12417_v11, 1  ;;  %v12454_v11 = vld [vmem:[#allocation3 + $0xb4] sm:$0xff]  }
 0x505   :  { %v6686_v26 = vsel %vm6657_vm4, %v6683_v23, %v6685_v41  ;;  %v12450_v23 = vld [vmem:[#allocation3 + $0x94] sm:$0xff]  }
 0x506   :  { %v6688_v1 = vsel %vm6657_vm4, %v6685_v41, %v6687_v39  ;;  %v12455_v41 = vld [vmem:[#allocation3 + $0xbc] sm:$0xff]  }
 0x50a   :  { %11536 = vmatmul.mubr.bf16.gmra.mrb[100].mxu0 %v5930_v45  ;;  %v12418_v45 = vld [vmem:[#allocation3 + $0x94] sm:$0xff]  }
 0x50b   :  { %11539 = vmatprep.mubr.bf16.mxu0 %v5932_v49  ;;  %v12420_v49 = vld [vmem:[#allocation3 + $0x9c] sm:$0xff]   ;;  %v6689_v6 = vrot.slane %v12418_v45, 1  ;;  %v12458_v45 = vld [vmem:[#allocation3 + $0xd4] sm:$0xff]  }
 0x50c   :  { %v6691_v13 = vrot.slane %v12420_v49, 1  ;;  %v12460_v49 = vld [vmem:[#allocation3 + $0xe4] sm:$0xff]  }
 0x50d   :  { %v6690_v7 = vsel %vm6657_vm4, %v6687_v39, %v6689_v6  ;;  %v12456_v39 = vld [vmem:[#allocation3 + $0xc4] sm:$0xff]  }
 0x50e   :  { %v6692_v50 = vsel %vm6657_vm4, %v6689_v6, %v6691_v13  ;;  %v12461_v6 = vld [vmem:[#allocation3 + $0xec] sm:$0xff]  }
 0x512   :  { %11540 = vmatmul.mubr.bf16.gmra.mrb[104].mxu0 %v5934_v43  ;;  %v12421_v43 = vld [vmem:[#allocation3 + $0xa4] sm:$0xff]  }
 0x513   :  { %11543 = vmatprep.mubr.bf16.mxu0 %v5936_v20  ;;  %v12422_v20 = vld [vmem:[#allocation3 + $0xac] sm:$0xff]   ;;  %v6693_v57 = vrot.slane %v12421_v43, 1 }
 0x514   :  { %v6695_v56 = vrot.slane %v12422_v20, 1  ;;  %v12463_v43 = vld [vmem:[%s15138_s5 + $0x48] sm:$0xff]  }
 0x515   :  { %v6694_v2 = vsel %vm6657_vm4, %v6691_v13, %v6693_v57  ;;  %v12462_v13 = vld [vmem:[%s15138_s5 + $0x40] sm:$0xff]  }
 0x516   :  { %v6696_v15 = vsel %vm6657_vm4, %v6693_v57, %v6695_v56  ;;  %v6698_v63 = vsel %vm6657_vm4, %v6695_v56, %v6697_v34 }
 0x51a   :  { %11544 = vmatmul.mubr.bf16.gmra.mrb[108].mxu0 %v5938_v22  ;;  %v12425_v22 = vld [vmem:[#allocation3 + $0xbc] sm:$0xff]  }
 0x51b   :  { %11563 = vmatprep.mubr.bf16.mxu0 %v6660_v5  ;;  %v6699_v5 = vrot.slane %v12425_v22, 1 }
 0x51d   :  { %v6700_v44 = vsel %vm6657_vm4, %v6697_v34, %v6699_v5 }
 0x522   :  { %11564 = vmatmul.mubr.bf16.vlgmr.msra.gmra.mrb[56].mxu0 %v6662_v4  ;;  %v6701_v4 = vrot.slane %v12426_v0, 1 }
 0x523   :  { %11567 = vmatprep.mubr.bf16.mxu0 %v6664_v59  ;;  %11620 = vmatpush3.bf16.msra.mxu0 %v14527_v54  ;;  %v12407_v54 = vld [vmem:[#allocation3 + $0x4c] sm:$0xff]  }
 0x524   :  { %11621 = vmatprep.subr.bf16.mxu0 %v12405_v60  ;;  %v6671_v62 = vrot.slane %v12407_v54, 1  ;;  %v6702_v59 = vsel %vm6657_vm4, %v6699_v5, %v6701_v4 }
 0x526   :  { %v6672_v24 = vsel %vm6657_vm4, %v6669_v55, %v6671_v62  ;;  %v6674_v37 = vsel %vm6657_vm4, %v6671_v62, %v6673_v16  ;;  %v12436_v16 = vld [vmem:[#allocation3 + $0x24] sm:$0xff]  }
 0x527   :  { %11622 = vmatpush3.bf16.msra.mxu0 %v12405_v60  ;;  %v12427_v60 = vld [vmem:[#allocation3 + $0xcc] sm:$0xff]  }
 0x528   :  { %11623 = vmatprep.subr.bf16.mxu0 %v12410_v47  ;;  %v6703_v17 = vrot.slane %v12427_v60, 1 }
 0x52a   :  { %11568 = vmatmul.mubr.bf16.gmra.mrb[60].mxu0 %v6666_v38  ;;  %v6707_v38 = vrot.slane %v12430_v18, 1 }
 0x52b   :  { %11571 = vmatprep.mubr.bf16.mxu0 %v6668_v32  ;;  %11624 = vmatpush3.bf16.msra.mxu0 %v12410_v47  ;;  %v6704_v47 = vsel %vm6657_vm4, %v6701_v4, %v6703_v17  ;;  %v12431_v32 = vld [vmem:[#allocation3 + $0xe4] sm:$0xff]  }
 0x52c   :  { %11625 = vmatprep.subr.bf16.mxu0 %v12415_v12  ;;  %v6709_v55 = vrot.slane %v12431_v32, 1 }
 0x52f   :  { %11626 = vmatpush3.bf16.msra.mxu0 %v12415_v12  ;;  %v6705_v12 = vrot.slane %v12429_v28, 1 }
 0x530   :  { %11627 = vmatprep.subr.bf16.mxu0 %v12419_v58 }
 0x531   :  { %v6706_v10 = vsel %vm6657_vm4, %v6703_v17, %v6705_v12  ;;  %v6708_v54 = vsel %vm6657_vm4, %v6705_v12, %v6707_v38 }
 0x532   :  { %11572 = vmatmul.mubr.bf16.gmra.mrb[64].mxu0 %v6670_v21  ;;  %v12434_v21 = vld [vmem:[#allocation3 + $0xf4] ss:$0 sps:$4 sm:$0x11]  }
 0x533   :  { %11575 = vmatprep.mubr.bf16.mxu0 %v6672_v24  ;;  %11628 = vmatpush3.bf16.msra.mxu0 %v12419_v58  ;;  %v12432_v58 = vld [vmem:[#allocation3 + $0xec] sm:$0xff]   ;;  %v6713_v24 = vrot.slane %v12434_v21, 1 }
 0x534   :  { %11629 = vmatprep.subr.bf16.mxu0 %v12423_v40  ;;  %v6711_v62 = vrot.slane %v12432_v58, 1 }
 0x536   :  { %v6712_v51 = vsel %vm6657_vm4, %v6709_v55, %v6711_v62  ;;  %v6714_v46 = vsel %vm6657_vm4, %v6711_v62, %v6713_v24 }
 0x537   :  { %11630 = vmatpush3.bf16.msra.mxu0 %v12423_v40  ;;  %v6710_v40 = vsel %vm6657_vm4, %v6707_v38, %v6709_v55 }
 0x538   :  { %11631 = vmatprep.subr.bf16.mxu0 %v12428_v25 }
 0x53a   :  { %11576 = vmatmul.mubr.bf16.gmra.mrb[68].mxu0 %v6674_v37  ;;  %v12439_v37 = vld [vmem:[#allocation3 + $0x3c] sm:$0xff]  }
 0x53b   :  { %11579 = vmatprep.mubr.bf16.mxu0 %v6676_v36  ;;  %11632 = vmatpush3.bf16.msra.mxu0 %v12428_v25  ;;  %v12435_v25 = vld [vmem:[#allocation3 + $0x1c] sm:$0xff]   ;;  %v12441_v36 = vld [vmem:[#allocation3 + $0x4c] sm:$0xff]  }
 0x53c   :  { %11633 = vmatprep.subr.bf16.mxu0 %v12433_v9 }
 0x53f   :  { %11634 = vmatpush3.bf16.msra.mxu0 %v12433_v9  ;;  %v12438_v9 = vld [vmem:[#allocation3 + $0x34] sm:$0xff]  }
 0x542   :  { %11580 = vmatmul.mubr.bf16.gmra.mrb[72].mxu0 %v6678_v19  ;;  %v12445_v19 = vld [vmem:[#allocation3 + $0x6c] sm:$0xff]  }
 0x543   :  { %11583 = vmatprep.mubr.bf16.mxu0 %v6680_v33  ;;  %v12447_v33 = vld [vmem:[#allocation3 + $0x7c] sm:$0xff]  }
 0x54a   :  { %11584 = vmatmul.mubr.bf16.gmra.mrb[76].mxu0 %v6682_v3  ;;  %v12451_v3 = vld [vmem:[#allocation3 + $0x9c] sm:$0xff]  }
 0x54b   :  { %11587 = vmatprep.mubr.bf16.mxu0 %v6684_v14  ;;  %v12453_v14 = vld [vmem:[#allocation3 + $0xac] sm:$0xff]  }
 0x552   :  { %11588 = vmatmul.mubr.bf16.gmra.mrb[80].mxu0 %v6686_v26  ;;  %v12457_v26 = vld [vmem:[#allocation3 + $0xcc] sm:$0xff]  }
 0x553   :  { %11591 = vmatprep.mubr.bf16.mxu0 %v6688_v1  ;;  %v12459_v1 = vld [vmem:[#allocation3 + $0xdc] sm:$0xff]  }
 0x55a   :  { %11592 = vmatmul.mubr.bf16.gmra.mrb[84].mxu0 %v6690_v7  ;;  %v12572_v7 = vmov 0.0  }
 0x55b   :  { %11595 = vmatprep.mubr.bf16.mxu0 %v6692_v50  ;;  %11691 = vmatprep.subr.bf16.mxu1 %v12572_v7 }
 0x55c   :  { %11692 = vmatpush3.bf16.msra.mxu1 %v12462_v13  ;;  %11707 = vmatprep.mubr.msk.bf16.mxu1 %vm12576_vm5, %v12572_v7 }
 0x55d   :  { %11693 = vmatprep.subr.bf16.mxu1 %v12572_v7 }
 0x560   :  { %11694 = vmatpush3.bf16.msra.mxu1 %v12463_v43 }
 0x561   :  { %11695 = vmatprep.subr.bf16.mxu1 %v12572_v7 }
 0x562   :  { %11596 = vmatmul.mubr.bf16.gmra.mrb[88].mxu0 %v6694_v2 }
 0x563   :  { %11599 = vmatprep.mubr.bf16.mxu0 %v6696_v15 }
 0x56a   :  { %11600 = vmatmul.mubr.bf16.gmra.mrb[92].mxu0 %v6698_v63 }
 0x56b   :  { %11603 = vmatprep.mubr.bf16.mxu0 %v6700_v44 }
 0x572   :  { %11604 = vmatmul.mubr.bf16.gmra.mrb[96].mxu0 %v6702_v59 }
 0x573   :  { %11607 = vmatprep.mubr.bf16.mxu0 %v6704_v47 }
 0x57a   :  { %11608 = vmatmul.mubr.bf16.gmra.mrb[100].mxu0 %v6706_v10 }
 0x57b   :  { %11611 = vmatprep.mubr.bf16.mxu0 %v6708_v54 }
 0x582   :  { %11612 = vmatmul.mubr.bf16.gmra.mrb[104].mxu0 %v6710_v40 }
 0x583   :  { %11615 = vmatprep.mubr.bf16.mxu0 %v6712_v51 }
 0x58a   :  { %11616 = vmatmul.mubr.bf16.gmra.mrb[108].mxu0 %v6714_v46 }
 0x58b   :  { %11635 = vmatprep.mubr.bf16.mxu0 %v12435_v25  ;;  %v12464_v25 = vld [vmem:[%s15138_s5 + $0x50] sm:$0xff]  }
 0x58c   :  { %11696 = vmatpush3.bf16.msra.mxu1 %v12464_v25 }
 0x58d   :  { %11697 = vmatprep.subr.bf16.mxu1 %v12572_v7 }
 0x592   :  { %11636 = vmatmul.mubr.bf16.vlgmr.msra.gmra.mrb[56].mxu0 %v12436_v16 }
 0x593   :  { %11639 = vmatprep.mubr.bf16.mxu0 %v12437_v35 }
 0x59a   :  { %11640 = vmatmul.mubr.bf16.gmra.mrb[60].mxu0 %v12438_v9 }
 0x59b   :  { %11643 = vmatprep.mubr.bf16.mxu0 %v12439_v37 }
 0x5a2   :  { %11644 = vmatmul.mubr.bf16.gmra.mrb[64].mxu0 %v12440_v27 }
 0x5a3   :  { %11647 = vmatprep.mubr.bf16.mxu0 %v12441_v36 }
 0x5aa   :  { %11648 = vmatmul.mubr.bf16.gmra.mrb[68].mxu0 %v12442_v31 }
 0x5ab   :  { %11651 = vmatprep.mubr.bf16.mxu0 %v12443_v29 }
 0x5b2   :  { %11652 = vmatmul.mubr.bf16.gmra.mrb[72].mxu0 %v12444_v48 }
 0x5b3   :  { %11655 = vmatprep.mubr.bf16.mxu0 %v12445_v19 }
 0x5ba   :  { %11656 = vmatmul.mubr.bf16.gmra.mrb[76].mxu0 %v12446_v52 }
 0x5bb   :  { %11659 = vmatprep.mubr.bf16.mxu0 %v12447_v33 }
 0x5c2   :  { %11660 = vmatmul.mubr.bf16.gmra.mrb[80].mxu0 %v12448_v30 }
 0x5c3   :  { %11663 = vmatprep.mubr.bf16.mxu0 %v12449_v53 }
 0x5ca   :  { %11664 = vmatmul.mubr.bf16.gmra.mrb[84].mxu0 %v12450_v23 }
 0x5cb   :  { %11667 = vmatprep.mubr.bf16.mxu0 %v12451_v3 }
 0x5d2   :  { %11668 = vmatmul.mubr.bf16.gmra.mrb[88].mxu0 %v12452_v61 }
 0x5d3   :  { %11671 = vmatprep.mubr.bf16.mxu0 %v12453_v14 }
 0x5da   :  { %11672 = vmatmul.mubr.bf16.gmra.mrb[92].mxu0 %v12454_v11 }
 0x5db   :  { %11675 = vmatprep.mubr.bf16.mxu0 %v12455_v41 }
 0x5e2   :  { %11676 = vmatmul.mubr.bf16.gmra.mrb[96].mxu0 %v12456_v39 }
 0x5e3   :  { %11679 = vmatprep.mubr.bf16.mxu0 %v12457_v26 }
 0x5ea   :  { %11680 = vmatmul.mubr.bf16.gmra.mrb[100].mxu0 %v12458_v45 }
 0x5eb   :  { %11683 = vmatprep.mubr.bf16.mxu0 %v12459_v1 }
 0x5f2   :  { %11684 = vmatmul.mubr.bf16.gmra.mrb[104].mxu0 %v12460_v49 }
 0x5f3   :  { %11687 = vmatprep.mubr.bf16.mxu0 %v12461_v6 }
 0x665   :  { %v11637_v50 = vpop.f32.mrb[56].mxu0 }
 0x666   :  { %v11877_v20 = vadd.f32 %v11637_v50, %v14597_v8  ;;  %v7539_v57 = vpop.f32.mrb[57].mxu0 }
 0x667   :  { %v11880_v56 = vadd.f32 %v14597_v8, %v7539_v57  ;;  %v11638_v2 = vpop.f32.mrb[58].mxu0 }
 0x668   :  { %v7876_v42 = vmax.f32 %v11877_v20, 0.0  ;;  %v14633_v15 = vadd.f32 %v11638_v2, %v14597_v8  ;;  %v7542_v22 = vpop.f32.mrb[59].mxu0 }
 0x669   :  { %v7874_v34 = vmax.f32 %v11880_v56, 0.0  ;;  %v11886_v5 = vadd.f32 %v14597_v8, %v7542_v22 }
 0x66a   :  { %7932 = vst [vmem:[#allocation4 + $0x10] sm:$0xff] %v7876_v42  ;;  %v7877_v63 = vmax.f32 %v14633_v15, 0.0 }
 0x66b   :  { %7930 = vst [vmem:[#allocation4] sm:$0xff] %v7874_v34  ;;  %v7875_v0 = vmax.f32 %v11886_v5, 0.0 }
 0x66c   :  { %7933 = vst [vmem:[#allocation4 + $0x18] sm:$0xff] %v7877_v63 }
 0x66d   :  { %7931 = vst [vmem:[#allocation4 + $0x8] sm:$0xff] %v7875_v0  ;;  %v11641_v44 = vpop.f32.mrb[60].mxu0 }
 0x66e   :  { %v11889_v60 = vadd.f32 %v11641_v44, %v14597_v8  ;;  %v7555_v4 = vpop.f32.mrb[61].mxu0 }
 0x66f   :  { %v11892_v17 = vadd.f32 %v14597_v8, %v7555_v4  ;;  %v11642_v59 = vpop.f32.mrb[62].mxu0 }
 0x670   :  { %v7880_v28 = vmax.f32 %v11889_v60, 0.0  ;;  %v14640_v47 = vadd.f32 %v11642_v59, %v14597_v8  ;;  %v7558_v18 = vpop.f32.mrb[63].mxu0 }
 0x671   :  { %v7878_v12 = vmax.f32 %v11892_v17, 0.0  ;;  %v11898_v38 = vadd.f32 %v14597_v8, %v7558_v18 }
 0x672   :  { %7936 = vst [vmem:[#allocation4 + $0x30] sm:$0xff] %v7880_v28  ;;  %v7881_v10 = vmax.f32 %v14640_v47, 0.0 }
 0x673   :  { %v8149_v32 = vld [vmem:[#allocation4 + $0x16] sm:$0xff]  ;;  %7934 = vst [vmem:[#allocation4 + $0x20] sm:$0xff] %v7878_v12  ;;  %v7879_v58 = vmax.f32 %v11898_v38, 0.0 }
 0x674   :  { %v8203_v54 = vld [vmem:[#allocation4 + $0x17] sm:$0xff]  ;;  %v8040_v55 = vld [vmem:[#allocation4 + $0x1] sm:$0xff]  ;;  %v8041_v62 = vld [vmem:[#allocation4 + $0x9] sm:$0xff]  ;;  %7937 = vst [vmem:[#allocation4 + $0x38] sm:$0xff] %v7881_v10 }
 0x675   :  { %v8148_v40 = vld [vmem:[#allocation4 + $0xe] sm:$0xff]  ;;  %v8257_v21 = vmax.f32 %v8149_v32, %v8203_v54  ;;  %v8094_v51 = vmax.f32 %v7874_v34, %v8040_v55  ;;  %7935 = vst [vmem:[#allocation4 + $0x28] sm:$0xff] %v7879_v58  ;;  %v11645_v46 = vpop.f32.mrb[64].mxu0  ;;  %v8095_v16 = vmax.f32 %v7875_v0, %v8041_v62 }
 0x676   :  { %v8202_v24 = vld [vmem:[#allocation4 + $0xf] sm:$0xff]  ;;  %v14650_v9 = vadd.f32 %v11645_v46, %v14597_v8  ;;  %v7571_v37 = vpop.f32.mrb[65].mxu0 }
 0x677   :  { %v8256_v35 = vmax.f32 %v8148_v40, %v8202_v24  ;;  %v11904_v27 = vadd.f32 %v14597_v8, %v7571_v37  ;;  %v11646_v36 = vpop.f32.mrb[66].mxu0  ;;  %v8311_v31 = vmax.f32 %v8095_v16, %v8257_v21  ;;  %v12465_v40 = vld [vmem:[%s15138_s5 + $0x58] sm:$0xff]  }
 0x678   :  { %v7884_v29 = vmax.f32 %v14650_v9, 0.0  ;;  %v14655_v48 = vadd.f32 %v11646_v36, %v14597_v8  ;;  %v7574_v19 = vpop.f32.mrb[67].mxu0  ;;  %11698 = vmatpush3.bf16.msra.mxu1 %v12465_v40 }
 0x679   :  { %v8310_v52 = vmax.f32 %v8094_v51, %v8256_v35  ;;  %v7882_v33 = vmax.f32 %v11904_v27, 0.0  ;;  %v11910_v30 = vadd.f32 %v14597_v8, %v7574_v19  ;;  %8365 = vst [vmem:[#allocation5 + $0x8] sm:$0xff] %v8311_v31  ;;  %11699 = vmatprep.subr.bf16.mxu1 %v12572_v7 }
 0x67a   :  { %7940 = vst [vmem:[#allocation4 + $0x50] sm:$0xff] %v7884_v29  ;;  %v7885_v53 = vmax.f32 %v14655_v48, 0.0  ;;  %v8043_v23 = vld [vmem:[#allocation4 + $0x19] sm:$0xff] }
 0x67b   :  { %8364 = vst [vmem:[#allocation5] sm:$0xff] %v8310_v52  ;;  %7938 = vst [vmem:[#allocation4 + $0x40] sm:$0xff] %v7882_v33  ;;  %v7883_v3 = vmax.f32 %v11910_v30, 0.0  ;;  %v8097_v1 = vmax.f32 %v7877_v63, %v8043_v23 }
 0x67c   :  { %v8044_v61 = vld [vmem:[#allocation4 + $0x21] sm:$0xff]  ;;  %7941 = vst [vmem:[#allocation4 + $0x58] sm:$0xff] %v7885_v53  ;;  %v8152_v41 = vld [vmem:[#allocation4 + $0x2e] sm:$0xff] }
 0x67d   :  { %v8151_v14 = vld [vmem:[#allocation4 + $0x26] sm:$0xff]  ;;  %v8098_v11 = vmax.f32 %v7878_v12, %v8044_v61  ;;  %v8206_v26 = vld [vmem:[#allocation4 + $0x2f] sm:$0xff]  ;;  %7939 = vst [vmem:[#allocation4 + $0x48] sm:$0xff] %v7883_v3  ;;  %v11649_v45 = vpop.f32.mrb[68].mxu0 }
 0x67e   :  { %v8205_v39 = vld [vmem:[#allocation4 + $0x27] sm:$0xff]  ;;  %v8260_v6 = vmax.f32 %v8152_v41, %v8206_v26  ;;  %v14665_v13 = vadd.f32 %v11649_v45, %v14597_v8  ;;  %v7587_v43 = vpop.f32.mrb[69].mxu0 }
 0x67f   :  { %v8259_v49 = vmax.f32 %v8151_v14, %v8205_v39  ;;  %v11916_v50 = vadd.f32 %v14597_v8, %v7587_v43  ;;  %v11650_v20 = vpop.f32.mrb[70].mxu0 }
 0x680   :  { %v7888_v57 = vmax.f32 %v14665_v13, 0.0  ;;  %v14670_v56 = vadd.f32 %v11650_v20, %v14597_v8  ;;  %v7590_v2 = vpop.f32.mrb[71].mxu0  ;;  %v8314_v15 = vmax.f32 %v8098_v11, %v8260_v6 }
 0x681   :  { %v8313_v42 = vmax.f32 %v8097_v1, %v8259_v49  ;;  %v7886_v22 = vmax.f32 %v11916_v50, 0.0  ;;  %v11922_v34 = vadd.f32 %v14597_v8, %v7590_v2 }
 0x682   :  { %v8419_v5 = vld [vmem:[#allocation5 + $0x2] sm:$0x1]  ;;  %7944 = vst [vmem:[#allocation4 + $0x70] sm:$0xff] %v7888_v57  ;;  %v7889_v63 = vmax.f32 %v14670_v56, 0.0  ;;  %8368 = vst [vmem:[#allocation5 + $0x20] sm:$0xff] %v8314_v15  ;;  %v8047_v0 = vld [vmem:[#allocation4 + $0x39] sm:$0xff] }
 0x683   :  { %8420 = vrot.lane.b32.xlu0 %v8419_v5, %s12573_s17  ;;  %8367 = vst [vmem:[#allocation5 + $0x18] sm:$0xff] %v8313_v42  ;;  %7942 = vst [vmem:[#allocation4 + $0x60] sm:$0xff] %v7886_v22  ;;  %v7887_v44 = vmax.f32 %v11922_v34, 0.0  ;;  %v8423_v60 = vld [vmem:[#allocation5 + $0x4] sm:$0x1]  ;;  %v8101_v32 = vmax.f32 %v7881_v10, %v8047_v0  ;;  %v8050_v24 = vld [vmem:[#allocation4 + $0x51] sm:$0xff] }
 0x684   :  { %v8048_v4 = vld [vmem:[#allocation4 + $0x41] sm:$0xff]  ;;  %7945 = vst [vmem:[#allocation4 + $0x78] sm:$0xff] %v7889_v63  ;;  %v8156_v28 = vld [vmem:[#allocation4 + $0x4e] sm:$0xff]  ;;  %v8104_v52 = vmax.f32 %v7884_v29, %v8050_v24 }
 0x685   :  { %v8155_v17 = vld [vmem:[#allocation4 + $0x46] sm:$0xff]  ;;  %v8102_v59 = vmax.f32 %v7882_v33, %v8048_v4  ;;  %v8210_v12 = vld [vmem:[#allocation4 + $0x4f] sm:$0xff]  ;;  %7943 = vst [vmem:[#allocation4 + $0x68] sm:$0xff] %v7887_v44  ;;  %v11653_v38 = vpop.f32.mrb[72].mxu0 }
 0x686   :  { %v8209_v18 = vld [vmem:[#allocation4 + $0x47] sm:$0xff]  ;;  %v8264_v58 = vmax.f32 %v8156_v28, %v8210_v12  ;;  %v11925_v55 = vadd.f32 %v11653_v38, %v14597_v8  ;;  %v7603_v62 = vpop.f32.mrb[73].mxu0  ;;  %v8427_v27 = vld [vmem:[#allocation5 + $0x6] sm:$0x1] }
 0x687   :  { %v8263_v54 = vmax.f32 %v8155_v17, %v8209_v18  ;;  %8424 = vrot.lane.b32.xlu0 %v8423_v60, %s12574_s18  ;;  %v11928_v21 = vadd.f32 %v14597_v8, %v7603_v62  ;;  %v11654_v51 = vpop.f32.mrb[74].mxu0 }
 0x688   :  { %v7892_v46 = vmax.f32 %v11925_v55, 0.0  ;;  %v11931_v47 = vadd.f32 %v11654_v51, %v14597_v8  ;;  %v7606_v10 = vpop.f32.mrb[75].mxu0  ;;  %v8318_v16 = vmax.f32 %v8102_v59, %v8264_v58 }
 0x689   :  { %v8317_v25 = vmax.f32 %v8101_v32, %v8263_v54  ;;  %v7890_v35 = vmax.f32 %v11928_v21, 0.0  ;;  %v11934_v37 = vadd.f32 %v14597_v8, %v7606_v10  ;;  %v8473_v60 = vld [vmem:[#allocation5 + $0x20] sm:$0x1]  ;;  %v8688_v21 = vld [vmem:[#allocation5 + $0x24] sm:$0x1] }
 0x68a   :  { %v8158_v36 = vld [vmem:[#allocation4 + $0x5e] sm:$0xff]  ;;  %7948 = vst [vmem:[#allocation4 + $0x90] sm:$0xff] %v7892_v46  ;;  %v7893_v19 = vmax.f32 %v11931_v47, 0.0  ;;  %8372 = vst [vmem:[#allocation5 + $0x40] sm:$0xff] %v8318_v16  ;;  %v8465_v3 = vld [vmem:[#allocation5 + $0x1c] sm:$0x1] }
 0x68b   :  { %v8212_v31 = vld [vmem:[#allocation4 + $0x5f] sm:$0xff]  ;;  %8428 = vrot.lane.b32.xlu0 %v8427_v27, %s12575_s22  ;;  %8371 = vst [vmem:[#allocation5 + $0x38] sm:$0xff] %v8317_v25  ;;  %7946 = vst [vmem:[#allocation4 + $0x80] sm:$0xff] %v7890_v35  ;;  %v7891_v23 = vmax.f32 %v11934_v37, 0.0  ;;  %v8054_v49 = vld [vmem:[#allocation4 + $0x71] sm:$0xff] }
 0x68c   :  { %v8051_v33 = vld [vmem:[#allocation4 + $0x59] sm:$0xff]  ;;  %v8266_v30 = vmax.f32 %v8158_v36, %v8212_v31  ;;  %v8159_v61 = vld [vmem:[#allocation4 + $0x66] sm:$0xff]  ;;  %7949 = vst [vmem:[#allocation4 + $0x98] sm:$0xff] %v7893_v19  ;;  %v8108_v34 = vmax.f32 %v7888_v57, %v8054_v49 }
 0x68d   :  { %v8213_v14 = vld [vmem:[#allocation4 + $0x67] sm:$0xff]  ;;  %7947 = vst [vmem:[#allocation4 + $0x88] sm:$0xff] %v7891_v23  ;;  %v11657_v11 = vpop.f32.mrb[76].mxu0  ;;  %v8105_v39 = vmax.f32 %v7885_v53, %v8051_v33  ;;  %v8469_v53 = vld [vmem:[#allocation5 + $0x1e] sm:$0x1] }
 0x68e   :  { %v8320_v41 = vmax.f32 %v8104_v52, %v8266_v30  ;;  %v8267_v26 = vmax.f32 %v8159_v61, %v8213_v14  ;;  %v11937_v45 = vadd.f32 %v11657_v11, %v14597_v8  ;;  %v7619_v9 = vpop.f32.mrb[77].mxu0  ;;  %v12466_v57 = vld [vmem:[%s15138_s5 + $0x60] sm:$0xff]   ;;  %v12467_v11 = vld [vmem:[%s15138_s5 + $0x68] sm:$0xff]  }
 0x68f   :  { %8466 = vrot.lane.b32.xlu0 %v8465_v3, %s12573_s17  ;;  %v11940_v29 = vadd.f32 %v14597_v8, %v7619_v9  ;;  %v11658_v1 = vpop.f32.mrb[78].mxu0  ;;  %11700 = vmatpush3.bf16.msra.mxu1 %v12466_v57 }
 0x690   :  { %8374 = vst [vmem:[#allocation5 + $0x50] sm:$0xff] %v8320_v41  ;;  %v7896_v6 = vmax.f32 %v11937_v45, 0.0  ;;  %v11943_v43 = vadd.f32 %v11658_v1, %v14597_v8  ;;  %v7622_v50 = vpop.f32.mrb[79].mxu0  ;;  %v8321_v20 = vmax.f32 %v8105_v39, %v8267_v26  ;;  %11701 = vmatprep.subr.bf16.mxu1 %v12572_v7 }
 0x691   :  { %v7894_v2 = vmax.f32 %v11940_v29, 0.0  ;;  %v11946_v48 = vadd.f32 %v14597_v8, %v7622_v50  ;;  %v8828_v49 = vld [vmem:[#allocation5 + $0x40] sm:$0x1] }
 0x692   :  { %v8162_v42 = vld [vmem:[#allocation4 + $0x7e] sm:$0xff]  ;;  %7952 = vst [vmem:[#allocation4 + $0xb0] sm:$0xff] %v7896_v6  ;;  %v7897_v22 = vmax.f32 %v11943_v43, 0.0  ;;  %8375 = vst [vmem:[#allocation5 + $0x58] sm:$0xff] %v8321_v20  ;;  %v8692_v46 = vld [vmem:[#allocation5 + $0x38] sm:$0x1] }
 0x693   :  { %v8216_v15 = vld [vmem:[#allocation4 + $0x7f] sm:$0xff]  ;;  %8470 = vrot.lane.b32.xlu0 %v8469_v53, %s12574_s18  ;;  %7950 = vst [vmem:[#allocation4 + $0xa0] sm:$0xff] %v7894_v2  ;;  %v7895_v44 = vmax.f32 %v11946_v48, 0.0  ;;  %v8696_v52 = vld [vmem:[#allocation5 + $0x3a] sm:$0x1]  ;;  %11702 = vmatpush3.bf16.msra.mxu1 %v12467_v11  ;;  %v11993_v53 = vld [vmem:[#allocation4 + $0x128] sm:$0xff] }
 0x694   :  { %v8055_v5 = vld [vmem:[#allocation4 + $0x79] sm:$0xff]  ;;  %v8270_v0 = vmax.f32 %v8162_v42, %v8216_v15  ;;  %v8163_v4 = vld [vmem:[#allocation4 + $0x86] sm:$0xff]  ;;  %7953 = vst [vmem:[#allocation4 + $0xb8] sm:$0xff] %v7897_v22  ;;  %11703 = vmatprep.subr.bf16.mxu1 %v12572_v7 }
 0x695   :  { %v8217_v17 = vld [vmem:[#allocation4 + $0x87] sm:$0xff]  ;;  %7951 = vst [vmem:[#allocation4 + $0xa8] sm:$0xff] %v7895_v44  ;;  %v11661_v59 = vpop.f32.mrb[80].mxu0  ;;  %v8109_v18 = vmax.f32 %v7889_v63, %v8055_v5  ;;  %v8824_v23 = vld [vmem:[#allocation5 + $0x3e] sm:$0x1] }
 0x696   :  { %v8324_v28 = vmax.f32 %v8108_v34, %v8270_v0  ;;  %v8271_v12 = vmax.f32 %v8163_v4, %v8217_v17  ;;  %v11949_v38 = vadd.f32 %v11661_v59, %v14597_v8  ;;  %v7635_v13 = vpop.f32.mrb[81].mxu0  ;;  %v11996_v4 = vld [vmem:[#allocation4 + $0x150] sm:$0xff]  ;;  %v11999_v59 = vld [vmem:[#allocation4 + $0x140] sm:$0xff] }
 0x697   :  { %8474 = vrot.lane.b32.xlu0 %v8473_v60, %s12575_s22  ;;  %v11952_v32 = vadd.f32 %v14597_v8, %v7635_v13  ;;  %v11662_v54 = vpop.f32.mrb[82].mxu0  ;;  %v8832_v50 = vld [vmem:[#allocation5 + $0x54] sm:$0x1]  ;;  %v12002_v13 = vld [vmem:[#allocation4 + $0x158] sm:$0xff] }
 0x698   :  { %8378 = vst [vmem:[#allocation5 + $0x70] sm:$0xff] %v8324_v28  ;;  %v8325_v58 = vmax.f32 %v8109_v18, %v8271_v12  ;;  %v7900_v55 = vmax.f32 %v11949_v38, 0.0  ;;  %v11955_v62 = vadd.f32 %v11662_v54, %v14597_v8  ;;  %v7638_v56 = vpop.f32.mrb[83].mxu0 }
 0x699   :  { %v7898_v63 = vmax.f32 %v11952_v32, 0.0  ;;  %v11958_v40 = vadd.f32 %v14597_v8, %v7638_v56  ;;  %v8960_v60 = vld [vmem:[#allocation5 + $0x58] sm:$0x1]  ;;  %v8964_v38 = vld [vmem:[#allocation5 + $0x5a] sm:$0x1] }
 0x69a   :  { %8379 = vst [vmem:[#allocation5 + $0x78] sm:$0xff] %v8325_v58  ;;  %7956 = vst [vmem:[#allocation4 + $0xd0] sm:$0xff] %v7900_v55  ;;  %v7901_v51 = vmax.f32 %v11955_v62, 0.0 }
 0x69b   :  { %8689 = vrot.lane.b32.xlu0 %v8688_v21, %s12573_s17  ;;  %7954 = vst [vmem:[#allocation4 + $0xc0] sm:$0xff] %v7898_v63  ;;  %v7899_v24 = vmax.f32 %v11958_v40, 0.0 }
 0x69c   :  { %7957 = vst [vmem:[#allocation4 + $0xd8] sm:$0xff] %v7901_v51  ;;  %v12005_v51 = vld [vmem:[#allocation4 + $0x148] sm:$0xff] }
 0x69d   :  { %7955 = vst [vmem:[#allocation4 + $0xc8] sm:$0xff] %v7899_v24  ;;  %v11665_v47 = vpop.f32.mrb[84].mxu0  ;;  %v12468_v24 = vld [vmem:[%s15138_s5 + $0x70] sm:$0xff]  }
 0x69e   :  { %v11961_v10 = vadd.f32 %v11665_v47, %v14597_v8  ;;  %v7651_v25 = vpop.f32.mrb[85].mxu0  ;;  %11704 = vmatpush3.bf16.msra.mxu1 %v12468_v24 }
 0x69f   :  { %8693 = vrot.lane.b32.xlu0 %v8692_v46, %s12574_s18  ;;  %v11964_v16 = vadd.f32 %v14597_v8, %v7651_v25  ;;  %v11666_v35 = vpop.f32.mrb[86].mxu0  ;;  %11705 = vmatprep.subr.bf16.mxu1 %v12572_v7 }
 0x6a0   :  { %v7904_v37 = vmax.f32 %v11961_v10, 0.0  ;;  %v11967_v27 = vadd.f32 %v11666_v35, %v14597_v8  ;;  %v7654_v36 = vpop.f32.mrb[87].mxu0 }
 0x6a1   :  { %v7902_v31 = vmax.f32 %v11964_v16, 0.0  ;;  %v11970_v19 = vadd.f32 %v14597_v8, %v7654_v36 }
 0x6a2   :  { %7960 = vst [vmem:[#allocation4 + $0xf0] sm:$0xff] %v7904_v37  ;;  %v7905_v33 = vmax.f32 %v11967_v27, 0.0 }
 0x6a3   :  { %8697 = vrot.lane.b32.xlu0 %v8696_v52, %s12575_s22  ;;  %7958 = vst [vmem:[#allocation4 + $0xe0] sm:$0xff] %v7902_v31  ;;  %v7903_v30 = vmax.f32 %v11970_v19, 0.0  ;;  %v8968_v31 = vld [vmem:[#allocation5 + $0x5c] sm:$0x1]  ;;  %v12008_v19 = vld [vmem:[#allocation4 + $0x170] sm:$0xff] }
 0x6a4   :  { %7961 = vst [vmem:[#allocation4 + $0xf8] sm:$0xff] %v7905_v33  ;;  %v12011_v33 = vld [vmem:[#allocation4 + $0x160] sm:$0xff] }
 0x6a5   :  { %7959 = vst [vmem:[#allocation4 + $0xe8] sm:$0xff] %v7903_v30  ;;  %v11669_v3 = vpop.f32.mrb[88].mxu0 }
 0x6a6   :  { %v11973_v61 = vadd.f32 %v11669_v3, %v14597_v8  ;;  %v7667_v14 = vpop.f32.mrb[89].mxu0  ;;  %v9096_v3 = vld [vmem:[#allocation5 + $0x72] sm:$0x1] }
 0x6a7   :  { %8825 = vrot.lane.b32.xlu0 %v8824_v23, %s12573_s17  ;;  %v11976_v41 = vadd.f32 %v14597_v8, %v7667_v14  ;;  %v11670_v39 = vpop.f32.mrb[90].mxu0 }
 0x6a8   :  { %v7908_v26 = vmax.f32 %v11973_v61, 0.0  ;;  %v14728_v45 = vadd.f32 %v11670_v39, %v14597_v8  ;;  %v7670_v9 = vpop.f32.mrb[91].mxu0  ;;  %v12014_v61 = vld [vmem:[#allocation4 + $0x178] sm:$0xff] }
 0x6a9   :  { %v7906_v29 = vmax.f32 %v11976_v41, 0.0  ;;  %v11982_v1 = vadd.f32 %v14597_v8, %v7670_v9 }
 0x6aa   :  { %7964 = vst [vmem:[#allocation4 + $0x110] sm:$0xff] %v7908_v26  ;;  %v7909_v6 = vmax.f32 %v14728_v45, 0.0 }
 0x6ab   :  { %8829 = vrot.lane.b32.xlu0 %v8828_v49, %s12574_s18  ;;  %7962 = vst [vmem:[#allocation4 + $0x100] sm:$0xff] %v7906_v29  ;;  %v7907_v43 = vmax.f32 %v11982_v1, 0.0 }
 0x6ac   :  { %7965 = vst [vmem:[#allocation4 + $0x118] sm:$0xff] %v7909_v6 }
 0x6ad   :  { %7963 = vst [vmem:[#allocation4 + $0x108] sm:$0xff] %v7907_v43  ;;  %v11673_v20 = vpop.f32.mrb[92].mxu0 }
 0x6ae   :  { %v11985_v2 = vadd.f32 %v11673_v20, %v14597_v8  ;;  %v7683_v48 = vpop.f32.mrb[93].mxu0 }
 0x6af   :  { %8833 = vrot.lane.b32.xlu0 %v8832_v50, %s12575_s22  ;;  %v14739_v42 = vadd.f32 %v14597_v8, %v7683_v48  ;;  %v11674_v15 = vpop.f32.mrb[94].mxu0 }
 0x6b0   :  { %v7912_v22 = vmax.f32 %v11985_v2, 0.0  ;;  %v14742_v34 = vadd.f32 %v11674_v15, %v14597_v8  ;;  %v7686_v5 = vpop.f32.mrb[95].mxu0  ;;  %v12017_v2 = vld [vmem:[#allocation4 + $0x168] sm:$0xff] }
 0x6b1   :  { %v7910_v0 = vmax.f32 %v14739_v42, 0.0  ;;  %v11994_v44 = vadd.f32 %v11993_v53, %v7686_v5 }
 0x6b2   :  { %7968 = vst [vmem:[#allocation4 + $0x130] sm:$0xff] %v7912_v22  ;;  %v7913_v17 = vmax.f32 %v14742_v34, 0.0  ;;  %v12469_v34 = vld [vmem:[%s15138_s5 + $0x78] sm:$0xff]  }
 0x6b3   :  { %8961 = vrot.lane.b32.xlu0 %v8960_v60, %s12573_s17  ;;  %v8181_v28 = vld [vmem:[#allocation4 + $0x116] sm:$0xff]  ;;  %7966 = vst [vmem:[#allocation4 + $0x120] sm:$0xff] %v7910_v0  ;;  %v7911_v12 = vmax.f32 %v11994_v44, 0.0  ;;  %v9100_v60 = vld [vmem:[#allocation5 + $0x74] sm:$0x1]  ;;  %11706 = vmatpush3.bf16.msra.mxu1 %v12469_v34 }
 0x6b4   :  { %v8235_v18 = vld [vmem:[#allocation4 + $0x117] sm:$0xff]  ;;  %v8072_v8 = vld [vmem:[#allocation4 + $0x101] sm:$0xff]  ;;  %v8073_v57 = vld [vmem:[#allocation4 + $0x109] sm:$0xff]  ;;  %7969 = vst [vmem:[#allocation4 + $0x138] sm:$0xff] %v7913_v17  ;;  %11711 = vmatprep.subr.bf16.mxu1 %v12572_v7 }
 0x6b5   :  { %v8289_v32 = vmax.f32 %v8181_v28, %v8235_v18  ;;  %v8126_v54 = vmax.f32 %v7906_v29, %v8072_v8  ;;  %v8180_v58 = vld [vmem:[#allocation4 + $0x10e] sm:$0xff]  ;;  %7967 = vst [vmem:[#allocation4 + $0x128] sm:$0xff] %v7911_v12  ;;  %v11677_v62 = vpop.f32.mrb[96].mxu0  ;;  %v8127_v56 = vmax.f32 %v7907_v43, %v8073_v57  ;;  %v12023_v18 = vld [vmem:[#allocation4 + $0x180] sm:$0xff]  ;;  %v12026_v8 = vld [vmem:[#allocation4 + $0x198] sm:$0xff] }
 0x6b6   :  { %v8234_v55 = vld [vmem:[#allocation4 + $0x10f] sm:$0xff]  ;;  %v14749_v40 = vadd.f32 %v11996_v4, %v11677_v62  ;;  %v7699_v21 = vpop.f32.mrb[97].mxu0 }
 0x6b7   :  { %v8288_v63 = vmax.f32 %v8180_v58, %v8234_v55  ;;  %8965 = vrot.lane.b32.xlu0 %v8964_v38, %s12574_s18  ;;  %v14755_v46 = vadd.f32 %v11999_v59, %v7699_v21  ;;  %v11678_v47 = vpop.f32.mrb[98].mxu0  ;;  %v8343_v10 = vmax.f32 %v8127_v56, %v8289_v32  ;;  %v12020_v4 = vld [vmem:[#allocation4 + $0x190] sm:$0xff] }
 0x6b8   :  { %v7916_v25 = vmax.f32 %v14749_v40, 0.0  ;;  %v14758_v16 = vadd.f32 %v12002_v13, %v11678_v47  ;;  %v7702_v35 = vpop.f32.mrb[99].mxu0  ;;  %v9104_v13 = vld [vmem:[#allocation5 + $0x76] sm:$0x1]  ;;  %v12029_v47 = vld [vmem:[#allocation4 + $0x188] sm:$0xff] }
 0x6b9   :  { %v8342_v37 = vmax.f32 %v8126_v54, %v8288_v63  ;;  %v7914_v27 = vmax.f32 %v14755_v46, 0.0  ;;  %v12006_v36 = vadd.f32 %v12005_v51, %v7702_v35  ;;  %8397 = vst [vmem:[#allocation5 + $0x108] sm:$0xff] %v8343_v10 }
 0x6ba   :  { %7972 = vst [vmem:[#allocation4 + $0x150] sm:$0xff] %v7916_v25  ;;  %v7917_v52 = vmax.f32 %v14758_v16, 0.0  ;;  %v8075_v30 = vld [vmem:[#allocation4 + $0x119] sm:$0xff] }
 0x6bb   :  { %8969 = vrot.lane.b32.xlu0 %v8968_v31, %s12575_s22  ;;  %8396 = vst [vmem:[#allocation5 + $0x100] sm:$0xff] %v8342_v37  ;;  %7970 = vst [vmem:[#allocation4 + $0x140] sm:$0xff] %v7914_v27  ;;  %v7915_v23 = vmax.f32 %v12006_v36, 0.0  ;;  %v8129_v1 = vmax.f32 %v7909_v6, %v8075_v30 }
 0x6bc   :  { %v8076_v14 = vld [vmem:[#allocation4 + $0x121] sm:$0xff]  ;;  %7973 = vst [vmem:[#allocation4 + $0x158] sm:$0xff] %v7917_v52  ;;  %v8184_v39 = vld [vmem:[#allocation4 + $0x12e] sm:$0xff] }
 0x6bd   :  { %v8183_v11 = vld [vmem:[#allocation4 + $0x126] sm:$0xff]  ;;  %v8130_v41 = vmax.f32 %v7910_v0, %v8076_v14  ;;  %v8238_v9 = vld [vmem:[#allocation4 + $0x12f] sm:$0xff]  ;;  %7971 = vst [vmem:[#allocation4 + $0x148] sm:$0xff] %v7915_v23  ;;  %v11681_v29 = vpop.f32.mrb[100].mxu0 }
 0x6be   :  { %v8237_v26 = vld [vmem:[#allocation4 + $0x127] sm:$0xff]  ;;  %v8292_v43 = vmax.f32 %v8184_v39, %v8238_v9  ;;  %v14770_v50 = vadd.f32 %v12008_v19, %v11681_v29  ;;  %v7715_v20 = vpop.f32.mrb[101].mxu0 }
 0x6bf   :  { %v8291_v49 = vmax.f32 %v8183_v11, %v8237_v26  ;;  %9097 = vrot.lane.b32.xlu0 %v9096_v3, %s12573_s17  ;;  %v12012_v48 = vadd.f32 %v12011_v33, %v7715_v20  ;;  %v11682_v53 = vpop.f32.mrb[102].mxu0  ;;  %v3018_v3 = vld [vmem:[#allocation2 + $0x1f1] sm:$0xff] }
 0x6c0   :  { %v7920_v42 = vmax.f32 %v14770_v50, 0.0  ;;  %v14774_v15 = vadd.f32 %v12014_v61, %v11682_v53  ;;  %v7718_v22 = vpop.f32.mrb[103].mxu0  ;;  %v8346_v0 = vmax.f32 %v8130_v41, %v8292_v43 }
 0x6c1   :  { %v8345_v5 = vmax.f32 %v8129_v1, %v8291_v49  ;;  %v7918_v44 = vmax.f32 %v12012_v48, 0.0  ;;  %v12018_v45 = vadd.f32 %v12017_v2, %v7718_v22  ;;  %v3522_v1 = vld [vmem:[#allocation2 + $0x1f3] sm:$0xff] }
 0x6c2   :  { %v8433_v6 = vld [vmem:[#allocation5 + $0x102] sm:$0x1]  ;;  %v8079_v59 = vld [vmem:[#allocation4 + $0x139] sm:$0xff]  ;;  %7976 = vst [vmem:[#allocation4 + $0x170] sm:$0xff] %v7920_v42  ;;  %v7921_v28 = vmax.f32 %v14774_v15, 0.0  ;;  %8400 = vst [vmem:[#allocation5 + $0x120] sm:$0xff] %v8346_v0 }
 0x6c3   :  { %8434 = vrot.lane.b32.xlu1 %v8433_v6, %s12573_s17  ;;  %9101 = vrot.lane.b32.xlu0 %v9100_v60, %s12574_s18  ;;  %8399 = vst [vmem:[#allocation5 + $0x118] sm:$0xff] %v8345_v5  ;;  %7974 = vst [vmem:[#allocation4 + $0x160] sm:$0xff] %v7918_v44  ;;  %v7919_v12 = vmax.f32 %v12018_v45, 0.0  ;;  %v8437_v38 = vld [vmem:[#allocation5 + $0x104] sm:$0x1]  ;;  %v8133_v54 = vmax.f32 %v7913_v17, %v8079_v59  ;;  %v8082_v17 = vld [vmem:[#allocation4 + $0x151] sm:$0xff] }
 0x6c4   :  { %v8080_v57 = vld [vmem:[#allocation4 + $0x141] sm:$0xff]  ;;  %7977 = vst [vmem:[#allocation4 + $0x178] sm:$0xff] %v7921_v28  ;;  %v8188_v55 = vld [vmem:[#allocation4 + $0x14e] sm:$0xff]  ;;  %v8136_v41 = vmax.f32 %v7916_v25, %v8082_v17 }
 0x6c5   :  { %v8187_v32 = vld [vmem:[#allocation4 + $0x146] sm:$0xff]  ;;  %v8134_v58 = vmax.f32 %v7914_v27, %v8080_v57  ;;  %v8242_v56 = vld [vmem:[#allocation4 + $0x14f] sm:$0xff]  ;;  %7975 = vst [vmem:[#allocation4 + $0x168] sm:$0xff] %v7919_v12  ;;  %v11685_v63 = vpop.f32.mrb[104].mxu0 }
 0x6c6   :  { %v8241_v62 = vld [vmem:[#allocation4 + $0x147] sm:$0xff]  ;;  %v8296_v51 = vmax.f32 %v8188_v55, %v8242_v56  ;;  %v12021_v24 = vadd.f32 %v12020_v4, %v11685_v63  ;;  %v7731_v46 = vpop.f32.mrb[105].mxu0  ;;  %v8441_v23 = vld [vmem:[#allocation5 + $0x106] sm:$0x1] }
 0x6c7   :  { %v8295_v21 = vmax.f32 %v8187_v32, %v8241_v62  ;;  %8438 = vrot.lane.b32.xlu1 %v8437_v38, %s12574_s18  ;;  %9105 = vrot.lane.b32.xlu0 %v9104_v13, %s12575_s22  ;;  %v12024_v10 = vadd.f32 %v12023_v18, %v7731_v46  ;;  %v11686_v35 = vpop.f32.mrb[106].mxu0  ;;  %v8418_v32 = vld [vmem:[#allocation5] sm:$0x1]  ;;  %v3270_v46 = vld [vmem:[#allocation2 + $0x1f2] sm:$0xff] }
 0x6c8   :  { %v7924_v37 = vmax.f32 %v12021_v24, 0.0  ;;  %v12027_v27 = vadd.f32 %v12026_v8, %v11686_v35  ;;  %v7734_v36 = vpop.f32.mrb[107].mxu0  ;;  %v8350_v19 = vmax.f32 %v8134_v58, %v8296_v51 }
 0x6c9   :  { %v8349_v31 = vmax.f32 %v8133_v54, %v8295_v21  ;;  %v7922_v33 = vmax.f32 %v12024_v10, 0.0  ;;  %v12030_v30 = vadd.f32 %v12029_v47, %v7734_v36  ;;  %v8702_v50 = vld [vmem:[#allocation5 + $0x124] sm:$0x1]  ;;  %v3774_v47 = vld [vmem:[#allocation2 + $0x1f4] sm:$0xff]  ;;  %v8432_v36 = vld [vmem:[#allocation5 + $0x100] sm:$0x1] }
 0x6ca   :  { %v8190_v61 = vld [vmem:[#allocation4 + $0x15e] sm:$0xff]  ;;  %7980 = vst [vmem:[#allocation4 + $0x190] sm:$0xff] %v7924_v37  ;;  %v7925_v11 = vmax.f32 %v12027_v27, 0.0  ;;  %8404 = vst [vmem:[#allocation5 + $0x140] sm:$0xff] %v8350_v19  ;;  %v8479_v29 = vld [vmem:[#allocation5 + $0x11c] sm:$0x1] }
 0x6cb   :  { %v8244_v14 = vld [vmem:[#allocation4 + $0x15f] sm:$0xff]  ;;  %8442 = vrot.lane.b32.xlu1 %v8441_v23, %s12575_s22  ;;  %3143 = vrot.lane.b32.xlu0 %v3018_v3, %s12569_s21  ;;  %8403 = vst [vmem:[#allocation5 + $0x138] sm:$0xff] %v8349_v31  ;;  %7978 = vst [vmem:[#allocation4 + $0x180] sm:$0xff] %v7922_v33  ;;  %v7923_v9 = vmax.f32 %v12030_v30, 0.0  ;;  %v8086_v40 = vld [vmem:[#allocation4 + $0x171] sm:$0xff] }
 0x6cc   :  { %v8083_v39 = vld [vmem:[#allocation4 + $0x159] sm:$0xff]  ;;  %v8298_v26 = vmax.f32 %v8190_v61, %v8244_v14  ;;  %v8191_v49 = vld [vmem:[#allocation4 + $0x166] sm:$0xff]  ;;  %7981 = vst [vmem:[#allocation4 + $0x198] sm:$0xff] %v7925_v11  ;;  %v8140_v0 = vmax.f32 %v7920_v42, %v8086_v40  ;;  %v8687_v40 = vld [vmem:[#allocation5 + $0x22] sm:$0x1] }
 0x6cd   :  { %v8245_v43 = vld [vmem:[#allocation4 + $0x167] sm:$0xff]  ;;  %7979 = vst [vmem:[#allocation4 + $0x188] sm:$0xff] %v7923_v9  ;;  %v8137_v2 = vmax.f32 %v7917_v52, %v8083_v39  ;;  %v8483_v53 = vld [vmem:[#allocation5 + $0x11e] sm:$0x1]  ;;  %v8487_v52 = vld [vmem:[#allocation5 + $0x120] sm:$0x1] }
 0x6ce   :  { %v8352_v20 = vmax.f32 %v8136_v41, %v8298_v26  ;;  %v8299_v48 = vmax.f32 %v8191_v49, %v8245_v43  ;;  %v8464_v61 = vld [vmem:[#allocation5 + $0x8] sm:$0x1] }
 0x6cf   :  { %8480 = vrot.lane.b32.xlu1 %v8479_v29, %s12573_s17  ;;  %3647 = vrot.lane.b32.xlu0 %v3522_v1, %s12570_s24  ;;  %v8478_v26 = vld [vmem:[#allocation5 + $0x108] sm:$0x1] }
 0x6d0   :  { %8406 = vst [vmem:[#allocation5 + $0x150] sm:$0xff] %v8352_v20  ;;  %v8353_v25 = vmax.f32 %v8137_v2, %v8299_v48 }
 0x6d1   :  { %v8842_v15 = vld [vmem:[#allocation5 + $0x140] sm:$0x1] }
 0x6d2   :  { %v8194_v22 = vld [vmem:[#allocation4 + $0x17e] sm:$0xff]  ;;  %8407 = vst [vmem:[#allocation5 + $0x158] sm:$0xff] %v8353_v25  ;;  %v8706_v42 = vld [vmem:[#allocation5 + $0x138] sm:$0x1]  ;;  %v8710_v12 = vld [vmem:[#allocation5 + $0x13a] sm:$0x1] }
 0x6d3   :  { %v8248_v5 = vld [vmem:[#allocation4 + $0x17f] sm:$0xff]  ;;  %8484 = vrot.lane.b32.xlu1 %v8483_v53, %s12574_s18  ;;  %v8838_v38 = vld [vmem:[#allocation5 + $0x13e] sm:$0x1] }
 0x6d4   :  { %v8087_v44 = vld [vmem:[#allocation4 + $0x179] sm:$0xff]  ;;  %v8302_v16 = vmax.f32 %v8194_v22, %v8248_v5  ;;  %v8195_v45 = vld [vmem:[#allocation4 + $0x186] sm:$0xff] }
 0x6d5   :  { %v8249_v6 = vld [vmem:[#allocation4 + $0x187] sm:$0xff]  ;;  %v8141_v4 = vmax.f32 %v7921_v28, %v8087_v44 }
 0x6d6   :  { %v8356_v60 = vmax.f32 %v8140_v0, %v8302_v16  ;;  %v8303_v59 = vmax.f32 %v8195_v45, %v8249_v6  ;;  %v8701_v0 = vld [vmem:[#allocation5 + $0x122] sm:$0x1]  ;;  %v12470_v6 = vld [vmem:[%s15138_s5] sm:$0xff]  }
 0x6d7   :  { %8488 = vrot.lane.b32.xlu1 %v8487_v52, %s12575_s22  ;;  %v8846_v28 = vld [vmem:[#allocation5 + $0x154] sm:$0x1] }
 0x6d8   :  { %8410 = vst [vmem:[#allocation5 + $0x170] sm:$0xff] %v8356_v60  ;;  %v8357_v18 = vmax.f32 %v8141_v4, %v8303_v59 }
 0x6d9   :  { %v8974_v13 = vld [vmem:[#allocation5 + $0x158] sm:$0x1]  ;;  %v8978_v57 = vld [vmem:[#allocation5 + $0x15a] sm:$0x1]  ;;  %v8982_v55 = vld [vmem:[#allocation5 + $0x15c] sm:$0x1] }
 0x6da   :  { %8411 = vst [vmem:[#allocation5 + $0x178] sm:$0xff] %v8357_v18 }
 0x6db   :  { %8703 = vrot.lane.b32.xlu1 %v8702_v50, %s12573_s17 }
 0x6df   :  { %8707 = vrot.lane.b32.xlu1 %v8706_v42, %s12574_s18  ;;  %v9110_v21 = vld [vmem:[#allocation5 + $0x172] sm:$0x1]  ;;  %v9114_v51 = vld [vmem:[#allocation5 + $0x174] sm:$0x1]  ;;  %v9118_v24 = vld [vmem:[#allocation5 + $0x176] sm:$0x1] }
 0x6e0   :  { %v12471_v42 = vld [vmem:[%s15138_s5 + $0x8] sm:$0xff]  }
 0x6e3   :  { %8711 = vrot.lane.b32.xlu1 %v8710_v12, %s12575_s22  ;;  %v8823_v12 = vld [vmem:[#allocation5 + $0x3c] sm:$0x1] }
 0x6e7   :  { %8839 = vrot.lane.b32.xlu1 %v8838_v38, %s12573_s17 }
 0x6eb   :  { %8843 = vrot.lane.b32.xlu1 %v8842_v15, %s12574_s18 }
 0x6ef   :  { %8847 = vrot.lane.b32.xlu1 %v8846_v28, %s12575_s22 }
 0x6f3   :  { %8975 = vrot.lane.b32.xlu1 %v8974_v13, %s12573_s17  ;;  %v12472_v13 = vld [vmem:[%s15138_s5 + $0x10] sm:$0xff]  }
 0x6f5   :  { %v8421_v8 = vpop.permute.xlu0 %8420 }
 0x6f6   :  { %v8422_v58 = vadd.f32 %v8421_v8, %v8418_v32 }
 0x6f7   :  { %8979 = vrot.lane.b32.xlu1 %v8978_v57, %s12574_s18  ;;  %v8837_v57 = vld [vmem:[#allocation5 + $0x13c] sm:$0x1] }
 0x6f9   :  { %v8425_v54 = vpop.permute.xlu0 %8424 }
 0x6fa   :  { %v8426_v62 = vadd.f32 %v8425_v54, %v8422_v58 }
 0x6fb   :  { %8983 = vrot.lane.b32.xlu1 %v8982_v55, %s12575_s22 }
 0x6fd   :  { %v8429_v56 = vpop.permute.xlu0 %8428 }
 0x6fe   :  { %v8430_v63 = vadd.f32 %v8429_v56, %v8426_v62  ;;  %v12473_v62 = vld [vmem:[%s15138_s5 + $0x18] sm:$0xff]  }
 0x6ff   :  { %9111 = vrot.lane.b32.xlu1 %v9110_v21, %s12573_s17 }
 0x700   :  { %8431 = vst [vmem:[#allocation6] sm:$0x1] %v8430_v63 }
 0x701   :  { %v8467_v10 = vpop.permute.xlu0 %8466 }
 0x702   :  { %v8468_v11 = vadd.f32 %v8467_v10, %v8464_v61 }
 0x703   :  { %9115 = vrot.lane.b32.xlu1 %v9114_v51, %s12574_s18 }
 0x705   :  { %v8471_v35 = vpop.permute.xlu0 %8470 }
 0x706   :  { %v8472_v39 = vadd.f32 %v8471_v35, %v8468_v11  ;;  %v9095_v11 = vld [vmem:[#allocation5 + $0x70] sm:$0x1] }
 0x707   :  { %9119 = vrot.lane.b32.xlu1 %v9118_v24, %s12575_s22  ;;  %v12474_v24 = vld [vmem:[%s15138_s5 + $0x20] sm:$0xff]  }
 0x709   :  { %v8475_v34 = vpop.permute.xlu0 %8474 }
 0x70a   :  { %v8476_v29 = vadd.f32 %v8475_v34, %v8472_v39  ;;  %v12475_v34 = vld [vmem:[%s15138_s5 + $0x28] sm:$0xff]  }
 0x70b   :  { %3395 = vrot.lane.b32.xlu1 %v3270_v46, %s12568_s20  ;;  %v8959_v46 = vld [vmem:[#allocation5 + $0x56] sm:$0x1] }
 0x70d   :  { %v8690_v17 = vpop.permute.xlu0 %8689 }
 0x70e   :  { %v8691_v53 = vadd.f32 %v8690_v17, %v8687_v40  ;;  %v12479_v40 = vld [vmem:[%s15138_s5 + $0x88] sm:$0xff]  }
 0x70f   :  { %3899 = vrot.lane.b32.xlu1 %v3774_v47, %s12571_s27 }
 0x711   :  { %v8694_v27 = vpop.permute.xlu0 %8693 }
 0x712   :  { %v8695_v5 = vadd.f32 %v8694_v27, %v8691_v53 }
 0x715   :  { %v8698_v30 = vpop.permute.xlu0 %8697 }
 0x716   :  { %v8699_v16 = vadd.f32 %v8698_v30, %v8695_v5 }
 0x719   :  { %v8826_v41 = vpop.permute.xlu0 %8825 }
 0x71a   :  { %v8827_v15 = vadd.f32 %v8826_v41, %v8823_v12 }
 0x71d   :  { %v8830_v20 = vpop.permute.xlu0 %8829 }
 0x71e   :  { %v8831_v8 = vadd.f32 %v8830_v20, %v8827_v15 }
 0x721   :  { %v8834_v22 = vpop.permute.xlu0 %8833 }
 0x722   :  { %v8835_v54 = vadd.f32 %v8834_v22, %v8831_v8 }
 0x725   :  { %v8962_v59 = vpop.permute.xlu0 %8961 }
 0x726   :  { %v8963_v10 = vadd.f32 %v8962_v59, %v8959_v46 }
 0x729   :  { %v8966_v28 = vpop.permute.xlu0 %8965 }
 0x72a   :  { %v8967_v17 = vadd.f32 %v8966_v28, %v8963_v10  ;;  %v12483_v28 = vld [vmem:[%s15138_s5 + $0xa8] sm:$0xff]   ;;  %v12497_v10 = vld [vmem:[%s15138_s5 + $0x110] sm:$0xff]  }
 0x72d   :  { %v8970_v63 = vpop.permute.xlu0 %8969 }
 0x731   :  { %v9098_v35 = vpop.permute.xlu0 %9097 }
 0x732   :  { %v9099_v39 = vadd.f32 %v9098_v35, %v9095_v11  ;;  %v12498_v35 = vld [vmem:[%s15138_s5 + $0x118] sm:$0xff]   ;;  %v12511_v11 = vld [vmem:[%s15138_s5 + $0x180] sm:$0xff]  }
 0x735   :  { %v8435_v37 = vpop.permute.xlu1 %8434 }
 0x736   :  { %v8436_v19 = vadd.f32 %v8435_v37, %v8432_v36  ;;  %v8973_v37 = vld [vmem:[#allocation5 + $0x156] sm:$0x1]  ;;  %v8971_v36 = vadd.f32 %v8970_v63, %v8967_v17  ;;  %v12492_v63 = vld [vmem:[%s15138_s5 + $0xe8] sm:$0xff]  }
 0x737   :  { %v12500_v17 = vld [vmem:[%s15138_s5 + $0x128] sm:$0xff]  }
 0x739   :  { %v8439_v31 = vpop.permute.xlu1 %8438 }
 0x73a   :  { %v8440_v33 = vadd.f32 %v8439_v31, %v8436_v19 }
 0x73d   :  { %v8443_v23 = vpop.permute.xlu1 %8442 }
 0x73e   :  { %v8444_v3 = vadd.f32 %v8443_v23, %v8440_v33  ;;  %v12476_v33 = vld [vmem:[%s15138_s5 + $0x30] sm:$0xff]   ;;  %v9102_v23 = vpop.permute.xlu0 %9101 }
 0x740   :  { %8445 = vst [vmem:[#allocation6 + $0x1] sm:$0x1] %v8444_v3 }
 0x741   :  { %v8481_v14 = vpop.permute.xlu1 %8480 }
 0x742   :  { %v8482_v1 = vadd.f32 %v8481_v14, %v8478_v26  ;;  %v12477_v14 = vld [vmem:[%s15138_s5 + $0x38] sm:$0xff]   ;;  %v9106_v26 = vpop.permute.xlu0 %9105 }
 0x745   :  { %v8485_v9 = vpop.permute.xlu1 %8484 }
 0x746   :  { %v8486_v43 = vadd.f32 %v8485_v9, %v8482_v1  ;;  %v12478_v9 = vld [vmem:[%s15138_s5 + $0x80] sm:$0xff]  }
 0x747   :  { %v14821_v49 = vld [vmem:[#allocation6] sm:$0x3] }
 0x748   :  { %8477 = vst [vmem:[#allocation6] sm:$0x1] %v8476_v29  ;;  %v9103_v29 = vadd.f32 %v9102_v23, %v9099_v39  ;;  %v8447_v1 = vpack.c.bf16 %v14821_v49, %v14821_v49  ;;  %v3144_v49 = vpop.permute.xlu0 %3143  ;;  %v12507_v23 = vld [vmem:[%s15138_s5 + $0x160] sm:$0xff]   ;;  %v12512_v39 = vld [vmem:[%s15138_s5 + $0x188] sm:$0xff]  }
 0x749   :  { %v8489_v2 = vpop.permute.xlu1 %8488 }
 0x74a   :  { %v8490_v48 = vadd.f32 %v8489_v2, %v8486_v43  ;;  %v9109_v43 = vld [vmem:[#allocation5 + $0x170] sm:$0x1]  ;;  %v9107_v2 = vadd.f32 %v9106_v26, %v9103_v29  ;;  %v12513_v26 = vld [vmem:[%s15138_s5 + $0x190] sm:$0xff]   ;;  %v12515_v29 = vld [vmem:[%s15138_s5 + $0x1a0] sm:$0xff]  }
 0x74c   :  { %8491 = vst [vmem:[#allocation6 + $0x1] sm:$0x1] %v8490_v48 }
 0x74d   :  { %v8704_v25 = vpop.permute.xlu1 %8703 }
 0x74e   :  { %v8705_v52 = vadd.f32 %v8704_v25, %v8701_v0  ;;  %v2955_v0 = vld [vmem:[#allocation2 + $0x1f0] sm:$0xff] }
 0x751   :  { %v8708_v44 = vpop.permute.xlu1 %8707 }
 0x752   :  { %v8709_v60 = vadd.f32 %v8708_v44, %v8705_v52  ;;  %v12480_v44 = vld [vmem:[%s15138_s5 + $0x90] sm:$0xff]  }
 0x753   :  { %v8492_v45 = vld [vmem:[#allocation6] sm:$0x3] }
 0x754   :  { %8700 = vst [vmem:[#allocation6] sm:$0x1] %v8699_v16  ;;  %v8493_v4 = vpack.c.bf16 %v8492_v45, %v8492_v45  ;;  %v3207_v16 = vadd.f32 %v3144_v49, %v2955_v0 }
 0x755   :  { %v8712_v18 = vpop.permute.xlu1 %8711 }
 0x756   :  { %v8713_v50 = vadd.f32 %v8712_v18, %v8709_v60  ;;  %11708 = vmatmul.mubr.bf16.vlgmr.msra.gmra.mrb[200].mxu1 %v8493_v4  ;;  %v12481_v60 = vld [vmem:[%s15138_s5 + $0x98] sm:$0xff]  }
 0x757   :  { %11712 = vmatpush3.bf16.msra.mxu1 %v12470_v6  ;;  %11727 = vmatprep.mubr.msk.bf16.mxu1 %vm12576_vm5, %v12572_v7  ;;  %v3648_v6 = vpop.permute.xlu0 %3647 }
 0x758   :  { %8714 = vst [vmem:[#allocation6 + $0x1] sm:$0x1] %v8713_v50  ;;  %11713 = vmatprep.subr.bf16.mxu1 %v12572_v7  ;;  %v9231_v50 = vld [vmem:[#allocation5 + $0x78] sm:$0x1] }
 0x759   :  { %v8840_v38 = vpop.permute.xlu1 %8839 }
 0x75a   :  { %v8841_v58 = vadd.f32 %v8840_v38, %v8837_v57  ;;  %v9233_v38 = vld [vmem:[#allocation5 + $0x178] sm:$0x1]  ;;  %v12486_v57 = vld [vmem:[%s15138_s5 + $0xb8] sm:$0xff]  }
 0x75b   :  { %11714 = vmatpush3.bf16.msra.mxu1 %v12471_v42  ;;  %v12482_v42 = vld [vmem:[%s15138_s5 + $0xa0] sm:$0xff]  }
 0x75c   :  { %11715 = vmatprep.subr.bf16.mxu1 %v12572_v7 }
 0x75d   :  { %v8844_v32 = vpop.permute.xlu1 %8843 }
 0x75e   :  { %v8845_v56 = vadd.f32 %v8844_v32, %v8841_v58  ;;  %v12487_v32 = vld [vmem:[%s15138_s5 + $0xc0] sm:$0xff]   ;;  %v12488_v58 = vld [vmem:[%s15138_s5 + $0xc8] sm:$0xff]  }
 0x75f   :  { %11716 = vmatpush3.bf16.msra.mxu1 %v12472_v13  ;;  %v14836_v55 = vld [vmem:[#allocation6] sm:$0x3]  ;;  %v12484_v13 = vld [vmem:[%s15138_s5 + $0xb0] sm:$0xff]  }
 0x760   :  { %8836 = vst [vmem:[#allocation6] sm:$0x1] %v8835_v54  ;;  %11717 = vmatprep.subr.bf16.mxu1 %v12572_v7  ;;  %v8716_v54 = vpack.c.bf16 %v14836_v55, %v14836_v55  ;;  %v12490_v55 = vld [vmem:[%s15138_s5 + $0xd8] sm:$0xff]  }
 0x761   :  { %v8848_v21 = vpop.permute.xlu1 %8847 }
 0x762   :  { %v8849_v51 = vadd.f32 %v8848_v21, %v8845_v56  ;;  %v12491_v56 = vld [vmem:[%s15138_s5 + $0xe0] sm:$0xff]   ;;  %v12493_v21 = vld [vmem:[%s15138_s5 + $0xf0] sm:$0xff]  }
 0x763   :  { %11718 = vmatpush3.bf16.msra.mxu1 %v12473_v62  ;;  %v12489_v62 = vld [vmem:[%s15138_s5 + $0xd0] sm:$0xff]  }
 0x764   :  { %8850 = vst [vmem:[#allocation6 + $0x1] sm:$0x1] %v8849_v51  ;;  %11719 = vmatprep.subr.bf16.mxu1 %v12572_v7  ;;  %v12494_v51 = vld [vmem:[%s15138_s5 + $0xf8] sm:$0xff]  }
 0x765   :  { %v8976_v47 = vpop.permute.xlu1 %8975 }
 0x766   :  { %v8977_v31 = vadd.f32 %v8976_v47, %v8973_v37  ;;  %v12496_v47 = vld [vmem:[%s15138_s5 + $0x108] sm:$0xff]   ;;  %v12501_v37 = vld [vmem:[%s15138_s5 + $0x130] sm:$0xff]  }
 0x767   :  { %11720 = vmatpush3.bf16.msra.mxu1 %v12474_v24  ;;  %v12495_v24 = vld [vmem:[%s15138_s5 + $0x100] sm:$0xff]  }
 0x768   :  { %11721 = vmatprep.subr.bf16.mxu1 %v12572_v7 }
 0x769   :  { %v8980_v27 = vpop.permute.xlu1 %8979 }
 0x76a   :  { %v8981_v30 = vadd.f32 %v8980_v27, %v8977_v31  ;;  %v12502_v27 = vld [vmem:[%s15138_s5 + $0x138] sm:$0xff]  }
 0x76b   :  { %11722 = vmatpush3.bf16.msra.mxu1 %v12475_v34  ;;  %v14850_v19 = vld [vmem:[#allocation6] sm:$0x3]  ;;  %v12499_v34 = vld [vmem:[%s15138_s5 + $0x120] sm:$0xff]  }
 0x76c   :  { %8972 = vst [vmem:[#allocation6] sm:$0x1] %v8971_v36  ;;  %11723 = vmatprep.subr.bf16.mxu1 %v12572_v7  ;;  %v8852_v46 = vpack.c.bf16 %v14850_v19, %v14850_v19  ;;  %v12503_v36 = vld [vmem:[%s15138_s5 + $0x140] sm:$0xff]   ;;  %v12504_v19 = vld [vmem:[%s15138_s5 + $0x148] sm:$0xff]  }
 0x76d   :  { %v8984_v3 = vpop.permute.xlu1 %8983 }
 0x76e   :  { %v8985_v61 = vadd.f32 %v8984_v3, %v8981_v30  ;;  %v12506_v30 = vld [vmem:[%s15138_s5 + $0x158] sm:$0xff]   ;;  %v12508_v3 = vld [vmem:[%s15138_s5 + $0x168] sm:$0xff]  }
 0x76f   :  { %11724 = vmatpush3.bf16.msra.mxu1 %v12476_v33  ;;  %v12505_v33 = vld [vmem:[%s15138_s5 + $0x150] sm:$0xff]  }
 0x770   :  { %8986 = vst [vmem:[#allocation6 + $0x1] sm:$0x1] %v8985_v61  ;;  %11725 = vmatprep.subr.bf16.mxu1 %v12572_v7  ;;  %v12509_v61 = vld [vmem:[%s15138_s5 + $0x170] sm:$0xff]  }
 0x771   :  { %v9112_v41 = vpop.permute.xlu1 %9111 }
 0x772   :  { %v9113_v48 = vadd.f32 %v9112_v41, %v9109_v43  ;;  %v12517_v43 = vld [vmem:[%s15138_s5 + $0x1b0] sm:$0xff]  }
 0x773   :  { %11726 = vmatpush3.bf16.msra.mxu1 %v12477_v14  ;;  %v12510_v14 = vld [vmem:[%s15138_s5 + $0x178] sm:$0xff]  }
 0x774   :  { %11731 = vmatprep.subr.bf16.mxu1 %v12572_v7 }
 0x775   :  { %v9116_v20 = vpop.permute.xlu1 %9115 }
 0x776   :  { %11728 = vmatmul.mubr.bf16.vlgmr.msra.gmra.mrb[204].mxu1 %v8447_v1  ;;  %v9117_v53 = vadd.f32 %v9116_v20, %v9113_v48  ;;  %v12516_v1 = vld [vmem:[%s15138_s5 + $0x1a8] sm:$0xff]   ;;  %v12518_v20 = vld [vmem:[%s15138_s5 + $0x1b8] sm:$0xff]  }
 0x777   :  { %11732 = vmatpush3.bf16.msra.mxu1 %v12478_v9  ;;  %11747 = vmatprep.mubr.msk.bf16.mxu1 %vm12576_vm5, %v12572_v7  ;;  %v14871_v25 = vld [vmem:[#allocation6] sm:$0x3]  ;;  %v12514_v9 = vld [vmem:[%s15138_s5 + $0x198] sm:$0xff]  }
 0x778   :  { %11733 = vmatprep.subr.bf16.mxu1 %v12572_v7  ;;  %9108 = vst [vmem:[#allocation6] sm:$0x1] %v9107_v2  ;;  %v8988_v31 = vpack.c.bf16 %v14871_v25, %v14871_v25 }
 0x779   :  { %v9120_v22 = vpop.permute.xlu1 %9119 }
 0x77a   :  { %v9121_v5 = vadd.f32 %v9120_v22, %v9117_v53 }
 0x77b   :  { %11734 = vmatpush3.bf16.msra.mxu1 %v12479_v40 }
 0x77c   :  { %11735 = vmatprep.subr.bf16.mxu1 %v12572_v7  ;;  %9122 = vst [vmem:[#allocation6 + $0x1] sm:$0x1] %v9121_v5 }
 0x77d   :  { %v3396_v52 = vpop.permute.xlu1 %3395 }
 0x77e   :  { %v3459_v45 = vadd.f32 %v3396_v52, %v3207_v16  ;;  %v12519_v52 = vld [vmem:[%s15140_s7] sm:$0xff]  }
 0x77f   :  { %11736 = vmatpush3.bf16.msra.mxu1 %v12480_v44 }
 0x780   :  { %v3711_v4 = vadd.f32 %v3648_v6, %v3459_v45  ;;  %11737 = vmatprep.subr.bf16.mxu1 %v12572_v7  ;;  %v12520_v45 = vld [vmem:[%s15140_s7 + $0x8] sm:$0xff]   ;;  %v12521_v6 = vld [vmem:[%s15140_s7 + $0x10] sm:$0xff]  }
 0x781   :  { %v3900_v59 = vpop.permute.xlu1 %3899 }
 0x782   :  { %v3963_v18 = vadd.f32 %v3900_v59, %v3711_v4  ;;  %v12523_v4 = vld [vmem:[%s15140_s7 + $0x20] sm:$0xff]   ;;  %v12524_v59 = vld [vmem:[%s15140_s7 + $0x28] sm:$0xff]  }
 0x783   :  { %11738 = vmatpush3.bf16.msra.mxu1 %v12481_v60  ;;  %v14885_v12 = vld [vmem:[#allocation6] sm:$0x3]  ;;  %v12522_v60 = vld [vmem:[%s15140_s7 + $0x18] sm:$0xff]  }
 0x784   :  { %v10476_v15 = vpack.c.bf16 %v3963_v18, %v3963_v18  ;;  %11739 = vmatprep.subr.bf16.mxu1 %v12572_v7  ;;  %9232 = vst [vmem:[#allocation6] sm:$0x1] %v9231_v50  ;;  %9234 = vst [vmem:[#allocation6 + $0x1] sm:$0x1] %v9233_v38  ;;  %v9124_v41 = vpack.c.bf16 %v14885_v12, %v14885_v12  ;;  %v12032_v18 = vld [vmem:[#allocation4 + $0x1b0] sm:$0xff]  ;;  %v12035_v50 = vld [vmem:[#allocation4 + $0x1a0] sm:$0xff] }
 0x785   :  { %v12038_v12 = vld [vmem:[#allocation4 + $0x1b8] sm:$0xff] }
 0x786   :  { %4279 = vst [vmem:[#allocation3 + $0xf8] sm:$0xf] %v10476_v15 }
 0x787   :  { %11740 = vmatpush3.bf16.msra.mxu1 %v12482_v42 }
 0x788   :  { %11741 = vmatprep.subr.bf16.mxu1 %v12572_v7 }
 0x78b   :  { %11742 = vmatpush3.bf16.msra.mxu1 %v12483_v28  ;;  %v9235_v2 = vld [vmem:[#allocation6] sm:$0x3]  ;;  %v12041_v28 = vld [vmem:[#allocation4 + $0x1a8] sm:$0xff] }
 0x78c   :  { %11743 = vmatprep.subr.bf16.mxu1 %v12572_v7  ;;  %v9236_v48 = vpack.c.bf16 %v9235_v2, %v9235_v2  ;;  %v12527_v2 = vld [vmem:[%s15142_s9] sm:$0xff]  }
 0x78d   :  { %v12485_v8 = vld [vmem:[#allocation3 + $0xf4] sm:$0xff]  }
 0x78e   :  { %11688 = vmatmul.mubr.bf16.gmra.mrb[108].mxu0 %v12485_v8 }
 0x78f   :  { %11744 = vmatpush3.bf16.msra.mxu1 %v12484_v13 }
 0x790   :  { %11745 = vmatprep.subr.bf16.mxu1 %v12572_v7 }
 0x793   :  { %11746 = vmatpush3.bf16.msra.mxu1 %v12486_v57 }
 0x794   :  { %11751 = vmatprep.subr.bf16.mxu1 %v12572_v7 }
 0x796   :  { %11748 = vmatmul.mubr.bf16.vlgmr.msra.gmra.mrb[208].mxu1 %v8716_v54 }
 0x797   :  { %11752 = vmatpush3.bf16.msra.mxu1 %v12487_v32  ;;  %11767 = vmatprep.mubr.msk.bf16.mxu1 %vm12576_vm5, %v12572_v7 }
 0x798   :  { %11753 = vmatprep.subr.bf16.mxu1 %v12572_v7 }
 0x79b   :  { %11754 = vmatpush3.bf16.msra.mxu1 %v12488_v58 }
 0x79c   :  { %11755 = vmatprep.subr.bf16.mxu1 %v12572_v7 }
 0x79f   :  { %11756 = vmatpush3.bf16.msra.mxu1 %v12489_v62 }
 0x7a0   :  { %11757 = vmatprep.subr.bf16.mxu1 %v12572_v7 }
 0x7a3   :  { %11758 = vmatpush3.bf16.msra.mxu1 %v12490_v55 }
 0x7a4   :  { %11759 = vmatprep.subr.bf16.mxu1 %v12572_v7 }
 0x7a7   :  { %11760 = vmatpush3.bf16.msra.mxu1 %v12491_v56 }
 0x7a8   :  { %11761 = vmatprep.subr.bf16.mxu1 %v12572_v7 }
 0x7ab   :  { %11762 = vmatpush3.bf16.msra.mxu1 %v12492_v63 }
 0x7ac   :  { %11763 = vmatprep.subr.bf16.mxu1 %v12572_v7 }
 0x7af   :  { %11764 = vmatpush3.bf16.msra.mxu1 %v12493_v21 }
 0x7b0   :  { %11765 = vmatprep.subr.bf16.mxu1 %v12572_v7 }
 0x7b3   :  { %11766 = vmatpush3.bf16.msra.mxu1 %v12494_v51 }
 0x7b4   :  { %11771 = vmatprep.subr.bf16.mxu1 %v12572_v7 }
 0x7b6   :  { %11768 = vmatmul.mubr.bf16.vlgmr.msra.gmra.mrb[212].mxu1 %v8852_v46 }
 0x7b7   :  { %11772 = vmatpush3.bf16.msra.mxu1 %v12495_v24  ;;  %11787 = vmatprep.mubr.msk.bf16.mxu1 %vm12576_vm5, %v12572_v7 }
 0x7b8   :  { %11773 = vmatprep.subr.bf16.mxu1 %v12572_v7 }
 0x7bb   :  { %11774 = vmatpush3.bf16.msra.mxu1 %v12496_v47  ;;  %v12525_v47 = vld [vmem:[%s15140_s7 + $0x30] sm:$0xff]  }
 0x7bc   :  { %11775 = vmatprep.subr.bf16.mxu1 %v12572_v7 }
 0x7bf   :  { %11776 = vmatpush3.bf16.msra.mxu1 %v12497_v10  ;;  %v12526_v10 = vld [vmem:[%s15140_s7 + $0x38] sm:$0xff]  }
 0x7c0   :  { %11777 = vmatprep.subr.bf16.mxu1 %v12572_v7 }
 0x7c3   :  { %11778 = vmatpush3.bf16.msra.mxu1 %v12498_v35 }
 0x7c4   :  { %11779 = vmatprep.subr.bf16.mxu1 %v12572_v7 }
 0x7c7   :  { %11780 = vmatpush3.bf16.msra.mxu1 %v12499_v34 }
 0x7c8   :  { %11781 = vmatprep.subr.bf16.mxu1 %v12572_v7 }
 0x7cb   :  { %11782 = vmatpush3.bf16.msra.mxu1 %v12500_v17 }
 0x7cc   :  { %11783 = vmatprep.subr.bf16.mxu1 %v12572_v7 }
 0x7cf   :  { %11784 = vmatpush3.bf16.msra.mxu1 %v12501_v37 }
 0x7d0   :  { %11785 = vmatprep.subr.bf16.mxu1 %v12572_v7 }
 0x7d3   :  { %11786 = vmatpush3.bf16.msra.mxu1 %v12502_v27 }
 0x7d4   :  { %11791 = vmatprep.subr.bf16.mxu1 %v12572_v7 }
 0x7d6   :  { %11788 = vmatmul.mubr.bf16.vlgmr.msra.gmra.mrb[216].mxu1 %v8988_v31 }
 0x7d7   :  { %11792 = vmatpush3.bf16.msra.mxu1 %v12503_v36  ;;  %11807 = vmatprep.mubr.msk.bf16.mxu1 %vm12576_vm5, %v12572_v7 }
 0x7d8   :  { %11793 = vmatprep.subr.bf16.mxu1 %v12572_v7 }
 0x7db   :  { %11794 = vmatpush3.bf16.msra.mxu1 %v12504_v19 }
 0x7dc   :  { %11795 = vmatprep.subr.bf16.mxu1 %v12572_v7 }
 0x7df   :  { %11796 = vmatpush3.bf16.msra.mxu1 %v12505_v33 }
 0x7e0   :  { %11797 = vmatprep.subr.bf16.mxu1 %v12572_v7 }
 0x7e3   :  { %11798 = vmatpush3.bf16.msra.mxu1 %v12506_v30 }
 0x7e4   :  { %11799 = vmatprep.subr.bf16.mxu1 %v12572_v7 }
 0x7e7   :  { %11800 = vmatpush3.bf16.msra.mxu1 %v12507_v23 }
 0x7e8   :  { %11801 = vmatprep.subr.bf16.mxu1 %v12572_v7 }
 0x7eb   :  { %11802 = vmatpush3.bf16.msra.mxu1 %v12508_v3 }
 0x7ec   :  { %11803 = vmatprep.subr.bf16.mxu1 %v12572_v7 }
 0x7ef   :  { %11804 = vmatpush3.bf16.msra.mxu1 %v12509_v61 }
 0x7f0   :  { %11805 = vmatprep.subr.bf16.mxu1 %v12572_v7 }
 0x7f3   :  { %11806 = vmatpush3.bf16.msra.mxu1 %v12510_v14 }
 0x7f4   :  { %11811 = vmatprep.subr.bf16.mxu1 %v12572_v7 }
 0x7f6   :  { %11808 = vmatmul.mubr.bf16.vlgmr.msra.gmra.mrb[220].mxu1 %v9124_v41 }
 0x7f7   :  { %11812 = vmatpush3.bf16.msra.mxu1 %v12511_v11  ;;  %11827 = vmatprep.mubr.msk.bf16.mxu1 %vm12576_vm5, %v12572_v7 }
 0x7f8   :  { %11813 = vmatprep.subr.bf16.mxu1 %v12572_v7 }
 0x7fb   :  { %11814 = vmatpush3.bf16.msra.mxu1 %v12512_v39  ;;  %v10395_v39 = vld [vmem:[%s15139_s6] ss:$0 sm:$0xff] }
 0x7fc   :  { %11815 = vmatprep.subr.bf16.mxu1 %v12572_v7 }
 0x7ff   :  { %11816 = vmatpush3.bf16.msra.mxu1 %v12513_v26 }
 0x800   :  { %11817 = vmatprep.subr.bf16.mxu1 %v12572_v7 }
 0x803   :  { %11818 = vmatpush3.bf16.msra.mxu1 %v12514_v9 }
 0x804   :  { %11819 = vmatprep.subr.bf16.mxu1 %v12572_v7 }
 0x807   :  { %11820 = vmatpush3.bf16.msra.mxu1 %v12515_v29 }
 0x808   :  { %11821 = vmatprep.subr.bf16.mxu1 %v12572_v7 }
 0x80b   :  { %11822 = vmatpush3.bf16.msra.mxu1 %v12516_v1 }
 0x80c   :  { %11823 = vmatprep.subr.bf16.mxu1 %v12572_v7 }
 0x80f   :  { %11824 = vmatpush3.bf16.msra.mxu1 %v12517_v43 }
 0x810   :  { %11825 = vmatprep.subr.bf16.mxu1 %v12572_v7 }
 0x813   :  { %11826 = vmatpush3.bf16.msra.mxu1 %v12518_v20 }
 0x814   :  { %11831 = vmatprep.subr.bf16.mxu1 %v12572_v7 }
 0x816   :  { %11828 = vmatmul.mubr.bf16.vlgmr.msra.gmra.mrb[224].mxu1 %v9236_v48 }
 0x817   :  { %11847 = vmatprep.mubr.msk.bf16.mxu1 %vm12576_vm5, %v12572_v7  ;;  %11832 = vmatpush3.bf16.msra.mxu1 %v12519_v52 }
 0x818   :  { %11833 = vmatprep.subr.bf16.mxu1 %v12572_v7 }
 0x81b   :  { %11834 = vmatpush3.bf16.msra.mxu1 %v12520_v45 }
 0x81c   :  { %11835 = vmatprep.subr.bf16.mxu1 %v12572_v7 }
 0x81f   :  { %11836 = vmatpush3.bf16.msra.mxu1 %v12521_v6 }
 0x820   :  { %11837 = vmatprep.subr.bf16.mxu1 %v12572_v7 }
 0x823   :  { %11838 = vmatpush3.bf16.msra.mxu1 %v12522_v60 }
 0x824   :  { %11839 = vmatprep.subr.bf16.mxu1 %v12572_v7 }
 0x827   :  { %11840 = vmatpush3.bf16.msra.mxu1 %v12523_v4 }
 0x828   :  { %11841 = vmatprep.subr.bf16.mxu1 %v12572_v7 }
 0x829   :  { %v8593_v40 = vpop.f32.mrb[200].mxu1 }
 0x82a   :  { %v11709_v25 = vpop.f32.mrb[201].mxu1 }
 0x82b   :  { %v8596_v53 = vpop.f32.mrb[202].mxu1  ;;  %11842 = vmatpush3.bf16.msra.mxu1 %v12524_v59  ;;  %v12529_v25 = vld [vmem:[%s15142_s9 + $0x10] sm:$0xff]  }
 0x82c   :  { %v11710_v49 = vpop.f32.mrb[203].mxu1  ;;  %11843 = vmatprep.subr.bf16.mxu1 %v12572_v7  ;;  %v12530_v53 = vld [vmem:[%s15142_s9 + $0x18] sm:$0xff]  }
 0x82d   :  { %v12531_v49 = vld [vmem:[%s15142_s9 + $0x20] sm:$0xff]  }
 0x82f   :  { %11844 = vmatpush3.bf16.msra.mxu1 %v12525_v47 }
 0x830   :  { %11845 = vmatprep.subr.bf16.mxu1 %v12572_v7 }
 0x833   :  { %11846 = vmatpush3.bf16.msra.mxu1 %v12526_v10 }
 0x834   :  { %11851 = vmatprep.subr.bf16.mxu1 %v12572_v7 }
 0x849   :  { %v8681_v22 = vpop.f32.mrb[204].mxu1 }
 0x84a   :  { %v8682_v5 = vadd.f32 %v8681_v22, %v8593_v40  ;;  %v11729_v0 = vpop.f32.mrb[205].mxu1  ;;  %v12528_v40 = vld [vmem:[%s15142_s9 + $0x8] sm:$0xff]  }
 0x84b   :  { %v8684_v44 = vpop.f32.mrb[206].mxu1  ;;  %v12532_v22 = vld [vmem:[%s15142_s9 + $0x28] sm:$0xff]   ;;  %v12534_v0 = vld [vmem:[%s15142_s9 + $0x38] sm:$0xff]  }
 0x84c   :  { %v11730_v16 = vpop.f32.mrb[207].mxu1  ;;  %v10396_v44 = vld [vmem:[%s15141_s8] ss:$0 sm:$0xff]  ;;  %s12577_s8 = smov [#allocation7]  }
 0x861   :  { %v11689_v42 = vpop.f32.mrb[108].mxu0 }
 0x862   :  { %v12033_v38 = vadd.f32 %v12032_v18, %v11689_v42  ;;  %v7747_v15 = vpop.f32.mrb[109].mxu0  ;;  %v9577_v18 = vlaneseq  ;;  %v10405_v42 = vld [vmem:[%s15143_s10] ss:$0 sm:$0xff] }
 0x863   :  { %v12036_v13 = vadd.f32 %v12035_v50, %v7747_v15  ;;  %v11690_v8 = vpop.f32.mrb[110].mxu0 }
 0x864   :  { %v7928_v57 = vmax.f32 %v12033_v38, 0.0  ;;  %v12039_v32 = vadd.f32 %v12038_v12, %v11690_v8  ;;  %v7750_v54 = vpop.f32.mrb[111].mxu0  ;;  %v9578_v50 = vand.u32 127, %v9577_v18 }
 0x865   :  { %v7926_v58 = vmax.f32 %v12036_v13, 0.0  ;;  %v12042_v62 = vadd.f32 %v12041_v28, %v7750_v54 }
 0x866   :  { %7984 = vst [vmem:[#allocation4 + $0x1b0] sm:$0xff] %v7928_v57  ;;  %v7929_v55 = vmax.f32 %v12039_v32, 0.0  ;;  %vm9579_vm6 = vcmp.lt.s32.totalorder %v9578_v50, 10 }
 0x867   :  { %7982 = vst [vmem:[#allocation4 + $0x1a0] sm:$0xff] %v7926_v58  ;;  %v7927_v56 = vmax.f32 %v12042_v62, 0.0 }
 0x868   :  { %7985 = vst [vmem:[#allocation4 + $0x1b8] sm:$0xff] %v7929_v55 }
 0x869   :  { %v8816_v63 = vpop.f32.mrb[208].mxu1  ;;  %7983 = vst [vmem:[#allocation4 + $0x1a8] sm:$0xff] %v7927_v56 }
 0x86a   :  { %v8822_v21 = vadd.f32 %v8816_v63, %v8682_v5  ;;  %v11749_v51 = vpop.f32.mrb[209].mxu1  ;;  %v12533_v5 = vld [vmem:[%s15142_s9 + $0x30] sm:$0xff]   ;;  %s9601_s9 = sshll.u32 %s12577_s8, 4  ;;  %s9602_s9 = int_to_ptr.vmem [resolvable:$true] %s9601_s9 }
 0x86b   :  { %v8819_v24 = vpop.f32.mrb[210].mxu1  ;;  %s12543_s10 = scalar_lea.vmem %s9602_s9, 32  ;;  %p12548_p1 = scmp.lt.s32.totalorder %s9602_s9, %s9602_s9 }
 0x86c   :  { %v11750_v46 = vpop.f32.mrb[211].mxu1  ;;  %p12544_p0 = scmp.ne.s32.totalorder %s9602_s9, %s12543_s10  ;;  %p12549_p2 = scmp.lt.s32.totalorder %s12543_s10, %s12543_s10 }
 0x86e   :  { %p12550_p3 = por %p12549_p2, %p12548_p1 }
 0x870   :  { %p12551_p4 = pnand %p12550_p3, %p12544_p0 }
 0x889   :  { %v8952_v35 = vpop.f32.mrb[212].mxu1 }
 0x88a   :  { %v8958_v34 = vadd.f32 %v8952_v35, %v8822_v21  ;;  %v11769_v17 = vpop.f32.mrb[213].mxu1 }
 0x88b   :  { %v8955_v37 = vpop.f32.mrb[214].mxu1 }
 0x88c   :  { %v11770_v27 = vpop.f32.mrb[215].mxu1 }
 0x8a9   :  { %v9088_v36 = vpop.f32.mrb[216].mxu1 }
 0x8aa   :  { %v9094_v31 = vadd.f32 %v9088_v36, %v8958_v34  ;;  %v11789_v19 = vpop.f32.mrb[217].mxu1 }
 0x8ab   :  { %v9091_v33 = vpop.f32.mrb[218].mxu1 }
 0x8ac   :  { %v11790_v30 = vpop.f32.mrb[219].mxu1 }
 0x8c9   :  { %v9224_v23 = vpop.f32.mrb[220].mxu1 }
 0x8ca   :  { %v9230_v3 = vadd.f32 %v9224_v23, %v9094_v31  ;;  %v11809_v61 = vpop.f32.mrb[221].mxu1 }
 0x8cb   :  { %v9227_v14 = vpop.f32.mrb[222].mxu1 }
 0x8cc   :  { %v11810_v11 = vpop.f32.mrb[223].mxu1 }
 0x8e9   :  { %v9336_v41 = vpop.f32.mrb[224].mxu1 }
 0x8ea   :  { %v9342_v26 = vadd.f32 %v9336_v41, %v9230_v3  ;;  %v11829_v9 = vpop.f32.mrb[225].mxu1 }
 0x8eb   :  { %v9339_v29 = vpop.f32.mrb[226].mxu1 }
 0x8ec   :  { %v9350_v1 = vadd.f32 %v10395_v39, %v9342_v26  ;;  %v11830_v43 = vpop.f32.mrb[227].mxu1 }
 0x8ee   :  { %v9351_v20 = vmax.f32 %v9350_v1, 0.0 }
 0x8f0   :  { %v9352_v48 = vpack.c.bf16 %v9351_v20, %v9351_v20 }
 0x8f2   :  { %11848 = vmatmul.mubr.bf16.vlgmr.msra.gmra.mrb[228].mxu1 %v9352_v48 }
 0x8f3   :  { %11852 = vmatpush3.bf16.msra.mxu1 %v12527_v2  ;;  %11867 = vmatprep.mubr.msk.bf16.mxu1 %vm12576_vm5, %v12572_v7 }
 0x8f4   :  { %11853 = vmatprep.subr.bf16.mxu1 %v12572_v7 }
 0x8f7   :  { %11854 = vmatpush3.bf16.msra.mxu1 %v12528_v40 }
 0x8f8   :  { %11855 = vmatprep.subr.bf16.mxu1 %v12572_v7 }
 0x8fb   :  { %11856 = vmatpush3.bf16.msra.mxu1 %v12529_v25 }
 0x8fc   :  { %11857 = vmatprep.subr.bf16.mxu1 %v12572_v7 }
 0x8ff   :  { %11858 = vmatpush3.bf16.msra.mxu1 %v12530_v53 }
 0x900   :  { %11859 = vmatprep.subr.bf16.mxu1 %v12572_v7 }
 0x903   :  { %11860 = vmatpush3.bf16.msra.mxu1 %v12531_v49 }
 0x904   :  { %11861 = vmatprep.subr.bf16.mxu1 %v12572_v7 }
 0x907   :  { %11862 = vmatpush3.bf16.msra.mxu1 %v12532_v22 }
 0x908   :  { %11863 = vmatprep.subr.bf16.mxu1 %v12572_v7 }
 0x90b   :  { %11864 = vmatpush3.bf16.msra.mxu1 %v12533_v5 }
 0x90c   :  { %11865 = vmatprep.subr.bf16.mxu1 %v12572_v7 }
 0x90f   :  { %11866 = vmatpush3.bf16.msra.mxu1 %v12534_v0 }
 0x9c5   :  { %v9458_v16 = vpop.f32.mrb[228].mxu1 }
 0x9c6   :  { %v9459_v52 = vadd.f32 %v10396_v44, %v9458_v16  ;;  %v11849_v45 = vpop.f32.mrb[229].mxu1 }
 0x9c7   :  { %v9461_v6 = vpop.f32.mrb[230].mxu1 }
 0x9c8   :  { %v9464_v60 = vmax.f32 %v9459_v52, 0.0  ;;  %v11850_v4 = vpop.f32.mrb[231].mxu1 }
 0x9ca   :  { %v9465_v59 = vpack.c.bf16 %v9464_v60, %v9464_v60 }
 0x9cc   :  { %11868 = vmatmul.mubr.bf16.vlgmr.msra.gmra.mrb[232].mxu1 %v9465_v59 }
 0xa9f   :  { %v9571_v7 = vpop.f32.mrb[232].mxu1 }
 0xaa0   :  { %v9572_v12 = vadd.f32 %v10405_v42, %v9571_v7  ;;  %v11869_v38 = vpop.f32.mrb[233].mxu1 }
 0xaa1   :  { %v9574_v15 = vpop.f32.mrb[234].mxu1 }
 0xaa2   :  { %v9580_v28 = vsel %vm9579_vm6, %v9572_v12, -1e+30  ;;  %v11870_v13 = vpop.f32.mrb[235].mxu1 }
 0xaa3   :  { %v9582_v8 = vsel %vm9581_vm7, %v9580_v28, -inf }
 0xaa4   :  { %9583 = vmax.xlane.f32.xlu0 %v9582_v8 }
 0xb31   :  { %v9584_v57 = vpop.xlane.xlu0 %9583 }
 0xb32   :  { %v9585_v32 = vsub.f32 %v9580_v28, %v9584_v57 }
 0xb34   :  { %v9586_v54 = vmul.f32 1.442695, %v9585_v32 }
 0xb36   :  { %12535 = vpow2.f32 %v9586_v54 }
 0xb40   :  { %v12536_v58 = vpop.eup %12535 }
 0xb41   :  { %v9588_v62 = vsel %vm9581_vm7, %v12536_v58, 0.0 }
 0xb42   :  { %9589 = vadd.xlane.f32.xlu1 %v9588_v62 }
 0xbcf   :  { %v9590_v55 = vpop.xlane.xlu1 %9589 }
 0xbd0   :  { %12537 = vlog2.f32 %v9590_v55 }
 0xbda   :  { %v12538_v56 = vpop.eup %12537 }
 0xbdb   :  { %v9592_v63 = vmul.f32 0.6931472, %v12538_v56 }
 0xbdd   :  { %v9593_v21 = vsub.f32 %v9585_v32, %v9592_v63 }
 0xbdf   :  { %9594 = vst [vmem:[#allocation7] sm:$0x3] %v9593_v21 }
 0xbe0   :  { %12554 = shalt.err (!%p12551_p4)
}
 0xbe1   :  { %s12555_s18 = scalar_lea.hbm %s15144_s11, 32 }
 0xbe2   :  { %p12556_p5 = scmp.ne.s32.totalorder %s15144_s11, %s12555_s18  ;;  %p12559_p6 = scmp.lt.u32.totalorder %s12555_s18, %s15144_s11 }
 0xbe4   :  { %p12561_p7 = pnand %p12559_p6, %p12556_p5 }
 0xbe6   :  { %12564 = shalt.err (!%p12561_p7)
}
 0xbe7   :  { %9604 = dma.vmem_to_hbm [thread:$0]  %s9602_s9, 32, %s15144_s11, [#allocation8]  }
 0xbe8   :  { %12565 = dma.done.wait [#allocation8], 32  }
 0xbe9   :  { %12566 = vsyncadd [#allocation8], 4294967264 }
 0xbea   :  { %9608 = vsyncpa [#allocation8], 1 }

</bundles_post_ra>
